<compile_context>
chip_gen: v7x
topology: tpu7x:2x2x1
jax: 0.10.0
libtpu: 0.0.40
codegen_flags: <defaults>
</compile_context>

<pallas_src>
import functools

import numpy as np
import jax
import jax.numpy as jnp
from jax.experimental import pallas as pl
from jax.experimental.pallas import tpu as pltpu

# ----------------------------- config (scaled-down swin-tiny) ----------------
IMG = 32          # input spatial size (PyTorch module uses 224)
PATCH = 4         # patch size (same as swin-tiny)
IN_CH = 3         # RGB
EMBED = 32        # embed dim (swin-tiny uses 96)
DEPTHS = (2, 2)   # blocks per stage (swin-tiny uses (2, 2, 6, 2))
HEADS = (2, 4)    # heads per stage
WINDOW = 4        # window size (swin-tiny uses 7)
MLP_RATIO = 4
LN_EPS = 1e-5


# ----------------------------- in-kernel helpers ------------------------------
def _mm(a, b):
    """bf16 MXU inputs, f32 accumulation (v6e/v7x friendly)."""
    return jnp.dot(a.astype(jnp.bfloat16), b.astype(jnp.bfloat16),
                   preferred_element_type=jnp.float32)


def _ln(x, g, b, eps=LN_EPS):
    x = x.astype(jnp.float32)
    mu = jnp.mean(x, axis=-1, keepdims=True)
    var = jnp.mean(jnp.square(x - mu), axis=-1, keepdims=True)
    return (x - mu) * jax.lax.rsqrt(var + eps) * g + b


# ----------------------------- Pallas kernels --------------------------------
def _patch_embed_kernel(x_ref, w_ref, b_ref, g_ref, bt_ref, o_ref):
    # Conv2d(3, C, k=P, stride=P) as patch matmul, fused with the LayerNorm.
    y = _mm(x_ref[...], w_ref[...]) + b_ref[...]
    o_ref[...] = _ln(y, g_ref[...], bt_ref[...])


def _win_attn_kernel(xw_ref, g_ref, b_ref, qkvw_ref, qkvb_ref, bias_ref,
                     pw_ref, pb_ref, o_ref, *, heads, n_rep, scale):
    # Fused: LN1 -> QKV -> per-head window attention (+bias/mask) -> out proj.
    Bw, N, C = xw_ref.shape
    Dh = C // heads
    nWb = bias_ref.shape[1]

    x = xw_ref[...].astype(jnp.float32).reshape(Bw * N, C)
    xn = _ln(x, g_ref[...], b_ref[...])
    qkv = _mm(xn, qkvw_ref[...]) + qkvb_ref[...]            # (Bw*N, 3C)  f32

    outs = []
    for h in range(heads):                                  # heads <= 4, unrolled
        q = qkv[:, h * Dh:(h + 1) * Dh].reshape(Bw, N, Dh)
        k = qkv[:, C + h * Dh:C + (h + 1) * Dh].reshape(Bw, N, Dh)
        v = qkv[:, 2 * C + h * Dh:2 * C + (h + 1) * Dh].reshape(Bw, N, Dh)

        s = jnp.einsum('bnd,bmd->bnm',
                       q.astype(jnp.bfloat16), k.astype(jnp.bfloat16),
                       preferred_element_type=jnp.float32) * scale
        bh = bias_ref[h]                                    # (nWb, N, N)
        if nWb == 1:
            s = s + bh                                      # broadcast over windows
        else:
            # broadcast (nW, N, N) bias over the batch without materializing it
            s = (s.reshape(n_rep, nWb, N, N) + bh[None]).reshape(Bw, N, N)

        m = jnp.max(s, axis=-1, keepdims=True)
        p = jnp.exp(s - m)
        p = p * pl.reciprocal(jnp.sum(p, axis=-1, keepdims=True), approx=True)

        o = jnp.einsum('bnm,bmd->bnd',
                       p.astype(jnp.bfloat16), v.astype(jnp.bfloat16),
                       preferred_element_type=jnp.float32)  # (Bw, N, Dh)
        outs.append(o)

    # Concatenate heads (minor-dim concat) so the output projection is one
    # matmul contracting over the full C axis (better MXU utilization than
    # `heads` partial matmuls with Dh-wide contraction).
    o_all = outs[0] if heads == 1 else jnp.concatenate(outs, axis=-1)   # (Bw, N, C)
    y = _mm(o_all.reshape(Bw * N, C), pw_ref[...]) + pb_ref[...]
    o_ref[...] = y.reshape(Bw, N, C)


def _mlp_block_kernel(x_ref, a_ref, g_ref, b_ref, w1_ref, b1_ref,
                      w2_ref, b2_ref, o_ref):
    # Fused: residual add -> LN2 -> fc1(GELU) -> fc2 -> residual add.
    x = x_ref[...].astype(jnp.float32) + a_ref[...].astype(jnp.float32)
    xn = _ln(x, g_ref[...], b_ref[...])
    h = _mm(xn, w1_ref[...]) + b1_ref[...]
    # TODO(synk): HF Swin uses exact erf GELU; tanh approximation used here.
    h = jax.nn.gelu(h, approximate=True)
    o_ref[...] = x + _mm(h, w2_ref[...]) + b2_ref[...]


def _merge_kernel(x_ref, g_ref, b_ref, w_ref, o_ref):
    # Patch merging: LN(4C) -> Linear(4C, 2C, bias=False), fused.
    xn = _ln(x_ref[...], g_ref[...], b_ref[...])
    o_ref[...] = _mm(xn, w_ref[...])


def _head_kernel(x_ref, g_ref, b_ref, w1_ref, b1_ref, w2_ref, b2_ref,
                 w3_ref, b3_ref, o_ref):
    # Fused: final LN -> mean pool over tokens (sublane reduce, no transpose)
    #        -> Linear(512)+ReLU -> Linear(128)+ReLU -> Linear(1).
    x = x_ref[...].astype(jnp.float32)              # (B, L, C)
    xn = _ln(x, g_ref[...], b_ref[...])
    pooled = jnp.mean(xn, axis=1)                   # (B, C)
    h = jnp.maximum(_mm(pooled, w1_ref[...]) + b1_ref[...], 0.0)
    # Dropout(0.2) -> identity at inference.
    h = jnp.maximum(_mm(h, w2_ref[...]) + b2_ref[...], 0.0)
    o_ref[...] = _mm(h, w3_ref[...]) + b3_ref[...]


# ----------------------------- pallas_call wrapper -----------------------------
def _zero_index_map(ndim):
    return lambda i, _n=ndim: (0,) * _n


def _pcall(kernel, out_shape, args, **static):
    kfn = functools.partial(kernel, **static) if static else kernel
    in_specs = [pl.BlockSpec(a.shape, _zero_index_map(a.ndim)) for a in args]
    return pl.pallas_call(
        kfn,
        out_shape=jax.ShapeDtypeStruct(out_shape, jnp.float32),
        grid=(1,),
        in_specs=in_specs,
        out_specs=pl.BlockSpec(out_shape, _zero_index_map(len(out_shape))),
        compiler_params=pltpu.CompilerParams(
            dimension_semantics=("arbitrary",)),
    )(*args)


# ----------------------------- glue helpers -----------------------------------
def window_partition(x, ws):
    B, H, W, C = x.shape
    x = x.reshape(B, H // ws, ws, W // ws, ws, C)
    return x.transpose(0, 1, 3, 2, 4, 5).reshape(-1, ws * ws, C)


def window_reverse(windows, ws, H, W, B):
    C = windows.shape[-1]
    x = windows.reshape(B, H // ws, W // ws, ws, ws, C)
    return x.transpose(0, 1, 3, 2, 4, 5).reshape(B, H, W, C)


@functools.lru_cache(maxsize=None)
def relative_position_index(ws):
    coords = np.stack(np.meshgrid(np.arange(ws), np.arange(ws), indexing="ij"))
    cf = coords.reshape(2, -1)
    rel = (cf[:, :, None] - cf[:, None, :]).transpose(1, 2, 0).astype(np.int32)
    rel[:, :, 0] += ws - 1
    rel[:, :, 1] += ws - 1
    rel[:, :, 0] *= 2 * ws - 1
    return rel.sum(-1)  # (ws*ws, ws*ws)


@functools.lru_cache(maxsize=None)
def shifted_window_mask(H, W, ws, shift):
    img = np.zeros((1, H, W, 1), np.float32)
    cnt = 0
    for hs in (slice(0, -ws), slice(-ws, -shift), slice(-shift, None)):
        for wsl in (slice(0, -ws), slice(-ws, -shift), slice(-shift, None)):
            img[:, hs, wsl, :] = cnt
            cnt += 1
    mw = img.reshape(1, H // ws, ws, W // ws, ws, 1)
    mw = mw.transpose(0, 1, 3, 2, 4, 5).reshape(-1, ws * ws)
    am = mw[:, None, :] - mw[:, :, None]
    am = np.where(am != 0, -100.0, 0.0).astype(np.float32)
    return am  # (nW, N, N)


# ----------------------------- Swin pieces -------------------------------------
def swin_block(x, blk, B, H, W, C, heads, ws, shift):
    L = H * W
    N = ws * ws
    Dh = C // heads
    shortcut = x.reshape(B * L, C)

    # LN1 is per-token, so it commutes with the roll / window partition and is
    # performed inside the fused attention kernel instead of here.
    xs = x.reshape(B, H, W, C)
    if shift > 0:
        xs = jnp.roll(xs, shift=(-shift, -shift), axis=(1, 2))
    xw = window_partition(xs, ws)                              # (Bw, N, C)
    Bw = xw.shape[0]

    # Relative-position bias (+ shift mask) as a tiny (heads, nW_or_1, N, N)
    # tensor; batch broadcast happens inside the kernel (no HBM duplication).
    rel_idx = jnp.asarray(relative_position_index(ws).reshape(-1))
    rel = jnp.take(blk["rel_table"], rel_idx, axis=0).reshape(N, N, heads)
    rel = rel.transpose(2, 0, 1)                               # (heads, N, N)
    if shift > 0:
        mask = jnp.asarray(shifted_window_mask(H, W, ws, shift))  # (nW, N, N)
        bias = rel[:, None, :, :] + mask[None, :, :, :]           # (heads, nW, N, N)
    else:
        bias = rel[:, None, :, :]                                  # (heads, 1, N, N)
    n_rep = Bw // bias.shape[1]

    attn = _pcall(
        _win_attn_kernel, (Bw, N, C),
        [xw,
         blk["ln1_g"].reshape(1, C), blk["ln1_b"].reshape(1, C),
         blk["qkv_w"], blk["qkv_b"].reshape(1, 3 * C),
         bias,
         blk["proj_w"], blk["proj_b"].reshape(1, C)],
        heads=heads, n_rep=n_rep, scale=Dh ** -0.5)

    xr = window_reverse(attn, ws, H, W, B)
    if shift > 0:
        xr = jnp.roll(xr, shift=(shift, shift), axis=(1, 2))
    attn_flat = xr.reshape(B * L, C)

    x_new = _pcall(
        _mlp_block_kernel, (B * L, C),
        [shortcut, attn_flat,
         blk["ln2_g"].reshape(1, C), blk["ln2_b"].reshape(1, C),
         blk["fc1_w"], blk["fc1_b"].reshape(1, -1),
         blk["fc2_w"], blk["fc2_b"].reshape(1, -1)])
    return x_new.reshape(B, L, C)


def patch_merging(x, ds, B, H, W, C):
    xr = x.reshape(B, H, W, C)
    x0 = xr[:, 0::2, 0::2, :]
    x1 = xr[:, 1::2, 0::2, :]
    x2 = xr[:, 0::2, 1::2, :]
    x3 = xr[:, 1::2, 1::2, :]
    xc = jnp.concatenate([x0, x1, x2, x3], axis=-1)
    xc = xc.reshape(B * (H // 2) * (W // 2), 4 * C)
    out = _pcall(
        _merge_kernel, (xc.shape[0], 2 * C),
        [xc, ds["ln_g"].reshape(1, -1), ds["ln_b"].reshape(1, -1), ds["reduce_w"]])
    return out.reshape(B, (H // 2) * (W // 2), 2 * C), H // 2, W // 2, 2 * C


def swin_for_iqa_forward(x_nchw, params):
    B = x_nchw.shape[0]
    P = PATCH
    nH = nW = IMG // P

    # Patch embedding: Conv2d(3, C, k=P, stride=P) expressed as a patch matmul,
    # fused with its LayerNorm.
    x = jnp.transpose(x_nchw, (0, 2, 3, 1))                    # NHWC
    patches = x.reshape(B, nH, P, nW, P, IN_CH).transpose(0, 1, 3, 2, 4, 5)
    patches = patches.reshape(B * nH * nW, P * P * IN_CH)
    tok = _pcall(
        _patch_embed_kernel, (B * nH * nW, EMBED),
        [patches, params["patch_w"], params["patch_b"].reshape(1, -1),
         params["patch_ln_g"].reshape(1, -1), params["patch_ln_b"].reshape(1, -1)])
    x = tok.reshape(B, nH * nW, EMBED)

    H, W, C = nH, nW, EMBED
    for si, stage in enumerate(params["stages"]):
        heads = HEADS[si]
        for bi, blk in enumerate(stage["blocks"]):
            shift = 0 if min(H, W) <= WINDOW else (0 if bi % 2 == 0 else WINDOW // 2)
            x = swin_block(x, blk, B, H, W, C, heads, WINDOW, shift)
        if stage["downsample"] is not None:
            x, H, W, C = patch_merging(x, stage["downsample"], B, H, W, C)

    # Final LN + mean pool (pooler_output) + regression head, one fused kernel.
    head = params["head"]
    score = _pcall(
        _head_kernel, (B, 1),
        [x,
         params["final_ln_g"].reshape(1, 1, C), params["final_ln_b"].reshape(1, 1, C),
         head["w1"], head["b1"].reshape(1, -1),
         head["w2"], head["b2"].reshape(1, -1),
         head["w3"], head["b3"].reshape(1, -1)])
    return score[:, 0]                                         # squeeze(1) -> (B,)


# ----------------------------- parameter init ----------------------------------
def init_params(key):
    ks = iter(jax.random.split(key, 128))

    def nrm(shape):
        return 0.02 * jax.random.normal(next(ks), shape, dtype=jnp.float32)

    p = {
        "patch_w": nrm((PATCH * PATCH * IN_CH, EMBED)),
        "patch_b": jnp.zeros((EMBED,), jnp.float32),
        "patch_ln_g": jnp.ones((EMBED,), jnp.float32),
        "patch_ln_b": jnp.zeros((EMBED,), jnp.float32),
    }
    stages = []
    C = EMBED
    for si, depth in enumerate(DEPTHS):
        heads = HEADS[si]
        blocks = []
        for _ in range(depth):
            blocks.append(dict(
                ln1_g=jnp.ones((C,), jnp.float32), ln1_b=jnp.zeros((C,), jnp.float32),
                qkv_w=nrm((C, 3 * C)), qkv_b=jnp.zeros((3 * C,), jnp.float32),
                proj_w=nrm((C, C)), proj_b=jnp.zeros((C,), jnp.float32),
                rel_table=nrm(((2 * WINDOW - 1) ** 2, heads)),
                ln2_g=jnp.ones((C,), jnp.float32), ln2_b=jnp.zeros((C,), jnp.float32),
                fc1_w=nrm((C, MLP_RATIO * C)), fc1_b=jnp.zeros((MLP_RATIO * C,), jnp.float32),
                fc2_w=nrm((MLP_RATIO * C, C)), fc2_b=jnp.zeros((C,), jnp.float32),
            ))
        ds = None
        if si < len(DEPTHS) - 1:
            ds = dict(ln_g=jnp.ones((4 * C,), jnp.float32),
                      ln_b=jnp.zeros((4 * C,), jnp.float32),
                      reduce_w=nrm((4 * C, 2 * C)))
            C = 2 * C
        stages.append(dict(blocks=blocks, downsample=ds))
    p["stages"] = stages
    p["final_ln_g"] = jnp.ones((C,), jnp.float32)
    p["final_ln_b"] = jnp.zeros((C,), jnp.float32)
    p["head"] = dict(
        w1=nrm((C, 512)), b1=jnp.zeros((512,), jnp.float32),
        w2=nrm((512, 128)), b2=jnp.zeros((128,), jnp.float32),
        w3=nrm((128, 1)), b3=jnp.zeros((1,), jnp.float32),
    )
    return p


# ----------------------------- main ---------------------------------------------
if __name__ == "__main__":
    key = jax.random.PRNGKey(0)
    pkey, xkey = jax.random.split(key)
    params = init_params(pkey)
    x = jax.random.normal(xkey, (2, IN_CH, IMG, IMG), dtype=jnp.float32)

    fwd = jax.jit(swin_for_iqa_forward)
    out = fwd(x, params)
    out = jax.block_until_ready(out)
    assert out.shape == (2,), out.shape
    assert out.dtype == jnp.float32
    assert bool(jnp.all(jnp.isfinite(out)))
    print("KERNEL_OK")
</pallas_src>

<mosaic_0001>
module attributes {stable_mosaic.version = 11 : i64} {
  func.func @_patch_embed_kernel(%arg0: i32, %arg1: memref<128x48xf32, #tpu.memory_space<vmem>>, %arg2: memref<48x32xf32, #tpu.memory_space<vmem>>, %arg3: memref<1x32xf32, #tpu.memory_space<vmem>>, %arg4: memref<1x32xf32, #tpu.memory_space<vmem>>, %arg5: memref<1x32xf32, #tpu.memory_space<vmem>>, %arg6: memref<128x32xf32, #tpu.memory_space<vmem>>) attributes {dimension_semantics = [#tpu.dimension_semantics<arbitrary>], iteration_bounds = array<i64: 1>, scalar_prefetch = 0 : i64, scratch_operands = 0 : i64, tpu.core_type = #tpu.core_type<tc>, window_params = [{pipeline_mode = #tpu.pipeline_mode<synchronous>, transform_indices = @transform_0, window_bounds = array<i64: 128, 48>}, {pipeline_mode = #tpu.pipeline_mode<synchronous>, transform_indices = @transform_1, window_bounds = array<i64: 48, 32>}, {pipeline_mode = #tpu.pipeline_mode<synchronous>, transform_indices = @transform_2, window_bounds = array<i64: 1, 32>}, {pipeline_mode = #tpu.pipeline_mode<synchronous>, transform_indices = @transform_3, window_bounds = array<i64: 1, 32>}, {pipeline_mode = #tpu.pipeline_mode<synchronous>, transform_indices = @transform_4, window_bounds = array<i64: 1, 32>}, {pipeline_mode = #tpu.pipeline_mode<synchronous>, transform_indices = @transform_5, window_bounds = array<i64: 128, 32>}]} {
    %c0 = arith.constant 0 : index
    %c0_0 = arith.constant 0 : index
    %0 = vector.load %arg1[%c0, %c0_0] : memref<128x48xf32, #tpu.memory_space<vmem>>, vector<128x48xf32>
    %c0_1 = arith.constant 0 : index
    %c0_2 = arith.constant 0 : index
    %1 = vector.load %arg2[%c0_1, %c0_2] : memref<48x32xf32, #tpu.memory_space<vmem>>, vector<48x32xf32>
    %2 = arith.truncf %0 : vector<128x48xf32> to vector<128x48xbf16>
    %3 = arith.truncf %1 : vector<48x32xf32> to vector<48x32xbf16>
    %cst = arith.constant dense<0.000000e+00> : vector<128x32xf32>
    %4 = tpu.matmul %2, %3, %cst {dimension_numbers = #tpu.dot_dimension_numbers<[1], [0], [0], [1], [0, 0, 1, 1], [], []>} : vector<128x48xbf16>, vector<48x32xbf16>, vector<128x32xf32> -> vector<128x32xf32>
    %c0_3 = arith.constant 0 : index
    %c0_4 = arith.constant 0 : index
    %5 = vector.load %arg3[%c0_3, %c0_4] : memref<1x32xf32, #tpu.memory_space<vmem>>, vector<1x32xf32>
    %6 = vector.broadcast %5 : vector<1x32xf32> to vector<128x32xf32>
    %7 = arith.addf %4, %6 : vector<128x32xf32>
    %c0_5 = arith.constant 0 : index
    %c0_6 = arith.constant 0 : index
    %8 = vector.load %arg4[%c0_5, %c0_6] : memref<1x32xf32, #tpu.memory_space<vmem>>, vector<1x32xf32>
    %c0_7 = arith.constant 0 : index
    %c0_8 = arith.constant 0 : index
    %9 = vector.load %arg5[%c0_7, %c0_8] : memref<1x32xf32, #tpu.memory_space<vmem>>, vector<1x32xf32>
    %cst_9 = arith.constant dense<0.000000e+00> : vector<128xf32>
    %10 = vector.multi_reduction <add>, %7, %cst_9 [1] : vector<128x32xf32> to vector<128xf32>
    %11 = vector.shape_cast %10 : vector<128xf32> to vector<128x1xf32>
    %cst_10 = arith.constant 3.200000e+01 : f32
    %12 = vector.broadcast %cst_10 : f32 to vector<128x1xf32>
    %13 = arith.divf %11, %12 : vector<128x1xf32>
    %14 = vector.broadcast %13 : vector<128x1xf32> to vector<128x32xf32>
    %15 = arith.subf %7, %14 : vector<128x32xf32>
    %16 = arith.mulf %15, %15 : vector<128x32xf32>
    %cst_11 = arith.constant dense<0.000000e+00> : vector<128xf32>
    %17 = vector.multi_reduction <add>, %16, %cst_11 [1] : vector<128x32xf32> to vector<128xf32>
    %18 = vector.shape_cast %17 : vector<128xf32> to vector<128x1xf32>
    %cst_12 = arith.constant 3.200000e+01 : f32
    %19 = vector.broadcast %cst_12 : f32 to vector<128x1xf32>
    %20 = arith.divf %18, %19 : vector<128x1xf32>
    %21 = vector.broadcast %13 : vector<128x1xf32> to vector<128x32xf32>
    %22 = arith.subf %7, %21 : vector<128x32xf32>
    %cst_13 = arith.constant 9.99999974E-6 : f32
    %23 = vector.broadcast %cst_13 : f32 to vector<128x1xf32>
    %24 = arith.addf %20, %23 : vector<128x1xf32>
    %25 = math.rsqrt %24 : vector<128x1xf32>
    %26 = vector.broadcast %25 : vector<128x1xf32> to vector<128x32xf32>
    %27 = arith.mulf %22, %26 : vector<128x32xf32>
    %28 = vector.broadcast %8 : vector<1x32xf32> to vector<128x32xf32>
    %29 = arith.mulf %27, %28 : vector<128x32xf32>
    %30 = vector.broadcast %9 : vector<1x32xf32> to vector<128x32xf32>
    %31 = arith.addf %29, %30 : vector<128x32xf32>
    %c0_14 = arith.constant 0 : index
    %c0_15 = arith.constant 0 : index
    %32 = vector.load %arg6[%c0_14, %c0_15] : memref<128x32xf32, #tpu.memory_space<vmem>>, vector<128x32xf32>
    tpu.vector_store %arg6[%c0_14, %c0_15], %31 {strides = array<i32>} : memref<128x32xf32, #tpu.memory_space<vmem>>, vector<128x32xf32>,
    return
  }
  func.func @transform_0(%arg0: i32) -> (i32, i32) {
    %c0_i32 = arith.constant 0 : i32
    %c0_i32_0 = arith.constant 0 : i32
    %c0_i32_1 = arith.constant 0 : i32
    return %c0_i32, %c0_i32_0 : i32, i32
  }
  func.func @transform_1(%arg0: i32) -> (i32, i32) {
    %c0_i32 = arith.constant 0 : i32
    %c0_i32_0 = arith.constant 0 : i32
    %c0_i32_1 = arith.constant 0 : i32
    return %c0_i32, %c0_i32_0 : i32, i32
  }
  func.func @transform_2(%arg0: i32) -> (i32, i32) {
    %c0_i32 = arith.constant 0 : i32
    %c0_i32_0 = arith.constant 0 : i32
    %c0_i32_1 = arith.constant 0 : i32
    return %c0_i32, %c0_i32_0 : i32, i32
  }
  func.func @transform_3(%arg0: i32) -> (i32, i32) {
    %c0_i32 = arith.constant 0 : i32
    %c0_i32_0 = arith.constant 0 : i32
    %c0_i32_1 = arith.constant 0 : i32
    return %c0_i32, %c0_i32_0 : i32, i32
  }
  func.func @transform_4(%arg0: i32) -> (i32, i32) {
    %c0_i32 = arith.constant 0 : i32
    %c0_i32_0 = arith.constant 0 : i32
    %c0_i32_1 = arith.constant 0 : i32
    return %c0_i32, %c0_i32_0 : i32, i32
  }
  func.func @transform_5(%arg0: i32) -> (i32, i32) {
    %c0_i32 = arith.constant 0 : i32
    %c0_i32_0 = arith.constant 0 : i32
    %c0_i32_1 = arith.constant 0 : i32
    return %c0_i32, %c0_i32_0 : i32, i32
  }
}

module attributes {stable_mosaic.version = 11 : i64} {
  func.func @_win_attn_kernel(%arg0: i32, %arg1: memref<8x16x32xf32, #tpu.memory_space<vmem>>, %arg2: memref<1x32xf32, #tpu.memory_space<vmem>>, %arg3: memref<1x32xf32, #tpu.memory_space<vmem>>, %arg4: memref<32x96xf32, #tpu.memory_space<vmem>>, %arg5: memref<1x96xf32, #tpu.memory_space<vmem>>, %arg6: memref<2x1x16x16xf32, #tpu.memory_space<vmem>>, %arg7: memref<32x32xf32, #tpu.memory_space<vmem>>, %arg8: memref<1x32xf32, #tpu.memory_space<vmem>>, %arg9: memref<8x16x32xf32, #tpu.memory_space<vmem>>) attributes {dimension_semantics = [#tpu.dimension_semantics<arbitrary>], iteration_bounds = array<i64: 1>, scalar_prefetch = 0 : i64, scratch_operands = 0 : i64, tpu.core_type = #tpu.core_type<tc>, window_params = [{pipeline_mode = #tpu.pipeline_mode<synchronous>, transform_indices = @transform_0, window_bounds = array<i64: 8, 16, 32>}, {pipeline_mode = #tpu.pipeline_mode<synchronous>, transform_indices = @transform_1, window_bounds = array<i64: 1, 32>}, {pipeline_mode = #tpu.pipeline_mode<synchronous>, transform_indices = @transform_2, window_bounds = array<i64: 1, 32>}, {pipeline_mode = #tpu.pipeline_mode<synchronous>, transform_indices = @transform_3, window_bounds = array<i64: 32, 96>}, {pipeline_mode = #tpu.pipeline_mode<synchronous>, transform_indices = @transform_4, window_bounds = array<i64: 1, 96>}, {pipeline_mode = #tpu.pipeline_mode<synchronous>, transform_indices = @transform_5, window_bounds = array<i64: 2, 1, 16, 16>}, {pipeline_mode = #tpu.pipeline_mode<synchronous>, transform_indices = @transform_6, window_bounds = array<i64: 32, 32>}, {pipeline_mode = #tpu.pipeline_mode<synchronous>, transform_indices = @transform_7, window_bounds = array<i64: 1, 32>}, {pipeline_mode = #tpu.pipeline_mode<synchronous>, transform_indices = @transform_8, window_bounds = array<i64: 8, 16, 32>}]} {
    %c0 = arith.constant 0 : index
    %c0_0 = arith.constant 0 : index
    %c0_1 = arith.constant 0 : index
    %0 = vector.load %arg1[%c0, %c0_0, %c0_1] : memref<8x16x32xf32, #tpu.memory_space<vmem>>, vector<8x16x32xf32>
    %1 = vector.shape_cast %0 : vector<8x16x32xf32> to vector<128x32xf32>
    %c0_2 = arith.constant 0 : index
    %c0_3 = arith.constant 0 : index
    %2 = vector.load %arg2[%c0_2, %c0_3] : memref<1x32xf32, #tpu.memory_space<vmem>>, vector<1x32xf32>
    %c0_4 = arith.constant 0 : index
    %c0_5 = arith.constant 0 : index
    %3 = vector.load %arg3[%c0_4, %c0_5] : memref<1x32xf32, #tpu.memory_space<vmem>>, vector<1x32xf32>
    %cst = arith.constant dense<0.000000e+00> : vector<128xf32>
    %4 = vector.multi_reduction <add>, %1, %cst [1] : vector<128x32xf32> to vector<128xf32>
    %5 = vector.shape_cast %4 : vector<128xf32> to vector<128x1xf32>
    %cst_6 = arith.constant 3.200000e+01 : f32
    %6 = vector.broadcast %cst_6 : f32 to vector<128x1xf32>
    %7 = arith.divf %5, %6 : vector<128x1xf32>
    %8 = vector.broadcast %7 : vector<128x1xf32> to vector<128x32xf32>
    %9 = arith.subf %1, %8 : vector<128x32xf32>
    %10 = arith.mulf %9, %9 : vector<128x32xf32>
    %cst_7 = arith.constant dense<0.000000e+00> : vector<128xf32>
    %11 = vector.multi_reduction <add>, %10, %cst_7 [1] : vector<128x32xf32> to vector<128xf32>
    %12 = vector.shape_cast %11 : vector<128xf32> to vector<128x1xf32>
    %cst_8 = arith.constant 3.200000e+01 : f32
    %13 = vector.broadcast %cst_8 : f32 to vector<128x1xf32>
    %14 = arith.divf %12, %13 : vector<128x1xf32>
    %15 = vector.broadcast %7 : vector<128x1xf32> to vector<128x32xf32>
    %16 = arith.subf %1, %15 : vector<128x32xf32>
    %cst_9 = arith.constant 9.99999974E-6 : f32
    %17 = vector.broadcast %cst_9 : f32 to vector<128x1xf32>
    %18 = arith.addf %14, %17 : vector<128x1xf32>
    %19 = math.rsqrt %18 : vector<128x1xf32>
    %20 = vector.broadcast %19 : vector<128x1xf32> to vector<128x32xf32>
    %21 = arith.mulf %16, %20 : vector<128x32xf32>
    %22 = vector.broadcast %2 : vector<1x32xf32> to vector<128x32xf32>
    %23 = arith.mulf %21, %22 : vector<128x32xf32>
    %24 = vector.broadcast %3 : vector<1x32xf32> to vector<128x32xf32>
    %25 = arith.addf %23, %24 : vector<128x32xf32>
    %c0_10 = arith.constant 0 : index
    %c0_11 = arith.constant 0 : index
    %26 = vector.load %arg4[%c0_10, %c0_11] : memref<32x96xf32, #tpu.memory_space<vmem>>, vector<32x96xf32>
    %27 = arith.truncf %25 : vector<128x32xf32> to vector<128x32xbf16>
    %28 = arith.truncf %26 : vector<32x96xf32> to vector<32x96xbf16>
    %cst_12 = arith.constant dense<0.000000e+00> : vector<128x96xf32>
    %29 = tpu.matmul %27, %28, %cst_12 {dimension_numbers = #tpu.dot_dimension_numbers<[1], [0], [0], [1], [0, 0, 1, 1], [], []>} : vector<128x32xbf16>, vector<32x96xbf16>, vector<128x96xf32> -> vector<128x96xf32>
    %c0_13 = arith.constant 0 : index
    %c0_14 = arith.constant 0 : index
    %30 = vector.load %arg5[%c0_13, %c0_14] : memref<1x96xf32, #tpu.memory_space<vmem>>, vector<1x96xf32>
    %31 = vector.broadcast %30 : vector<1x96xf32> to vector<128x96xf32>
    %32 = arith.addf %29, %31 : vector<128x96xf32>
    %33 = vector.extract_strided_slice %32 {offsets = [0, 0], sizes = [128, 16], strides = [1, 1]} : vector<128x96xf32> to vector<128x16xf32>
    %34 = vector.shape_cast %33 : vector<128x16xf32> to vector<8x16x16xf32>
    %35 = vector.extract_strided_slice %32 {offsets = [0, 32], sizes = [128, 16], strides = [1, 1]} : vector<128x96xf32> to vector<128x16xf32>
    %36 = vector.shape_cast %35 : vector<128x16xf32> to vector<8x16x16xf32>
    %37 = vector.extract_strided_slice %32 {offsets = [0, 64], sizes = [128, 16], strides = [1, 1]} : vector<128x96xf32> to vector<128x16xf32>
    %38 = vector.shape_cast %37 : vector<128x16xf32> to vector<8x16x16xf32>
    %39 = arith.truncf %34 : vector<8x16x16xf32> to vector<8x16x16xbf16>
    %40 = arith.truncf %36 : vector<8x16x16xf32> to vector<8x16x16xbf16>
    "tpu.trace_start"() <{level = 10 : i32, message = "bnd,bmd->bnm"}> : () -> ()
    %cst_15 = arith.constant dense<0.000000e+00> : vector<8x16x16xf32>
    %41 = tpu.matmul %39, %40, %cst_15 {dimension_numbers = #tpu.dot_dimension_numbers<[2], [2], [1], [1], [0, 0, 0, 1, 1, 1], [0], [0]>} : vector<8x16x16xbf16>, vector<8x16x16xbf16>, vector<8x16x16xf32> -> vector<8x16x16xf32>
    "tpu.trace_stop"() : () -> ()
    %cst_16 = arith.constant 2.500000e-01 : f32
    %42 = vector.broadcast %cst_16 : f32 to vector<8x16x16xf32>
    %43 = arith.mulf %41, %42 : vector<8x16x16xf32>
    %c0_17 = arith.constant 0 : index
    %c0_18 = arith.constant 0 : index
    %c0_19 = arith.constant 0 : index
    %c0_20 = arith.constant 0 : index
    %44 = vector.load %arg6[%c0_17, %c0_18, %c0_19, %c0_20] : memref<2x1x16x16xf32, #tpu.memory_space<vmem>>, vector<1x1x16x16xf32>
    %45 = vector.shape_cast %44 : vector<1x1x16x16xf32> to vector<1x16x16xf32>
    %46 = vector.broadcast %45 : vector<1x16x16xf32> to vector<8x16x16xf32>
    %47 = arith.addf %43, %46 : vector<8x16x16xf32>
    %cst_21 = arith.constant dense<0xFF800000> : vector<8x16xf32>
    %48 = vector.multi_reduction <maximumf>, %47, %cst_21 [2] : vector<8x16x16xf32> to vector<8x16xf32>
    %49 = vector.shape_cast %48 : vector<8x16xf32> to vector<8x16x1xf32>
    %50 = vector.broadcast %49 : vector<8x16x1xf32> to vector<8x16x16xf32>
    %51 = arith.subf %47, %50 : vector<8x16x16xf32>
    %52 = math.exp %51 : vector<8x16x16xf32>
    %cst_22 = arith.constant dense<0.000000e+00> : vector<8x16xf32>
    %53 = vector.multi_reduction <add>, %52, %cst_22 [2] : vector<8x16x16xf32> to vector<8x16xf32>
    %54 = vector.shape_cast %53 : vector<8x16xf32> to vector<8x16x1xf32>
    %55 = tpu.reciprocal %54 {approx = true} : vector<8x16x1xf32> -> vector<8x16x1xf32>
    %56 = vector.broadcast %55 : vector<8x16x1xf32> to vector<8x16x16xf32>
    %57 = arith.mulf %52, %56 : vector<8x16x16xf32>
    %58 = arith.truncf %57 : vector<8x16x16xf32> to vector<8x16x16xbf16>
    %59 = arith.truncf %38 : vector<8x16x16xf32> to vector<8x16x16xbf16>
    "tpu.trace_start"() <{level = 10 : i32, message = "bnm,bmd->bnd"}> : () -> ()
    %cst_23 = arith.constant dense<0.000000e+00> : vector<8x16x16xf32>
    %60 = tpu.matmul %58, %59, %cst_23 {dimension_numbers = #tpu.dot_dimension_numbers<[2], [1], [1], [2], [0, 0, 0, 1, 1, 2], [0], [0]>} : vector<8x16x16xbf16>, vector<8x16x16xbf16>, vector<8x16x16xf32> -> vector<8x16x16xf32>
    "tpu.trace_stop"() : () -> ()
    %61 = vector.extract_strided_slice %32 {offsets = [0, 16], sizes = [128, 16], strides = [1, 1]} : vector<128x96xf32> to vector<128x16xf32>
    %62 = vector.shape_cast %61 : vector<128x16xf32> to vector<8x16x16xf32>
    %63 = vector.extract_strided_slice %32 {offsets = [0, 48], sizes = [128, 16], strides = [1, 1]} : vector<128x96xf32> to vector<128x16xf32>
    %64 = vector.shape_cast %63 : vector<128x16xf32> to vector<8x16x16xf32>
    %65 = vector.extract_strided_slice %32 {offsets = [0, 80], sizes = [128, 16], strides = [1, 1]} : vector<128x96xf32> to vector<128x16xf32>
    %66 = vector.shape_cast %65 : vector<128x16xf32> to vector<8x16x16xf32>
    %67 = arith.truncf %62 : vector<8x16x16xf32> to vector<8x16x16xbf16>
    %68 = arith.truncf %64 : vector<8x16x16xf32> to vector<8x16x16xbf16>
    "tpu.trace_start"() <{level = 10 : i32, message = "bnd,bmd->bnm"}> : () -> ()
    %cst_24 = arith.constant dense<0.000000e+00> : vector<8x16x16xf32>
    %69 = tpu.matmul %67, %68, %cst_24 {dimension_numbers = #tpu.dot_dimension_numbers<[2], [2], [1], [1], [0, 0, 0, 1, 1, 1], [0], [0]>} : vector<8x16x16xbf16>, vector<8x16x16xbf16>, vector<8x16x16xf32> -> vector<8x16x16xf32>
    "tpu.trace_stop"() : () -> ()
    %cst_25 = arith.constant 2.500000e-01 : f32
    %70 = vector.broadcast %cst_25 : f32 to vector<8x16x16xf32>
    %71 = arith.mulf %69, %70 : vector<8x16x16xf32>
    %c1 = arith.constant 1 : index
    %c0_26 = arith.constant 0 : index
    %c0_27 = arith.constant 0 : index
    %c0_28 = arith.constant 0 : index
    %72 = vector.load %arg6[%c1, %c0_26, %c0_27, %c0_28] : memref<2x1x16x16xf32, #tpu.memory_space<vmem>>, vector<1x1x16x16xf32>
    %73 = vector.shape_cast %72 : vector<1x1x16x16xf32> to vector<1x16x16xf32>
    %74 = vector.broadcast %73 : vector<1x16x16xf32> to vector<8x16x16xf32>
    %75 = arith.addf %71, %74 : vector<8x16x16xf32>
    %cst_29 = arith.constant dense<0xFF800000> : vector<8x16xf32>
    %76 = vector.multi_reduction <maximumf>, %75, %cst_29 [2] : vector<8x16x16xf32> to vector<8x16xf32>
    %77 = vector.shape_cast %76 : vector<8x16xf32> to vector<8x16x1xf32>
    %78 = vector.broadcast %77 : vector<8x16x1xf32> to vector<8x16x16xf32>
    %79 = arith.subf %75, %78 : vector<8x16x16xf32>
    %80 = math.exp %79 : vector<8x16x16xf32>
    %cst_30 = arith.constant dense<0.000000e+00> : vector<8x16xf32>
    %81 = vector.multi_reduction <add>, %80, %cst_30 [2] : vector<8x16x16xf32> to vector<8x16xf32>
    %82 = vector.shape_cast %81 : vector<8x16xf32> to vector<8x16x1xf32>
    %83 = tpu.reciprocal %82 {approx = true} : vector<8x16x1xf32> -> vector<8x16x1xf32>
    %84 = vector.broadcast %83 : vector<8x16x1xf32> to vector<8x16x16xf32>
    %85 = arith.mulf %80, %84 : vector<8x16x16xf32>
    %86 = arith.truncf %85 : vector<8x16x16xf32> to vector<8x16x16xbf16>
    %87 = arith.truncf %66 : vector<8x16x16xf32> to vector<8x16x16xbf16>
    "tpu.trace_start"() <{level = 10 : i32, message = "bnm,bmd->bnd"}> : () -> ()
    %cst_31 = arith.constant dense<0.000000e+00> : vector<8x16x16xf32>
    %88 = tpu.matmul %86, %87, %cst_31 {dimension_numbers = #tpu.dot_dimension_numbers<[2], [1], [1], [2], [0, 0, 0, 1, 1, 2], [0], [0]>} : vector<8x16x16xbf16>, vector<8x16x16xbf16>, vector<8x16x16xf32> -> vector<8x16x16xf32>
    "tpu.trace_stop"() : () -> ()
    %89 = tpu.concatenate %60, %88 in 2 : vector<8x16x16xf32>, vector<8x16x16xf32> -> vector<8x16x32xf32>
    %90 = vector.shape_cast %89 : vector<8x16x32xf32> to vector<128x32xf32>
    %c0_32 = arith.constant 0 : index
    %c0_33 = arith.constant 0 : index
    %91 = vector.load %arg7[%c0_32, %c0_33] : memref<32x32xf32, #tpu.memory_space<vmem>>, vector<32x32xf32>
    %92 = arith.truncf %90 : vector<128x32xf32> to vector<128x32xbf16>
    %93 = arith.truncf %91 : vector<32x32xf32> to vector<32x32xbf16>
    %cst_34 = arith.constant dense<0.000000e+00> : vector<128x32xf32>
    %94 = tpu.matmul %92, %93, %cst_34 {dimension_numbers = #tpu.dot_dimension_numbers<[1], [0], [0], [1], [0, 0, 1, 1], [], []>} : vector<128x32xbf16>, vector<32x32xbf16>, vector<128x32xf32> -> vector<128x32xf32>
    %c0_35 = arith.constant 0 : index
    %c0_36 = arith.constant 0 : index
    %95 = vector.load %arg8[%c0_35, %c0_36] : memref<1x32xf32, #tpu.memory_space<vmem>>, vector<1x32xf32>
    %96 = vector.broadcast %95 : vector<1x32xf32> to vector<128x32xf32>
    %97 = arith.addf %94, %96 : vector<128x32xf32>
    %98 = vector.shape_cast %97 : vector<128x32xf32> to vector<8x16x32xf32>
    %c0_37 = arith.constant 0 : index
    %c0_38 = arith.constant 0 : index
    %c0_39 = arith.constant 0 : index
    %99 = vector.load %arg9[%c0_37, %c0_38, %c0_39] : memref<8x16x32xf32, #tpu.memory_space<vmem>>, vector<8x16x32xf32>
    tpu.vector_store %arg9[%c0_37, %c0_38, %c0_39], %98 {strides = array<i32>} : memref<8x16x32xf32, #tpu.memory_space<vmem>>, vector<8x16x32xf32>,
    return
  }
  func.func @transform_0(%arg0: i32) -> (i32, i32, i32) {
    %c0_i32 = arith.constant 0 : i32
    %c0_i32_0 = arith.constant 0 : i32
    %c0_i32_1 = arith.constant 0 : i32
    %c0_i32_2 = arith.constant 0 : i32
    return %c0_i32, %c0_i32_0, %c0_i32_1 : i32, i32, i32
  }
  func.func @transform_1(%arg0: i32) -> (i32, i32) {
    %c0_i32 = arith.constant 0 : i32
    %c0_i32_0 = arith.constant 0 : i32
    %c0_i32_1 = arith.constant 0 : i32
    return %c0_i32, %c0_i32_0 : i32, i32
  }
  func.func @transform_2(%arg0: i32) -> (i32, i32) {
    %c0_i32 = arith.constant 0 : i32
    %c0_i32_0 = arith.constant 0 : i32
    %c0_i32_1 = arith.constant 0 : i32
    return %c0_i32, %c0_i32_0 : i32, i32
  }
  func.func @transform_3(%arg0: i32) -> (i32, i32) {
    %c0_i32 = arith.constant 0 : i32
    %c0_i32_0 = arith.constant 0 : i32
    %c0_i32_1 = arith.constant 0 : i32
    return %c0_i32, %c0_i32_0 : i32, i32
  }
  func.func @transform_4(%arg0: i32) -> (i32, i32) {
    %c0_i32 = arith.constant 0 : i32
    %c0_i32_0 = arith.constant 0 : i32
    %c0_i32_1 = arith.constant 0 : i32
    return %c0_i32, %c0_i32_0 : i32, i32
  }
  func.func @transform_5(%arg0: i32) -> (i32, i32, i32, i32) {
    %c0_i32 = arith.constant 0 : i32
    %c0_i32_0 = arith.constant 0 : i32
    %c0_i32_1 = arith.constant 0 : i32
    %c0_i32_2 = arith.constant 0 : i32
    %c0_i32_3 = arith.constant 0 : i32
    return %c0_i32, %c0_i32_0, %c0_i32_1, %c0_i32_2 : i32, i32, i32, i32
  }
  func.func @transform_6(%arg0: i32) -> (i32, i32) {
    %c0_i32 = arith.constant 0 : i32
    %c0_i32_0 = arith.constant 0 : i32
    %c0_i32_1 = arith.constant 0 : i32
    return %c0_i32, %c0_i32_0 : i32, i32
  }
  func.func @transform_7(%arg0: i32) -> (i32, i32) {
    %c0_i32 = arith.constant 0 : i32
    %c0_i32_0 = arith.constant 0 : i32
    %c0_i32_1 = arith.constant 0 : i32
    return %c0_i32, %c0_i32_0 : i32, i32
  }
  func.func @transform_8(%arg0: i32) -> (i32, i32, i32) {
    %c0_i32 = arith.constant 0 : i32
    %c0_i32_0 = arith.constant 0 : i32
    %c0_i32_1 = arith.constant 0 : i32
    %c0_i32_2 = arith.constant 0 : i32
    return %c0_i32, %c0_i32_0, %c0_i32_1 : i32, i32, i32
  }
}

module attributes {stable_mosaic.version = 11 : i64} {
  func.func @_win_attn_kernel(%arg0: i32, %arg1: memref<8x16x32xf32, #tpu.memory_space<vmem>>, %arg2: memref<1x32xf32, #tpu.memory_space<vmem>>, %arg3: memref<1x32xf32, #tpu.memory_space<vmem>>, %arg4: memref<32x96xf32, #tpu.memory_space<vmem>>, %arg5: memref<1x96xf32, #tpu.memory_space<vmem>>, %arg6: memref<2x4x16x16xf32, #tpu.memory_space<vmem>>, %arg7: memref<32x32xf32, #tpu.memory_space<vmem>>, %arg8: memref<1x32xf32, #tpu.memory_space<vmem>>, %arg9: memref<8x16x32xf32, #tpu.memory_space<vmem>>) attributes {dimension_semantics = [#tpu.dimension_semantics<arbitrary>], iteration_bounds = array<i64: 1>, scalar_prefetch = 0 : i64, scratch_operands = 0 : i64, tpu.core_type = #tpu.core_type<tc>, window_params = [{pipeline_mode = #tpu.pipeline_mode<synchronous>, transform_indices = @transform_0, window_bounds = array<i64: 8, 16, 32>}, {pipeline_mode = #tpu.pipeline_mode<synchronous>, transform_indices = @transform_1, window_bounds = array<i64: 1, 32>}, {pipeline_mode = #tpu.pipeline_mode<synchronous>, transform_indices = @transform_2, window_bounds = array<i64: 1, 32>}, {pipeline_mode = #tpu.pipeline_mode<synchronous>, transform_indices = @transform_3, window_bounds = array<i64: 32, 96>}, {pipeline_mode = #tpu.pipeline_mode<synchronous>, transform_indices = @transform_4, window_bounds = array<i64: 1, 96>}, {pipeline_mode = #tpu.pipeline_mode<synchronous>, transform_indices = @transform_5, window_bounds = array<i64: 2, 4, 16, 16>}, {pipeline_mode = #tpu.pipeline_mode<synchronous>, transform_indices = @transform_6, window_bounds = array<i64: 32, 32>}, {pipeline_mode = #tpu.pipeline_mode<synchronous>, transform_indices = @transform_7, window_bounds = array<i64: 1, 32>}, {pipeline_mode = #tpu.pipeline_mode<synchronous>, transform_indices = @transform_8, window_bounds = array<i64: 8, 16, 32>}]} {
    %c0 = arith.constant 0 : index
    %c0_0 = arith.constant 0 : index
    %c0_1 = arith.constant 0 : index
    %0 = vector.load %arg1[%c0, %c0_0, %c0_1] : memref<8x16x32xf32, #tpu.memory_space<vmem>>, vector<8x16x32xf32>
    %1 = vector.shape_cast %0 : vector<8x16x32xf32> to vector<128x32xf32>
    %c0_2 = arith.constant 0 : index
    %c0_3 = arith.constant 0 : index
    %2 = vector.load %arg2[%c0_2, %c0_3] : memref<1x32xf32, #tpu.memory_space<vmem>>, vector<1x32xf32>
    %c0_4 = arith.constant 0 : index
    %c0_5 = arith.constant 0 : index
    %3 = vector.load %arg3[%c0_4, %c0_5] : memref<1x32xf32, #tpu.memory_space<vmem>>, vector<1x32xf32>
    %cst = arith.constant dense<0.000000e+00> : vector<128xf32>
    %4 = vector.multi_reduction <add>, %1, %cst [1] : vector<128x32xf32> to vector<128xf32>
    %5 = vector.shape_cast %4 : vector<128xf32> to vector<128x1xf32>
    %cst_6 = arith.constant 3.200000e+01 : f32
    %6 = vector.broadcast %cst_6 : f32 to vector<128x1xf32>
    %7 = arith.divf %5, %6 : vector<128x1xf32>
    %8 = vector.broadcast %7 : vector<128x1xf32> to vector<128x32xf32>
    %9 = arith.subf %1, %8 : vector<128x32xf32>
    %10 = arith.mulf %9, %9 : vector<128x32xf32>
    %cst_7 = arith.constant dense<0.000000e+00> : vector<128xf32>
    %11 = vector.multi_reduction <add>, %10, %cst_7 [1] : vector<128x32xf32> to vector<128xf32>
    %12 = vector.shape_cast %11 : vector<128xf32> to vector<128x1xf32>
    %cst_8 = arith.constant 3.200000e+01 : f32
    %13 = vector.broadcast %cst_8 : f32 to vector<128x1xf32>
    %14 = arith.divf %12, %13 : vector<128x1xf32>
    %15 = vector.broadcast %7 : vector<128x1xf32> to vector<128x32xf32>
    %16 = arith.subf %1, %15 : vector<128x32xf32>
    %cst_9 = arith.constant 9.99999974E-6 : f32
    %17 = vector.broadcast %cst_9 : f32 to vector<128x1xf32>
    %18 = arith.addf %14, %17 : vector<128x1xf32>
    %19 = math.rsqrt %18 : vector<128x1xf32>
    %20 = vector.broadcast %19 : vector<128x1xf32> to vector<128x32xf32>
    %21 = arith.mulf %16, %20 : vector<128x32xf32>
    %22 = vector.broadcast %2 : vector<1x32xf32> to vector<128x32xf32>
    %23 = arith.mulf %21, %22 : vector<128x32xf32>
    %24 = vector.broadcast %3 : vector<1x32xf32> to vector<128x32xf32>
    %25 = arith.addf %23, %24 : vector<128x32xf32>
    %c0_10 = arith.constant 0 : index
    %c0_11 = arith.constant 0 : index
    %26 = vector.load %arg4[%c0_10, %c0_11] : memref<32x96xf32, #tpu.memory_space<vmem>>, vector<32x96xf32>
    %27 = arith.truncf %25 : vector<128x32xf32> to vector<128x32xbf16>
    %28 = arith.truncf %26 : vector<32x96xf32> to vector<32x96xbf16>
    %cst_12 = arith.constant dense<0.000000e+00> : vector<128x96xf32>
    %29 = tpu.matmul %27, %28, %cst_12 {dimension_numbers = #tpu.dot_dimension_numbers<[1], [0], [0], [1], [0, 0, 1, 1], [], []>} : vector<128x32xbf16>, vector<32x96xbf16>, vector<128x96xf32> -> vector<128x96xf32>
    %c0_13 = arith.constant 0 : index
    %c0_14 = arith.constant 0 : index
    %30 = vector.load %arg5[%c0_13, %c0_14] : memref<1x96xf32, #tpu.memory_space<vmem>>, vector<1x96xf32>
    %31 = vector.broadcast %30 : vector<1x96xf32> to vector<128x96xf32>
    %32 = arith.addf %29, %31 : vector<128x96xf32>
    %33 = vector.extract_strided_slice %32 {offsets = [0, 0], sizes = [128, 16], strides = [1, 1]} : vector<128x96xf32> to vector<128x16xf32>
    %34 = vector.shape_cast %33 : vector<128x16xf32> to vector<8x16x16xf32>
    %35 = vector.extract_strided_slice %32 {offsets = [0, 32], sizes = [128, 16], strides = [1, 1]} : vector<128x96xf32> to vector<128x16xf32>
    %36 = vector.shape_cast %35 : vector<128x16xf32> to vector<8x16x16xf32>
    %37 = vector.extract_strided_slice %32 {offsets = [0, 64], sizes = [128, 16], strides = [1, 1]} : vector<128x96xf32> to vector<128x16xf32>
    %38 = vector.shape_cast %37 : vector<128x16xf32> to vector<8x16x16xf32>
    %39 = arith.truncf %34 : vector<8x16x16xf32> to vector<8x16x16xbf16>
    %40 = arith.truncf %36 : vector<8x16x16xf32> to vector<8x16x16xbf16>
    "tpu.trace_start"() <{level = 10 : i32, message = "bnd,bmd->bnm"}> : () -> ()
    %cst_15 = arith.constant dense<0.000000e+00> : vector<8x16x16xf32>
    %41 = tpu.matmul %39, %40, %cst_15 {dimension_numbers = #tpu.dot_dimension_numbers<[2], [2], [1], [1], [0, 0, 0, 1, 1, 1], [0], [0]>} : vector<8x16x16xbf16>, vector<8x16x16xbf16>, vector<8x16x16xf32> -> vector<8x16x16xf32>
    "tpu.trace_stop"() : () -> ()
    %cst_16 = arith.constant 2.500000e-01 : f32
    %42 = vector.broadcast %cst_16 : f32 to vector<8x16x16xf32>
    %43 = arith.mulf %41, %42 : vector<8x16x16xf32>
    %c0_17 = arith.constant 0 : index
    %c0_18 = arith.constant 0 : index
    %c0_19 = arith.constant 0 : index
    %c0_20 = arith.constant 0 : index
    %44 = vector.load %arg6[%c0_17, %c0_18, %c0_19, %c0_20] : memref<2x4x16x16xf32, #tpu.memory_space<vmem>>, vector<1x4x16x16xf32>
    %45 = vector.shape_cast %44 : vector<1x4x16x16xf32> to vector<4x16x16xf32>
    %46 = vector.shape_cast %43 : vector<8x16x16xf32> to vector<2x4x16x16xf32>
    %47 = vector.shape_cast %45 : vector<4x16x16xf32> to vector<1x4x16x16xf32>
    %48 = vector.broadcast %47 : vector<1x4x16x16xf32> to vector<2x4x16x16xf32>
    %49 = arith.addf %46, %48 : vector<2x4x16x16xf32>
    %50 = vector.shape_cast %49 : vector<2x4x16x16xf32> to vector<8x16x16xf32>
    %cst_21 = arith.constant dense<0xFF800000> : vector<8x16xf32>
    %51 = vector.multi_reduction <maximumf>, %50, %cst_21 [2] : vector<8x16x16xf32> to vector<8x16xf32>
    %52 = vector.shape_cast %51 : vector<8x16xf32> to vector<8x16x1xf32>
    %53 = vector.broadcast %52 : vector<8x16x1xf32> to vector<8x16x16xf32>
    %54 = arith.subf %50, %53 : vector<8x16x16xf32>
    %55 = math.exp %54 : vector<8x16x16xf32>
    %cst_22 = arith.constant dense<0.000000e+00> : vector<8x16xf32>
    %56 = vector.multi_reduction <add>, %55, %cst_22 [2] : vector<8x16x16xf32> to vector<8x16xf32>
    %57 = vector.shape_cast %56 : vector<8x16xf32> to vector<8x16x1xf32>
    %58 = tpu.reciprocal %57 {approx = true} : vector<8x16x1xf32> -> vector<8x16x1xf32>
    %59 = vector.broadcast %58 : vector<8x16x1xf32> to vector<8x16x16xf32>
    %60 = arith.mulf %55, %59 : vector<8x16x16xf32>
    %61 = arith.truncf %60 : vector<8x16x16xf32> to vector<8x16x16xbf16>
    %62 = arith.truncf %38 : vector<8x16x16xf32> to vector<8x16x16xbf16>
    "tpu.trace_start"() <{level = 10 : i32, message = "bnm,bmd->bnd"}> : () -> ()
    %cst_23 = arith.constant dense<0.000000e+00> : vector<8x16x16xf32>
    %63 = tpu.matmul %61, %62, %cst_23 {dimension_numbers = #tpu.dot_dimension_numbers<[2], [1], [1], [2], [0, 0, 0, 1, 1, 2], [0], [0]>} : vector<8x16x16xbf16>, vector<8x16x16xbf16>, vector<8x16x16xf32> -> vector<8x16x16xf32>
    "tpu.trace_stop"() : () -> ()
    %64 = vector.extract_strided_slice %32 {offsets = [0, 16], sizes = [128, 16], strides = [1, 1]} : vector<128x96xf32> to vector<128x16xf32>
    %65 = vector.shape_cast %64 : vector<128x16xf32> to vector<8x16x16xf32>
    %66 = vector.extract_strided_slice %32 {offsets = [0, 48], sizes = [128, 16], strides = [1, 1]} : vector<128x96xf32> to vector<128x16xf32>
    %67 = vector.shape_cast %66 : vector<128x16xf32> to vector<8x16x16xf32>
    %68 = vector.extract_strided_slice %32 {offsets = [0, 80], sizes = [128, 16], strides = [1, 1]} : vector<128x96xf32> to vector<128x16xf32>
    %69 = vector.shape_cast %68 : vector<128x16xf32> to vector<8x16x16xf32>
    %70 = arith.truncf %65 : vector<8x16x16xf32> to vector<8x16x16xbf16>
    %71 = arith.truncf %67 : vector<8x16x16xf32> to vector<8x16x16xbf16>
    "tpu.trace_start"() <{level = 10 : i32, message = "bnd,bmd->bnm"}> : () -> ()
    %cst_24 = arith.constant dense<0.000000e+00> : vector<8x16x16xf32>
    %72 = tpu.matmul %70, %71, %cst_24 {dimension_numbers = #tpu.dot_dimension_numbers<[2], [2], [1], [1], [0, 0, 0, 1, 1, 1], [0], [0]>} : vector<8x16x16xbf16>, vector<8x16x16xbf16>, vector<8x16x16xf32> -> vector<8x16x16xf32>
    "tpu.trace_stop"() : () -> ()
    %cst_25 = arith.constant 2.500000e-01 : f32
    %73 = vector.broadcast %cst_25 : f32 to vector<8x16x16xf32>
    %74 = arith.mulf %72, %73 : vector<8x16x16xf32>
    %c1 = arith.constant 1 : index
    %c0_26 = arith.constant 0 : index
    %c0_27 = arith.constant 0 : index
    %c0_28 = arith.constant 0 : index
    %75 = vector.load %arg6[%c1, %c0_26, %c0_27, %c0_28] : memref<2x4x16x16xf32, #tpu.memory_space<vmem>>, vector<1x4x16x16xf32>
    %76 = vector.shape_cast %75 : vector<1x4x16x16xf32> to vector<4x16x16xf32>
    %77 = vector.shape_cast %74 : vector<8x16x16xf32> to vector<2x4x16x16xf32>
    %78 = vector.shape_cast %76 : vector<4x16x16xf32> to vector<1x4x16x16xf32>
    %79 = vector.broadcast %78 : vector<1x4x16x16xf32> to vector<2x4x16x16xf32>
    %80 = arith.addf %77, %79 : vector<2x4x16x16xf32>
    %81 = vector.shape_cast %80 : vector<2x4x16x16xf32> to vector<8x16x16xf32>
    %cst_29 = arith.constant dense<0xFF800000> : vector<8x16xf32>
    %82 = vector.multi_reduction <maximumf>, %81, %cst_29 [2] : vector<8x16x16xf32> to vector<8x16xf32>
    %83 = vector.shape_cast %82 : vector<8x16xf32> to vector<8x16x1xf32>
    %84 = vector.broadcast %83 : vector<8x16x1xf32> to vector<8x16x16xf32>
    %85 = arith.subf %81, %84 : vector<8x16x16xf32>
    %86 = math.exp %85 : vector<8x16x16xf32>
    %cst_30 = arith.constant dense<0.000000e+00> : vector<8x16xf32>
    %87 = vector.multi_reduction <add>, %86, %cst_30 [2] : vector<8x16x16xf32> to vector<8x16xf32>
    %88 = vector.shape_cast %87 : vector<8x16xf32> to vector<8x16x1xf32>
    %89 = tpu.reciprocal %88 {approx = true} : vector<8x16x1xf32> -> vector<8x16x1xf32>
    %90 = vector.broadcast %89 : vector<8x16x1xf32> to vector<8x16x16xf32>
    %91 = arith.mulf %86, %90 : vector<8x16x16xf32>
    %92 = arith.truncf %91 : vector<8x16x16xf32> to vector<8x16x16xbf16>
    %93 = arith.truncf %69 : vector<8x16x16xf32> to vector<8x16x16xbf16>
    "tpu.trace_start"() <{level = 10 : i32, message = "bnm,bmd->bnd"}> : () -> ()
    %cst_31 = arith.constant dense<0.000000e+00> : vector<8x16x16xf32>
    %94 = tpu.matmul %92, %93, %cst_31 {dimension_numbers = #tpu.dot_dimension_numbers<[2], [1], [1], [2], [0, 0, 0, 1, 1, 2], [0], [0]>} : vector<8x16x16xbf16>, vector<8x16x16xbf16>, vector<8x16x16xf32> -> vector<8x16x16xf32>
    "tpu.trace_stop"() : () -> ()
    %95 = tpu.concatenate %63, %94 in 2 : vector<8x16x16xf32>, vector<8x16x16xf32> -> vector<8x16x32xf32>
    %96 = vector.shape_cast %95 : vector<8x16x32xf32> to vector<128x32xf32>
    %c0_32 = arith.constant 0 : index
    %c0_33 = arith.constant 0 : index
    %97 = vector.load %arg7[%c0_32, %c0_33] : memref<32x32xf32, #tpu.memory_space<vmem>>, vector<32x32xf32>
    %98 = arith.truncf %96 : vector<128x32xf32> to vector<128x32xbf16>
    %99 = arith.truncf %97 : vector<32x32xf32> to vector<32x32xbf16>
    %cst_34 = arith.constant dense<0.000000e+00> : vector<128x32xf32>
    %100 = tpu.matmul %98, %99, %cst_34 {dimension_numbers = #tpu.dot_dimension_numbers<[1], [0], [0], [1], [0, 0, 1, 1], [], []>} : vector<128x32xbf16>, vector<32x32xbf16>, vector<128x32xf32> -> vector<128x32xf32>
    %c0_35 = arith.constant 0 : index
    %c0_36 = arith.constant 0 : index
    %101 = vector.load %arg8[%c0_35, %c0_36] : memref<1x32xf32, #tpu.memory_space<vmem>>, vector<1x32xf32>
    %102 = vector.broadcast %101 : vector<1x32xf32> to vector<128x32xf32>
    %103 = arith.addf %100, %102 : vector<128x32xf32>
    %104 = vector.shape_cast %103 : vector<128x32xf32> to vector<8x16x32xf32>
    %c0_37 = arith.constant 0 : index
    %c0_38 = arith.constant 0 : index
    %c0_39 = arith.constant 0 : index
    %105 = vector.load %arg9[%c0_37, %c0_38, %c0_39] : memref<8x16x32xf32, #tpu.memory_space<vmem>>, vector<8x16x32xf32>
    tpu.vector_store %arg9[%c0_37, %c0_38, %c0_39], %104 {strides = array<i32>} : memref<8x16x32xf32, #tpu.memory_space<vmem>>, vector<8x16x32xf32>,
    return
  }
  func.func @transform_0(%arg0: i32) -> (i32, i32, i32) {
    %c0_i32 = arith.constant 0 : i32
    %c0_i32_0 = arith.constant 0 : i32
    %c0_i32_1 = arith.constant 0 : i32
    %c0_i32_2 = arith.constant 0 : i32
    return %c0_i32, %c0_i32_0, %c0_i32_1 : i32, i32, i32
  }
  func.func @transform_1(%arg0: i32) -> (i32, i32) {
    %c0_i32 = arith.constant 0 : i32
    %c0_i32_0 = arith.constant 0 : i32
    %c0_i32_1 = arith.constant 0 : i32
    return %c0_i32, %c0_i32_0 : i32, i32
  }
  func.func @transform_2(%arg0: i32) -> (i32, i32) {
    %c0_i32 = arith.constant 0 : i32
    %c0_i32_0 = arith.constant 0 : i32
    %c0_i32_1 = arith.constant 0 : i32
    return %c0_i32, %c0_i32_0 : i32, i32
  }
  func.func @transform_3(%arg0: i32) -> (i32, i32) {
    %c0_i32 = arith.constant 0 : i32
    %c0_i32_0 = arith.constant 0 : i32
    %c0_i32_1 = arith.constant 0 : i32
    return %c0_i32, %c0_i32_0 : i32, i32
  }
  func.func @transform_4(%arg0: i32) -> (i32, i32) {
    %c0_i32 = arith.constant 0 : i32
    %c0_i32_0 = arith.constant 0 : i32
    %c0_i32_1 = arith.constant 0 : i32
    return %c0_i32, %c0_i32_0 : i32, i32
  }
  func.func @transform_5(%arg0: i32) -> (i32, i32, i32, i32) {
    %c0_i32 = arith.constant 0 : i32
    %c0_i32_0 = arith.constant 0 : i32
    %c0_i32_1 = arith.constant 0 : i32
    %c0_i32_2 = arith.constant 0 : i32
    %c0_i32_3 = arith.constant 0 : i32
    return %c0_i32, %c0_i32_0, %c0_i32_1, %c0_i32_2 : i32, i32, i32, i32
  }
  func.func @transform_6(%arg0: i32) -> (i32, i32) {
    %c0_i32 = arith.constant 0 : i32
    %c0_i32_0 = arith.constant 0 : i32
    %c0_i32_1 = arith.constant 0 : i32
    return %c0_i32, %c0_i32_0 : i32, i32
  }
  func.func @transform_7(%arg0: i32) -> (i32, i32) {
    %c0_i32 = arith.constant 0 : i32
    %c0_i32_0 = arith.constant 0 : i32
    %c0_i32_1 = arith.constant 0 : i32
    return %c0_i32, %c0_i32_0 : i32, i32
  }
  func.func @transform_8(%arg0: i32) -> (i32, i32, i32) {
    %c0_i32 = arith.constant 0 : i32
    %c0_i32_0 = arith.constant 0 : i32
    %c0_i32_1 = arith.constant 0 : i32
    %c0_i32_2 = arith.constant 0 : i32
    return %c0_i32, %c0_i32_0, %c0_i32_1 : i32, i32, i32
  }
}

module attributes {stable_mosaic.version = 11 : i64} {
  func.func @_mlp_block_kernel(%arg0: i32, %arg1: memref<128x32xf32, #tpu.memory_space<vmem>>, %arg2: memref<128x32xf32, #tpu.memory_space<vmem>>, %arg3: memref<1x32xf32, #tpu.memory_space<vmem>>, %arg4: memref<1x32xf32, #tpu.memory_space<vmem>>, %arg5: memref<32x128xf32, #tpu.memory_space<vmem>>, %arg6: memref<1x128xf32, #tpu.memory_space<vmem>>, %arg7: memref<128x32xf32, #tpu.memory_space<vmem>>, %arg8: memref<1x32xf32, #tpu.memory_space<vmem>>, %arg9: memref<128x32xf32, #tpu.memory_space<vmem>>) attributes {dimension_semantics = [#tpu.dimension_semantics<arbitrary>], iteration_bounds = array<i64: 1>, scalar_prefetch = 0 : i64, scratch_operands = 0 : i64, tpu.core_type = #tpu.core_type<tc>, window_params = [{pipeline_mode = #tpu.pipeline_mode<synchronous>, transform_indices = @transform_0, window_bounds = array<i64: 128, 32>}, {pipeline_mode = #tpu.pipeline_mode<synchronous>, transform_indices = @transform_1, window_bounds = array<i64: 128, 32>}, {pipeline_mode = #tpu.pipeline_mode<synchronous>, transform_indices = @transform_2, window_bounds = array<i64: 1, 32>}, {pipeline_mode = #tpu.pipeline_mode<synchronous>, transform_indices = @transform_3, window_bounds = array<i64: 1, 32>}, {pipeline_mode = #tpu.pipeline_mode<synchronous>, transform_indices = @transform_4, window_bounds = array<i64: 32, 128>}, {pipeline_mode = #tpu.pipeline_mode<synchronous>, transform_indices = @transform_5, window_bounds = array<i64: 1, 128>}, {pipeline_mode = #tpu.pipeline_mode<synchronous>, transform_indices = @transform_6, window_bounds = array<i64: 128, 32>}, {pipeline_mode = #tpu.pipeline_mode<synchronous>, transform_indices = @transform_7, window_bounds = array<i64: 1, 32>}, {pipeline_mode = #tpu.pipeline_mode<synchronous>, transform_indices = @transform_8, window_bounds = array<i64: 128, 32>}]} {
    %c0 = arith.constant 0 : index
    %c0_0 = arith.constant 0 : index
    %0 = vector.load %arg1[%c0, %c0_0] : memref<128x32xf32, #tpu.memory_space<vmem>>, vector<128x32xf32>
    %c0_1 = arith.constant 0 : index
    %c0_2 = arith.constant 0 : index
    %1 = vector.load %arg2[%c0_1, %c0_2] : memref<128x32xf32, #tpu.memory_space<vmem>>, vector<128x32xf32>
    %2 = arith.addf %0, %1 : vector<128x32xf32>
    %c0_3 = arith.constant 0 : index
    %c0_4 = arith.constant 0 : index
    %3 = vector.load %arg3[%c0_3, %c0_4] : memref<1x32xf32, #tpu.memory_space<vmem>>, vector<1x32xf32>
    %c0_5 = arith.constant 0 : index
    %c0_6 = arith.constant 0 : index
    %4 = vector.load %arg4[%c0_5, %c0_6] : memref<1x32xf32, #tpu.memory_space<vmem>>, vector<1x32xf32>
    %cst = arith.constant dense<0.000000e+00> : vector<128xf32>
    %5 = vector.multi_reduction <add>, %2, %cst [1] : vector<128x32xf32> to vector<128xf32>
    %6 = vector.shape_cast %5 : vector<128xf32> to vector<128x1xf32>
    %cst_7 = arith.constant 3.200000e+01 : f32
    %7 = vector.broadcast %cst_7 : f32 to vector<128x1xf32>
    %8 = arith.divf %6, %7 : vector<128x1xf32>
    %9 = vector.broadcast %8 : vector<128x1xf32> to vector<128x32xf32>
    %10 = arith.subf %2, %9 : vector<128x32xf32>
    %11 = arith.mulf %10, %10 : vector<128x32xf32>
    %cst_8 = arith.constant dense<0.000000e+00> : vector<128xf32>
    %12 = vector.multi_reduction <add>, %11, %cst_8 [1] : vector<128x32xf32> to vector<128xf32>
    %13 = vector.shape_cast %12 : vector<128xf32> to vector<128x1xf32>
    %cst_9 = arith.constant 3.200000e+01 : f32
    %14 = vector.broadcast %cst_9 : f32 to vector<128x1xf32>
    %15 = arith.divf %13, %14 : vector<128x1xf32>
    %16 = vector.broadcast %8 : vector<128x1xf32> to vector<128x32xf32>
    %17 = arith.subf %2, %16 : vector<128x32xf32>
    %cst_10 = arith.constant 9.99999974E-6 : f32
    %18 = vector.broadcast %cst_10 : f32 to vector<128x1xf32>
    %19 = arith.addf %15, %18 : vector<128x1xf32>
    %20 = math.rsqrt %19 : vector<128x1xf32>
    %21 = vector.broadcast %20 : vector<128x1xf32> to vector<128x32xf32>
    %22 = arith.mulf %17, %21 : vector<128x32xf32>
    %23 = vector.broadcast %3 : vector<1x32xf32> to vector<128x32xf32>
    %24 = arith.mulf %22, %23 : vector<128x32xf32>
    %25 = vector.broadcast %4 : vector<1x32xf32> to vector<128x32xf32>
    %26 = arith.addf %24, %25 : vector<128x32xf32>
    %c0_11 = arith.constant 0 : index
    %c0_12 = arith.constant 0 : index
    %27 = vector.load %arg5[%c0_11, %c0_12] : memref<32x128xf32, #tpu.memory_space<vmem>>, vector<32x128xf32>
    %28 = arith.truncf %26 : vector<128x32xf32> to vector<128x32xbf16>
    %29 = arith.truncf %27 : vector<32x128xf32> to vector<32x128xbf16>
    %cst_13 = arith.constant dense<0.000000e+00> : vector<128x128xf32>
    %30 = tpu.matmul %28, %29, %cst_13 {dimension_numbers = #tpu.dot_dimension_numbers<[1], [0], [0], [1], [0, 0, 1, 1], [], []>} : vector<128x32xbf16>, vector<32x128xbf16>, vector<128x128xf32> -> vector<128x128xf32>
    %c0_14 = arith.constant 0 : index
    %c0_15 = arith.constant 0 : index
    %31 = vector.load %arg6[%c0_14, %c0_15] : memref<1x128xf32, #tpu.memory_space<vmem>>, vector<1x128xf32>
    %32 = vector.broadcast %31 : vector<1x128xf32> to vector<128x128xf32>
    %33 = arith.addf %30, %32 : vector<128x128xf32>
    %34 = arith.mulf %33, %33 : vector<128x128xf32>
    %35 = arith.mulf %33, %34 : vector<128x128xf32>
    %cst_16 = arith.constant 4.471500e-02 : f32
    %36 = vector.broadcast %cst_16 : f32 to vector<128x128xf32>
    %37 = arith.mulf %36, %35 : vector<128x128xf32>
    %38 = arith.addf %33, %37 : vector<128x128xf32>
    %cst_17 = arith.constant 0.797884583 : f32
    %39 = vector.broadcast %cst_17 : f32 to vector<128x128xf32>
    %40 = arith.mulf %39, %38 : vector<128x128xf32>
    %41 = math.tanh %40 : vector<128x128xf32>
    %cst_18 = arith.constant 1.000000e+00 : f32
    %42 = vector.broadcast %cst_18 : f32 to vector<128x128xf32>
    %43 = arith.addf %42, %41 : vector<128x128xf32>
    %cst_19 = arith.constant 5.000000e-01 : f32
    %44 = vector.broadcast %cst_19 : f32 to vector<128x128xf32>
    %45 = arith.mulf %44, %43 : vector<128x128xf32>
    %46 = arith.mulf %33, %45 : vector<128x128xf32>
    %c0_20 = arith.constant 0 : index
    %c0_21 = arith.constant 0 : index
    %47 = vector.load %arg7[%c0_20, %c0_21] : memref<128x32xf32, #tpu.memory_space<vmem>>, vector<128x32xf32>
    %48 = arith.truncf %46 : vector<128x128xf32> to vector<128x128xbf16>
    %49 = arith.truncf %47 : vector<128x32xf32> to vector<128x32xbf16>
    %cst_22 = arith.constant dense<0.000000e+00> : vector<128x32xf32>
    %50 = tpu.matmul %48, %49, %cst_22 {dimension_numbers = #tpu.dot_dimension_numbers<[1], [0], [0], [1], [0, 0, 1, 1], [], []>} : vector<128x128xbf16>, vector<128x32xbf16>, vector<128x32xf32> -> vector<128x32xf32>
    %51 = arith.addf %2, %50 : vector<128x32xf32>
    %c0_23 = arith.constant 0 : index
    %c0_24 = arith.constant 0 : index
    %52 = vector.load %arg8[%c0_23, %c0_24] : memref<1x32xf32, #tpu.memory_space<vmem>>, vector<1x32xf32>
    %53 = vector.broadcast %52 : vector<1x32xf32> to vector<128x32xf32>
    %54 = arith.addf %51, %53 : vector<128x32xf32>
    %c0_25 = arith.constant 0 : index
    %c0_26 = arith.constant 0 : index
    %55 = vector.load %arg9[%c0_25, %c0_26] : memref<128x32xf32, #tpu.memory_space<vmem>>, vector<128x32xf32>
    tpu.vector_store %arg9[%c0_25, %c0_26], %54 {strides = array<i32>} : memref<128x32xf32, #tpu.memory_space<vmem>>, vector<128x32xf32>,
    return
  }
  func.func @transform_0(%arg0: i32) -> (i32, i32) {
    %c0_i32 = arith.constant 0 : i32
    %c0_i32_0 = arith.constant 0 : i32
    %c0_i32_1 = arith.constant 0 : i32
    return %c0_i32, %c0_i32_0 : i32, i32
  }
  func.func @transform_1(%arg0: i32) -> (i32, i32) {
    %c0_i32 = arith.constant 0 : i32
    %c0_i32_0 = arith.constant 0 : i32
    %c0_i32_1 = arith.constant 0 : i32
    return %c0_i32, %c0_i32_0 : i32, i32
  }
  func.func @transform_2(%arg0: i32) -> (i32, i32) {
    %c0_i32 = arith.constant 0 : i32
    %c0_i32_0 = arith.constant 0 : i32
    %c0_i32_1 = arith.constant 0 : i32
    return %c0_i32, %c0_i32_0 : i32, i32
  }
  func.func @transform_3(%arg0: i32) -> (i32, i32) {
    %c0_i32 = arith.constant 0 : i32
    %c0_i32_0 = arith.constant 0 : i32
    %c0_i32_1 = arith.constant 0 : i32
    return %c0_i32, %c0_i32_0 : i32, i32
  }
  func.func @transform_4(%arg0: i32) -> (i32, i32) {
    %c0_i32 = arith.constant 0 : i32
    %c0_i32_0 = arith.constant 0 : i32
    %c0_i32_1 = arith.constant 0 : i32
    return %c0_i32, %c0_i32_0 : i32, i32
  }
  func.func @transform_5(%arg0: i32) -> (i32, i32) {
    %c0_i32 = arith.constant 0 : i32
    %c0_i32_0 = arith.constant 0 : i32
    %c0_i32_1 = arith.constant 0 : i32
    return %c0_i32, %c0_i32_0 : i32, i32
  }
  func.func @transform_6(%arg0: i32) -> (i32, i32) {
    %c0_i32 = arith.constant 0 : i32
    %c0_i32_0 = arith.constant 0 : i32
    %c0_i32_1 = arith.constant 0 : i32
    return %c0_i32, %c0_i32_0 : i32, i32
  }
  func.func @transform_7(%arg0: i32) -> (i32, i32) {
    %c0_i32 = arith.constant 0 : i32
    %c0_i32_0 = arith.constant 0 : i32
    %c0_i32_1 = arith.constant 0 : i32
    return %c0_i32, %c0_i32_0 : i32, i32
  }
  func.func @transform_8(%arg0: i32) -> (i32, i32) {
    %c0_i32 = arith.constant 0 : i32
    %c0_i32_0 = arith.constant 0 : i32
    %c0_i32_1 = arith.constant 0 : i32
    return %c0_i32, %c0_i32_0 : i32, i32
  }
}

module attributes {stable_mosaic.version = 11 : i64} {
  func.func @_merge_kernel(%arg0: i32, %arg1: memref<32x128xf32, #tpu.memory_space<vmem>>, %arg2: memref<1x128xf32, #tpu.memory_space<vmem>>, %arg3: memref<1x128xf32, #tpu.memory_space<vmem>>, %arg4: memref<128x64xf32, #tpu.memory_space<vmem>>, %arg5: memref<32x64xf32, #tpu.memory_space<vmem>>) attributes {dimension_semantics = [#tpu.dimension_semantics<arbitrary>], iteration_bounds = array<i64: 1>, scalar_prefetch = 0 : i64, scratch_operands = 0 : i64, tpu.core_type = #tpu.core_type<tc>, window_params = [{pipeline_mode = #tpu.pipeline_mode<synchronous>, transform_indices = @transform_0, window_bounds = array<i64: 32, 128>}, {pipeline_mode = #tpu.pipeline_mode<synchronous>, transform_indices = @transform_1, window_bounds = array<i64: 1, 128>}, {pipeline_mode = #tpu.pipeline_mode<synchronous>, transform_indices = @transform_2, window_bounds = array<i64: 1, 128>}, {pipeline_mode = #tpu.pipeline_mode<synchronous>, transform_indices = @transform_3, window_bounds = array<i64: 128, 64>}, {pipeline_mode = #tpu.pipeline_mode<synchronous>, transform_indices = @transform_4, window_bounds = array<i64: 32, 64>}]} {
    %c0 = arith.constant 0 : index
    %c0_0 = arith.constant 0 : index
    %0 = vector.load %arg1[%c0, %c0_0] : memref<32x128xf32, #tpu.memory_space<vmem>>, vector<32x128xf32>
    %c0_1 = arith.constant 0 : index
    %c0_2 = arith.constant 0 : index
    %1 = vector.load %arg2[%c0_1, %c0_2] : memref<1x128xf32, #tpu.memory_space<vmem>>, vector<1x128xf32>
    %c0_3 = arith.constant 0 : index
    %c0_4 = arith.constant 0 : index
    %2 = vector.load %arg3[%c0_3, %c0_4] : memref<1x128xf32, #tpu.memory_space<vmem>>, vector<1x128xf32>
    %cst = arith.constant dense<0.000000e+00> : vector<32xf32>
    %3 = vector.multi_reduction <add>, %0, %cst [1] : vector<32x128xf32> to vector<32xf32>
    %4 = vector.shape_cast %3 : vector<32xf32> to vector<32x1xf32>
    %cst_5 = arith.constant 1.280000e+02 : f32
    %5 = vector.broadcast %cst_5 : f32 to vector<32x1xf32>
    %6 = arith.divf %4, %5 : vector<32x1xf32>
    %7 = vector.broadcast %6 : vector<32x1xf32> to vector<32x128xf32>
    %8 = arith.subf %0, %7 : vector<32x128xf32>
    %9 = arith.mulf %8, %8 : vector<32x128xf32>
    %cst_6 = arith.constant dense<0.000000e+00> : vector<32xf32>
    %10 = vector.multi_reduction <add>, %9, %cst_6 [1] : vector<32x128xf32> to vector<32xf32>
    %11 = vector.shape_cast %10 : vector<32xf32> to vector<32x1xf32>
    %cst_7 = arith.constant 1.280000e+02 : f32
    %12 = vector.broadcast %cst_7 : f32 to vector<32x1xf32>
    %13 = arith.divf %11, %12 : vector<32x1xf32>
    %14 = vector.broadcast %6 : vector<32x1xf32> to vector<32x128xf32>
    %15 = arith.subf %0, %14 : vector<32x128xf32>
    %cst_8 = arith.constant 9.99999974E-6 : f32
    %16 = vector.broadcast %cst_8 : f32 to vector<32x1xf32>
    %17 = arith.addf %13, %16 : vector<32x1xf32>
    %18 = math.rsqrt %17 : vector<32x1xf32>
    %19 = vector.broadcast %18 : vector<32x1xf32> to vector<32x128xf32>
    %20 = arith.mulf %15, %19 : vector<32x128xf32>
    %21 = vector.broadcast %1 : vector<1x128xf32> to vector<32x128xf32>
    %22 = arith.mulf %20, %21 : vector<32x128xf32>
    %23 = vector.broadcast %2 : vector<1x128xf32> to vector<32x128xf32>
    %24 = arith.addf %22, %23 : vector<32x128xf32>
    %c0_9 = arith.constant 0 : index
    %c0_10 = arith.constant 0 : index
    %25 = vector.load %arg4[%c0_9, %c0_10] : memref<128x64xf32, #tpu.memory_space<vmem>>, vector<128x64xf32>
    %26 = arith.truncf %24 : vector<32x128xf32> to vector<32x128xbf16>
    %27 = arith.truncf %25 : vector<128x64xf32> to vector<128x64xbf16>
    %cst_11 = arith.constant dense<0.000000e+00> : vector<32x64xf32>
    %28 = tpu.matmul %26, %27, %cst_11 {dimension_numbers = #tpu.dot_dimension_numbers<[1], [0], [0], [1], [0, 0, 1, 1], [], []>} : vector<32x128xbf16>, vector<128x64xbf16>, vector<32x64xf32> -> vector<32x64xf32>
    %c0_12 = arith.constant 0 : index
    %c0_13 = arith.constant 0 : index
    %29 = vector.load %arg5[%c0_12, %c0_13] : memref<32x64xf32, #tpu.memory_space<vmem>>, vector<32x64xf32>
    tpu.vector_store %arg5[%c0_12, %c0_13], %28 {strides = array<i32>} : memref<32x64xf32, #tpu.memory_space<vmem>>, vector<32x64xf32>,
    return
  }
  func.func @transform_0(%arg0: i32) -> (i32, i32) {
    %c0_i32 = arith.constant 0 : i32
    %c0_i32_0 = arith.constant 0 : i32
    %c0_i32_1 = arith.constant 0 : i32
    return %c0_i32, %c0_i32_0 : i32, i32
  }
  func.func @transform_1(%arg0: i32) -> (i32, i32) {
    %c0_i32 = arith.constant 0 : i32
    %c0_i32_0 = arith.constant 0 : i32
    %c0_i32_1 = arith.constant 0 : i32
    return %c0_i32, %c0_i32_0 : i32, i32
  }
  func.func @transform_2(%arg0: i32) -> (i32, i32) {
    %c0_i32 = arith.constant 0 : i32
    %c0_i32_0 = arith.constant 0 : i32
    %c0_i32_1 = arith.constant 0 : i32
    return %c0_i32, %c0_i32_0 : i32, i32
  }
  func.func @transform_3(%arg0: i32) -> (i32, i32) {
    %c0_i32 = arith.constant 0 : i32
    %c0_i32_0 = arith.constant 0 : i32
    %c0_i32_1 = arith.constant 0 : i32
    return %c0_i32, %c0_i32_0 : i32, i32
  }
  func.func @transform_4(%arg0: i32) -> (i32, i32) {
    %c0_i32 = arith.constant 0 : i32
    %c0_i32_0 = arith.constant 0 : i32
    %c0_i32_1 = arith.constant 0 : i32
    return %c0_i32, %c0_i32_0 : i32, i32
  }
}

module attributes {stable_mosaic.version = 11 : i64} {
  func.func @_win_attn_kernel(%arg0: i32, %arg1: memref<2x16x64xf32, #tpu.memory_space<vmem>>, %arg2: memref<1x64xf32, #tpu.memory_space<vmem>>, %arg3: memref<1x64xf32, #tpu.memory_space<vmem>>, %arg4: memref<64x192xf32, #tpu.memory_space<vmem>>, %arg5: memref<1x192xf32, #tpu.memory_space<vmem>>, %arg6: memref<4x1x16x16xf32, #tpu.memory_space<vmem>>, %arg7: memref<64x64xf32, #tpu.memory_space<vmem>>, %arg8: memref<1x64xf32, #tpu.memory_space<vmem>>, %arg9: memref<2x16x64xf32, #tpu.memory_space<vmem>>) attributes {dimension_semantics = [#tpu.dimension_semantics<arbitrary>], iteration_bounds = array<i64: 1>, scalar_prefetch = 0 : i64, scratch_operands = 0 : i64, tpu.core_type = #tpu.core_type<tc>, window_params = [{pipeline_mode = #tpu.pipeline_mode<synchronous>, transform_indices = @transform_0, window_bounds = array<i64: 2, 16, 64>}, {pipeline_mode = #tpu.pipeline_mode<synchronous>, transform_indices = @transform_1, window_bounds = array<i64: 1, 64>}, {pipeline_mode = #tpu.pipeline_mode<synchronous>, transform_indices = @transform_2, window_bounds = array<i64: 1, 64>}, {pipeline_mode = #tpu.pipeline_mode<synchronous>, transform_indices = @transform_3, window_bounds = array<i64: 64, 192>}, {pipeline_mode = #tpu.pipeline_mode<synchronous>, transform_indices = @transform_4, window_bounds = array<i64: 1, 192>}, {pipeline_mode = #tpu.pipeline_mode<synchronous>, transform_indices = @transform_5, window_bounds = array<i64: 4, 1, 16, 16>}, {pipeline_mode = #tpu.pipeline_mode<synchronous>, transform_indices = @transform_6, window_bounds = array<i64: 64, 64>}, {pipeline_mode = #tpu.pipeline_mode<synchronous>, transform_indices = @transform_7, window_bounds = array<i64: 1, 64>}, {pipeline_mode = #tpu.pipeline_mode<synchronous>, transform_indices = @transform_8, window_bounds = array<i64: 2, 16, 64>}]} {
    %c0 = arith.constant 0 : index
    %c0_0 = arith.constant 0 : index
    %c0_1 = arith.constant 0 : index
    %0 = vector.load %arg1[%c0, %c0_0, %c0_1] : memref<2x16x64xf32, #tpu.memory_space<vmem>>, vector<2x16x64xf32>
    %1 = vector.shape_cast %0 : vector<2x16x64xf32> to vector<32x64xf32>
    %c0_2 = arith.constant 0 : index
    %c0_3 = arith.constant 0 : index
    %2 = vector.load %arg2[%c0_2, %c0_3] : memref<1x64xf32, #tpu.memory_space<vmem>>, vector<1x64xf32>
    %c0_4 = arith.constant 0 : index
    %c0_5 = arith.constant 0 : index
    %3 = vector.load %arg3[%c0_4, %c0_5] : memref<1x64xf32, #tpu.memory_space<vmem>>, vector<1x64xf32>
    %cst = arith.constant dense<0.000000e+00> : vector<32xf32>
    %4 = vector.multi_reduction <add>, %1, %cst [1] : vector<32x64xf32> to vector<32xf32>
    %5 = vector.shape_cast %4 : vector<32xf32> to vector<32x1xf32>
    %cst_6 = arith.constant 6.400000e+01 : f32
    %6 = vector.broadcast %cst_6 : f32 to vector<32x1xf32>
    %7 = arith.divf %5, %6 : vector<32x1xf32>
    %8 = vector.broadcast %7 : vector<32x1xf32> to vector<32x64xf32>
    %9 = arith.subf %1, %8 : vector<32x64xf32>
    %10 = arith.mulf %9, %9 : vector<32x64xf32>
    %cst_7 = arith.constant dense<0.000000e+00> : vector<32xf32>
    %11 = vector.multi_reduction <add>, %10, %cst_7 [1] : vector<32x64xf32> to vector<32xf32>
    %12 = vector.shape_cast %11 : vector<32xf32> to vector<32x1xf32>
    %cst_8 = arith.constant 6.400000e+01 : f32
    %13 = vector.broadcast %cst_8 : f32 to vector<32x1xf32>
    %14 = arith.divf %12, %13 : vector<32x1xf32>
    %15 = vector.broadcast %7 : vector<32x1xf32> to vector<32x64xf32>
    %16 = arith.subf %1, %15 : vector<32x64xf32>
    %cst_9 = arith.constant 9.99999974E-6 : f32
    %17 = vector.broadcast %cst_9 : f32 to vector<32x1xf32>
    %18 = arith.addf %14, %17 : vector<32x1xf32>
    %19 = math.rsqrt %18 : vector<32x1xf32>
    %20 = vector.broadcast %19 : vector<32x1xf32> to vector<32x64xf32>
    %21 = arith.mulf %16, %20 : vector<32x64xf32>
    %22 = vector.broadcast %2 : vector<1x64xf32> to vector<32x64xf32>
    %23 = arith.mulf %21, %22 : vector<32x64xf32>
    %24 = vector.broadcast %3 : vector<1x64xf32> to vector<32x64xf32>
    %25 = arith.addf %23, %24 : vector<32x64xf32>
    %c0_10 = arith.constant 0 : index
    %c0_11 = arith.constant 0 : index
    %26 = vector.load %arg4[%c0_10, %c0_11] : memref<64x192xf32, #tpu.memory_space<vmem>>, vector<64x192xf32>
    %27 = arith.truncf %25 : vector<32x64xf32> to vector<32x64xbf16>
    %28 = arith.truncf %26 : vector<64x192xf32> to vector<64x192xbf16>
    %cst_12 = arith.constant dense<0.000000e+00> : vector<32x192xf32>
    %29 = tpu.matmul %27, %28, %cst_12 {dimension_numbers = #tpu.dot_dimension_numbers<[1], [0], [0], [1], [0, 0, 1, 1], [], []>} : vector<32x64xbf16>, vector<64x192xbf16>, vector<32x192xf32> -> vector<32x192xf32>
    %c0_13 = arith.constant 0 : index
    %c0_14 = arith.constant 0 : index
    %30 = vector.load %arg5[%c0_13, %c0_14] : memref<1x192xf32, #tpu.memory_space<vmem>>, vector<1x192xf32>
    %31 = vector.broadcast %30 : vector<1x192xf32> to vector<32x192xf32>
    %32 = arith.addf %29, %31 : vector<32x192xf32>
    %33 = vector.extract_strided_slice %32 {offsets = [0, 0], sizes = [32, 16], strides = [1, 1]} : vector<32x192xf32> to vector<32x16xf32>
    %34 = vector.shape_cast %33 : vector<32x16xf32> to vector<2x16x16xf32>
    %35 = vector.extract_strided_slice %32 {offsets = [0, 64], sizes = [32, 16], strides = [1, 1]} : vector<32x192xf32> to vector<32x16xf32>
    %36 = vector.shape_cast %35 : vector<32x16xf32> to vector<2x16x16xf32>
    %37 = vector.extract_strided_slice %32 {offsets = [0, 128], sizes = [32, 16], strides = [1, 1]} : vector<32x192xf32> to vector<32x16xf32>
    %38 = vector.shape_cast %37 : vector<32x16xf32> to vector<2x16x16xf32>
    %39 = arith.truncf %34 : vector<2x16x16xf32> to vector<2x16x16xbf16>
    %40 = arith.truncf %36 : vector<2x16x16xf32> to vector<2x16x16xbf16>
    "tpu.trace_start"() <{level = 10 : i32, message = "bnd,bmd->bnm"}> : () -> ()
    %cst_15 = arith.constant dense<0.000000e+00> : vector<2x16x16xf32>
    %41 = tpu.matmul %39, %40, %cst_15 {dimension_numbers = #tpu.dot_dimension_numbers<[2], [2], [1], [1], [0, 0, 0, 1, 1, 1], [0], [0]>} : vector<2x16x16xbf16>, vector<2x16x16xbf16>, vector<2x16x16xf32> -> vector<2x16x16xf32>
    "tpu.trace_stop"() : () -> ()
    %cst_16 = arith.constant 2.500000e-01 : f32
    %42 = vector.broadcast %cst_16 : f32 to vector<2x16x16xf32>
    %43 = arith.mulf %41, %42 : vector<2x16x16xf32>
    %c0_17 = arith.constant 0 : index
    %c0_18 = arith.constant 0 : index
    %c0_19 = arith.constant 0 : index
    %c0_20 = arith.constant 0 : index
    %44 = vector.load %arg6[%c0_17, %c0_18, %c0_19, %c0_20] : memref<4x1x16x16xf32, #tpu.memory_space<vmem>>, vector<1x1x16x16xf32>
    %45 = vector.shape_cast %44 : vector<1x1x16x16xf32> to vector<1x16x16xf32>
    %46 = vector.broadcast %45 : vector<1x16x16xf32> to vector<2x16x16xf32>
    %47 = arith.addf %43, %46 : vector<2x16x16xf32>
    %cst_21 = arith.constant dense<0xFF800000> : vector<2x16xf32>
    %48 = vector.multi_reduction <maximumf>, %47, %cst_21 [2] : vector<2x16x16xf32> to vector<2x16xf32>
    %49 = vector.shape_cast %48 : vector<2x16xf32> to vector<2x16x1xf32>
    %50 = vector.broadcast %49 : vector<2x16x1xf32> to vector<2x16x16xf32>
    %51 = arith.subf %47, %50 : vector<2x16x16xf32>
    %52 = math.exp %51 : vector<2x16x16xf32>
    %cst_22 = arith.constant dense<0.000000e+00> : vector<2x16xf32>
    %53 = vector.multi_reduction <add>, %52, %cst_22 [2] : vector<2x16x16xf32> to vector<2x16xf32>
    %54 = vector.shape_cast %53 : vector<2x16xf32> to vector<2x16x1xf32>
    %55 = tpu.reciprocal %54 {approx = true} : vector<2x16x1xf32> -> vector<2x16x1xf32>
    %56 = vector.broadcast %55 : vector<2x16x1xf32> to vector<2x16x16xf32>
    %57 = arith.mulf %52, %56 : vector<2x16x16xf32>
    %58 = arith.truncf %57 : vector<2x16x16xf32> to vector<2x16x16xbf16>
    %59 = arith.truncf %38 : vector<2x16x16xf32> to vector<2x16x16xbf16>
    "tpu.trace_start"() <{level = 10 : i32, message = "bnm,bmd->bnd"}> : () -> ()
    %cst_23 = arith.constant dense<0.000000e+00> : vector<2x16x16xf32>
    %60 = tpu.matmul %58, %59, %cst_23 {dimension_numbers = #tpu.dot_dimension_numbers<[2], [1], [1], [2], [0, 0, 0, 1, 1, 2], [0], [0]>} : vector<2x16x16xbf16>, vector<2x16x16xbf16>, vector<2x16x16xf32> -> vector<2x16x16xf32>
    "tpu.trace_stop"() : () -> ()
    %61 = vector.extract_strided_slice %32 {offsets = [0, 16], sizes = [32, 16], strides = [1, 1]} : vector<32x192xf32> to vector<32x16xf32>
    %62 = vector.shape_cast %61 : vector<32x16xf32> to vector<2x16x16xf32>
    %63 = vector.extract_strided_slice %32 {offsets = [0, 80], sizes = [32, 16], strides = [1, 1]} : vector<32x192xf32> to vector<32x16xf32>
    %64 = vector.shape_cast %63 : vector<32x16xf32> to vector<2x16x16xf32>
    %65 = vector.extract_strided_slice %32 {offsets = [0, 144], sizes = [32, 16], strides = [1, 1]} : vector<32x192xf32> to vector<32x16xf32>
    %66 = vector.shape_cast %65 : vector<32x16xf32> to vector<2x16x16xf32>
    %67 = arith.truncf %62 : vector<2x16x16xf32> to vector<2x16x16xbf16>
    %68 = arith.truncf %64 : vector<2x16x16xf32> to vector<2x16x16xbf16>
    "tpu.trace_start"() <{level = 10 : i32, message = "bnd,bmd->bnm"}> : () -> ()
    %cst_24 = arith.constant dense<0.000000e+00> : vector<2x16x16xf32>
    %69 = tpu.matmul %67, %68, %cst_24 {dimension_numbers = #tpu.dot_dimension_numbers<[2], [2], [1], [1], [0, 0, 0, 1, 1, 1], [0], [0]>} : vector<2x16x16xbf16>, vector<2x16x16xbf16>, vector<2x16x16xf32> -> vector<2x16x16xf32>
    "tpu.trace_stop"() : () -> ()
    %cst_25 = arith.constant 2.500000e-01 : f32
    %70 = vector.broadcast %cst_25 : f32 to vector<2x16x16xf32>
    %71 = arith.mulf %69, %70 : vector<2x16x16xf32>
    %c1 = arith.constant 1 : index
    %c0_26 = arith.constant 0 : index
    %c0_27 = arith.constant 0 : index
    %c0_28 = arith.constant 0 : index
    %72 = vector.load %arg6[%c1, %c0_26, %c0_27, %c0_28] : memref<4x1x16x16xf32, #tpu.memory_space<vmem>>, vector<1x1x16x16xf32>
    %73 = vector.shape_cast %72 : vector<1x1x16x16xf32> to vector<1x16x16xf32>
    %74 = vector.broadcast %73 : vector<1x16x16xf32> to vector<2x16x16xf32>
    %75 = arith.addf %71, %74 : vector<2x16x16xf32>
    %cst_29 = arith.constant dense<0xFF800000> : vector<2x16xf32>
    %76 = vector.multi_reduction <maximumf>, %75, %cst_29 [2] : vector<2x16x16xf32> to vector<2x16xf32>
    %77 = vector.shape_cast %76 : vector<2x16xf32> to vector<2x16x1xf32>
    %78 = vector.broadcast %77 : vector<2x16x1xf32> to vector<2x16x16xf32>
    %79 = arith.subf %75, %78 : vector<2x16x16xf32>
    %80 = math.exp %79 : vector<2x16x16xf32>
    %cst_30 = arith.constant dense<0.000000e+00> : vector<2x16xf32>
    %81 = vector.multi_reduction <add>, %80, %cst_30 [2] : vector<2x16x16xf32> to vector<2x16xf32>
    %82 = vector.shape_cast %81 : vector<2x16xf32> to vector<2x16x1xf32>
    %83 = tpu.reciprocal %82 {approx = true} : vector<2x16x1xf32> -> vector<2x16x1xf32>
    %84 = vector.broadcast %83 : vector<2x16x1xf32> to vector<2x16x16xf32>
    %85 = arith.mulf %80, %84 : vector<2x16x16xf32>
    %86 = arith.truncf %85 : vector<2x16x16xf32> to vector<2x16x16xbf16>
    %87 = arith.truncf %66 : vector<2x16x16xf32> to vector<2x16x16xbf16>
    "tpu.trace_start"() <{level = 10 : i32, message = "bnm,bmd->bnd"}> : () -> ()
    %cst_31 = arith.constant dense<0.000000e+00> : vector<2x16x16xf32>
    %88 = tpu.matmul %86, %87, %cst_31 {dimension_numbers = #tpu.dot_dimension_numbers<[2], [1], [1], [2], [0, 0, 0, 1, 1, 2], [0], [0]>} : vector<2x16x16xbf16>, vector<2x16x16xbf16>, vector<2x16x16xf32> -> vector<2x16x16xf32>
    "tpu.trace_stop"() : () -> ()
    %89 = vector.extract_strided_slice %32 {offsets = [0, 32], sizes = [32, 16], strides = [1, 1]} : vector<32x192xf32> to vector<32x16xf32>
    %90 = vector.shape_cast %89 : vector<32x16xf32> to vector<2x16x16xf32>
    %91 = vector.extract_strided_slice %32 {offsets = [0, 96], sizes = [32, 16], strides = [1, 1]} : vector<32x192xf32> to vector<32x16xf32>
    %92 = vector.shape_cast %91 : vector<32x16xf32> to vector<2x16x16xf32>
    %93 = vector.extract_strided_slice %32 {offsets = [0, 160], sizes = [32, 16], strides = [1, 1]} : vector<32x192xf32> to vector<32x16xf32>
    %94 = vector.shape_cast %93 : vector<32x16xf32> to vector<2x16x16xf32>
    %95 = arith.truncf %90 : vector<2x16x16xf32> to vector<2x16x16xbf16>
    %96 = arith.truncf %92 : vector<2x16x16xf32> to vector<2x16x16xbf16>
    "tpu.trace_start"() <{level = 10 : i32, message = "bnd,bmd->bnm"}> : () -> ()
    %cst_32 = arith.constant dense<0.000000e+00> : vector<2x16x16xf32>
    %97 = tpu.matmul %95, %96, %cst_32 {dimension_numbers = #tpu.dot_dimension_numbers<[2], [2], [1], [1], [0, 0, 0, 1, 1, 1], [0], [0]>} : vector<2x16x16xbf16>, vector<2x16x16xbf16>, vector<2x16x16xf32> -> vector<2x16x16xf32>
    "tpu.trace_stop"() : () -> ()
    %cst_33 = arith.constant 2.500000e-01 : f32
    %98 = vector.broadcast %cst_33 : f32 to vector<2x16x16xf32>
    %99 = arith.mulf %97, %98 : vector<2x16x16xf32>
    %c2 = arith.constant 2 : index
    %c0_34 = arith.constant 0 : index
    %c0_35 = arith.constant 0 : index
    %c0_36 = arith.constant 0 : index
    %100 = vector.load %arg6[%c2, %c0_34, %c0_35, %c0_36] : memref<4x1x16x16xf32, #tpu.memory_space<vmem>>, vector<1x1x16x16xf32>
    %101 = vector.shape_cast %100 : vector<1x1x16x16xf32> to vector<1x16x16xf32>
    %102 = vector.broadcast %101 : vector<1x16x16xf32> to vector<2x16x16xf32>
    %103 = arith.addf %99, %102 : vector<2x16x16xf32>
    %cst_37 = arith.constant dense<0xFF800000> : vector<2x16xf32>
    %104 = vector.multi_reduction <maximumf>, %103, %cst_37 [2] : vector<2x16x16xf32> to vector<2x16xf32>
    %105 = vector.shape_cast %104 : vector<2x16xf32> to vector<2x16x1xf32>
    %106 = vector.broadcast %105 : vector<2x16x1xf32> to vector<2x16x16xf32>
    %107 = arith.subf %103, %106 : vector<2x16x16xf32>
    %108 = math.exp %107 : vector<2x16x16xf32>
    %cst_38 = arith.constant dense<0.000000e+00> : vector<2x16xf32>
    %109 = vector.multi_reduction <add>, %108, %cst_38 [2] : vector<2x16x16xf32> to vector<2x16xf32>
    %110 = vector.shape_cast %109 : vector<2x16xf32> to vector<2x16x1xf32>
    %111 = tpu.reciprocal %110 {approx = true} : vector<2x16x1xf32> -> vector<2x16x1xf32>
    %112 = vector.broadcast %111 : vector<2x16x1xf32> to vector<2x16x16xf32>
    %113 = arith.mulf %108, %112 : vector<2x16x16xf32>
    %114 = arith.truncf %113 : vector<2x16x16xf32> to vector<2x16x16xbf16>
    %115 = arith.truncf %94 : vector<2x16x16xf32> to vector<2x16x16xbf16>
    "tpu.trace_start"() <{level = 10 : i32, message = "bnm,bmd->bnd"}> : () -> ()
    %cst_39 = arith.constant dense<0.000000e+00> : vector<2x16x16xf32>
    %116 = tpu.matmul %114, %115, %cst_39 {dimension_numbers = #tpu.dot_dimension_numbers<[2], [1], [1], [2], [0, 0, 0, 1, 1, 2], [0], [0]>} : vector<2x16x16xbf16>, vector<2x16x16xbf16>, vector<2x16x16xf32> -> vector<2x16x16xf32>
    "tpu.trace_stop"() : () -> ()
    %117 = vector.extract_strided_slice %32 {offsets = [0, 48], sizes = [32, 16], strides = [1, 1]} : vector<32x192xf32> to vector<32x16xf32>
    %118 = vector.shape_cast %117 : vector<32x16xf32> to vector<2x16x16xf32>
    %119 = vector.extract_strided_slice %32 {offsets = [0, 112], sizes = [32, 16], strides = [1, 1]} : vector<32x192xf32> to vector<32x16xf32>
    %120 = vector.shape_cast %119 : vector<32x16xf32> to vector<2x16x16xf32>
    %121 = vector.extract_strided_slice %32 {offsets = [0, 176], sizes = [32, 16], strides = [1, 1]} : vector<32x192xf32> to vector<32x16xf32>
    %122 = vector.shape_cast %121 : vector<32x16xf32> to vector<2x16x16xf32>
    %123 = arith.truncf %118 : vector<2x16x16xf32> to vector<2x16x16xbf16>
    %124 = arith.truncf %120 : vector<2x16x16xf32> to vector<2x16x16xbf16>
    "tpu.trace_start"() <{level = 10 : i32, message = "bnd,bmd->bnm"}> : () -> ()
    %cst_40 = arith.constant dense<0.000000e+00> : vector<2x16x16xf32>
    %125 = tpu.matmul %123, %124, %cst_40 {dimension_numbers = #tpu.dot_dimension_numbers<[2], [2], [1], [1], [0, 0, 0, 1, 1, 1], [0], [0]>} : vector<2x16x16xbf16>, vector<2x16x16xbf16>, vector<2x16x16xf32> -> vector<2x16x16xf32>
    "tpu.trace_stop"() : () -> ()
    %cst_41 = arith.constant 2.500000e-01 : f32
    %126 = vector.broadcast %cst_41 : f32 to vector<2x16x16xf32>
    %127 = arith.mulf %125, %126 : vector<2x16x16xf32>
    %c3 = arith.constant 3 : index
    %c0_42 = arith.constant 0 : index
    %c0_43 = arith.constant 0 : index
    %c0_44 = arith.constant 0 : index
    %128 = vector.load %arg6[%c3, %c0_42, %c0_43, %c0_44] : memref<4x1x16x16xf32, #tpu.memory_space<vmem>>, vector<1x1x16x16xf32>
    %129 = vector.shape_cast %128 : vector<1x1x16x16xf32> to vector<1x16x16xf32>
    %130 = vector.broadcast %129 : vector<1x16x16xf32> to vector<2x16x16xf32>
    %131 = arith.addf %127, %130 : vector<2x16x16xf32>
    %cst_45 = arith.constant dense<0xFF800000> : vector<2x16xf32>
    %132 = vector.multi_reduction <maximumf>, %131, %cst_45 [2] : vector<2x16x16xf32> to vector<2x16xf32>
    %133 = vector.shape_cast %132 : vector<2x16xf32> to vector<2x16x1xf32>
    %134 = vector.broadcast %133 : vector<2x16x1xf32> to vector<2x16x16xf32>
    %135 = arith.subf %131, %134 : vector<2x16x16xf32>
    %136 = math.exp %135 : vector<2x16x16xf32>
    %cst_46 = arith.constant dense<0.000000e+00> : vector<2x16xf32>
    %137 = vector.multi_reduction <add>, %136, %cst_46 [2] : vector<2x16x16xf32> to vector<2x16xf32>
    %138 = vector.shape_cast %137 : vector<2x16xf32> to vector<2x16x1xf32>
    %139 = tpu.reciprocal %138 {approx = true} : vector<2x16x1xf32> -> vector<2x16x1xf32>
    %140 = vector.broadcast %139 : vector<2x16x1xf32> to vector<2x16x16xf32>
    %141 = arith.mulf %136, %140 : vector<2x16x16xf32>
    %142 = arith.truncf %141 : vector<2x16x16xf32> to vector<2x16x16xbf16>
    %143 = arith.truncf %122 : vector<2x16x16xf32> to vector<2x16x16xbf16>
    "tpu.trace_start"() <{level = 10 : i32, message = "bnm,bmd->bnd"}> : () -> ()
    %cst_47 = arith.constant dense<0.000000e+00> : vector<2x16x16xf32>
    %144 = tpu.matmul %142, %143, %cst_47 {dimension_numbers = #tpu.dot_dimension_numbers<[2], [1], [1], [2], [0, 0, 0, 1, 1, 2], [0], [0]>} : vector<2x16x16xbf16>, vector<2x16x16xbf16>, vector<2x16x16xf32> -> vector<2x16x16xf32>
    "tpu.trace_stop"() : () -> ()
    %145 = tpu.concatenate %60, %88, %116, %144 in 2 : vector<2x16x16xf32>, vector<2x16x16xf32>, vector<2x16x16xf32>, vector<2x16x16xf32> -> vector<2x16x64xf32>
    %146 = vector.shape_cast %145 : vector<2x16x64xf32> to vector<32x64xf32>
    %c0_48 = arith.constant 0 : index
    %c0_49 = arith.constant 0 : index
    %147 = vector.load %arg7[%c0_48, %c0_49] : memref<64x64xf32, #tpu.memory_space<vmem>>, vector<64x64xf32>
    %148 = arith.truncf %146 : vector<32x64xf32> to vector<32x64xbf16>
    %149 = arith.truncf %147 : vector<64x64xf32> to vector<64x64xbf16>
    %cst_50 = arith.constant dense<0.000000e+00> : vector<32x64xf32>
    %150 = tpu.matmul %148, %149, %cst_50 {dimension_numbers = #tpu.dot_dimension_numbers<[1], [0], [0], [1], [0, 0, 1, 1], [], []>} : vector<32x64xbf16>, vector<64x64xbf16>, vector<32x64xf32> -> vector<32x64xf32>
    %c0_51 = arith.constant 0 : index
    %c0_52 = arith.constant 0 : index
    %151 = vector.load %arg8[%c0_51, %c0_52] : memref<1x64xf32, #tpu.memory_space<vmem>>, vector<1x64xf32>
    %152 = vector.broadcast %151 : vector<1x64xf32> to vector<32x64xf32>
    %153 = arith.addf %150, %152 : vector<32x64xf32>
    %154 = vector.shape_cast %153 : vector<32x64xf32> to vector<2x16x64xf32>
    %c0_53 = arith.constant 0 : index
    %c0_54 = arith.constant 0 : index
    %c0_55 = arith.constant 0 : index
    %155 = vector.load %arg9[%c0_53, %c0_54, %c0_55] : memref<2x16x64xf32, #tpu.memory_space<vmem>>, vector<2x16x64xf32>
    tpu.vector_store %arg9[%c0_53, %c0_54, %c0_55], %154 {strides = array<i32>} : memref<2x16x64xf32, #tpu.memory_space<vmem>>, vector<2x16x64xf32>,
    return
  }
  func.func @transform_0(%arg0: i32) -> (i32, i32, i32) {
    %c0_i32 = arith.constant 0 : i32
    %c0_i32_0 = arith.constant 0 : i32
    %c0_i32_1 = arith.constant 0 : i32
    %c0_i32_2 = arith.constant 0 : i32
    return %c0_i32, %c0_i32_0, %c0_i32_1 : i32, i32, i32
  }
  func.func @transform_1(%arg0: i32) -> (i32, i32) {
    %c0_i32 = arith.constant 0 : i32
    %c0_i32_0 = arith.constant 0 : i32
    %c0_i32_1 = arith.constant 0 : i32
    return %c0_i32, %c0_i32_0 : i32, i32
  }
  func.func @transform_2(%arg0: i32) -> (i32, i32) {
    %c0_i32 = arith.constant 0 : i32
    %c0_i32_0 = arith.constant 0 : i32
    %c0_i32_1 = arith.constant 0 : i32
    return %c0_i32, %c0_i32_0 : i32, i32
  }
  func.func @transform_3(%arg0: i32) -> (i32, i32) {
    %c0_i32 = arith.constant 0 : i32
    %c0_i32_0 = arith.constant 0 : i32
    %c0_i32_1 = arith.constant 0 : i32
    return %c0_i32, %c0_i32_0 : i32, i32
  }
  func.func @transform_4(%arg0: i32) -> (i32, i32) {
    %c0_i32 = arith.constant 0 : i32
    %c0_i32_0 = arith.constant 0 : i32
    %c0_i32_1 = arith.constant 0 : i32
    return %c0_i32, %c0_i32_0 : i32, i32
  }
  func.func @transform_5(%arg0: i32) -> (i32, i32, i32, i32) {
    %c0_i32 = arith.constant 0 : i32
    %c0_i32_0 = arith.constant 0 : i32
    %c0_i32_1 = arith.constant 0 : i32
    %c0_i32_2 = arith.constant 0 : i32
    %c0_i32_3 = arith.constant 0 : i32
    return %c0_i32, %c0_i32_0, %c0_i32_1, %c0_i32_2 : i32, i32, i32, i32
  }
  func.func @transform_6(%arg0: i32) -> (i32, i32) {
    %c0_i32 = arith.constant 0 : i32
    %c0_i32_0 = arith.constant 0 : i32
    %c0_i32_1 = arith.constant 0 : i32
    return %c0_i32, %c0_i32_0 : i32, i32
  }
  func.func @transform_7(%arg0: i32) -> (i32, i32) {
    %c0_i32 = arith.constant 0 : i32
    %c0_i32_0 = arith.constant 0 : i32
    %c0_i32_1 = arith.constant 0 : i32
    return %c0_i32, %c0_i32_0 : i32, i32
  }
  func.func @transform_8(%arg0: i32) -> (i32, i32, i32) {
    %c0_i32 = arith.constant 0 : i32
    %c0_i32_0 = arith.constant 0 : i32
    %c0_i32_1 = arith.constant 0 : i32
    %c0_i32_2 = arith.constant 0 : i32
    return %c0_i32, %c0_i32_0, %c0_i32_1 : i32, i32, i32
  }
}

module attributes {stable_mosaic.version = 11 : i64} {
  func.func @_head_kernel(%arg0: i32, %arg1: memref<2x16x64xf32, #tpu.memory_space<vmem>>, %arg2: memref<1x1x64xf32, #tpu.memory_space<vmem>>, %arg3: memref<1x1x64xf32, #tpu.memory_space<vmem>>, %arg4: memref<64x512xf32, #tpu.memory_space<vmem>>, %arg5: memref<1x512xf32, #tpu.memory_space<vmem>>, %arg6: memref<512x128xf32, #tpu.memory_space<vmem>>, %arg7: memref<1x128xf32, #tpu.memory_space<vmem>>, %arg8: memref<128x1xf32, #tpu.memory_space<vmem>>, %arg9: memref<1x1xf32, #tpu.memory_space<vmem>>, %arg10: memref<2x1xf32, #tpu.memory_space<vmem>>) attributes {dimension_semantics = [#tpu.dimension_semantics<arbitrary>], iteration_bounds = array<i64: 1>, scalar_prefetch = 0 : i64, scratch_operands = 0 : i64, tpu.core_type = #tpu.core_type<tc>, window_params = [{pipeline_mode = #tpu.pipeline_mode<synchronous>, transform_indices = @transform_0, window_bounds = array<i64: 2, 16, 64>}, {pipeline_mode = #tpu.pipeline_mode<synchronous>, transform_indices = @transform_1, window_bounds = array<i64: 1, 1, 64>}, {pipeline_mode = #tpu.pipeline_mode<synchronous>, transform_indices = @transform_2, window_bounds = array<i64: 1, 1, 64>}, {pipeline_mode = #tpu.pipeline_mode<synchronous>, transform_indices = @transform_3, window_bounds = array<i64: 64, 512>}, {pipeline_mode = #tpu.pipeline_mode<synchronous>, transform_indices = @transform_4, window_bounds = array<i64: 1, 512>}, {pipeline_mode = #tpu.pipeline_mode<synchronous>, transform_indices = @transform_5, window_bounds = array<i64: 512, 128>}, {pipeline_mode = #tpu.pipeline_mode<synchronous>, transform_indices = @transform_6, window_bounds = array<i64: 1, 128>}, {pipeline_mode = #tpu.pipeline_mode<synchronous>, transform_indices = @transform_7, window_bounds = array<i64: 128, 1>}, {pipeline_mode = #tpu.pipeline_mode<synchronous>, transform_indices = @transform_8, window_bounds = array<i64: 1, 1>}, {pipeline_mode = #tpu.pipeline_mode<synchronous>, transform_indices = @transform_9, window_bounds = array<i64: 2, 1>}]} {
    %c0 = arith.constant 0 : index
    %c0_0 = arith.constant 0 : index
    %c0_1 = arith.constant 0 : index
    %0 = vector.load %arg1[%c0, %c0_0, %c0_1] : memref<2x16x64xf32, #tpu.memory_space<vmem>>, vector<2x16x64xf32>
    %c0_2 = arith.constant 0 : index
    %c0_3 = arith.constant 0 : index
    %c0_4 = arith.constant 0 : index
    %1 = vector.load %arg2[%c0_2, %c0_3, %c0_4] : memref<1x1x64xf32, #tpu.memory_space<vmem>>, vector<1x1x64xf32>
    %c0_5 = arith.constant 0 : index
    %c0_6 = arith.constant 0 : index
    %c0_7 = arith.constant 0 : index
    %2 = vector.load %arg3[%c0_5, %c0_6, %c0_7] : memref<1x1x64xf32, #tpu.memory_space<vmem>>, vector<1x1x64xf32>
    %cst = arith.constant dense<0.000000e+00> : vector<2x16xf32>
    %3 = vector.multi_reduction <add>, %0, %cst [2] : vector<2x16x64xf32> to vector<2x16xf32>
    %4 = vector.shape_cast %3 : vector<2x16xf32> to vector<2x16x1xf32>
    %cst_8 = arith.constant 6.400000e+01 : f32
    %5 = vector.broadcast %cst_8 : f32 to vector<2x16x1xf32>
    %6 = arith.divf %4, %5 : vector<2x16x1xf32>
    %7 = vector.broadcast %6 : vector<2x16x1xf32> to vector<2x16x64xf32>
    %8 = arith.subf %0, %7 : vector<2x16x64xf32>
    %9 = arith.mulf %8, %8 : vector<2x16x64xf32>
    %cst_9 = arith.constant dense<0.000000e+00> : vector<2x16xf32>
    %10 = vector.multi_reduction <add>, %9, %cst_9 [2] : vector<2x16x64xf32> to vector<2x16xf32>
    %11 = vector.shape_cast %10 : vector<2x16xf32> to vector<2x16x1xf32>
    %cst_10 = arith.constant 6.400000e+01 : f32
    %12 = vector.broadcast %cst_10 : f32 to vector<2x16x1xf32>
    %13 = arith.divf %11, %12 : vector<2x16x1xf32>
    %14 = vector.broadcast %6 : vector<2x16x1xf32> to vector<2x16x64xf32>
    %15 = arith.subf %0, %14 : vector<2x16x64xf32>
    %cst_11 = arith.constant 9.99999974E-6 : f32
    %16 = vector.broadcast %cst_11 : f32 to vector<2x16x1xf32>
    %17 = arith.addf %13, %16 : vector<2x16x1xf32>
    %18 = math.rsqrt %17 : vector<2x16x1xf32>
    %19 = vector.broadcast %18 : vector<2x16x1xf32> to vector<2x16x64xf32>
    %20 = arith.mulf %15, %19 : vector<2x16x64xf32>
    %21 = vector.broadcast %1 : vector<1x1x64xf32> to vector<2x16x64xf32>
    %22 = arith.mulf %20, %21 : vector<2x16x64xf32>
    %23 = vector.broadcast %2 : vector<1x1x64xf32> to vector<2x16x64xf32>
    %24 = arith.addf %22, %23 : vector<2x16x64xf32>
    %cst_12 = arith.constant dense<0.000000e+00> : vector<2x64xf32>
    %25 = vector.multi_reduction <add>, %24, %cst_12 [1] : vector<2x16x64xf32> to vector<2x64xf32>
    %cst_13 = arith.constant 1.600000e+01 : f32
    %26 = vector.broadcast %cst_13 : f32 to vector<2x64xf32>
    %27 = arith.divf %25, %26 : vector<2x64xf32>
    %c0_14 = arith.constant 0 : index
    %c0_15 = arith.constant 0 : index
    %28 = vector.load %arg4[%c0_14, %c0_15] : memref<64x512xf32, #tpu.memory_space<vmem>>, vector<64x512xf32>
    %29 = arith.truncf %27 : vector<2x64xf32> to vector<2x64xbf16>
    %30 = arith.truncf %28 : vector<64x512xf32> to vector<64x512xbf16>
    %cst_16 = arith.constant dense<0.000000e+00> : vector<2x512xf32>
    %31 = tpu.matmul %29, %30, %cst_16 {dimension_numbers = #tpu.dot_dimension_numbers<[1], [0], [0], [1], [0, 0, 1, 1], [], []>} : vector<2x64xbf16>, vector<64x512xbf16>, vector<2x512xf32> -> vector<2x512xf32>
    %c0_17 = arith.constant 0 : index
    %c0_18 = arith.constant 0 : index
    %32 = vector.load %arg5[%c0_17, %c0_18] : memref<1x512xf32, #tpu.memory_space<vmem>>, vector<1x512xf32>
    %33 = vector.broadcast %32 : vector<1x512xf32> to vector<2x512xf32>
    %34 = arith.addf %31, %33 : vector<2x512xf32>
    %cst_19 = arith.constant 0.000000e+00 : f32
    %35 = vector.broadcast %cst_19 : f32 to vector<2x512xf32>
    %36 = arith.maximumf %34, %35 : vector<2x512xf32>
    %c0_20 = arith.constant 0 : index
    %c0_21 = arith.constant 0 : index
    %37 = vector.load %arg6[%c0_20, %c0_21] : memref<512x128xf32, #tpu.memory_space<vmem>>, vector<512x128xf32>
    %38 = arith.truncf %36 : vector<2x512xf32> to vector<2x512xbf16>
    %39 = arith.truncf %37 : vector<512x128xf32> to vector<512x128xbf16>
    %cst_22 = arith.constant dense<0.000000e+00> : vector<2x128xf32>
    %40 = tpu.matmul %38, %39, %cst_22 {dimension_numbers = #tpu.dot_dimension_numbers<[1], [0], [0], [1], [0, 0, 1, 1], [], []>} : vector<2x512xbf16>, vector<512x128xbf16>, vector<2x128xf32> -> vector<2x128xf32>
    %c0_23 = arith.constant 0 : index
    %c0_24 = arith.constant 0 : index
    %41 = vector.load %arg7[%c0_23, %c0_24] : memref<1x128xf32, #tpu.memory_space<vmem>>, vector<1x128xf32>
    %42 = vector.broadcast %41 : vector<1x128xf32> to vector<2x128xf32>
    %43 = arith.addf %40, %42 : vector<2x128xf32>
    %cst_25 = arith.constant 0.000000e+00 : f32
    %44 = vector.broadcast %cst_25 : f32 to vector<2x128xf32>
    %45 = arith.maximumf %43, %44 : vector<2x128xf32>
    %c0_26 = arith.constant 0 : index
    %c0_27 = arith.constant 0 : index
    %46 = vector.load %arg8[%c0_26, %c0_27] : memref<128x1xf32, #tpu.memory_space<vmem>>, vector<128x1xf32>
    %47 = arith.truncf %45 : vector<2x128xf32> to vector<2x128xbf16>
    %48 = arith.truncf %46 : vector<128x1xf32> to vector<128x1xbf16>
    %cst_28 = arith.constant dense<0.000000e+00> : vector<2x1xf32>
    %49 = tpu.matmul %47, %48, %cst_28 {dimension_numbers = #tpu.dot_dimension_numbers<[1], [0], [0], [1], [0, 0, 1, 1], [], []>} : vector<2x128xbf16>, vector<128x1xbf16>, vector<2x1xf32> -> vector<2x1xf32>
    %c0_29 = arith.constant 0 : index
    %c0_30 = arith.constant 0 : index
    %50 = vector.load %arg9[%c0_29, %c0_30] : memref<1x1xf32, #tpu.memory_space<vmem>>, vector<1x1xf32>
    %51 = vector.broadcast %50 : vector<1x1xf32> to vector<2x1xf32>
    %52 = arith.addf %49, %51 : vector<2x1xf32>
    %c0_31 = arith.constant 0 : index
    %c0_32 = arith.constant 0 : index
    %53 = vector.load %arg10[%c0_31, %c0_32] : memref<2x1xf32, #tpu.memory_space<vmem>>, vector<2x1xf32>
    tpu.vector_store %arg10[%c0_31, %c0_32], %52 {strides = array<i32>} : memref<2x1xf32, #tpu.memory_space<vmem>>, vector<2x1xf32>,
    return
  }
  func.func @transform_0(%arg0: i32) -> (i32, i32, i32) {
    %c0_i32 = arith.constant 0 : i32
    %c0_i32_0 = arith.constant 0 : i32
    %c0_i32_1 = arith.constant 0 : i32
    %c0_i32_2 = arith.constant 0 : i32
    return %c0_i32, %c0_i32_0, %c0_i32_1 : i32, i32, i32
  }
  func.func @transform_1(%arg0: i32) -> (i32, i32, i32) {
    %c0_i32 = arith.constant 0 : i32
    %c0_i32_0 = arith.constant 0 : i32
    %c0_i32_1 = arith.constant 0 : i32
    %c0_i32_2 = arith.constant 0 : i32
    return %c0_i32, %c0_i32_0, %c0_i32_1 : i32, i32, i32
  }
  func.func @transform_2(%arg0: i32) -> (i32, i32, i32) {
    %c0_i32 = arith.constant 0 : i32
    %c0_i32_0 = arith.constant 0 : i32
    %c0_i32_1 = arith.constant 0 : i32
    %c0_i32_2 = arith.constant 0 : i32
    return %c0_i32, %c0_i32_0, %c0_i32_1 : i32, i32, i32
  }
  func.func @transform_3(%arg0: i32) -> (i32, i32) {
    %c0_i32 = arith.constant 0 : i32
    %c0_i32_0 = arith.constant 0 : i32
    %c0_i32_1 = arith.constant 0 : i32
    return %c0_i32, %c0_i32_0 : i32, i32
  }
  func.func @transform_4(%arg0: i32) -> (i32, i32) {
    %c0_i32 = arith.constant 0 : i32
    %c0_i32_0 = arith.constant 0 : i32
    %c0_i32_1 = arith.constant 0 : i32
    return %c0_i32, %c0_i32_0 : i32, i32
  }
  func.func @transform_5(%arg0: i32) -> (i32, i32) {
    %c0_i32 = arith.constant 0 : i32
    %c0_i32_0 = arith.constant 0 : i32
    %c0_i32_1 = arith.constant 0 : i32
    return %c0_i32, %c0_i32_0 : i32, i32
  }
  func.func @transform_6(%arg0: i32) -> (i32, i32) {
    %c0_i32 = arith.constant 0 : i32
    %c0_i32_0 = arith.constant 0 : i32
    %c0_i32_1 = arith.constant 0 : i32
    return %c0_i32, %c0_i32_0 : i32, i32
  }
  func.func @transform_7(%arg0: i32) -> (i32, i32) {
    %c0_i32 = arith.constant 0 : i32
    %c0_i32_0 = arith.constant 0 : i32
    %c0_i32_1 = arith.constant 0 : i32
    return %c0_i32, %c0_i32_0 : i32, i32
  }
  func.func @transform_8(%arg0: i32) -> (i32, i32) {
    %c0_i32 = arith.constant 0 : i32
    %c0_i32_0 = arith.constant 0 : i32
    %c0_i32_1 = arith.constant 0 : i32
    return %c0_i32, %c0_i32_0 : i32, i32
  }
  func.func @transform_9(%arg0: i32) -> (i32, i32) {
    %c0_i32 = arith.constant 0 : i32
    %c0_i32_0 = arith.constant 0 : i32
    %c0_i32_1 = arith.constant 0 : i32
    return %c0_i32, %c0_i32_0 : i32, i32
  }
}

module attributes {stable_mosaic.version = 11 : i64} {
  func.func @_mlp_block_kernel(%arg0: i32, %arg1: memref<32x64xf32, #tpu.memory_space<vmem>>, %arg2: memref<32x64xf32, #tpu.memory_space<vmem>>, %arg3: memref<1x64xf32, #tpu.memory_space<vmem>>, %arg4: memref<1x64xf32, #tpu.memory_space<vmem>>, %arg5: memref<64x256xf32, #tpu.memory_space<vmem>>, %arg6: memref<1x256xf32, #tpu.memory_space<vmem>>, %arg7: memref<256x64xf32, #tpu.memory_space<vmem>>, %arg8: memref<1x64xf32, #tpu.memory_space<vmem>>, %arg9: memref<32x64xf32, #tpu.memory_space<vmem>>) attributes {dimension_semantics = [#tpu.dimension_semantics<arbitrary>], iteration_bounds = array<i64: 1>, scalar_prefetch = 0 : i64, scratch_operands = 0 : i64, tpu.core_type = #tpu.core_type<tc>, window_params = [{pipeline_mode = #tpu.pipeline_mode<synchronous>, transform_indices = @transform_0, window_bounds = array<i64: 32, 64>}, {pipeline_mode = #tpu.pipeline_mode<synchronous>, transform_indices = @transform_1, window_bounds = array<i64: 32, 64>}, {pipeline_mode = #tpu.pipeline_mode<synchronous>, transform_indices = @transform_2, window_bounds = array<i64: 1, 64>}, {pipeline_mode = #tpu.pipeline_mode<synchronous>, transform_indices = @transform_3, window_bounds = array<i64: 1, 64>}, {pipeline_mode = #tpu.pipeline_mode<synchronous>, transform_indices = @transform_4, window_bounds = array<i64: 64, 256>}, {pipeline_mode = #tpu.pipeline_mode<synchronous>, transform_indices = @transform_5, window_bounds = array<i64: 1, 256>}, {pipeline_mode = #tpu.pipeline_mode<synchronous>, transform_indices = @transform_6, window_bounds = array<i64: 256, 64>}, {pipeline_mode = #tpu.pipeline_mode<synchronous>, transform_indices = @transform_7, window_bounds = array<i64: 1, 64>}, {pipeline_mode = #tpu.pipeline_mode<synchronous>, transform_indices = @transform_8, window_bounds = array<i64: 32, 64>}]} {
    %c0 = arith.constant 0 : index
    %c0_0 = arith.constant 0 : index
    %0 = vector.load %arg1[%c0, %c0_0] : memref<32x64xf32, #tpu.memory_space<vmem>>, vector<32x64xf32>
    %c0_1 = arith.constant 0 : index
    %c0_2 = arith.constant 0 : index
    %1 = vector.load %arg2[%c0_1, %c0_2] : memref<32x64xf32, #tpu.memory_space<vmem>>, vector<32x64xf32>
    %2 = arith.addf %0, %1 : vector<32x64xf32>
    %c0_3 = arith.constant 0 : index
    %c0_4 = arith.constant 0 : index
    %3 = vector.load %arg3[%c0_3, %c0_4] : memref<1x64xf32, #tpu.memory_space<vmem>>, vector<1x64xf32>
    %c0_5 = arith.constant 0 : index
    %c0_6 = arith.constant 0 : index
    %4 = vector.load %arg4[%c0_5, %c0_6] : memref<1x64xf32, #tpu.memory_space<vmem>>, vector<1x64xf32>
    %cst = arith.constant dense<0.000000e+00> : vector<32xf32>
    %5 = vector.multi_reduction <add>, %2, %cst [1] : vector<32x64xf32> to vector<32xf32>
    %6 = vector.shape_cast %5 : vector<32xf32> to vector<32x1xf32>
    %cst_7 = arith.constant 6.400000e+01 : f32
    %7 = vector.broadcast %cst_7 : f32 to vector<32x1xf32>
    %8 = arith.divf %6, %7 : vector<32x1xf32>
    %9 = vector.broadcast %8 : vector<32x1xf32> to vector<32x64xf32>
    %10 = arith.subf %2, %9 : vector<32x64xf32>
    %11 = arith.mulf %10, %10 : vector<32x64xf32>
    %cst_8 = arith.constant dense<0.000000e+00> : vector<32xf32>
    %12 = vector.multi_reduction <add>, %11, %cst_8 [1] : vector<32x64xf32> to vector<32xf32>
    %13 = vector.shape_cast %12 : vector<32xf32> to vector<32x1xf32>
    %cst_9 = arith.constant 6.400000e+01 : f32
    %14 = vector.broadcast %cst_9 : f32 to vector<32x1xf32>
    %15 = arith.divf %13, %14 : vector<32x1xf32>
    %16 = vector.broadcast %8 : vector<32x1xf32> to vector<32x64xf32>
    %17 = arith.subf %2, %16 : vector<32x64xf32>
    %cst_10 = arith.constant 9.99999974E-6 : f32
    %18 = vector.broadcast %cst_10 : f32 to vector<32x1xf32>
    %19 = arith.addf %15, %18 : vector<32x1xf32>
    %20 = math.rsqrt %19 : vector<32x1xf32>
    %21 = vector.broadcast %20 : vector<32x1xf32> to vector<32x64xf32>
    %22 = arith.mulf %17, %21 : vector<32x64xf32>
    %23 = vector.broadcast %3 : vector<1x64xf32> to vector<32x64xf32>
    %24 = arith.mulf %22, %23 : vector<32x64xf32>
    %25 = vector.broadcast %4 : vector<1x64xf32> to vector<32x64xf32>
    %26 = arith.addf %24, %25 : vector<32x64xf32>
    %c0_11 = arith.constant 0 : index
    %c0_12 = arith.constant 0 : index
    %27 = vector.load %arg5[%c0_11, %c0_12] : memref<64x256xf32, #tpu.memory_space<vmem>>, vector<64x256xf32>
    %28 = arith.truncf %26 : vector<32x64xf32> to vector<32x64xbf16>
    %29 = arith.truncf %27 : vector<64x256xf32> to vector<64x256xbf16>
    %cst_13 = arith.constant dense<0.000000e+00> : vector<32x256xf32>
    %30 = tpu.matmul %28, %29, %cst_13 {dimension_numbers = #tpu.dot_dimension_numbers<[1], [0], [0], [1], [0, 0, 1, 1], [], []>} : vector<32x64xbf16>, vector<64x256xbf16>, vector<32x256xf32> -> vector<32x256xf32>
    %c0_14 = arith.constant 0 : index
    %c0_15 = arith.constant 0 : index
    %31 = vector.load %arg6[%c0_14, %c0_15] : memref<1x256xf32, #tpu.memory_space<vmem>>, vector<1x256xf32>
    %32 = vector.broadcast %31 : vector<1x256xf32> to vector<32x256xf32>
    %33 = arith.addf %30, %32 : vector<32x256xf32>
    %34 = arith.mulf %33, %33 : vector<32x256xf32>
    %35 = arith.mulf %33, %34 : vector<32x256xf32>
    %cst_16 = arith.constant 4.471500e-02 : f32
    %36 = vector.broadcast %cst_16 : f32 to vector<32x256xf32>
    %37 = arith.mulf %36, %35 : vector<32x256xf32>
    %38 = arith.addf %33, %37 : vector<32x256xf32>
    %cst_17 = arith.constant 0.797884583 : f32
    %39 = vector.broadcast %cst_17 : f32 to vector<32x256xf32>
    %40 = arith.mulf %39, %38 : vector<32x256xf32>
    %41 = math.tanh %40 : vector<32x256xf32>
    %cst_18 = arith.constant 1.000000e+00 : f32
    %42 = vector.broadcast %cst_18 : f32 to vector<32x256xf32>
    %43 = arith.addf %42, %41 : vector<32x256xf32>
    %cst_19 = arith.constant 5.000000e-01 : f32
    %44 = vector.broadcast %cst_19 : f32 to vector<32x256xf32>
    %45 = arith.mulf %44, %43 : vector<32x256xf32>
    %46 = arith.mulf %33, %45 : vector<32x256xf32>
    %c0_20 = arith.constant 0 : index
    %c0_21 = arith.constant 0 : index
    %47 = vector.load %arg7[%c0_20, %c0_21] : memref<256x64xf32, #tpu.memory_space<vmem>>, vector<256x64xf32>
    %48 = arith.truncf %46 : vector<32x256xf32> to vector<32x256xbf16>
    %49 = arith.truncf %47 : vector<256x64xf32> to vector<256x64xbf16>
    %cst_22 = arith.constant dense<0.000000e+00> : vector<32x64xf32>
    %50 = tpu.matmul %48, %49, %cst_22 {dimension_numbers = #tpu.dot_dimension_numbers<[1], [0], [0], [1], [0, 0, 1, 1], [], []>} : vector<32x256xbf16>, vector<256x64xbf16>, vector<32x64xf32> -> vector<32x64xf32>
    %51 = arith.addf %2, %50 : vector<32x64xf32>
    %c0_23 = arith.constant 0 : index
    %c0_24 = arith.constant 0 : index
    %52 = vector.load %arg8[%c0_23, %c0_24] : memref<1x64xf32, #tpu.memory_space<vmem>>, vector<1x64xf32>
    %53 = vector.broadcast %52 : vector<1x64xf32> to vector<32x64xf32>
    %54 = arith.addf %51, %53 : vector<32x64xf32>
    %c0_25 = arith.constant 0 : index
    %c0_26 = arith.constant 0 : index
    %55 = vector.load %arg9[%c0_25, %c0_26] : memref<32x64xf32, #tpu.memory_space<vmem>>, vector<32x64xf32>
    tpu.vector_store %arg9[%c0_25, %c0_26], %54 {strides = array<i32>} : memref<32x64xf32, #tpu.memory_space<vmem>>, vector<32x64xf32>,
    return
  }
  func.func @transform_0(%arg0: i32) -> (i32, i32) {
    %c0_i32 = arith.constant 0 : i32
    %c0_i32_0 = arith.constant 0 : i32
    %c0_i32_1 = arith.constant 0 : i32
    return %c0_i32, %c0_i32_0 : i32, i32
  }
  func.func @transform_1(%arg0: i32) -> (i32, i32) {
    %c0_i32 = arith.constant 0 : i32
    %c0_i32_0 = arith.constant 0 : i32
    %c0_i32_1 = arith.constant 0 : i32
    return %c0_i32, %c0_i32_0 : i32, i32
  }
  func.func @transform_2(%arg0: i32) -> (i32, i32) {
    %c0_i32 = arith.constant 0 : i32
    %c0_i32_0 = arith.constant 0 : i32
    %c0_i32_1 = arith.constant 0 : i32
    return %c0_i32, %c0_i32_0 : i32, i32
  }
  func.func @transform_3(%arg0: i32) -> (i32, i32) {
    %c0_i32 = arith.constant 0 : i32
    %c0_i32_0 = arith.constant 0 : i32
    %c0_i32_1 = arith.constant 0 : i32
    return %c0_i32, %c0_i32_0 : i32, i32
  }
  func.func @transform_4(%arg0: i32) -> (i32, i32) {
    %c0_i32 = arith.constant 0 : i32
    %c0_i32_0 = arith.constant 0 : i32
    %c0_i32_1 = arith.constant 0 : i32
    return %c0_i32, %c0_i32_0 : i32, i32
  }
  func.func @transform_5(%arg0: i32) -> (i32, i32) {
    %c0_i32 = arith.constant 0 : i32
    %c0_i32_0 = arith.constant 0 : i32
    %c0_i32_1 = arith.constant 0 : i32
    return %c0_i32, %c0_i32_0 : i32, i32
  }
  func.func @transform_6(%arg0: i32) -> (i32, i32) {
    %c0_i32 = arith.constant 0 : i32
    %c0_i32_0 = arith.constant 0 : i32
    %c0_i32_1 = arith.constant 0 : i32
    return %c0_i32, %c0_i32_0 : i32, i32
  }
  func.func @transform_7(%arg0: i32) -> (i32, i32) {
    %c0_i32 = arith.constant 0 : i32
    %c0_i32_0 = arith.constant 0 : i32
    %c0_i32_1 = arith.constant 0 : i32
    return %c0_i32, %c0_i32_0 : i32, i32
  }
  func.func @transform_8(%arg0: i32) -> (i32, i32) {
    %c0_i32 = arith.constant 0 : i32
    %c0_i32_0 = arith.constant 0 : i32
    %c0_i32_1 = arith.constant 0 : i32
    return %c0_i32, %c0_i32_0 : i32, i32
  }
}

</mosaic_0001>

<bundles_post_ra>
// kernel: swin_for_iqa_forward.11
= control target key start
LH: loop header
LB: loop body
LE: loop exit
PB: predicated region body
PF: predicated region fallthrough
CT: control target
= control target key end

     0   :  { %vm61_vm0 = vcmask 392192   ;;  %vm185_vm1 = vcmask 261120   ;;  %s930_s1 = inlined_call_operand.vmem [shape: f32[48,32], index: 1, kind: input, shape index: {}]   ;;  %s931_s0 = inlined_call_operand.vmem [shape: f32[128,48], index: 0, kind: input, shape index: {}]   ;;  %s932_s2 = inlined_call_operand.vmem [shape: f32[1,32], index: 2, kind: input, shape index: {}]   ;;  %s933_s3 = inlined_call_operand.vmem [shape: f32[1,32], index: 3, kind: input, shape index: {}]   ;;  %s934_s4 = inlined_call_operand.vmem [shape: f32[1,32], index: 4, kind: input, shape index: {}]   ;;  %s935_s5 = inlined_call_operand.vmem [shape: f32[128,32], index: 5, kind: output, shape index: {}]  }
   0x1   :  { %v37_v0 = vld [vmem:[%s930_s1] sm:$0xff]  ;;  %v38_v1 = vld [vmem:[%s930_s1 + $0x8] sm:$0xff]  ;;  %v39_v2 = vld [vmem:[%s930_s1 + $0x10] sm:$0xff] }
   0x2   :  { %v51_v3 = vpack.c.bf16 %v38_v1, %v37_v0  ;;  %v40_v4 = vld [vmem:[%s930_s1 + $0x18] sm:$0xff]  ;;  %v41_v5 = vld [vmem:[%s930_s1 + $0x20] sm:$0xff]  ;;  %v42_v6 = vld [vmem:[%s930_s1 + $0x28] sm:$0xff] }
   0x3   :  { %v52_v7 = vpack.c.bf16 %v40_v4, %v39_v2  ;;  %v21_v8 = vld [vmem:[%s931_s0] sm:$0xff]  ;;  %v22_v9 = vld [vmem:[%s931_s0 + $0x8] sm:$0xff]  ;;  %v53_v14 = vpack.c.bf16 %v42_v6, %v41_v5  ;;  %v23_v15 = vld [vmem:[%s931_s0 + $0x10] sm:$0xff] }
   0x4   :  { %v29_v10 = vld [vmem:[%s931_s0 + $0x40] sm:$0xff]  ;;  %481 = vmatprep.subr.bf16.mxu0 %v51_v3  ;;  %503 = vmatprep.subr.bf16.mxu1 %v51_v3  ;;  %v43_v11 = vpack.c.bf16 %v22_v9, %v21_v8  ;;  %v30_v12 = vld [vmem:[%s931_s0 + $0x48] sm:$0xff]  ;;  %v24_v16 = vld [vmem:[%s931_s0 + $0x18] sm:$0xff] }
   0x5   :  { %482 = vmatpush3.bf16.msra.mxu0 %v51_v3  ;;  %506 = vmatpush3.bf16.msra.mxu1 %v51_v3  ;;  %v47_v13 = vpack.c.bf16 %v30_v12, %v29_v10  ;;  %v31_v17 = vld [vmem:[%s931_s0 + $0x50] sm:$0xff]  ;;  %v32_v18 = vld [vmem:[%s931_s0 + $0x58] sm:$0xff]  ;;  %v25_v19 = vld [vmem:[%s931_s0 + $0x20] sm:$0xff]  ;;  %v44_v23 = vpack.c.bf16 %v24_v16, %v23_v15 }
   0x6   :  { %483 = vmatprep.subr.bf16.mxu0 %v52_v7  ;;  %504 = vmatprep.subr.bf16.mxu1 %v52_v7  ;;  %v26_v20 = vld [vmem:[%s931_s0 + $0x28] sm:$0xff]  ;;  %v33_v21 = vld [vmem:[%s931_s0 + $0x60] sm:$0xff]  ;;  %v48_v24 = vpack.c.bf16 %v32_v18, %v31_v17  ;;  %v27_v27 = vld [vmem:[%s931_s0 + $0x30] sm:$0xff] }
   0x7   :  { %487 = vmatprep.mubr.msk.bf16.mxu0 %vm61_vm0, %v43_v11  ;;  %495 = vmatprep.mubr.msk.bf16.mxu1 %vm61_vm0, %v47_v13  ;;  %v34_v22 = vld [vmem:[%s931_s0 + $0x68] sm:$0xff]  ;;  %v45_v25 = vpack.c.bf16 %v26_v20, %v25_v19  ;;  %v28_v28 = vld [vmem:[%s931_s0 + $0x38] sm:$0xff]  ;;  %v35_v29 = vld [vmem:[%s931_s0 + $0x70] sm:$0xff] }
   0x8   :  { %v49_v26 = vpack.c.bf16 %v34_v22, %v33_v21  ;;  %v36_v30 = vld [vmem:[%s931_s0 + $0x78] sm:$0xff]  ;;  %v46_v31 = vpack.c.bf16 %v28_v28, %v27_v27  ;;  %v459_v33 = vld [vmem:[%s932_s2] ss:$0 sm:$0xff] }
   0x9   :  { %484 = vmatpush3.bf16.msra.mxu0 %v52_v7  ;;  %507 = vmatpush3.bf16.msra.mxu1 %v52_v7  ;;  %v50_v32 = vpack.c.bf16 %v36_v30, %v35_v29 }
   0xa   :  { %485 = vmatprep.subr.bf16.mxu0 %v53_v14  ;;  %505 = vmatprep.subr.bf16.mxu1 %v53_v14 }
   0xd   :  { %486 = vmatpush3.bf16.msra.mxu0 %v53_v14  ;;  %508 = vmatpush3.bf16.msra.mxu1 %v53_v14 }
  0x10   :  { %488 = vmatmul.mubr.msk.bf16.vlgmr.msra.gmra.mrb[0].mxu0 %vm61_vm0, %v44_v23  ;;  %496 = vmatmul.mubr.msk.bf16.vlgmr.msra.gmra.mrb[0].mxu1 %vm61_vm0, %v48_v24 }
  0x11   :  { %491 = vmatprep.mubr.msk.bf16.mxu0 %vm61_vm0, %v45_v25  ;;  %499 = vmatprep.mubr.msk.bf16.mxu1 %vm61_vm0, %v49_v26 }
  0x18   :  { %492 = vmatmul.mubr.msk.bf16.gmra.mrb[4].mxu0 %vm61_vm0, %v46_v31  ;;  %500 = vmatmul.mubr.msk.bf16.gmra.mrb[4].mxu1 %vm61_vm0, %v50_v32 }
  0xe3   :  { %v489_v34 = vpop.f32.mrb[0].mxu0  ;;  %v497_v35 = vpop.f32.mrb[0].mxu1 }
  0xe4   :  { %v648_v36 = vadd.f32 %v489_v34, %v459_v33  ;;  %v650_v37 = vadd.f32 %v497_v35, %v459_v33  ;;  %v120_v38 = vpop.f32.mrb[1].mxu0  ;;  %v152_v39 = vpop.f32.mrb[1].mxu1 }
  0xe5   :  { %v490_v40 = vpop.f32.mrb[2].mxu0  ;;  %v498_v41 = vpop.f32.mrb[2].mxu1  ;;  %v652_v42 = vadd.f32 %v459_v33, %v120_v38  ;;  %v660_v48 = vadd.f32 %v459_v33, %v152_v39 }
  0xe6   :  { %v654_v43 = vadd.f32 %v490_v40, %v459_v33  ;;  %v123_v44 = vpop.f32.mrb[3].mxu0  ;;  %v155_v45 = vpop.f32.mrb[3].mxu1  ;;  %v216_v46 = vsel %vm185_vm1, %v650_v37, 0.0  ;;  %v192_v47 = vsel %vm185_vm1, %v648_v36, 0.0  ;;  %v662_v49 = vadd.f32 %v498_v41, %v459_v33 }
  0xe7   :  { %217 = vadd.xlane.f32.xlu0 %v216_v46  ;;  %193 = vadd.xlane.f32.xlu1 %v192_v47  ;;  %v186_v51 = vsel %vm185_vm1, %v652_v42, 0.0  ;;  %v668_v58 = vadd.f32 %v459_v33, %v123_v44  ;;  %v670_v59 = vadd.f32 %v459_v33, %v155_v45  ;;  %v210_v61 = vsel %vm185_vm1, %v660_v48, 0.0 }
  0xe8   :  { %v195_v50 = vsel %vm185_vm1, %v654_v43, 0.0  ;;  %v219_v60 = vsel %vm185_vm1, %v662_v49, 0.0 }
  0xe9   :  { %v213_v2 = vsel %vm185_vm1, %v670_v59, 0.0  ;;  %v189_v3 = vsel %vm185_vm1, %v668_v58, 0.0 }
  0xeb   :  { %196 = vadd.xlane.f32.xlu1 %v195_v50  ;;  %187 = vadd.xlane.f32.xlu0 %v186_v51  ;;  %v493_v52 = vpop.f32.mrb[4].mxu0  ;;  %v501_v53 = vpop.f32.mrb[4].mxu1 }
  0xec   :  { %v136_v54 = vpop.f32.mrb[5].mxu0  ;;  %v168_v55 = vpop.f32.mrb[5].mxu1  ;;  %v676_v0 = vadd.f32 %v493_v52, %v459_v33  ;;  %v704_v14 = vadd.f32 %v501_v53, %v459_v33 }
  0xed   :  { %v494_v56 = vpop.f32.mrb[6].mxu0  ;;  %v502_v57 = vpop.f32.mrb[6].mxu1  ;;  %v688_v6 = vadd.f32 %v459_v33, %v136_v54  ;;  %v692_v8 = vadd.f32 %v459_v33, %v168_v55 }
  0xee   :  { %v139_v62 = vpop.f32.mrb[7].mxu0  ;;  %v171_v63 = vpop.f32.mrb[7].mxu1  ;;  %v678_v1 = vadd.f32 %v494_v56, %v459_v33  ;;  %v204_v5 = vsel %vm185_vm1, %v676_v0, 0.0  ;;  %v706_v15 = vadd.f32 %v502_v57, %v459_v33  ;;  %v228_v17 = vsel %vm185_vm1, %v704_v14, 0.0 }
  0xef   :  { %220 = vadd.xlane.f32.xlu1 %v219_v60  ;;  %211 = vadd.xlane.f32.xlu0 %v210_v61  ;;  %v690_v7 = vadd.f32 %v459_v33, %v139_v62  ;;  %v694_v9 = vadd.f32 %v459_v33, %v171_v63  ;;  %v198_v11 = vsel %vm185_vm1, %v688_v6, 0.0  ;;  %v222_v13 = vsel %vm185_vm1, %v692_v8, 0.0 }
  0xf0   :  { %v207_v4 = vsel %vm185_vm1, %v678_v1, 0.0  ;;  %v231_v16 = vsel %vm185_vm1, %v706_v15, 0.0 }
  0xf1   :  { %v201_v10 = vsel %vm185_vm1, %v690_v7, 0.0  ;;  %v225_v12 = vsel %vm185_vm1, %v694_v9, 0.0 }
  0xf3   :  { %214 = vadd.xlane.f32.xlu1 %v213_v2  ;;  %190 = vadd.xlane.f32.xlu0 %v189_v3 }
  0xf7   :  { %208 = vadd.xlane.f32.xlu1 %v207_v4  ;;  %205 = vadd.xlane.f32.xlu0 %v204_v5 }
  0xfb   :  { %202 = vadd.xlane.f32.xlu1 %v201_v10  ;;  %199 = vadd.xlane.f32.xlu0 %v198_v11 }
  0xff   :  { %226 = vadd.xlane.f32.xlu1 %v225_v12  ;;  %223 = vadd.xlane.f32.xlu0 %v222_v13 }
 0x103   :  { %232 = vadd.xlane.f32.xlu1 %v231_v16  ;;  %229 = vadd.xlane.f32.xlu0 %v228_v17 }
 0x174   :  { %v218_v18 = vpop.xlane.xlu0 %217  ;;  %v194_v19 = vpop.xlane.xlu1 %193 }
 0x175   :  { %v245_v20 = vmul.f32 0.03125, %v218_v18  ;;  %v237_v21 = vmul.f32 0.03125, %v194_v19 }
 0x177   :  { %v713_v22 = vsub.f32 %v650_v37, %v245_v20  ;;  %v716_v23 = vsub.f32 %v648_v36, %v237_v21 }
 0x178   :  { %v197_v24 = vpop.xlane.xlu1 %196  ;;  %v188_v25 = vpop.xlane.xlu0 %187 }
 0x179   :  { %v238_v26 = vmul.f32 0.03125, %v197_v24  ;;  %v235_v27 = vmul.f32 0.03125, %v188_v25  ;;  %v269_v28 = vmul.f32 %v716_v23, %v716_v23  ;;  %v277_v32 = vmul.f32 %v713_v22, %v713_v22 }
 0x17b   :  { %v721_v29 = vsub.f32 %v654_v43, %v238_v26  ;;  %v724_v30 = vsub.f32 %v652_v42, %v235_v27  ;;  %v289_v31 = vsel %vm185_vm1, %v269_v28, 0.0  ;;  %v313_v42 = vsel %vm185_vm1, %v277_v32, 0.0 }
 0x17c   :  { %v221_v33 = vpop.xlane.xlu1 %220  ;;  %290 = vadd.xlane.f32.xlu0 %v289_v31  ;;  %v212_v34 = vpop.xlane.xlu0 %211 }
 0x17d   :  { %v246_v35 = vmul.f32 0.03125, %v221_v33  ;;  %v243_v36 = vmul.f32 0.03125, %v212_v34  ;;  %v270_v37 = vmul.f32 %v721_v29, %v721_v29  ;;  %v267_v38 = vmul.f32 %v724_v30, %v724_v30 }
 0x17f   :  { %v734_v39 = vsub.f32 %v662_v49, %v246_v35  ;;  %v737_v40 = vsub.f32 %v660_v48, %v243_v36  ;;  %v292_v41 = vsel %vm185_vm1, %v270_v37, 0.0  ;;  %v283_v50 = vsel %vm185_vm1, %v267_v38, 0.0 }
 0x180   :  { %v215_v43 = vpop.xlane.xlu1 %214  ;;  %293 = vadd.xlane.f32.xlu1 %v292_v41  ;;  %314 = vadd.xlane.f32.xlu0 %v313_v42  ;;  %v191_v44 = vpop.xlane.xlu0 %190 }
 0x181   :  { %v244_v45 = vmul.f32 0.03125, %v215_v43  ;;  %v236_v46 = vmul.f32 0.03125, %v191_v44  ;;  %v278_v47 = vmul.f32 %v734_v39, %v734_v39  ;;  %v275_v52 = vmul.f32 %v737_v40, %v737_v40 }
 0x183   :  { %v745_v49 = vsub.f32 %v670_v59, %v244_v45  ;;  %v748_v48 = vsub.f32 %v668_v58, %v236_v46  ;;  %v316_v51 = vsel %vm185_vm1, %v278_v47, 0.0  ;;  %v307_v61 = vsel %vm185_vm1, %v275_v52, 0.0 }
 0x184   :  { %v209_v53 = vpop.xlane.xlu1 %208  ;;  %317 = vadd.xlane.f32.xlu1 %v316_v51  ;;  %284 = vadd.xlane.f32.xlu0 %v283_v50  ;;  %v206_v54 = vpop.xlane.xlu0 %205 }
 0x185   :  { %v242_v55 = vmul.f32 0.03125, %v209_v53  ;;  %v241_v56 = vmul.f32 0.03125, %v206_v54  ;;  %v268_v57 = vmul.f32 %v748_v48, %v748_v48  ;;  %v276_v59 = vmul.f32 %v745_v49, %v745_v49 }
 0x187   :  { %v758_v58 = vsub.f32 %v678_v1, %v242_v55  ;;  %v761_v60 = vsub.f32 %v676_v0, %v241_v56  ;;  %v286_v62 = vsel %vm185_vm1, %v268_v57, 0.0  ;;  %v310_v10 = vsel %vm185_vm1, %v276_v59, 0.0 }
 0x188   :  { %v203_v63 = vpop.xlane.xlu1 %202  ;;  %308 = vadd.xlane.f32.xlu0 %v307_v61  ;;  %287 = vadd.xlane.f32.xlu1 %v286_v62  ;;  %v200_v2 = vpop.xlane.xlu0 %199 }
 0x189   :  { %v240_v3 = vmul.f32 0.03125, %v203_v63  ;;  %v239_v4 = vmul.f32 0.03125, %v200_v2  ;;  %v273_v5 = vmul.f32 %v761_v60, %v761_v60  ;;  %v274_v12 = vmul.f32 %v758_v58, %v758_v58  ;;  %v811_v2 = vld [vmem:[%s933_s3] ss:$0 sm:$0xff] }
 0x18b   :  { %v769_v1 = vsub.f32 %v690_v7, %v240_v3  ;;  %v772_v0 = vsub.f32 %v688_v6, %v239_v4  ;;  %v301_v11 = vsel %vm185_vm1, %v273_v5, 0.0  ;;  %v304_v21 = vsel %vm185_vm1, %v274_v12, 0.0  ;;  %v817_v12 = vld [vmem:[%s934_s4] ss:$0 sm:$0xff] }
 0x18c   :  { %v227_v13 = vpop.xlane.xlu1 %226  ;;  %311 = vadd.xlane.f32.xlu1 %v310_v10  ;;  %302 = vadd.xlane.f32.xlu0 %v301_v11  ;;  %v224_v16 = vpop.xlane.xlu0 %223 }
 0x18d   :  { %v248_v17 = vmul.f32 0.03125, %v227_v13  ;;  %v247_v18 = vmul.f32 0.03125, %v224_v16  ;;  %v271_v19 = vmul.f32 %v772_v0, %v772_v0  ;;  %v272_v7 = vmul.f32 %v769_v1, %v769_v1 }
 0x18f   :  { %v782_v6 = vsub.f32 %v694_v9, %v248_v17  ;;  %v785_v20 = vsub.f32 %v692_v8, %v247_v18  ;;  %v295_v24 = vsel %vm185_vm1, %v271_v19, 0.0  ;;  %v298_v32 = vsel %vm185_vm1, %v272_v7, 0.0 }
 0x190   :  { %v233_v25 = vpop.xlane.xlu1 %232  ;;  %305 = vadd.xlane.f32.xlu1 %v304_v21  ;;  %296 = vadd.xlane.f32.xlu0 %v295_v24  ;;  %v230_v26 = vpop.xlane.xlu0 %229 }
 0x191   :  { %v250_v27 = vmul.f32 0.03125, %v233_v25  ;;  %v249_v28 = vmul.f32 0.03125, %v230_v26  ;;  %v279_v31 = vmul.f32 %v785_v20, %v785_v20  ;;  %v280_v34 = vmul.f32 %v782_v6, %v782_v6 }
 0x193   :  { %v793_v9 = vsub.f32 %v706_v15, %v250_v27  ;;  %v796_v8 = vsub.f32 %v704_v14, %v249_v28  ;;  %v319_v33 = vsel %vm185_vm1, %v279_v31, 0.0  ;;  %v322_v36 = vsel %vm185_vm1, %v280_v34, 0.0 }
 0x194   :  { %299 = vadd.xlane.f32.xlu1 %v298_v32  ;;  %320 = vadd.xlane.f32.xlu0 %v319_v33 }
 0x195   :  { %v281_v35 = vmul.f32 %v796_v8, %v796_v8  ;;  %v282_v15 = vmul.f32 %v793_v9, %v793_v9 }
 0x197   :  { %v325_v37 = vsel %vm185_vm1, %v281_v35, 0.0  ;;  %v328_v14 = vsel %vm185_vm1, %v282_v15, 0.0 }
 0x198   :  { %323 = vadd.xlane.f32.xlu1 %v322_v36  ;;  %326 = vadd.xlane.f32.xlu0 %v325_v37 }
 0x19c   :  { %329 = vadd.xlane.f32.xlu1 %v328_v14 }
 0x209   :  { %v291_v38 = vpop.xlane.xlu0 %290 }
 0x20a   :  { %v333_v41 = vmul.f32 0.03125, %v291_v38 }
 0x20c   :  { %v349_v42 = vadd.f32 1e-05, %v333_v41 }
 0x20d   :  { %v294_v43 = vpop.xlane.xlu1 %293  ;;  %v315_v44 = vpop.xlane.xlu0 %314 }
 0x20e   :  { %509 = vrsqrt.f32 %v349_v42  ;;  %v334_v45 = vmul.f32 0.03125, %v294_v43  ;;  %v341_v46 = vmul.f32 0.03125, %v315_v44 }
 0x210   :  { %v350_v47 = vadd.f32 1e-05, %v334_v45  ;;  %v357_v50 = vadd.f32 1e-05, %v341_v46 }
 0x211   :  { %v318_v51 = vpop.xlane.xlu1 %317  ;;  %v285_v52 = vpop.xlane.xlu0 %284 }
 0x212   :  { %511 = vrsqrt.f32 %v350_v47  ;;  %v342_v53 = vmul.f32 0.03125, %v318_v51  ;;  %v331_v54 = vmul.f32 0.03125, %v285_v52 }
 0x213   :  { %513 = vrsqrt.f32 %v357_v50 }
 0x214   :  { %v358_v55 = vadd.f32 1e-05, %v342_v53  ;;  %v347_v56 = vadd.f32 1e-05, %v331_v54 }
 0x215   :  { %v288_v57 = vpop.xlane.xlu1 %287  ;;  %v309_v59 = vpop.xlane.xlu0 %308 }
 0x216   :  { %515 = vrsqrt.f32 %v358_v55  ;;  %v332_v61 = vmul.f32 0.03125, %v288_v57  ;;  %v339_v62 = vmul.f32 0.03125, %v309_v59 }
 0x217   :  { %517 = vrsqrt.f32 %v347_v56 }
 0x218   :  { %v510_v63 = vpop.eup %509  ;;  %v348_v3 = vadd.f32 1e-05, %v332_v61  ;;  %v355_v4 = vadd.f32 1e-05, %v339_v62 }
 0x219   :  { %v381_v5 = vmul.f32 %v510_v63, %v716_v23  ;;  %v312_v10 = vpop.xlane.xlu1 %311  ;;  %v303_v11 = vpop.xlane.xlu0 %302 }
 0x21a   :  { %519 = vrsqrt.f32 %v348_v3  ;;  %v340_v13 = vmul.f32 0.03125, %v312_v10  ;;  %v337_v16 = vmul.f32 0.03125, %v303_v11 }
 0x21b   :  { %v403_v17 = vmul.f32 %v811_v2, %v381_v5  ;;  %521 = vrsqrt.f32 %v355_v4 }
 0x21c   :  { %v512_v18 = vpop.eup %511  ;;  %v356_v19 = vadd.f32 1e-05, %v340_v13  ;;  %v353_v7 = vadd.f32 1e-05, %v337_v16 }
 0x21d   :  { %v514_v21 = vpop.eup %513  ;;  %v425_v24 = vadd.f32 %v817_v12, %v403_v17  ;;  %v382_v23 = vmul.f32 %v512_v18, %v721_v29  ;;  %v306_v25 = vpop.xlane.xlu1 %305 }
 0x21e   :  { %v297_v26 = vpop.xlane.xlu0 %296  ;;  %v389_v27 = vmul.f32 %v514_v21, %v713_v22  ;;  %523 = vrsqrt.f32 %v356_v19  ;;  %v338_v28 = vmul.f32 0.03125, %v306_v25 }
 0x21f   :  { %v335_v31 = vmul.f32 0.03125, %v297_v26  ;;  %441 = vst.msk [vmem:[%s935_s5 + $0x10] sm:$0xff] %vm185_vm1, %v425_v24  ;;  %v404_v32 = vmul.f32 %v811_v2, %v382_v23  ;;  %525 = vrsqrt.f32 %v353_v7 }
 0x220   :  { %v516_v33 = vpop.eup %515  ;;  %v411_v34 = vmul.f32 %v811_v2, %v389_v27  ;;  %v354_v35 = vadd.f32 1e-05, %v338_v28 }
 0x221   :  { %v351_v29 = vadd.f32 1e-05, %v335_v31  ;;  %v518_v36 = vpop.eup %517  ;;  %v426_v37 = vadd.f32 %v817_v12, %v404_v32  ;;  %v390_v22 = vmul.f32 %v516_v33, %v734_v39  ;;  %v300_v15 = vpop.xlane.xlu1 %299 }
 0x222   :  { %v321_v14 = vpop.xlane.xlu0 %320  ;;  %v433_v38 = vadd.f32 %v817_v12, %v411_v34  ;;  %v379_v41 = vmul.f32 %v518_v36, %v724_v30  ;;  %527 = vrsqrt.f32 %v354_v35  ;;  %v336_v42 = vmul.f32 0.03125, %v300_v15 }
 0x223   :  { %442 = vst.msk [vmem:[%s935_s5 + $0x18] sm:$0xff] %vm185_vm1, %v426_v37  ;;  %v412_v43 = vmul.f32 %v811_v2, %v390_v22  ;;  %529 = vrsqrt.f32 %v351_v29  ;;  %v343_v44 = vmul.f32 0.03125, %v321_v14 }
 0x224   :  { %v520_v45 = vpop.eup %519  ;;  %449 = vst.msk [vmem:[%s935_s5 + $0x50] sm:$0xff] %vm185_vm1, %v433_v38  ;;  %v401_v39 = vmul.f32 %v811_v2, %v379_v41  ;;  %v352_v30 = vadd.f32 1e-05, %v336_v42 }
 0x225   :  { %v522_v46 = vpop.eup %521  ;;  %v434_v47 = vadd.f32 %v817_v12, %v412_v43  ;;  %v380_v50 = vmul.f32 %v520_v45, %v748_v48  ;;  %v359_v51 = vadd.f32 1e-05, %v343_v44  ;;  %v324_v52 = vpop.xlane.xlu1 %323 }
 0x226   :  { %v327_v53 = vpop.xlane.xlu0 %326  ;;  %v423_v54 = vadd.f32 %v817_v12, %v401_v39  ;;  %v387_v55 = vmul.f32 %v522_v46, %v737_v40  ;;  %531 = vrsqrt.f32 %v352_v30  ;;  %v344_v56 = vmul.f32 0.03125, %v324_v52 }
 0x227   :  { %450 = vst.msk [vmem:[%s935_s5 + $0x58] sm:$0xff] %vm185_vm1, %v434_v47  ;;  %v402_v57 = vmul.f32 %v811_v2, %v380_v50  ;;  %533 = vrsqrt.f32 %v359_v51  ;;  %v345_v59 = vmul.f32 0.03125, %v327_v53 }
 0x228   :  { %v524_v61 = vpop.eup %523  ;;  %439 = vst.msk [vmem:[%s935_s5] sm:$0xff] %vm185_vm1, %v423_v54  ;;  %v409_v48 = vmul.f32 %v811_v2, %v387_v55  ;;  %v360_v40 = vadd.f32 1e-05, %v344_v56 }
 0x229   :  { %v526_v62 = vpop.eup %525  ;;  %v424_v63 = vadd.f32 %v817_v12, %v402_v57  ;;  %v388_v3 = vmul.f32 %v524_v61, %v745_v49  ;;  %v361_v4 = vadd.f32 1e-05, %v345_v59  ;;  %v330_v5 = vpop.xlane.xlu1 %329 }
 0x22a   :  { %v431_v10 = vadd.f32 %v817_v12, %v409_v48  ;;  %v385_v11 = vmul.f32 %v526_v62, %v761_v60  ;;  %535 = vrsqrt.f32 %v360_v40  ;;  %v346_v13 = vmul.f32 0.03125, %v330_v5 }
 0x22b   :  { %440 = vst.msk [vmem:[%s935_s5 + $0x8] sm:$0xff] %vm185_vm1, %v424_v63  ;;  %v410_v16 = vmul.f32 %v811_v2, %v388_v3  ;;  %537 = vrsqrt.f32 %v361_v4 }
 0x22c   :  { %v528_v17 = vpop.eup %527  ;;  %447 = vst.msk [vmem:[%s935_s5 + $0x40] sm:$0xff] %vm185_vm1, %v431_v10  ;;  %v407_v49 = vmul.f32 %v811_v2, %v385_v11  ;;  %v362_v18 = vadd.f32 1e-05, %v346_v13 }
 0x22d   :  { %v530_v60 = vpop.eup %529  ;;  %v432_v19 = vadd.f32 %v817_v12, %v410_v16  ;;  %v386_v7 = vmul.f32 %v528_v17, %v758_v58 }
 0x22e   :  { %v429_v21 = vadd.f32 %v817_v12, %v407_v49  ;;  %v383_v24 = vmul.f32 %v530_v60, %v772_v0  ;;  %539 = vrsqrt.f32 %v362_v18 }
 0x22f   :  { %448 = vst.msk [vmem:[%s935_s5 + $0x48] sm:$0xff] %vm185_vm1, %v432_v19  ;;  %v408_v23 = vmul.f32 %v811_v2, %v386_v7 }
 0x230   :  { %v532_v25 = vpop.eup %531  ;;  %445 = vst.msk [vmem:[%s935_s5 + $0x30] sm:$0xff] %vm185_vm1, %v429_v21  ;;  %v405_v58 = vmul.f32 %v811_v2, %v383_v24 }
 0x231   :  { %v534_v26 = vpop.eup %533  ;;  %v430_v27 = vadd.f32 %v817_v12, %v408_v23  ;;  %v384_v0 = vmul.f32 %v532_v25, %v769_v1 }
 0x232   :  { %v427_v28 = vadd.f32 %v817_v12, %v405_v58  ;;  %v391_v31 = vmul.f32 %v534_v26, %v785_v20 }
 0x233   :  { %446 = vst.msk [vmem:[%s935_s5 + $0x38] sm:$0xff] %vm185_vm1, %v430_v27  ;;  %v406_v32 = vmul.f32 %v811_v2, %v384_v0 }
 0x234   :  { %v536_v33 = vpop.eup %535  ;;  %443 = vst.msk [vmem:[%s935_s5 + $0x20] sm:$0xff] %vm185_vm1, %v427_v28  ;;  %v413_v34 = vmul.f32 %v811_v2, %v391_v31 }
 0x235   :  { %v538_v1 = vpop.eup %537  ;;  %v428_v35 = vadd.f32 %v817_v12, %v406_v32  ;;  %v392_v20 = vmul.f32 %v536_v33, %v782_v6 }
 0x236   :  { %v435_v29 = vadd.f32 %v817_v12, %v413_v34  ;;  %v393_v36 = vmul.f32 %v538_v1, %v796_v8 }
 0x237   :  { %444 = vst.msk [vmem:[%s935_s5 + $0x28] sm:$0xff] %vm185_vm1, %v428_v35  ;;  %v414_v37 = vmul.f32 %v811_v2, %v392_v20 }
 0x238   :  { %v540_v22 = vpop.eup %539  ;;  %451 = vst.msk [vmem:[%s935_s5 + $0x60] sm:$0xff] %vm185_vm1, %v435_v29  ;;  %v415_v15 = vmul.f32 %v811_v2, %v393_v36 }
 0x239   :  { %v436_v6 = vadd.f32 %v817_v12, %v414_v37  ;;  %v394_v14 = vmul.f32 %v540_v22, %v793_v9 }
 0x23a   :  { %v437_v8 = vadd.f32 %v817_v12, %v415_v15 }
 0x23b   :  { %452 = vst.msk [vmem:[%s935_s5 + $0x68] sm:$0xff] %vm185_vm1, %v436_v6  ;;  %v416_v38 = vmul.f32 %v811_v2, %v394_v14 }
 0x23c   :  { %453 = vst.msk [vmem:[%s935_s5 + $0x70] sm:$0xff] %vm185_vm1, %v437_v8 }
 0x23d   :  { %v438_v41 = vadd.f32 %v817_v12, %v416_v38 }
 0x23f   :  { %454 = vst.msk [vmem:[%s935_s5 + $0x78] sm:$0xff] %vm185_vm1, %v438_v41 }

// kernel: swin_for_iqa_forward.12
= control target key start
LH: loop header
LB: loop body
LE: loop exit
PB: predicated region body
PF: predicated region fallthrough
CT: control target
= control target key end

     0   :  { %vm48_vm0 = vcmask 261120   ;;  %vm3275_vm1 = vmmov 0   ;;  %s3276_s25 = smov 96   ;;  %vm455_vm2 = vcmask 130048   ;;  %s3278_s30 = smov 80   ;;  %s4386_s0 = inlined_call_operand.vmem [shape: f32[8,16,32], index: 0, kind: input, shape index: {}]   ;;  %s4387_s3 = inlined_call_operand.vmem [shape: f32[32,96], index: 3, kind: input, shape index: {}]   ;;  %s4388_s1 = inlined_call_operand.vmem [shape: f32[1,32], index: 1, kind: input, shape index: {}]   ;;  %s4389_s2 = inlined_call_operand.vmem [shape: f32[1,32], index: 2, kind: input, shape index: {}]   ;;  %s4390_s4 = inlined_call_operand.vmem [shape: f32[1,96], index: 4, kind: input, shape index: {}]   ;;  %s4391_s5 = inlined_call_operand.vmem [shape: f32[2,1,16,16], index: 5, kind: input, shape index: {}]   ;;  %s4392_s6 = inlined_call_operand.vmem [shape: f32[32,32], index: 6, kind: input, shape index: {}]   ;;  %s4393_s7 = inlined_call_operand.vmem [shape: f32[1,32], index: 7, kind: input, shape index: {}]   ;;  %s4394_s8 = inlined_call_operand.vmem [shape: f32[8,16,32], index: 8, kind: output, shape index: {}]  }
   0x1   :  { %v30_v0 = vld [vmem:[%s4386_s0] sm:$0xff]  ;;  %v32_v1 = vld [vmem:[%s4386_s0 + $0x10] sm:$0xff]  ;;  %v31_v2 = vld [vmem:[%s4386_s0 + $0x8] sm:$0xff]  ;;  %s3279_s9 = smov 112   ;;  %s3281_s17 = smov 16  }
   0x2   :  { %v49_v3 = vsel %vm48_vm0, %v30_v0, 0.0  ;;  %v55_v4 = vsel %vm48_vm0, %v32_v1, 0.0  ;;  %v33_v5 = vld [vmem:[%s4386_s0 + $0x18] sm:$0xff]  ;;  %v52_v6 = vsel %vm48_vm0, %v31_v2, 0.0  ;;  %v34_v8 = vld [vmem:[%s4386_s0 + $0x20] sm:$0xff]  ;;  %v35_v9 = vld [vmem:[%s4386_s0 + $0x28] sm:$0xff] }
   0x3   :  { %50 = vadd.xlane.f32.xlu0 %v49_v3  ;;  %56 = vadd.xlane.f32.xlu1 %v55_v4  ;;  %v58_v7 = vsel %vm48_vm0, %v33_v5, 0.0  ;;  %v61_v10 = vsel %vm48_vm0, %v34_v8, 0.0  ;;  %v64_v11 = vsel %vm48_vm0, %v35_v9, 0.0  ;;  %v3354_v12 = vld [vmem:[%s4386_s0 + $0x30] sm:$0xff]  ;;  %v3359_v13 = vld [vmem:[%s4386_s0 + $0x38] sm:$0xff]  ;;  %v3368_v16 = vld [vmem:[%s4386_s0 + $0x40] sm:$0xff] }
   0x4   :  { %v67_v14 = vsel %vm48_vm0, %v3354_v12, 0.0  ;;  %v70_v15 = vsel %vm48_vm0, %v3359_v13, 0.0  ;;  %v3373_v17 = vld [vmem:[%s4386_s0 + $0x48] sm:$0xff]  ;;  %v73_v18 = vsel %vm48_vm0, %v3368_v16, 0.0  ;;  %v3382_v20 = vld [vmem:[%s4386_s0 + $0x50] sm:$0xff]  ;;  %v3387_v21 = vld [vmem:[%s4386_s0 + $0x58] sm:$0xff] }
   0x5   :  { %v76_v19 = vsel %vm48_vm0, %v3373_v17, 0.0  ;;  %v79_v22 = vsel %vm48_vm0, %v3382_v20, 0.0  ;;  %v82_v23 = vsel %vm48_vm0, %v3387_v21, 0.0  ;;  %v3396_v24 = vld [vmem:[%s4386_s0 + $0x60] sm:$0xff]  ;;  %v3401_v25 = vld [vmem:[%s4386_s0 + $0x68] sm:$0xff]  ;;  %v3410_v28 = vld [vmem:[%s4386_s0 + $0x70] sm:$0xff] }
   0x6   :  { %v85_v26 = vsel %vm48_vm0, %v3396_v24, 0.0  ;;  %v88_v27 = vsel %vm48_vm0, %v3401_v25, 0.0  ;;  %v3415_v29 = vld [vmem:[%s4386_s0 + $0x78] sm:$0xff]  ;;  %v91_v30 = vsel %vm48_vm0, %v3410_v28, 0.0 }
   0x7   :  { %53 = vadd.xlane.f32.xlu0 %v52_v6  ;;  %59 = vadd.xlane.f32.xlu1 %v58_v7  ;;  %v94_v31 = vsel %vm48_vm0, %v3415_v29, 0.0 }
   0xb   :  { %62 = vadd.xlane.f32.xlu0 %v61_v10  ;;  %65 = vadd.xlane.f32.xlu1 %v64_v11 }
   0xf   :  { %68 = vadd.xlane.f32.xlu0 %v67_v14  ;;  %71 = vadd.xlane.f32.xlu1 %v70_v15 }
  0x13   :  { %74 = vadd.xlane.f32.xlu0 %v73_v18  ;;  %77 = vadd.xlane.f32.xlu1 %v76_v19 }
  0x17   :  { %80 = vadd.xlane.f32.xlu0 %v79_v22  ;;  %83 = vadd.xlane.f32.xlu1 %v82_v23 }
  0x1b   :  { %86 = vadd.xlane.f32.xlu0 %v85_v26  ;;  %89 = vadd.xlane.f32.xlu1 %v88_v27 }
  0x1f   :  { %92 = vadd.xlane.f32.xlu0 %v91_v30  ;;  %95 = vadd.xlane.f32.xlu1 %v94_v31 }
  0x90   :  { %v51_v32 = vpop.xlane.xlu0 %50  ;;  %v57_v33 = vpop.xlane.xlu1 %56 }
  0x91   :  { %v98_v34 = vmul.f32 0.03125, %v51_v32  ;;  %v100_v35 = vmul.f32 0.03125, %v57_v33 }
  0x93   :  { %v3421_v36 = vsub.f32 %v30_v0, %v98_v34  ;;  %v3423_v37 = vsub.f32 %v32_v1, %v100_v35 }
  0x94   :  { %v54_v38 = vpop.xlane.xlu0 %53  ;;  %v60_v39 = vpop.xlane.xlu1 %59 }
  0x95   :  { %v99_v40 = vmul.f32 0.03125, %v54_v38  ;;  %v101_v41 = vmul.f32 0.03125, %v60_v39  ;;  %v130_v42 = vmul.f32 %v3421_v36, %v3421_v36  ;;  %v132_v43 = vmul.f32 %v3423_v37, %v3423_v37 }
  0x97   :  { %v3429_v44 = vsub.f32 %v31_v2, %v99_v40  ;;  %v3431_v45 = vsub.f32 %v33_v5, %v101_v41  ;;  %v146_v46 = vsel %vm48_vm0, %v130_v42, 0.0  ;;  %v152_v49 = vsel %vm48_vm0, %v132_v43, 0.0 }
  0x98   :  { %147 = vadd.xlane.f32.xlu0 %v146_v46  ;;  %v63_v47 = vpop.xlane.xlu0 %62  ;;  %v66_v48 = vpop.xlane.xlu1 %65 }
  0x99   :  { %v102_v50 = vmul.f32 0.03125, %v63_v47  ;;  %v103_v51 = vmul.f32 0.03125, %v66_v48  ;;  %v131_v52 = vmul.f32 %v3429_v44, %v3429_v44  ;;  %v133_v53 = vmul.f32 %v3431_v45, %v3431_v45 }
  0x9b   :  { %v3439_v54 = vsub.f32 %v34_v8, %v102_v50  ;;  %v3441_v55 = vsub.f32 %v35_v9, %v103_v51  ;;  %v149_v56 = vsel %vm48_vm0, %v131_v52, 0.0  ;;  %v155_v59 = vsel %vm48_vm0, %v133_v53, 0.0  ;;  %v303_v53 = vld [vmem:[%s4387_s3 + $0x8] sm:$0xff] }
  0x9c   :  { %153 = vadd.xlane.f32.xlu0 %v152_v49  ;;  %150 = vadd.xlane.f32.xlu1 %v149_v56  ;;  %v69_v57 = vpop.xlane.xlu0 %68  ;;  %v72_v58 = vpop.xlane.xlu1 %71 }
  0x9d   :  { %v104_v60 = vmul.f32 0.03125, %v69_v57  ;;  %v105_v61 = vmul.f32 0.03125, %v72_v58  ;;  %v134_v62 = vmul.f32 %v3439_v54, %v3439_v54  ;;  %v135_v63 = vmul.f32 %v3441_v55, %v3441_v55  ;;  %v304_v57 = vld [vmem:[%s4387_s3 + $0x10] sm:$0xff]  ;;  %v305_v58 = vld [vmem:[%s4387_s3 + $0x18] sm:$0xff] }
  0x9f   :  { %v3450_v0 = vsub.f32 %v3354_v12, %v104_v60  ;;  %v3453_v1 = vsub.f32 %v3359_v13, %v105_v61  ;;  %v158_v2 = vsel %vm48_vm0, %v134_v62, 0.0  ;;  %v161_v5 = vsel %vm48_vm0, %v135_v63, 0.0 }
  0xa0   :  { %156 = vadd.xlane.f32.xlu1 %v155_v59  ;;  %159 = vadd.xlane.f32.xlu0 %v158_v2  ;;  %v75_v3 = vpop.xlane.xlu0 %74  ;;  %v78_v4 = vpop.xlane.xlu1 %77  ;;  %v315_v59 = vpack.c.bf16 %v305_v58, %v304_v57 }
  0xa1   :  { %v106_v6 = vmul.f32 0.03125, %v75_v3  ;;  %v107_v7 = vmul.f32 0.03125, %v78_v4  ;;  %v136_v8 = vmul.f32 %v3450_v0, %v3450_v0  ;;  %v137_v9 = vmul.f32 %v3453_v1, %v3453_v1 }
  0xa3   :  { %v3462_v10 = vsub.f32 %v3368_v16, %v106_v6  ;;  %v3465_v11 = vsub.f32 %v3373_v17, %v107_v7  ;;  %v164_v12 = vsel %vm48_vm0, %v136_v8, 0.0  ;;  %v167_v15 = vsel %vm48_vm0, %v137_v9, 0.0 }
  0xa4   :  { %162 = vadd.xlane.f32.xlu1 %v161_v5  ;;  %165 = vadd.xlane.f32.xlu0 %v164_v12  ;;  %v81_v13 = vpop.xlane.xlu0 %80  ;;  %v84_v14 = vpop.xlane.xlu1 %83 }
  0xa5   :  { %v108_v18 = vmul.f32 0.03125, %v81_v13  ;;  %v109_v19 = vmul.f32 0.03125, %v84_v14  ;;  %v138_v22 = vmul.f32 %v3462_v10, %v3462_v10  ;;  %v139_v16 = vmul.f32 %v3465_v11, %v3465_v11 }
  0xa7   :  { %v3474_v23 = vsub.f32 %v3382_v20, %v108_v18  ;;  %v3477_v17 = vsub.f32 %v3387_v21, %v109_v19  ;;  %v170_v26 = vsel %vm48_vm0, %v138_v22, 0.0  ;;  %v173_v31 = vsel %vm48_vm0, %v139_v16, 0.0 }
  0xa8   :  { %168 = vadd.xlane.f32.xlu1 %v167_v15  ;;  %171 = vadd.xlane.f32.xlu0 %v170_v26  ;;  %v87_v27 = vpop.xlane.xlu0 %86  ;;  %v90_v30 = vpop.xlane.xlu1 %89 }
  0xa9   :  { %v110_v32 = vmul.f32 0.03125, %v87_v27  ;;  %v111_v33 = vmul.f32 0.03125, %v90_v30  ;;  %v140_v34 = vmul.f32 %v3474_v23, %v3474_v23  ;;  %v141_v20 = vmul.f32 %v3477_v17, %v3477_v17 }
  0xab   :  { %v3486_v35 = vsub.f32 %v3396_v24, %v110_v32  ;;  %v3489_v21 = vsub.f32 %v3401_v25, %v111_v33  ;;  %v176_v38 = vsel %vm48_vm0, %v140_v34, 0.0  ;;  %v179_v41 = vsel %vm48_vm0, %v141_v20, 0.0  ;;  %v3527_v20 = vld [vmem:[%s4388_s1] ss:$0 sm:$0xff] }
  0xac   :  { %174 = vadd.xlane.f32.xlu1 %v173_v31  ;;  %177 = vadd.xlane.f32.xlu0 %v176_v38  ;;  %v93_v39 = vpop.xlane.xlu0 %92  ;;  %v96_v40 = vpop.xlane.xlu1 %95 }
  0xad   :  { %v112_v42 = vmul.f32 0.03125, %v93_v39  ;;  %v113_v43 = vmul.f32 0.03125, %v96_v40  ;;  %v142_v46 = vmul.f32 %v3486_v35, %v3486_v35  ;;  %v143_v24 = vmul.f32 %v3489_v21, %v3489_v21 }
  0xaf   :  { %v3498_v47 = vsub.f32 %v3410_v28, %v112_v42  ;;  %v3501_v25 = vsub.f32 %v3415_v29, %v113_v43  ;;  %v182_v48 = vsel %vm48_vm0, %v142_v46, 0.0  ;;  %v185_v49 = vsel %vm48_vm0, %v143_v24, 0.0  ;;  %v302_v29 = vld [vmem:[%s4387_s3] sm:$0xff] }
  0xb0   :  { %180 = vadd.xlane.f32.xlu1 %v179_v41  ;;  %183 = vadd.xlane.f32.xlu0 %v182_v48  ;;  %v314_v56 = vpack.c.bf16 %v303_v53, %v302_v29 }
  0xb1   :  { %v144_v50 = vmul.f32 %v3498_v47, %v3498_v47  ;;  %v145_v51 = vmul.f32 %v3501_v25, %v3501_v25 }
  0xb2   :  { %2830 = vmatprep.subr.bf16.mxu0 %v314_v56  ;;  %3062 = vmatprep.subr.bf16.mxu1 %v314_v56 }
  0xb3   :  { %v188_v52 = vsel %vm48_vm0, %v144_v50, 0.0  ;;  %v191_v28 = vsel %vm48_vm0, %v145_v51, 0.0  ;;  %2831 = vmatpush3.bf16.msra.mxu0 %v314_v56  ;;  %3064 = vmatpush3.bf16.msra.mxu1 %v314_v56 }
  0xb4   :  { %186 = vadd.xlane.f32.xlu1 %v185_v49  ;;  %189 = vadd.xlane.f32.xlu0 %v188_v52  ;;  %v3534_v49 = vld [vmem:[%s4389_s2] ss:$0 sm:$0xff] }
  0xb5   :  { %2832 = vmatprep.subr.bf16.mxu0 %v315_v59  ;;  %3063 = vmatprep.subr.bf16.mxu1 %v315_v59 }
  0xb7   :  { %2833 = vmatpush3.bf16.msra.mxu0 %v315_v59  ;;  %3065 = vmatpush3.bf16.msra.mxu1 %v315_v59 }
  0xb8   :  { %192 = vadd.xlane.f32.xlu1 %v191_v28 }
 0x125   :  { %v148_v60 = vpop.xlane.xlu0 %147 }
 0x126   :  { %v194_v61 = vmul.f32 0.03125, %v148_v60 }
 0x128   :  { %v210_v62 = vadd.f32 1e-05, %v194_v61 }
 0x129   :  { %v151_v63 = vpop.xlane.xlu1 %150  ;;  %v154_v2 = vpop.xlane.xlu0 %153 }
 0x12a   :  { %3114 = vrsqrt.f32 %v210_v62  ;;  %v195_v3 = vmul.f32 0.03125, %v151_v63  ;;  %v196_v4 = vmul.f32 0.03125, %v154_v2 }
 0x12c   :  { %v211_v5 = vadd.f32 1e-05, %v195_v3  ;;  %v212_v6 = vadd.f32 1e-05, %v196_v4 }
 0x12d   :  { %v157_v7 = vpop.xlane.xlu1 %156  ;;  %v160_v8 = vpop.xlane.xlu0 %159 }
 0x12e   :  { %3116 = vrsqrt.f32 %v211_v5  ;;  %v197_v9 = vmul.f32 0.03125, %v157_v7  ;;  %v198_v12 = vmul.f32 0.03125, %v160_v8 }
 0x12f   :  { %3118 = vrsqrt.f32 %v212_v6 }
 0x130   :  { %v213_v13 = vadd.f32 1e-05, %v197_v9  ;;  %v214_v14 = vadd.f32 1e-05, %v198_v12 }
 0x131   :  { %v163_v15 = vpop.xlane.xlu1 %162  ;;  %v166_v18 = vpop.xlane.xlu0 %165 }
 0x132   :  { %3120 = vrsqrt.f32 %v213_v13  ;;  %v199_v19 = vmul.f32 0.03125, %v163_v15  ;;  %v200_v22 = vmul.f32 0.03125, %v166_v18 }
 0x133   :  { %3122 = vrsqrt.f32 %v214_v14 }
 0x134   :  { %v3115_v16 = vpop.eup %3114  ;;  %v215_v26 = vadd.f32 1e-05, %v199_v19  ;;  %v216_v27 = vadd.f32 1e-05, %v200_v22 }
 0x135   :  { %v169_v30 = vpop.xlane.xlu1 %168  ;;  %v172_v31 = vpop.xlane.xlu0 %171  ;;  %v242_v32 = vmul.f32 %v3115_v16, %v3421_v36 }
 0x136   :  { %3124 = vrsqrt.f32 %v215_v26  ;;  %v201_v33 = vmul.f32 0.03125, %v169_v30  ;;  %v202_v34 = vmul.f32 0.03125, %v172_v31 }
 0x137   :  { %3126 = vrsqrt.f32 %v216_v27  ;;  %v264_v24 = vmul.f32 %v3527_v20, %v242_v32 }
 0x138   :  { %v3117_v38 = vpop.eup %3116  ;;  %v217_v39 = vadd.f32 1e-05, %v201_v33  ;;  %v218_v40 = vadd.f32 1e-05, %v202_v34 }
 0x139   :  { %v3119_v41 = vpop.eup %3118  ;;  %v175_v42 = vpop.xlane.xlu1 %174  ;;  %v243_v46 = vmul.f32 %v3117_v38, %v3429_v44  ;;  %v286_v57 = vadd.f32 %v3534_v49, %v264_v24 }
 0x13a   :  { %v178_v43 = vpop.xlane.xlu0 %177  ;;  %3128 = vrsqrt.f32 %v217_v39  ;;  %v203_v36 = vmul.f32 0.03125, %v175_v42  ;;  %v244_v50 = vmul.f32 %v3119_v41, %v3423_v37 }
 0x13b   :  { %v204_v48 = vmul.f32 0.03125, %v178_v43  ;;  %3130 = vrsqrt.f32 %v218_v40  ;;  %v265_v51 = vmul.f32 %v3527_v20, %v243_v46 }
 0x13c   :  { %v3121_v52 = vpop.eup %3120  ;;  %v219_v28 = vadd.f32 1e-05, %v203_v36  ;;  %v266_v60 = vmul.f32 %v3527_v20, %v244_v50 }
 0x13d   :  { %v220_v29 = vadd.f32 1e-05, %v204_v48  ;;  %v3123_v53 = vpop.eup %3122  ;;  %v181_v44 = vpop.xlane.xlu1 %180  ;;  %v287_v58 = vadd.f32 %v3534_v49, %v265_v51  ;;  %v245_v59 = vmul.f32 %v3121_v52, %v3431_v45 }
 0x13e   :  { %v184_v56 = vpop.xlane.xlu0 %183  ;;  %3132 = vrsqrt.f32 %v219_v28  ;;  %v205_v61 = vmul.f32 0.03125, %v181_v44  ;;  %v246_v2 = vmul.f32 %v3123_v53, %v3439_v54  ;;  %v288_v45 = vadd.f32 %v3534_v49, %v266_v60 }
 0x13f   :  { %v206_v37 = vmul.f32 0.03125, %v184_v56  ;;  %3134 = vrsqrt.f32 %v220_v29  ;;  %v306_v62 = vpack.c.bf16 %v287_v58, %v286_v57  ;;  %v267_v63 = vmul.f32 %v3527_v20, %v245_v59 }
 0x140   :  { %v3125_v3 = vpop.eup %3124  ;;  %v221_v4 = vadd.f32 1e-05, %v205_v61  ;;  %v268_v13 = vmul.f32 %v3527_v20, %v246_v2 }
 0x141   :  { %v222_v5 = vadd.f32 1e-05, %v206_v37  ;;  %v3127_v6 = vpop.eup %3126  ;;  %v187_v7 = vpop.xlane.xlu1 %186  ;;  %2834 = vmatprep.mubr.msk.bf16.mxu0 %vm48_vm0, %v306_v62  ;;  %v289_v9 = vadd.f32 %v3534_v49, %v267_v63  ;;  %v247_v12 = vmul.f32 %v3125_v3, %v3441_v55 }
 0x142   :  { %v190_v8 = vpop.xlane.xlu0 %189  ;;  %3136 = vrsqrt.f32 %v221_v4  ;;  %v207_v14 = vmul.f32 0.03125, %v187_v7  ;;  %v248_v54 = vmul.f32 %v3127_v6, %v3450_v0  ;;  %v290_v55 = vadd.f32 %v3534_v49, %v268_v13 }
 0x143   :  { %v208_v15 = vmul.f32 0.03125, %v190_v8  ;;  %3138 = vrsqrt.f32 %v222_v5  ;;  %v307_v18 = vpack.c.bf16 %v289_v9, %v288_v45  ;;  %v269_v19 = vmul.f32 %v3527_v20, %v247_v12  ;;  %v2694_v45 = vld [vmem:[%s4390_s4] ss:$0 sm:$0xff]  ;;  %s3277_s4 = smov 64  }
 0x144   :  { %v3129_v22 = vpop.eup %3128  ;;  %v223_v16 = vadd.f32 1e-05, %v207_v14  ;;  %v270_v33 = vmul.f32 %v3527_v20, %v248_v54  ;;  %v3274_v8 = vmov 0.0  }
 0x145   :  { %v224_v26 = vadd.f32 1e-05, %v208_v15  ;;  %v3131_v27 = vpop.eup %3130  ;;  %v193_v30 = vpop.xlane.xlu1 %192  ;;  %2835 = vmatmul.mubr.msk.bf16.vlgmr.msra.gmra.mrb[0].mxu0 %vm48_vm0, %v307_v18  ;;  %v291_v31 = vadd.f32 %v3534_v49, %v269_v19  ;;  %v249_v32 = vmul.f32 %v3129_v22, %v3453_v1  ;;  %2850 = vmatprep.subr.bf16.mxu1 %v3274_v8 }
 0x146   :  { %3140 = vrsqrt.f32 %v223_v16  ;;  %v209_v0 = vmul.f32 0.03125, %v193_v30  ;;  %v250_v34 = vmul.f32 %v3131_v27, %v3462_v10  ;;  %v292_v43 = vadd.f32 %v3534_v49, %v270_v33  ;;  %2874 = vmatprep.subr.bf16.mxu0 %v3274_v8 }
 0x147   :  { %3142 = vrsqrt.f32 %v224_v26  ;;  %v308_v38 = vpack.c.bf16 %v291_v31, %v290_v55  ;;  %v271_v39 = vmul.f32 %v3527_v20, %v249_v32 }
 0x148   :  { %v3133_v40 = vpop.eup %3132  ;;  %v225_v41 = vadd.f32 1e-05, %v209_v0  ;;  %v272_v24 = vmul.f32 %v3527_v20, %v250_v34 }
 0x149   :  { %v3135_v42 = vpop.eup %3134  ;;  %2838 = vmatprep.mubr.msk.bf16.mxu0 %vm48_vm0, %v308_v38  ;;  %v293_v46 = vadd.f32 %v3534_v49, %v271_v39  ;;  %v251_v1 = vmul.f32 %v3133_v40, %v3465_v11 }
 0x14a   :  { %3144 = vrsqrt.f32 %v225_v41  ;;  %v252_v10 = vmul.f32 %v3135_v42, %v3474_v23  ;;  %v294_v52 = vadd.f32 %v3534_v49, %v272_v24 }
 0x14b   :  { %v309_v36 = vpack.c.bf16 %v293_v46, %v292_v43  ;;  %v273_v48 = vmul.f32 %v3527_v20, %v251_v1 }
 0x14c   :  { %v3137_v50 = vpop.eup %3136  ;;  %v274_v11 = vmul.f32 %v3527_v20, %v252_v10 }
 0x14d   :  { %v3139_v51 = vpop.eup %3138  ;;  %2839 = vmatmul.mubr.msk.bf16.gmra.mrb[4].mxu0 %vm48_vm0, %v309_v36  ;;  %v295_v28 = vadd.f32 %v3534_v49, %v273_v48  ;;  %v253_v29 = vmul.f32 %v3137_v50, %v3477_v17 }
 0x14e   :  { %v254_v53 = vmul.f32 %v3139_v51, %v3486_v35  ;;  %v296_v58 = vadd.f32 %v3534_v49, %v274_v11  ;;  %2876 = vmatprep.mubr.msk.bf16.mxu0 %vm3275_vm1, %v3274_v8 }
 0x14f   :  { %v310_v44 = vpack.c.bf16 %v295_v28, %v294_v52  ;;  %v275_v23 = vmul.f32 %v3527_v20, %v253_v29 }
 0x150   :  { %v3141_v56 = vpop.eup %3140  ;;  %v276_v61 = vmul.f32 %v3527_v20, %v254_v53 }
 0x151   :  { %v3143_v57 = vpop.eup %3142  ;;  %2842 = vmatprep.mubr.msk.bf16.mxu1 %vm48_vm0, %v310_v44  ;;  %v297_v59 = vadd.f32 %v3534_v49, %v275_v23  ;;  %v255_v60 = vmul.f32 %v3141_v56, %v3489_v21 }
 0x152   :  { %v256_v17 = vmul.f32 %v3143_v57, %v3498_v47  ;;  %v298_v63 = vadd.f32 %v3534_v49, %v276_v61 }
 0x153   :  { %v311_v37 = vpack.c.bf16 %v297_v59, %v296_v58  ;;  %v277_v35 = vmul.f32 %v3527_v20, %v255_v60 }
 0x154   :  { %v3145_v62 = vpop.eup %3144  ;;  %v278_v4 = vmul.f32 %v3527_v20, %v256_v17 }
 0x155   :  { %2843 = vmatmul.mubr.msk.bf16.vlgmr.msra.gmra.mrb[0].mxu1 %vm48_vm0, %v311_v37  ;;  %v299_v2 = vadd.f32 %v3534_v49, %v277_v35  ;;  %v257_v3 = vmul.f32 %v3145_v62, %v3501_v25 }
 0x156   :  { %v300_v47 = vadd.f32 %v3534_v49, %v278_v4 }
 0x157   :  { %v312_v5 = vpack.c.bf16 %v299_v2, %v298_v63  ;;  %v279_v21 = vmul.f32 %v3527_v20, %v257_v3 }
 0x159   :  { %2846 = vmatprep.mubr.msk.bf16.mxu1 %vm48_vm0, %v312_v5  ;;  %v301_v6 = vadd.f32 %v3534_v49, %v279_v21 }
 0x15b   :  { %v313_v7 = vpack.c.bf16 %v301_v6, %v300_v47  ;;  %v3691_v47 = vld [vmem:[%s4391_s5] sm:$0xff] }
 0x15d   :  { %2847 = vmatmul.mubr.msk.bf16.gmra.mrb[4].mxu1 %vm48_vm0, %v313_v7 }
 0x15e   :  { %2852 = vmatprep.mubr.msk.bf16.mxu1 %vm3275_vm1, %v3274_v8 }
 0x218   :  { %v2836_v25 = vpop.f32.mrb[0].mxu0 }
 0x219   :  { %v381_v20 = vpop.f32.mrb[1].mxu0  ;;  %v390_v12 = vadd.f32 %v2836_v25, %v2694_v45 }
 0x21a   :  { %v2837_v9 = vpop.f32.mrb[2].mxu0  ;;  %v382_v15 = vadd.f32 %v2694_v45, %v381_v20 }
 0x21b   :  { %v393_v13 = vadd.f32 %v2837_v9, %v2694_v45  ;;  %v384_v14 = vpop.f32.mrb[3].mxu0 }
 0x21c   :  { %v385_v49 = vadd.f32 %v2694_v45, %v384_v14 }
 0x21d   :  { %v3598_v54 = vpack.c.bf16 %v393_v13, %v390_v12 }
 0x21e   :  { %v3600_v18 = vpack.c.bf16 %v385_v49, %v382_v15 }
 0x21f   :  { %504 = vrot.lane.b32.xlu1 %v3598_v54, %s3276_s25 }
 0x220   :  { %453 = vrot.lane.b32.xlu0 %v3600_v18, %s3276_s25  ;;  %v2840_v19 = vpop.f32.mrb[4].mxu0 }
 0x221   :  { %v397_v22 = vpop.f32.mrb[5].mxu0  ;;  %v406_v26 = vadd.f32 %v2840_v19, %v2694_v45 }
 0x222   :  { %v2841_v16 = vpop.f32.mrb[6].mxu0  ;;  %v398_v55 = vadd.f32 %v2694_v45, %v397_v22 }
 0x223   :  { %v409_v27 = vadd.f32 %v2841_v16, %v2694_v45  ;;  %v400_v30 = vpop.f32.mrb[7].mxu0 }
 0x224   :  { %v401_v31 = vadd.f32 %v2694_v45, %v400_v30 }
 0x225   :  { %v3606_v32 = vpack.c.bf16 %v409_v27, %v406_v26 }
 0x226   :  { %v3608_v33 = vpack.c.bf16 %v401_v31, %v398_v55 }
 0x228   :  { %554 = vrot.lane.b32.xlu1 %v3608_v33, %s3276_s25  ;;  %v2844_v0 = vpop.f32.mrb[0].mxu1 }
 0x229   :  { %v413_v34 = vpop.f32.mrb[1].mxu1  ;;  %v422_v39 = vadd.f32 %v2844_v0, %v2694_v45 }
 0x22a   :  { %v2845_v38 = vpop.f32.mrb[2].mxu1  ;;  %v414_v42 = vadd.f32 %v2694_v45, %v413_v34 }
 0x22b   :  { %v425_v40 = vadd.f32 %v2845_v38, %v2694_v45  ;;  %v416_v41 = vpop.f32.mrb[3].mxu1 }
 0x22c   :  { %v417_v43 = vadd.f32 %v2694_v45, %v416_v41  ;;  %604 = vrot.lane.b32.xlu1 %v3606_v32, %s3276_s25 }
 0x22d   :  { %v3614_v46 = vpack.c.bf16 %v425_v40, %v422_v39 }
 0x22e   :  { %v3616_v1 = vpack.c.bf16 %v417_v43, %v414_v42 }
 0x230   :  { %704 = vrot.lane.b32.xlu1 %v3614_v46, %s3276_s25  ;;  %654 = vrot.lane.b32.xlu0 %v3616_v1, %s3276_s25  ;;  %v2848_v24 = vpop.f32.mrb[4].mxu1 }
 0x231   :  { %v429_v10 = vpop.f32.mrb[5].mxu1  ;;  %v438_v48 = vadd.f32 %v2848_v24, %v2694_v45 }
 0x232   :  { %v2849_v36 = vpop.f32.mrb[6].mxu1  ;;  %v430_v52 = vadd.f32 %v2694_v45, %v429_v10 }
 0x233   :  { %v441_v50 = vadd.f32 %v2849_v36, %v2694_v45  ;;  %v432_v51 = vpop.f32.mrb[7].mxu1 }
 0x234   :  { %v433_v28 = vadd.f32 %v2694_v45, %v432_v51  ;;  %v3696_v45 = vld [vmem:[%s4391_s5 + $0x8] sm:$0xff] }
 0x235   :  { %v3622_v29 = vpack.c.bf16 %v441_v50, %v438_v48 }
 0x236   :  { %v3624_v11 = vpack.c.bf16 %v433_v28, %v430_v52 }
 0x237   :  { %804 = vrot.lane.b32.xlu1 %v3622_v29, %s3276_s25 }
 0x238   :  { %754 = vrot.lane.b32.xlu0 %v3624_v11, %s3276_s25 }
 0x23b   :  { %1118 = vrot.lane.b32.xlu1 %v3598_v54, %s3277_s4 }
 0x23c   :  { %1071 = vrot.lane.b32.xlu0 %v3600_v18, %s3277_s4 }
 0x23f   :  { %1212 = vrot.lane.b32.xlu1 %v3606_v32, %s3277_s4 }
 0x243   :  { %1165 = vrot.lane.b32.xlu1 %v3608_v33, %s3277_s4 }
 0x291   :  { %v505_v23 = vpop.permute.xlu1 %504 }
 0x292   :  { %v454_v53 = vpop.permute.xlu0 %453  ;;  %v510_v56 = vsel %vm455_vm2, %v505_v23, 0 }
 0x293   :  { %v460_v44 = vsel %vm455_vm2, %v454_v53, 0 }
 0x294   :  { %2851 = vmatpush3.bf16.xpose.msra.mxu1 %v460_v44 }
 0x295   :  { %2856 = vmatprep.subr.bf16.mxu1 %v3274_v8 }
 0x29a   :  { %v555_v57 = vpop.permute.xlu1 %554 }
 0x29b   :  { %2853 = vmatmul.mubr.msk.bf16.vlgmr.msra.gmra.mrb[8].mxu1 %vm455_vm2, %v3600_v18  ;;  %v560_v59 = vsel %vm455_vm2, %v555_v57, 0 }
 0x29c   :  { %2857 = vmatpush3.bf16.xpose.msra.mxu1 %v510_v56  ;;  %2858 = vmatprep.mubr.msk.bf16.mxu1 %vm3275_vm1, %v3274_v8 }
 0x29d   :  { %2862 = vmatprep.subr.bf16.mxu1 %v3274_v8 }
 0x29e   :  { %v605_v61 = vpop.permute.xlu1 %604 }
 0x29f   :  { %v610_v37 = vsel %vm455_vm2, %v605_v61, 0 }
 0x2a2   :  { %v655_v58 = vpop.permute.xlu0 %654  ;;  %v705_v62 = vpop.permute.xlu1 %704 }
 0x2a3   :  { %v660_v60 = vsel %vm455_vm2, %v655_v58, 0  ;;  %2859 = vmatmul.mubr.msk.bf16.vlgmr.msra.gmra.mrb[12].mxu1 %vm455_vm2, %v3598_v54  ;;  %v710_v63 = vsel %vm455_vm2, %v705_v62, 0 }
 0x2a4   :  { %2863 = vmatpush3.bf16.xpose.msra.mxu1 %v560_v59  ;;  %2875 = vmatpush3.bf16.xpose.msra.mxu0 %v660_v60 }
 0x2a5   :  { %2864 = vmatprep.mubr.msk.bf16.mxu1 %vm3275_vm1, %v3274_v8  ;;  %2868 = vmatprep.subr.bf16.mxu1 %v3274_v8 }
 0x2a6   :  { %2886 = vmatprep.subr.bf16.mxu0 %v3274_v8 }
 0x2a9   :  { %v805_v3 = vpop.permute.xlu1 %804 }
 0x2aa   :  { %v755_v17 = vpop.permute.xlu0 %754  ;;  %v810_v4 = vsel %vm455_vm2, %v805_v3, 0 }
 0x2ab   :  { %v760_v35 = vsel %vm455_vm2, %v755_v17, 0  ;;  %2865 = vmatmul.mubr.msk.bf16.vlgmr.msra.gmra.mrb[16].mxu1 %vm455_vm2, %v3608_v33  ;;  %2877 = vmatmul.mubr.msk.bf16.vlgmr.msra.gmra.mrb[8].mxu0 %vm455_vm2, %v3616_v1 }
 0x2ac   :  { %2869 = vmatpush3.bf16.xpose.msra.mxu1 %v610_v37  ;;  %2887 = vmatpush3.bf16.xpose.msra.mxu0 %v760_v35 }
 0x2ad   :  { %2870 = vmatprep.mubr.msk.bf16.mxu1 %vm3275_vm1, %v3274_v8  ;;  %2888 = vmatprep.mubr.msk.bf16.mxu0 %vm3275_vm1, %v3274_v8  ;;  %v1119_v5 = vpop.permute.xlu1 %1118 }
 0x2ae   :  { %2880 = vmatprep.subr.bf16.mxu1 %v3274_v8  ;;  %2898 = vmatprep.subr.bf16.mxu0 %v3274_v8  ;;  %v1072_v2 = vpop.permute.xlu0 %1071 }
 0x2b3   :  { %2871 = vmatmul.mubr.msk.bf16.vlgmr.msra.gmra.mrb[20].mxu1 %vm455_vm2, %v3606_v32  ;;  %2889 = vmatmul.mubr.msk.bf16.vlgmr.msra.gmra.mrb[12].mxu0 %vm455_vm2, %v3624_v11 }
 0x2b4   :  { %2881 = vmatpush3.bf16.xpose.msra.mxu1 %v710_v63  ;;  %2899 = vmatpush3.bf16.msra.mxu0 %v1072_v2 }
 0x2b5   :  { %2882 = vmatprep.mubr.msk.bf16.mxu1 %vm3275_vm1, %v3274_v8  ;;  %2892 = vmatprep.subr.bf16.mxu1 %v3274_v8 }
 0x2b6   :  { %2900 = vmatprep.mubr.msk.bf16.mxu0 %vm3275_vm1, %v3274_v8  ;;  %2910 = vmatprep.subr.bf16.mxu0 %v3274_v8 }
 0x2bb   :  { %2883 = vmatmul.mubr.msk.bf16.vlgmr.msra.gmra.mrb[24].mxu1 %vm455_vm2, %v3614_v46 }
 0x2bc   :  { %2893 = vmatpush3.bf16.xpose.msra.mxu1 %v810_v4  ;;  %2894 = vmatprep.mubr.msk.bf16.mxu1 %vm3275_vm1, %v3274_v8 }
 0x2bd   :  { %2904 = vmatprep.subr.bf16.mxu1 %v3274_v8 }
 0x2c3   :  { %2895 = vmatmul.mubr.msk.bf16.vlgmr.msra.gmra.mrb[28].mxu1 %vm455_vm2, %v3622_v29 }
 0x2c4   :  { %2905 = vmatpush3.bf16.msra.mxu1 %v1119_v5  ;;  %2906 = vmatprep.mubr.msk.bf16.mxu1 %vm3275_vm1, %v3274_v8 }
 0x2c5   :  { %2916 = vmatprep.subr.bf16.mxu1 %v3274_v8 }
 0x36e   :  { %v496_v21 = vpop.f32.mrb[8].mxu1 }
 0x36f   :  { %v853_v6 = vmul.f32 0.25, %v496_v21  ;;  %v2854_v7 = vpop.f32.mrb[9].mxu1 }
 0x370   :  { %v499_v25 = vpop.f32.mrb[10].mxu1 }
 0x371   :  { %v854_v20 = vmul.f32 0.25, %v499_v25  ;;  %v2855_v9 = vpop.f32.mrb[11].mxu1  ;;  %v3699_v12 = vadd.f32 %v3691_v47, %v853_v6 }
 0x373   :  { %v887_v13 = vsel %vm455_vm2, %v3699_v12, -inf  ;;  %v3704_v14 = vadd.f32 %v3696_v45, %v854_v20 }
 0x374   :  { %888 = vmax.xlane.f32.xlu0 %v887_v13 }
 0x375   :  { %v890_v15 = vsel %vm455_vm2, %v3704_v14, -inf }
 0x376   :  { %891 = vmax.xlane.f32.xlu1 %v890_v15  ;;  %v546_v49 = vpop.f32.mrb[12].mxu1 }
 0x377   :  { %v2860_v19 = vpop.f32.mrb[13].mxu1  ;;  %v855_v30 = vmul.f32 0.25, %v546_v49 }
 0x378   :  { %v549_v22 = vpop.f32.mrb[14].mxu1 }
 0x379   :  { %v2861_v16 = vpop.f32.mrb[15].mxu1  ;;  %v3717_v10 = vadd.f32 %v3691_v47, %v855_v30  ;;  %v856_v51 = vmul.f32 0.25, %v549_v22 }
 0x37b   :  { %v893_v44 = vsel %vm455_vm2, %v3717_v10, -inf  ;;  %v3732_v62 = vadd.f32 %v3696_v45, %v856_v51 }
 0x37d   :  { %v896_v6 = vsel %vm455_vm2, %v3732_v62, -inf }
 0x37e   :  { %v596_v26 = vpop.f32.mrb[16].mxu1  ;;  %v696_v27 = vpop.f32.mrb[8].mxu0 }
 0x37f   :  { %v861_v55 = vmul.f32 0.25, %v696_v27  ;;  %v2866_v31 = vpop.f32.mrb[17].mxu1  ;;  %v2878_v0 = vpop.f32.mrb[9].mxu0  ;;  %v857_v17 = vmul.f32 0.25, %v596_v26 }
 0x380   :  { %v599_v34 = vpop.f32.mrb[18].mxu1  ;;  %v699_v38 = vpop.f32.mrb[10].mxu0 }
 0x381   :  { %v862_v39 = vmul.f32 0.25, %v699_v38  ;;  %v2867_v40 = vpop.f32.mrb[19].mxu1  ;;  %v2879_v41 = vpop.f32.mrb[11].mxu0  ;;  %v3709_v42 = vadd.f32 %v3691_v47, %v861_v55  ;;  %v858_v57 = vmul.f32 0.25, %v599_v34  ;;  %v3742_v7 = vadd.f32 %v3691_v47, %v857_v17 }
 0x383   :  { %v911_v43 = vsel %vm455_vm2, %v3709_v42, -inf  ;;  %v3714_v24 = vadd.f32 %v3696_v45, %v862_v39  ;;  %v3737_v3 = vadd.f32 %v3696_v45, %v858_v57  ;;  %v899_v19 = vsel %vm455_vm2, %v3742_v7, -inf }
 0x384   :  { %912 = vmax.xlane.f32.xlu0 %v911_v43 }
 0x385   :  { %v914_v36 = vsel %vm455_vm2, %v3714_v24, -inf  ;;  %v902_v13 = vsel %vm455_vm2, %v3737_v3, -inf }
 0x386   :  { %v646_v48 = vpop.f32.mrb[20].mxu1  ;;  %915 = vmax.xlane.f32.xlu1 %v914_v36  ;;  %v796_v50 = vpop.f32.mrb[12].mxu0 }
 0x387   :  { %v865_v52 = vmul.f32 0.25, %v796_v50  ;;  %v2872_v28 = vpop.f32.mrb[21].mxu1  ;;  %v2890_v53 = vpop.f32.mrb[13].mxu0  ;;  %v859_v5 = vmul.f32 0.25, %v646_v48 }
 0x388   :  { %v649_v23 = vpop.f32.mrb[22].mxu1  ;;  %894 = vmax.xlane.f32.xlu0 %v893_v44  ;;  %v799_v56 = vpop.f32.mrb[14].mxu0 }
 0x389   :  { %v866_v58 = vmul.f32 0.25, %v799_v56  ;;  %v2873_v59 = vpop.f32.mrb[23].mxu1  ;;  %v2891_v60 = vpop.f32.mrb[15].mxu0  ;;  %v3724_v61 = vadd.f32 %v3691_v47, %v865_v52  ;;  %v860_v63 = vmul.f32 0.25, %v649_v23  ;;  %v3752_v22 = vadd.f32 %v3691_v47, %v859_v5 }
 0x38b   :  { %v923_v37 = vsel %vm455_vm2, %v3724_v61, -inf  ;;  %v3729_v35 = vadd.f32 %v3696_v45, %v866_v58  ;;  %v3747_v15 = vadd.f32 %v3696_v45, %v860_v63  ;;  %v905_v31 = vsel %vm455_vm2, %v3752_v22, -inf }
 0x38c   :  { %924 = vmax.xlane.f32.xlu0 %v923_v37 }
 0x38d   :  { %v926_v2 = vsel %vm455_vm2, %v3729_v35, -inf  ;;  %v908_v16 = vsel %vm455_vm2, %v3747_v15, -inf }
 0x38e   :  { %v746_v4 = vpop.f32.mrb[24].mxu1  ;;  %927 = vmax.xlane.f32.xlu1 %v926_v2 }
 0x38f   :  { %v2884_v21 = vpop.f32.mrb[25].mxu1  ;;  %v863_v49 = vmul.f32 0.25, %v746_v4 }
 0x390   :  { %v749_v25 = vpop.f32.mrb[26].mxu1  ;;  %897 = vmax.xlane.f32.xlu0 %v896_v6 }
 0x391   :  { %v864_v20 = vmul.f32 0.25, %v749_v25  ;;  %v2885_v9 = vpop.f32.mrb[27].mxu1  ;;  %v3762_v0 = vadd.f32 %v3691_v47, %v863_v49 }
 0x392   :  { %903 = vmax.xlane.f32.xlu1 %v902_v13 }
 0x393   :  { %v3757_v26 = vadd.f32 %v3696_v45, %v864_v20  ;;  %v917_v41 = vsel %vm455_vm2, %v3762_v0, -inf }
 0x394   :  { %900 = vmax.xlane.f32.xlu0 %v899_v19 }
 0x395   :  { %v920_v40 = vsel %vm455_vm2, %v3757_v26, -inf }
 0x396   :  { %v846_v27 = vpop.f32.mrb[28].mxu1  ;;  %909 = vmax.xlane.f32.xlu1 %v908_v16 }
 0x397   :  { %v867_v30 = vmul.f32 0.25, %v846_v27  ;;  %v2896_v55 = vpop.f32.mrb[29].mxu1 }
 0x398   :  { %v849_v34 = vpop.f32.mrb[30].mxu1  ;;  %906 = vmax.xlane.f32.xlu0 %v905_v31 }
 0x399   :  { %v868_v38 = vmul.f32 0.25, %v849_v34  ;;  %v2897_v39 = vpop.f32.mrb[31].mxu1  ;;  %v3769_v43 = vadd.f32 %v3691_v47, %v867_v30  ;;  %v3782_v47 = vpop.permute.xlu1 %1212 }
 0x39a   :  { %921 = vmax.xlane.f32.xlu1 %v920_v40 }
 0x39b   :  { %v3772_v36 = vadd.f32 %v3696_v45, %v868_v38  ;;  %v929_v48 = vsel %vm455_vm2, %v3769_v43, -inf }
 0x39c   :  { %918 = vmax.xlane.f32.xlu0 %v917_v41 }
 0x39d   :  { %v932_v50 = vsel %vm455_vm2, %v3772_v36, -inf  ;;  %v3784_v51 = vpop.permute.xlu1 %1165 }
 0x3a0   :  { %930 = vmax.xlane.f32.xlu0 %v929_v48 }
 0x3ab   :  { %1306 = vrot.lane.b32.xlu1 %v3614_v46, %s3277_s4 }
 0x3b6   :  { %1259 = vrot.lane.b32.xlu0 %v3616_v1, %s3277_s4 }
 0x3cf   :  { %933 = vmax.xlane.f32.xlu1 %v932_v50 }
 0x401   :  { %v889_v45 = vpop.xlane.xlu0 %888 }
 0x402   :  { %v935_v52 = vsub.f32 %v3699_v12, %v889_v45 }
 0x403   :  { %v892_v28 = vpop.xlane.xlu1 %891 }
 0x404   :  { %v951_v53 = vmul.f32 1.442695, %v935_v52  ;;  %v936_v44 = vsub.f32 %v3704_v14, %v892_v28 }
 0x406   :  { %3146 = vpow2.f32 %v951_v53  ;;  %v953_v23 = vmul.f32 1.442695, %v936_v44 }
 0x408   :  { %3148 = vpow2.f32 %v953_v23 }
 0x410   :  { %v3788_v56 = vpop.eup %3146 }
 0x411   :  { %v913_v57 = vpop.xlane.xlu0 %912  ;;  %v983_v58 = vsel %vm455_vm2, %v3788_v56, 0.0 }
 0x412   :  { %v3792_v59 = vpop.eup %3148  ;;  %v943_v60 = vsub.f32 %v3709_v42, %v913_v57  ;;  %984 = vadd.xlane.f32.xlu0 %v983_v58 }
 0x413   :  { %v916_v17 = vpop.xlane.xlu1 %915  ;;  %v986_v12 = vsel %vm455_vm2, %v3792_v59, 0.0 }
 0x414   :  { %v967_v37 = vmul.f32 1.442695, %v943_v60  ;;  %v944_v14 = vsub.f32 %v3714_v24, %v916_v17  ;;  %987 = vadd.xlane.f32.xlu1 %v986_v12 }
 0x415   :  { %v895_v63 = vpop.xlane.xlu0 %894 }
 0x416   :  { %3150 = vpow2.f32 %v967_v37  ;;  %v969_v2 = vmul.f32 1.442695, %v944_v14  ;;  %v937_v4 = vsub.f32 %v3717_v10, %v895_v63 }
 0x418   :  { %3152 = vpow2.f32 %v969_v2  ;;  %v955_v5 = vmul.f32 1.442695, %v937_v4 }
 0x419   :  { %v925_v21 = vpop.xlane.xlu0 %924 }
 0x41a   :  { %3154 = vpow2.f32 %v955_v5  ;;  %v947_v42 = vsub.f32 %v3724_v61, %v925_v21 }
 0x41b   :  { %v928_v6 = vpop.xlane.xlu1 %927 }
 0x41c   :  { %v975_v25 = vmul.f32 1.442695, %v947_v42  ;;  %v948_v20 = vsub.f32 %v3729_v35, %v928_v6 }
 0x41d   :  { %v898_v9 = vpop.xlane.xlu0 %897 }
 0x41e   :  { %3156 = vpow2.f32 %v975_v25  ;;  %v938_v24 = vsub.f32 %v3732_v62, %v898_v9  ;;  %v977_v19 = vmul.f32 1.442695, %v948_v20 }
 0x41f   :  { %v904_v13 = vpop.xlane.xlu1 %903 }
 0x420   :  { %v3802_v49 = vpop.eup %3150  ;;  %v957_v16 = vmul.f32 1.442695, %v938_v24  ;;  %v940_v10 = vsub.f32 %v3737_v3, %v904_v13 }
 0x421   :  { %v901_v27 = vpop.xlane.xlu0 %900  ;;  %v1007_v30 = vsel %vm455_vm2, %v3802_v49, 0.0 }
 0x422   :  { %v3807_v61 = vpop.eup %3152  ;;  %3158 = vpow2.f32 %v957_v16  ;;  %v939_v35 = vsub.f32 %v3742_v7, %v901_v27  ;;  %1008 = vadd.xlane.f32.xlu0 %v1007_v30  ;;  %v961_v34 = vmul.f32 1.442695, %v940_v10 }
 0x423   :  { %v910_v55 = vpop.xlane.xlu1 %909  ;;  %v1010_v62 = vsel %vm455_vm2, %v3807_v61, 0.0  ;;  %3160 = vpow2.f32 %v977_v19 }
 0x424   :  { %v3812_v31 = vpop.eup %3154  ;;  %v959_v38 = vmul.f32 1.442695, %v939_v35  ;;  %v942_v3 = vsub.f32 %v3747_v15, %v910_v55  ;;  %1011 = vadd.xlane.f32.xlu1 %v1010_v62 }
 0x425   :  { %v907_v39 = vpop.xlane.xlu0 %906  ;;  %v989_v40 = vsel %vm455_vm2, %v3812_v31, 0.0 }
 0x426   :  { %3162 = vpow2.f32 %v959_v38  ;;  %v941_v7 = vsub.f32 %v3752_v22, %v907_v39  ;;  %990 = vadd.xlane.f32.xlu0 %v989_v40  ;;  %v965_v48 = vmul.f32 1.442695, %v942_v3 }
 0x427   :  { %3164 = vpow2.f32 %v961_v34  ;;  %v922_v4 = vpop.xlane.xlu1 %921 }
 0x428   :  { %v3818_v41 = vpop.eup %3156  ;;  %v963_v50 = vmul.f32 1.442695, %v941_v7  ;;  %v946_v21 = vsub.f32 %v3757_v26, %v922_v4 }
 0x429   :  { %v919_v45 = vpop.xlane.xlu0 %918  ;;  %v1019_v52 = vsel %vm455_vm2, %v3818_v41, 0.0 }
 0x42a   :  { %3166 = vpow2.f32 %v963_v50  ;;  %v945_v15 = vsub.f32 %v3762_v0, %v919_v45  ;;  %1020 = vadd.xlane.f32.xlu0 %v1019_v52  ;;  %v973_v6 = vmul.f32 1.442695, %v946_v21 }
 0x42b   :  { %3168 = vpow2.f32 %v965_v48  ;;  %v3869_v26 = vpop.permute.xlu1 %1306 }
 0x42c   :  { %v3823_v28 = vpop.eup %3158  ;;  %v971_v53 = vmul.f32 1.442695, %v945_v15 }
 0x42d   :  { %v992_v22 = vsel %vm455_vm2, %v3823_v28, 0.0  ;;  %v3827_v44 = vpop.eup %3160  ;;  %v931_v5 = vpop.xlane.xlu0 %930 }
 0x42e   :  { %3170 = vpow2.f32 %v971_v53  ;;  %993 = vadd.xlane.f32.xlu1 %v992_v22  ;;  %v1022_v57 = vsel %vm455_vm2, %v3827_v44, 0.0  ;;  %v949_v42 = vsub.f32 %v3769_v43, %v931_v5 }
 0x42f   :  { %3172 = vpow2.f32 %v973_v6 }
 0x430   :  { %v3829_v23 = vpop.eup %3162  ;;  %v979_v25 = vmul.f32 1.442695, %v949_v42 }
 0x431   :  { %v995_v0 = vsel %vm455_vm2, %v3829_v23, 0.0  ;;  %v3835_v58 = vpop.eup %3164  ;;  %v3882_v10 = vpop.permute.xlu0 %1259 }
 0x432   :  { %1023 = vadd.xlane.f32.xlu1 %v1022_v57  ;;  %996 = vadd.xlane.f32.xlu0 %v995_v0  ;;  %v998_v17 = vsel %vm455_vm2, %v3835_v58, 0.0  ;;  %3174 = vpow2.f32 %v979_v25 }
 0x434   :  { %v3837_v60 = vpop.eup %3166 }
 0x435   :  { %v1001_v12 = vsel %vm455_vm2, %v3837_v60, 0.0  ;;  %v3843_v37 = vpop.eup %3168 }
 0x436   :  { %999 = vadd.xlane.f32.xlu1 %v998_v17  ;;  %1002 = vadd.xlane.f32.xlu0 %v1001_v12  ;;  %v1004_v63 = vsel %vm455_vm2, %v3843_v37, 0.0 }
 0x438   :  { %v3845_v14 = vpop.eup %3170 }
 0x439   :  { %v1013_v2 = vsel %vm455_vm2, %v3845_v14, 0.0  ;;  %v3857_v20 = vpop.eup %3172 }
 0x43a   :  { %1005 = vadd.xlane.f32.xlu1 %v1004_v63  ;;  %1014 = vadd.xlane.f32.xlu0 %v1013_v2  ;;  %v1016_v24 = vsel %vm455_vm2, %v3857_v20, 0.0 }
 0x43c   :  { %v3859_v9 = vpop.eup %3174 }
 0x43d   :  { %v1025_v13 = vsel %vm455_vm2, %v3859_v9, 0.0 }
 0x44b   :  { %1400 = vrot.lane.b32.xlu1 %v3622_v29, %s3277_s4 }
 0x450   :  { %1353 = vrot.lane.b32.xlu0 %v3624_v11, %s3277_s4 }
 0x45c   :  { %v934_v43 = vpop.xlane.xlu1 %933 }
 0x45d   :  { %v950_v19 = vsub.f32 %v3772_v36, %v934_v43 }
 0x45f   :  { %v981_v16 = vmul.f32 1.442695, %v950_v19 }
 0x461   :  { %3176 = vpow2.f32 %v981_v16 }
 0x46b   :  { %v3886_v30 = vpop.eup %3176 }
 0x46c   :  { %v1028_v35 = vsel %vm455_vm2, %v3886_v30, 0.0 }
 0x46f   :  { %1017 = vadd.xlane.f32.xlu1 %v1016_v24  ;;  %1026 = vadd.xlane.f32.xlu0 %v1025_v13 }
 0x480   :  { %1500 = vrot.lane.b32.xlu1 %v3598_v54, %s3278_s30 }
 0x485   :  { %1449 = vrot.lane.b32.xlu0 %v3600_v18, %s3278_s30 }
 0x489   :  { %1447 = vrot.lane.b32.xlu0 %v3600_v18, %s3279_s9 }
 0x48d   :  { %1498 = vrot.lane.b32.xlu0 %v3598_v54, %s3279_s9 }
 0x491   :  { %1549 = vrot.lane.b32.xlu0 %v3608_v33, %s3279_s9 }
 0x495   :  { %1600 = vrot.lane.b32.xlu0 %v3606_v32, %s3279_s9 }
 0x499   :  { %1651 = vrot.lane.b32.xlu0 %v3616_v1, %s3279_s9 }
 0x49d   :  { %1702 = vrot.lane.b32.xlu0 %v3614_v46, %s3279_s9 }
 0x49f   :  { %v985_v27 = vpop.xlane.xlu0 %984 }
 0x4a0   :  { %3178 = vrcp.f32 %v985_v27 }
 0x4a1   :  { %v988_v36 = vpop.xlane.xlu1 %987  ;;  %1753 = vrot.lane.b32.xlu0 %v3624_v11, %s3279_s9 }
 0x4a2   :  { %3180 = vrcp.f32 %v988_v36 }
 0x4a4   :  { %1029 = vadd.xlane.f32.xlu1 %v1028_v35 }
 0x4aa   :  { %v3179_v55 = vpop.eup %3178 }
 0x4ab   :  { %v1047_v34 = vmul.f32 %v3179_v55, %v3788_v56 }
 0x4ac   :  { %v3181_v62 = vpop.eup %3180 }
 0x4ad   :  { %v1048_v38 = vmul.f32 %v3181_v62, %v3792_v59 }
 0x4af   :  { %v1009_v3 = vpop.xlane.xlu0 %1008  ;;  %v1063_v39 = vpack.c.bf16 %v1048_v38, %v1047_v34 }
 0x4b1   :  { %2901 = vmatmul.mubr.msk.bf16.vlgmr.msra.gmra.mrb[16].mxu0 %vm455_vm2, %v1063_v39  ;;  %v1012_v7 = vpop.xlane.xlu1 %1011 }
 0x4b2   :  { %2911 = vmatpush3.bf16.msra.mxu0 %v3784_v51  ;;  %2912 = vmatprep.mubr.msk.bf16.mxu0 %vm3275_vm1, %v3274_v8 }
 0x4b3   :  { %2922 = vmatprep.subr.bf16.mxu0 %v3274_v8  ;;  %v991_v40 = vpop.xlane.xlu0 %990 }
 0x4b4   :  { %3182 = vrcp.f32 %v991_v40 }
 0x4b5   :  { %1551 = vrot.lane.b32.xlu1 %v3608_v33, %s3278_s30 }
 0x4b7   :  { %v1021_v56 = vpop.xlane.xlu0 %1020 }
 0x4b9   :  { %1602 = vrot.lane.b32.xlu1 %v3606_v32, %s3278_s30 }
 0x4bb   :  { %v994_v59 = vpop.xlane.xlu1 %993 }
 0x4bc   :  { %3184 = vrcp.f32 %v994_v59 }
 0x4bd   :  { %1653 = vrot.lane.b32.xlu1 %v3616_v1, %s3278_s30 }
 0x4be   :  { %v3183_v52 = vpop.eup %3182 }
 0x4bf   :  { %v1024_v51 = vpop.xlane.xlu1 %1023  ;;  %v997_v48 = vpop.xlane.xlu0 %996  ;;  %v1049_v53 = vmul.f32 %v3183_v52, %v3812_v31 }
 0x4c0   :  { %3186 = vrcp.f32 %v997_v48 }
 0x4c1   :  { %1704 = vrot.lane.b32.xlu1 %v3614_v46, %s3278_s30 }
 0x4c3   :  { %v1000_v50 = vpop.xlane.xlu1 %999  ;;  %v1003_v45 = vpop.xlane.xlu0 %1002 }
 0x4c4   :  { %3188 = vrcp.f32 %v1000_v50 }
 0x4c5   :  { %1755 = vrot.lane.b32.xlu1 %v3624_v11, %s3278_s30  ;;  %3190 = vrcp.f32 %v1003_v45 }
 0x4c6   :  { %v3185_v15 = vpop.eup %3184  ;;  %3192 = vrcp.f32 %v1012_v7 }
 0x4c7   :  { %v1050_v22 = vmul.f32 %v3185_v15, %v3823_v28  ;;  %v1006_v57 = vpop.xlane.xlu1 %1005 }
 0x4c8   :  { %3194 = vrcp.f32 %v1006_v57 }
 0x4c9   :  { %1806 = vrot.lane.b32.xlu1 %v3622_v29, %s3278_s30  ;;  %v1064_v0 = vpack.c.bf16 %v1050_v22, %v1049_v53  ;;  %3196 = vrcp.f32 %v1009_v3 }
 0x4ca   :  { %v3187_v17 = vpop.eup %3186  ;;  %3198 = vrcp.f32 %v1024_v51 }
 0x4cb   :  { %2907 = vmatmul.mubr.msk.bf16.vlgmr.msra.gmra.mrb[32].mxu1 %vm455_vm2, %v1064_v0  ;;  %v1051_v28 = vmul.f32 %v3187_v17, %v3829_v23  ;;  %3200 = vrcp.f32 %v1021_v56  ;;  %v1401_v43 = vpop.permute.xlu1 %1400 }
 0x4cc   :  { %2917 = vmatpush3.bf16.msra.mxu1 %v3782_v47  ;;  %2918 = vmatprep.mubr.msk.bf16.mxu1 %vm3275_vm1, %v3274_v8 }
 0x4cd   :  { %1804 = vrot.lane.b32.xlu1 %v3622_v29, %s3279_s9  ;;  %2928 = vmatprep.subr.bf16.mxu1 %v3274_v8 }
 0x4ce   :  { %v3189_v31 = vpop.eup %3188 }
 0x4cf   :  { %v1052_v12 = vmul.f32 %v3189_v31, %v3835_v58  ;;  %v3191_v63 = vpop.eup %3190  ;;  %v1015_v58 = vpop.xlane.xlu0 %1014 }
 0x4d0   :  { %v3193_v2 = vpop.eup %3192  ;;  %v1053_v47 = vmul.f32 %v3191_v63, %v3837_v60  ;;  %3202 = vrcp.f32 %v1015_v58 }
 0x4d1   :  { %v1065_v4 = vpack.c.bf16 %v1052_v12, %v1051_v28  ;;  %v1056_v23 = vmul.f32 %v3193_v2, %v3807_v61 }
 0x4d2   :  { %v3195_v5 = vpop.eup %3194 }
 0x4d3   :  { %v1054_v21 = vmul.f32 %v3195_v5, %v3843_v37  ;;  %2913 = vmatmul.mubr.msk.bf16.vlgmr.msra.gmra.mrb[20].mxu0 %vm455_vm2, %v1065_v4  ;;  %v3197_v42 = vpop.eup %3196  ;;  %v1354_v24 = vpop.permute.xlu0 %1353 }
 0x4d4   :  { %2923 = vmatpush3.bf16.msra.mxu0 %v3882_v10  ;;  %2924 = vmatprep.mubr.msk.bf16.mxu0 %vm3275_vm1, %v3274_v8  ;;  %v1055_v25 = vmul.f32 %v3197_v42, %v3802_v49  ;;  %v3199_v37 = vpop.eup %3198 }
 0x4d5   :  { %v1066_v6 = vpack.c.bf16 %v1054_v21, %v1053_v47  ;;  %2934 = vmatprep.subr.bf16.mxu0 %v3274_v8  ;;  %v3201_v61 = vpop.eup %3200  ;;  %v1060_v49 = vmul.f32 %v3199_v37, %v3827_v44 }
 0x4d6   :  { %v1067_v60 = vpack.c.bf16 %v1056_v23, %v1055_v25  ;;  %v1059_v13 = vmul.f32 %v3201_v61, %v3818_v41 }
 0x4d7   :  { %2919 = vmatmul.mubr.msk.bf16.vlgmr.msra.gmra.mrb[36].mxu1 %vm455_vm2, %v1066_v6 }
 0x4d8   :  { %2929 = vmatpush3.bf16.msra.mxu1 %v3869_v26  ;;  %2930 = vmatprep.mubr.msk.bf16.mxu1 %vm3275_vm1, %v3274_v8  ;;  %v1069_v26 = vpack.c.bf16 %v1060_v49, %v1059_v13 }
 0x4d9   :  { %2940 = vmatprep.subr.bf16.mxu1 %v3274_v8 }
 0x4da   :  { %v3203_v44 = vpop.eup %3202 }
 0x4db   :  { %2925 = vmatmul.mubr.msk.bf16.vlgmr.msra.gmra.mrb[24].mxu0 %vm455_vm2, %v1067_v60  ;;  %v1057_v41 = vmul.f32 %v3203_v44, %v3845_v14 }
 0x4dc   :  { %2935 = vmatpush3.bf16.msra.mxu0 %v1354_v24  ;;  %2936 = vmatprep.mubr.msk.bf16.mxu0 %vm3275_vm1, %v3274_v8 }
 0x4dd   :  { %2946 = vmatprep.subr.bf16.mxu0 %v3274_v8 }
 0x4e3   :  { %2937 = vmatmul.mubr.msk.bf16.vlgmr.msra.gmra.mrb[28].mxu0 %vm455_vm2, %v1069_v26 }
 0x4e4   :  { %2948 = vmatprep.mubr.msk.bf16.mxu0 %vm3275_vm1, %v3274_v8 }
 0x4fc   :  { %v1018_v19 = vpop.xlane.xlu1 %1017  ;;  %v1027_v16 = vpop.xlane.xlu0 %1026 }
 0x4fd   :  { %3204 = vrcp.f32 %v1018_v19 }
 0x4fe   :  { %3206 = vrcp.f32 %v1027_v16 }
 0x500   :  { %v1450_v10 = vpop.permute.xlu0 %1449  ;;  %v1501_v34 = vpop.permute.xlu1 %1500 }
 0x501   :  { %v1455_v27 = vsel %vm455_vm2, %v1450_v10, 0  ;;  %v1506_v15 = vsel %vm455_vm2, %v1501_v34, 0 }
 0x502   :  { %2947 = vmatpush3.bf16.xpose.msra.mxu0 %v1455_v27 }
 0x503   :  { %2958 = vmatprep.subr.bf16.mxu0 %v3274_v8 }
 0x504   :  { %v1448_v55 = vpop.permute.xlu0 %1447 }
 0x507   :  { %v3205_v36 = vpop.eup %3204 }
 0x508   :  { %v1058_v35 = vmul.f32 %v3205_v36, %v3857_v20  ;;  %v1499_v38 = vpop.permute.xlu0 %1498  ;;  %v3207_v7 = vpop.eup %3206 }
 0x509   :  { %2949 = vmatmul.mubr.msk.bf16.vlgmr.msra.gmra.mrb[32].mxu0 %vm455_vm2, %v1448_v55  ;;  %v1061_v51 = vmul.f32 %v3207_v7, %v3859_v9 }
 0x50a   :  { %v1068_v62 = vpack.c.bf16 %v1058_v35, %v1057_v41  ;;  %2960 = vmatprep.mubr.msk.bf16.mxu0 %vm3275_vm1, %v3274_v8  ;;  %v4023_v35 = vld [vmem:[%s4391_s5 + $0x10] sm:$0xff] }
 0x50c   :  { %2931 = vmatmul.mubr.msk.bf16.vlgmr.msra.gmra.mrb[40].mxu1 %vm455_vm2, %v1068_v62  ;;  %v1550_v20 = vpop.permute.xlu0 %1549 }
 0x50d   :  { %2941 = vmatpush3.bf16.msra.mxu1 %v1401_v43  ;;  %2942 = vmatprep.mubr.msk.bf16.mxu1 %vm3275_vm1, %v3274_v8 }
 0x50e   :  { %2952 = vmatprep.subr.bf16.mxu1 %v3274_v8 }
 0x510   :  { %v1601_v56 = vpop.permute.xlu0 %1600 }
 0x514   :  { %v1652_v53 = vpop.permute.xlu0 %1651 }
 0x518   :  { %v1703_v57 = vpop.permute.xlu0 %1702 }
 0x51c   :  { %v1754_v17 = vpop.permute.xlu0 %1753 }
 0x531   :  { %v1030_v14 = vpop.xlane.xlu1 %1029 }
 0x532   :  { %3208 = vrcp.f32 %v1030_v14 }
 0x535   :  { %v1552_v3 = vpop.permute.xlu1 %1551 }
 0x536   :  { %v1557_v39 = vsel %vm455_vm2, %v1552_v3, 0 }
 0x537   :  { %2959 = vmatpush3.bf16.xpose.msra.mxu0 %v1557_v39 }
 0x538   :  { %2970 = vmatprep.subr.bf16.mxu0 %v3274_v8 }
 0x539   :  { %v1603_v40 = vpop.permute.xlu1 %1602 }
 0x53a   :  { %v1608_v0 = vsel %vm455_vm2, %v1603_v40, 0 }
 0x53c   :  { %v3209_v59 = vpop.eup %3208 }
 0x53d   :  { %v1062_v48 = vmul.f32 %v3209_v59, %v3886_v30  ;;  %v1654_v50 = vpop.permute.xlu1 %1653 }
 0x53e   :  { %v1659_v45 = vsel %vm455_vm2, %v1654_v50, 0  ;;  %2961 = vmatmul.mubr.msk.bf16.vlgmr.msra.gmra.mrb[36].mxu0 %vm455_vm2, %v1550_v20 }
 0x53f   :  { %2971 = vmatpush3.bf16.xpose.msra.mxu0 %v1659_v45  ;;  %v1070_v52 = vpack.c.bf16 %v1062_v48, %v1061_v51  ;;  %2972 = vmatprep.mubr.msk.bf16.mxu0 %vm3275_vm1, %v3274_v8 }
 0x540   :  { %2982 = vmatprep.subr.bf16.mxu0 %v3274_v8 }
 0x541   :  { %v1705_v22 = vpop.permute.xlu1 %1704  ;;  %2943 = vmatmul.mubr.msk.bf16.vlgmr.msra.gmra.mrb[44].mxu1 %vm455_vm2, %v1070_v52 }
 0x542   :  { %2953 = vmatpush3.bf16.xpose.msra.mxu1 %v1506_v15  ;;  %2954 = vmatprep.mubr.msk.bf16.mxu1 %vm3275_vm1, %v3274_v8  ;;  %v1710_v31 = vsel %vm455_vm2, %v1705_v22, 0 }
 0x543   :  { %2964 = vmatprep.subr.bf16.mxu1 %v3274_v8 }
 0x545   :  { %v1756_v9 = vpop.permute.xlu1 %1755 }
 0x546   :  { %v1761_v30 = vsel %vm455_vm2, %v1756_v9, 0  ;;  %2973 = vmatmul.mubr.msk.bf16.vlgmr.msra.gmra.mrb[40].mxu0 %vm455_vm2, %v1652_v53 }
 0x547   :  { %2983 = vmatpush3.bf16.xpose.msra.mxu0 %v1761_v30  ;;  %2984 = vmatprep.mubr.msk.bf16.mxu0 %vm3275_vm1, %v3274_v8 }
 0x548   :  { %2994 = vmatprep.subr.bf16.mxu0 %v3274_v8 }
 0x549   :  { %2955 = vmatmul.mubr.msk.bf16.vlgmr.msra.gmra.mrb[48].mxu1 %vm455_vm2, %v1499_v38  ;;  %v1807_v28 = vpop.permute.xlu1 %1806  ;;  %v4028_v38 = vld [vmem:[%s4391_s5 + $0x18] sm:$0xff]  ;;  %s3280_s5 = smov 48  }
 0x54a   :  { %2965 = vmatpush3.bf16.xpose.msra.mxu1 %v1608_v0  ;;  %2966 = vmatprep.mubr.msk.bf16.mxu1 %vm3275_vm1, %v3274_v8  ;;  %v1812_v12 = vsel %vm455_vm2, %v1807_v28, 0 }
 0x54b   :  { %2976 = vmatprep.subr.bf16.mxu1 %v3274_v8 }
 0x54d   :  { %v1805_v63 = vpop.permute.xlu1 %1804 }
 0x54e   :  { %2985 = vmatmul.mubr.msk.bf16.vlgmr.msra.gmra.mrb[44].mxu0 %vm455_vm2, %v1754_v17 }
 0x54f   :  { %2996 = vmatprep.mubr.msk.bf16.mxu0 %vm3275_vm1, %v3274_v8 }
 0x551   :  { %2967 = vmatmul.mubr.msk.bf16.vlgmr.msra.gmra.mrb[52].mxu1 %vm455_vm2, %v1601_v56 }
 0x552   :  { %2977 = vmatpush3.bf16.xpose.msra.mxu1 %v1710_v31  ;;  %2978 = vmatprep.mubr.msk.bf16.mxu1 %vm3275_vm1, %v3274_v8 }
 0x553   :  { %2988 = vmatprep.subr.bf16.mxu1 %v3274_v8 }
 0x559   :  { %2979 = vmatmul.mubr.msk.bf16.vlgmr.msra.gmra.mrb[56].mxu1 %vm455_vm2, %v1703_v57 }
 0x55a   :  { %2989 = vmatpush3.bf16.xpose.msra.mxu1 %v1812_v12  ;;  %2990 = vmatprep.mubr.msk.bf16.mxu1 %vm3275_vm1, %v3274_v8 }
 0x55b   :  { %3000 = vmatprep.subr.bf16.mxu1 %v3274_v8 }
 0x561   :  { %2991 = vmatmul.mubr.msk.bf16.vlgmr.msra.gmra.mrb[60].mxu1 %vm455_vm2, %v1805_v63 }
 0x562   :  { %3002 = vmatprep.mubr.msk.bf16.mxu1 %vm3275_vm1, %v3274_v8 }
 0x584   :  { %v3996_v2 = vpop.f32.mrb[16].mxu0 }
 0x585   :  { %v2902_v4 = vpop.f32.mrb[17].mxu0 }
 0x586   :  { %v3998_v5 = vpop.f32.mrb[18].mxu0 }
 0x587   :  { %v2903_v47 = vpop.f32.mrb[19].mxu0 }
 0x59e   :  { %v4000_v21 = vpop.f32.mrb[32].mxu1 }
 0x59f   :  { %v2908_v42 = vpop.f32.mrb[33].mxu1 }
 0x5a0   :  { %v4002_v23 = vpop.f32.mrb[34].mxu1 }
 0x5a1   :  { %v2909_v58 = vpop.f32.mrb[35].mxu1 }
 0x5a6   :  { %v4004_v6 = vpop.f32.mrb[20].mxu0 }
 0x5a7   :  { %v2914_v25 = vpop.f32.mrb[21].mxu0 }
 0x5a8   :  { %v4006_v60 = vpop.f32.mrb[22].mxu0 }
 0x5a9   :  { %v2915_v37 = vpop.f32.mrb[23].mxu0 }
 0x5aa   :  { %v4008_v24 = vpop.f32.mrb[36].mxu1 }
 0x5ab   :  { %v2920_v61 = vpop.f32.mrb[37].mxu1 }
 0x5ac   :  { %v4010_v49 = vpop.f32.mrb[38].mxu1 }
 0x5ad   :  { %v2921_v13 = vpop.f32.mrb[39].mxu1 }
 0x5ae   :  { %v4012_v26 = vpop.f32.mrb[24].mxu0 }
 0x5af   :  { %v2926_v43 = vpop.f32.mrb[25].mxu0 }
 0x5b0   :  { %v4014_v19 = vpop.f32.mrb[26].mxu0 }
 0x5b1   :  { %v2927_v16 = vpop.f32.mrb[27].mxu0 }
 0x5b6   :  { %v4016_v10 = vpop.f32.mrb[28].mxu0 }
 0x5b7   :  { %v2938_v27 = vpop.f32.mrb[29].mxu0 }
 0x5b8   :  { %v4018_v44 = vpop.f32.mrb[30].mxu0 }
 0x5b9   :  { %v2939_v36 = vpop.f32.mrb[31].mxu0 }
 0x5dc   :  { %v1491_v41 = vpop.f32.mrb[32].mxu0 }
 0x5dd   :  { %v1855_v55 = vmul.f32 0.25, %v1491_v41  ;;  %v2950_v62 = vpop.f32.mrb[33].mxu0 }
 0x5de   :  { %v1494_v34 = vpop.f32.mrb[34].mxu0 }
 0x5df   :  { %v1856_v14 = vmul.f32 0.25, %v1494_v34  ;;  %v4030_v20 = vpop.f32.mrb[40].mxu1  ;;  %v2951_v3 = vpop.f32.mrb[35].mxu0  ;;  %v4033_v39 = vadd.f32 %v4023_v35, %v1855_v55 }
 0x5e0   :  { %v2932_v40 = vpop.f32.mrb[41].mxu1 }
 0x5e1   :  { %v4036_v7 = vadd.f32 %v4028_v38, %v1856_v14  ;;  %v4038_v56 = vpop.f32.mrb[42].mxu1  ;;  %v1890_v59 = vsel %vm455_vm2, %v4033_v39, -inf }
 0x5e2   :  { %v2933_v51 = vpop.f32.mrb[43].mxu1  ;;  %1891 = vmax.xlane.f32.xlu0 %v1890_v59 }
 0x5e3   :  { %v1893_v48 = vsel %vm455_vm2, %v4036_v7, -inf }
 0x5e4   :  { %1894 = vmax.xlane.f32.xlu1 %v1893_v48 }
 0x611   :  { %v1593_v50 = vpop.f32.mrb[36].mxu0 }
 0x612   :  { %v2962_v45 = vpop.f32.mrb[37].mxu0  ;;  %v1859_v13 = vmul.f32 0.25, %v1593_v50 }
 0x613   :  { %v1596_v52 = vpop.f32.mrb[38].mxu0 }
 0x614   :  { %v1860_v15 = vmul.f32 0.25, %v1596_v52  ;;  %v4044_v53 = vpop.f32.mrb[44].mxu1  ;;  %v2963_v22 = vpop.f32.mrb[39].mxu0  ;;  %v4062_v34 = vadd.f32 %v4023_v35, %v1859_v13 }
 0x615   :  { %v2944_v9 = vpop.f32.mrb[45].mxu1 }
 0x616   :  { %v4047_v30 = vadd.f32 %v4028_v38, %v1860_v15  ;;  %v4049_v57 = vpop.f32.mrb[46].mxu1  ;;  %v1902_v22 = vsel %vm455_vm2, %v4062_v34, -inf }
 0x617   :  { %v2945_v0 = vpop.f32.mrb[47].mxu1 }
 0x618   :  { %v1905_v17 = vsel %vm455_vm2, %v4047_v30, -inf }
 0x619   :  { %1906 = vmax.xlane.f32.xlu1 %v1905_v17  ;;  %v1695_v31 = vpop.f32.mrb[40].mxu0 }
 0x61a   :  { %v2974_v28 = vpop.f32.mrb[41].mxu0  ;;  %v1863_v45 = vmul.f32 0.25, %v1695_v31 }
 0x61b   :  { %v1698_v12 = vpop.f32.mrb[42].mxu0 }
 0x61c   :  { %v1542_v63 = vpop.f32.mrb[48].mxu1  ;;  %v2975_v4 = vpop.f32.mrb[43].mxu0  ;;  %v1864_v51 = vmul.f32 0.25, %v1698_v12  ;;  %v4080_v31 = vadd.f32 %v4023_v35, %v1863_v45 }
 0x61d   :  { %v1857_v47 = vmul.f32 0.25, %v1542_v63  ;;  %v2956_v42 = vpop.f32.mrb[49].mxu1 }
 0x61e   :  { %v1545_v58 = vpop.f32.mrb[50].mxu1  ;;  %v4075_v9 = vadd.f32 %v4028_v38, %v1864_v51 }
 0x61f   :  { %v1858_v25 = vmul.f32 0.25, %v1545_v58  ;;  %v2957_v37 = vpop.f32.mrb[51].mxu1  ;;  %v4054_v61 = vadd.f32 %v4023_v35, %v1857_v47 }
 0x621   :  { %v4057_v43 = vadd.f32 %v4028_v38, %v1858_v25  ;;  %v1797_v16 = vpop.f32.mrb[44].mxu0  ;;  %v1896_v27 = vsel %vm455_vm2, %v4054_v61, -inf  ;;  %v1917_v25 = vsel %vm455_vm2, %v4075_v9, -inf }
 0x622   :  { %1897 = vmax.xlane.f32.xlu0 %v1896_v27  ;;  %v2986_v36 = vpop.f32.mrb[45].mxu0  ;;  %v1867_v37 = vmul.f32 0.25, %v1797_v16 }
 0x623   :  { %v1800_v41 = vpop.f32.mrb[46].mxu0  ;;  %v1899_v40 = vsel %vm455_vm2, %v4057_v43, -inf  ;;  %v1914_v36 = vsel %vm455_vm2, %v4080_v31, -inf }
 0x624   :  { %v1644_v55 = vpop.f32.mrb[52].mxu1  ;;  %v2987_v62 = vpop.f32.mrb[47].mxu0  ;;  %v1868_v47 = vmul.f32 0.25, %v1800_v41  ;;  %v4100_v16 = vadd.f32 %v4023_v35, %v1867_v37 }
 0x625   :  { %v1861_v14 = vmul.f32 0.25, %v1644_v55  ;;  %v2968_v3 = vpop.f32.mrb[53].mxu1 }
 0x626   :  { %1900 = vmax.xlane.f32.xlu0 %v1899_v40  ;;  %v1647_v59 = vpop.f32.mrb[54].mxu1  ;;  %v4095_v55 = vadd.f32 %v4028_v38, %v1868_v47  ;;  %v1926_v45 = vsel %vm455_vm2, %v4100_v16, -inf }
 0x627   :  { %v1862_v48 = vmul.f32 0.25, %v1647_v59  ;;  %v2969_v50 = vpop.f32.mrb[55].mxu1  ;;  %v4067_v52 = vadd.f32 %v4023_v35, %v1861_v14 }
 0x629   :  { %v4070_v15 = vadd.f32 %v4028_v38, %v1862_v48  ;;  %v1908_v63 = vsel %vm455_vm2, %v4067_v52, -inf  ;;  %v1929_v48 = vsel %vm455_vm2, %v4095_v55, -inf }
 0x62a   :  { %1903 = vmax.xlane.f32.xlu0 %v1902_v22 }
 0x62b   :  { %v1911_v0 = vsel %vm455_vm2, %v4070_v15, -inf }
 0x62c   :  { %1912 = vmax.xlane.f32.xlu1 %v1911_v0  ;;  %v1746_v17 = vpop.f32.mrb[56].mxu1 }
 0x62d   :  { %v1865_v28 = vmul.f32 0.25, %v1746_v17  ;;  %v2980_v12 = vpop.f32.mrb[57].mxu1 }
 0x62e   :  { %1909 = vmax.xlane.f32.xlu0 %v1908_v63  ;;  %v1749_v4 = vpop.f32.mrb[58].mxu1 }
 0x62f   :  { %v1866_v42 = vmul.f32 0.25, %v1749_v4  ;;  %v2981_v58 = vpop.f32.mrb[59].mxu1  ;;  %v4087_v13 = vadd.f32 %v4023_v35, %v1865_v28 }
 0x630   :  { %1918 = vmax.xlane.f32.xlu1 %v1917_v25 }
 0x631   :  { %v4090_v27 = vadd.f32 %v4028_v38, %v1866_v42  ;;  %v1920_v40 = vsel %vm455_vm2, %v4087_v13, -inf }
 0x632   :  { %1915 = vmax.xlane.f32.xlu0 %v1914_v36 }
 0x633   :  { %v1923_v41 = vsel %vm455_vm2, %v4090_v27, -inf }
 0x634   :  { %1924 = vmax.xlane.f32.xlu1 %v1923_v41  ;;  %v1848_v62 = vpop.f32.mrb[60].mxu1 }
 0x635   :  { %v1869_v14 = vmul.f32 0.25, %v1848_v62  ;;  %v2992_v3 = vpop.f32.mrb[61].mxu1 }
 0x636   :  { %1921 = vmax.xlane.f32.xlu0 %v1920_v40  ;;  %v1851_v59 = vpop.f32.mrb[62].mxu1 }
 0x637   :  { %v2993_v51 = vpop.f32.mrb[63].mxu1  ;;  %v4107_v50 = vadd.f32 %v4023_v35, %v1869_v14  ;;  %v1870_v35 = vmul.f32 0.25, %v1851_v59 }
 0x638   :  { %1930 = vmax.xlane.f32.xlu1 %v1929_v48 }
 0x639   :  { %v1932_v22 = vsel %vm455_vm2, %v4107_v50, -inf  ;;  %v4124_v17 = vadd.f32 %v4028_v38, %v1870_v35 }
 0x63a   :  { %1927 = vmax.xlane.f32.xlu0 %v1926_v45 }
 0x63e   :  { %1933 = vmax.xlane.f32.xlu0 %v1932_v22 }
 0x649   :  { %2121 = vrot.lane.b32.xlu1 %v3598_v54, %s3280_s5 }
 0x64d   :  { %2168 = vrot.lane.b32.xlu1 %v3608_v33, %s3280_s5  ;;  %v1935_v33 = vsel %vm455_vm2, %v4124_v17, -inf }
 0x651   :  { %2215 = vrot.lane.b32.xlu1 %v3606_v32, %s3280_s5 }
 0x654   :  { %2074 = vrot.lane.b32.xlu0 %v3600_v18, %s3280_s5 }
 0x658   :  { %2262 = vrot.lane.b32.xlu0 %v3616_v1, %s3280_s5 }
 0x66f   :  { %v1892_v0 = vpop.xlane.xlu0 %1891 }
 0x670   :  { %v1938_v28 = vsub.f32 %v4033_v39, %v1892_v0 }
 0x671   :  { %v1895_v1 = vpop.xlane.xlu1 %1894 }
 0x672   :  { %v1954_v54 = vmul.f32 1.442695, %v1938_v28  ;;  %v1939_v38 = vsub.f32 %v4036_v7, %v1895_v1 }
 0x674   :  { %3210 = vpow2.f32 %v1954_v54  ;;  %v1956_v12 = vmul.f32 1.442695, %v1939_v38 }
 0x675   :  { %1936 = vmax.xlane.f32.xlu1 %v1935_v33 }
 0x676   :  { %3212 = vpow2.f32 %v1956_v12 }
 0x67e   :  { %v4129_v32 = vpop.eup %3210 }
 0x67f   :  { %v1986_v18 = vsel %vm455_vm2, %v4129_v32, 0.0 }
 0x680   :  { %1987 = vadd.xlane.f32.xlu0 %v1986_v18  ;;  %v4136_v39 = vpop.eup %3212 }
 0x681   :  { %v1989_v63 = vsel %vm455_vm2, %v4136_v39, 0.0 }
 0x686   :  { %2309 = vrot.lane.b32.xlu1 %v3614_v46, %s3280_s5 }
 0x6a6   :  { %v1907_v4 = vpop.xlane.xlu1 %1906 }
 0x6a7   :  { %v1943_v58 = vsub.f32 %v4047_v30, %v1907_v4 }
 0x6a9   :  { %v1964_v7 = vmul.f32 1.442695, %v1943_v58 }
 0x6aa   :  { %1990 = vadd.xlane.f32.xlu1 %v1989_v63 }
 0x6af   :  { %v1898_v47 = vpop.xlane.xlu0 %1897 }
 0x6b0   :  { %v1940_v42 = vsub.f32 %v4054_v61, %v1898_v47 }
 0x6b2   :  { %v1958_v25 = vmul.f32 1.442695, %v1940_v42 }
 0x6b3   :  { %v1901_v37 = vpop.xlane.xlu0 %1900 }
 0x6b4   :  { %3214 = vpow2.f32 %v1958_v25  ;;  %v1941_v46 = vsub.f32 %v4057_v43, %v1901_v37 }
 0x6b6   :  { %v1960_v36 = vmul.f32 1.442695, %v1941_v46 }
 0x6b7   :  { %v1904_v41 = vpop.xlane.xlu0 %1903 }
 0x6b8   :  { %3216 = vpow2.f32 %v1960_v36  ;;  %v1942_v62 = vsub.f32 %v4062_v34, %v1904_v41 }
 0x6b9   :  { %v1913_v14 = vpop.xlane.xlu1 %1912  ;;  %3218 = vpow2.f32 %v1964_v7 }
 0x6ba   :  { %v1962_v3 = vmul.f32 1.442695, %v1942_v62  ;;  %v1945_v40 = vsub.f32 %v4070_v15, %v1913_v14 }
 0x6bb   :  { %v1910_v59 = vpop.xlane.xlu0 %1909 }
 0x6bc   :  { %3220 = vpow2.f32 %v1962_v3  ;;  %v1968_v61 = vmul.f32 1.442695, %v1945_v40  ;;  %v1944_v30 = vsub.f32 %v4067_v52, %v1910_v59 }
 0x6bd   :  { %v1919_v51 = vpop.xlane.xlu1 %1918 }
 0x6be   :  { %v4146_v48 = vpop.eup %3214  ;;  %3222 = vpow2.f32 %v1968_v61  ;;  %v1966_v43 = vmul.f32 1.442695, %v1944_v30  ;;  %v1947_v45 = vsub.f32 %v4075_v9, %v1919_v51 }
 0x6bf   :  { %v1916_v22 = vpop.xlane.xlu0 %1915  ;;  %v1992_v34 = vsel %vm455_vm2, %v4146_v48, 0.0 }
 0x6c0   :  { %3224 = vpow2.f32 %v1966_v43  ;;  %v1972_v35 = vmul.f32 1.442695, %v1947_v45  ;;  %v1946_v15 = vsub.f32 %v4080_v31, %v1916_v22  ;;  %1993 = vadd.xlane.f32.xlu0 %v1992_v34 }
 0x6c1   :  { %v1925_v0 = vpop.xlane.xlu1 %1924 }
 0x6c2   :  { %v4152_v28 = vpop.eup %3216  ;;  %3226 = vpow2.f32 %v1972_v35  ;;  %v1970_v52 = vmul.f32 1.442695, %v1946_v15  ;;  %v1949_v54 = vsub.f32 %v4090_v27, %v1925_v0 }
 0x6c3   :  { %v1922_v33 = vpop.xlane.xlu0 %1921  ;;  %v1995_v9 = vsel %vm455_vm2, %v4152_v28, 0.0  ;;  %v4157_v18 = vpop.eup %3218 }
 0x6c4   :  { %3228 = vpow2.f32 %v1970_v52  ;;  %v1976_v1 = vmul.f32 1.442695, %v1949_v54  ;;  %v1948_v38 = vsub.f32 %v4087_v13, %v1922_v33  ;;  %1996 = vadd.xlane.f32.xlu1 %v1995_v9  ;;  %v2001_v27 = vsel %vm455_vm2, %v4157_v18, 0.0 }
 0x6c5   :  { %v1931_v31 = vpop.xlane.xlu1 %1930 }
 0x6c6   :  { %v4160_v12 = vpop.eup %3220  ;;  %3230 = vpow2.f32 %v1976_v1  ;;  %v1974_v63 = vmul.f32 1.442695, %v1948_v38  ;;  %v1951_v4 = vsub.f32 %v4095_v55, %v1931_v31 }
 0x6c7   :  { %v1928_v47 = vpop.xlane.xlu0 %1927  ;;  %v1998_v42 = vsel %vm455_vm2, %v4160_v12, 0.0 }
 0x6c8   :  { %v4167_v58 = vpop.eup %3222  ;;  %3232 = vpow2.f32 %v1974_v63  ;;  %v1980_v25 = vmul.f32 1.442695, %v1951_v4  ;;  %v1950_v13 = vsub.f32 %v4100_v16, %v1928_v47  ;;  %2002 = vadd.xlane.f32.xlu1 %v2001_v27  ;;  %1999 = vadd.xlane.f32.xlu0 %v1998_v42 }
 0x6c9   :  { %v2122_v37 = vpop.permute.xlu1 %2121  ;;  %v2007_v36 = vsel %vm455_vm2, %v4167_v58, 0.0 }
 0x6ca   :  { %v4170_v46 = vpop.eup %3224  ;;  %3234 = vpow2.f32 %v1980_v25  ;;  %v1978_v55 = vmul.f32 1.442695, %v1950_v13  ;;  %3001 = vmatpush3.bf16.msra.mxu1 %v2122_v37 }
 0x6cb   :  { %v1934_v7 = vpop.xlane.xlu0 %1933  ;;  %v2004_v41 = vsel %vm455_vm2, %v4170_v46, 0.0  ;;  %3012 = vmatprep.subr.bf16.mxu1 %v3274_v8 }
 0x6cc   :  { %v4177_v62 = vpop.eup %3226  ;;  %3236 = vpow2.f32 %v1978_v55  ;;  %v1952_v16 = vsub.f32 %v4107_v50, %v1934_v7  ;;  %2008 = vadd.xlane.f32.xlu1 %v2007_v36  ;;  %2005 = vadd.xlane.f32.xlu0 %v2004_v41 }
 0x6cd   :  { %v2013_v59 = vsel %vm455_vm2, %v4177_v62, 0.0  ;;  %v2169_v52 = vpop.permute.xlu1 %2168 }
 0x6ce   :  { %v4180_v14 = vpop.eup %3228  ;;  %v1982_v3 = vmul.f32 1.442695, %v1952_v16 }
 0x6cf   :  { %v2075_v40 = vpop.permute.xlu0 %2074  ;;  %v2010_v61 = vsel %vm455_vm2, %v4180_v14, 0.0 }
 0x6d0   :  { %v4186_v30 = vpop.eup %3230  ;;  %3238 = vpow2.f32 %v1982_v3  ;;  %2014 = vadd.xlane.f32.xlu1 %v2013_v59  ;;  %2011 = vadd.xlane.f32.xlu0 %v2010_v61 }
 0x6d1   :  { %2995 = vmatpush3.bf16.msra.mxu0 %v2075_v40  ;;  %v2019_v50 = vsel %vm455_vm2, %v4186_v30, 0.0  ;;  %v2216_v54 = vpop.permute.xlu1 %2215 }
 0x6d2   :  { %v4188_v51 = vpop.eup %3232  ;;  %3006 = vmatprep.subr.bf16.mxu0 %v3274_v8 }
 0x6d3   :  { %v2016_v43 = vsel %vm455_vm2, %v4188_v51, 0.0  ;;  %v2263_v63 = vpop.permute.xlu0 %2262 }
 0x6d4   :  { %v4195_v45 = vpop.eup %3234  ;;  %2020 = vadd.xlane.f32.xlu1 %v2019_v50  ;;  %2017 = vadd.xlane.f32.xlu0 %v2016_v43 }
 0x6d5   :  { %v2025_v34 = vsel %vm455_vm2, %v4195_v45, 0.0 }
 0x6d6   :  { %v4197_v22 = vpop.eup %3236 }
 0x6d7   :  { %v2022_v35 = vsel %vm455_vm2, %v4197_v22, 0.0 }
 0x6d8   :  { %2026 = vadd.xlane.f32.xlu1 %v2025_v34  ;;  %2023 = vadd.xlane.f32.xlu0 %v2022_v35 }
 0x6da   :  { %v4203_v15 = vpop.eup %3238 }
 0x6db   :  { %v2028_v0 = vsel %vm455_vm2, %v4203_v15, 0.0 }
 0x6dc   :  { %2029 = vadd.xlane.f32.xlu0 %v2028_v0 }
 0x6f2   :  { %2356 = vrot.lane.b32.xlu0 %v3624_v11, %s3280_s5 }
 0x702   :  { %v1937_v33 = vpop.xlane.xlu1 %1936 }
 0x703   :  { %v1953_v9 = vsub.f32 %v4124_v17, %v1937_v33 }
 0x705   :  { %v1984_v1 = vmul.f32 1.442695, %v1953_v9 }
 0x706   :  { %v4216_v4 = vpop.permute.xlu1 %2309 }
 0x707   :  { %3240 = vpow2.f32 %v1984_v1 }
 0x70d   :  { %v1988_v11 = vpop.xlane.xlu0 %1987 }
 0x70e   :  { %3242 = vrcp.f32 %v1988_v11 }
 0x711   :  { %v4210_v38 = vpop.eup %3240 }
 0x712   :  { %v2031_v31 = vsel %vm455_vm2, %v4210_v38, 0.0 }
 0x713   :  { %2032 = vadd.xlane.f32.xlu1 %v2031_v31 }
 0x718   :  { %v3243_v27 = vpop.eup %3242 }
 0x719   :  { %v2050_v42 = vmul.f32 %v3243_v27, %v4129_v32 }
 0x724   :  { %2403 = vrot.lane.b32.xlu1 %v3622_v29, %s3280_s5 }
 0x737   :  { %v1991_v47 = vpop.xlane.xlu1 %1990 }
 0x738   :  { %3244 = vrcp.f32 %v1991_v47 }
 0x742   :  { %v3245_v17 = vpop.eup %3244 }
 0x743   :  { %v2051_v25 = vmul.f32 %v3245_v17, %v4136_v39 }
 0x745   :  { %v2066_v13 = vpack.c.bf16 %v2051_v25, %v2050_v42 }
 0x747   :  { %2997 = vmatmul.mubr.msk.bf16.vlgmr.msra.gmra.mrb[48].mxu0 %vm455_vm2, %v2066_v13 }
 0x748   :  { %3007 = vmatpush3.bf16.msra.mxu0 %v2169_v52  ;;  %3008 = vmatprep.mubr.msk.bf16.mxu0 %vm3275_vm1, %v3274_v8 }
 0x749   :  { %3018 = vmatprep.subr.bf16.mxu0 %v3274_v8 }
 0x74d   :  { %v1994_v29 = vpop.xlane.xlu0 %1993 }
 0x74e   :  { %3246 = vrcp.f32 %v1994_v29 }
 0x751   :  { %v1997_v37 = vpop.xlane.xlu1 %1996 }
 0x752   :  { %3248 = vrcp.f32 %v1997_v37 }
 0x755   :  { %v2003_v55 = vpop.xlane.xlu1 %2002  ;;  %v2000_v7 = vpop.xlane.xlu0 %1999 }
 0x756   :  { %3250 = vrcp.f32 %v2003_v55 }
 0x757   :  { %3252 = vrcp.f32 %v2000_v7 }
 0x758   :  { %v3247_v39 = vpop.eup %3246 }
 0x759   :  { %v2009_v32 = vpop.xlane.xlu1 %2008  ;;  %v2006_v36 = vpop.xlane.xlu0 %2005  ;;  %v2052_v16 = vmul.f32 %v3247_v39, %v4146_v48  ;;  %v2531_v39 = vld [vmem:[%s4392_s6 + $0x8] sm:$0xff] }
 0x75a   :  { %3254 = vrcp.f32 %v2009_v32 }
 0x75b   :  { %3256 = vrcp.f32 %v2006_v36 }
 0x75c   :  { %v3249_v41 = vpop.eup %3248 }
 0x75d   :  { %v2053_v3 = vmul.f32 %v3249_v41, %v4152_v28  ;;  %v2015_v40 = vpop.xlane.xlu1 %2014  ;;  %v2012_v59 = vpop.xlane.xlu0 %2011 }
 0x75e   :  { %3258 = vrcp.f32 %v2015_v40 }
 0x75f   :  { %3260 = vrcp.f32 %v2012_v59  ;;  %v2067_v61 = vpack.c.bf16 %v2053_v3, %v2052_v16 }
 0x760   :  { %v3251_v50 = vpop.eup %3250 }
 0x761   :  { %v3253_v43 = vpop.eup %3252  ;;  %v2055_v34 = vmul.f32 %v3251_v50, %v4157_v18  ;;  %v2021_v35 = vpop.xlane.xlu1 %2020  ;;  %3003 = vmatmul.mubr.msk.bf16.vlgmr.msra.gmra.mrb[64].mxu1 %vm455_vm2, %v2067_v61  ;;  %v2533_v61 = vld [vmem:[%s4392_s6 + $0x18] sm:$0xff] }
 0x762   :  { %v2018_v0 = vpop.xlane.xlu0 %2017  ;;  %v2054_v52 = vmul.f32 %v3253_v43, %v4160_v12  ;;  %3262 = vrcp.f32 %v2021_v35  ;;  %3013 = vmatpush3.bf16.msra.mxu1 %v2216_v54  ;;  %3014 = vmatprep.mubr.msk.bf16.mxu1 %vm3275_vm1, %v3274_v8 }
 0x763   :  { %3264 = vrcp.f32 %v2018_v0  ;;  %3024 = vmatprep.subr.bf16.mxu1 %v3274_v8 }
 0x764   :  { %v3255_v48 = vpop.eup %3254  ;;  %v2068_v28 = vpack.c.bf16 %v2055_v34, %v2054_v52 }
 0x765   :  { %v3257_v33 = vpop.eup %3256  ;;  %v2057_v9 = vmul.f32 %v3255_v48, %v4167_v58  ;;  %v2027_v18 = vpop.xlane.xlu1 %2026 }
 0x766   :  { %v2024_v1 = vpop.xlane.xlu0 %2023  ;;  %v2056_v31 = vmul.f32 %v3257_v33, %v4170_v46  ;;  %3266 = vrcp.f32 %v2027_v18  ;;  %3009 = vmatmul.mubr.msk.bf16.vlgmr.msra.gmra.mrb[52].mxu0 %vm455_vm2, %v2068_v28 }
 0x767   :  { %3019 = vmatpush3.bf16.msra.mxu0 %v2263_v63  ;;  %3268 = vrcp.f32 %v2024_v1  ;;  %3020 = vmatprep.mubr.msk.bf16.mxu0 %vm3275_vm1, %v3274_v8 }
 0x768   :  { %v3259_v12 = vpop.eup %3258  ;;  %v2069_v54 = vpack.c.bf16 %v2057_v9, %v2056_v31  ;;  %3030 = vmatprep.subr.bf16.mxu0 %v3274_v8 }
 0x769   :  { %v3261_v11 = vpop.eup %3260  ;;  %v2059_v47 = vmul.f32 %v3259_v12, %v4177_v62 }
 0x76a   :  { %v2030_v58 = vpop.xlane.xlu0 %2029  ;;  %v2058_v27 = vmul.f32 %v3261_v11, %v4180_v14  ;;  %3015 = vmatmul.mubr.msk.bf16.vlgmr.msra.gmra.mrb[68].mxu1 %vm455_vm2, %v2069_v54 }
 0x76b   :  { %3025 = vmatpush3.bf16.msra.mxu1 %v4216_v4  ;;  %3026 = vmatprep.mubr.msk.bf16.mxu1 %vm3275_vm1, %v3274_v8  ;;  %3270 = vrcp.f32 %v2030_v58 }
 0x76c   :  { %v3263_v46 = vpop.eup %3262  ;;  %v2070_v63 = vpack.c.bf16 %v2059_v47, %v2058_v27  ;;  %3036 = vmatprep.subr.bf16.mxu1 %v3274_v8 }
 0x76d   :  { %v3265_v17 = vpop.eup %3264  ;;  %v2061_v42 = vmul.f32 %v3263_v46, %v4186_v30 }
 0x76e   :  { %v2357_v25 = vpop.permute.xlu0 %2356  ;;  %v2060_v62 = vmul.f32 %v3265_v17, %v4188_v51  ;;  %3021 = vmatmul.mubr.msk.bf16.vlgmr.msra.gmra.mrb[56].mxu0 %vm455_vm2, %v2070_v63 }
 0x76f   :  { %3031 = vmatpush3.bf16.msra.mxu0 %v2357_v25  ;;  %3032 = vmatprep.mubr.msk.bf16.mxu0 %vm3275_vm1, %v3274_v8 }
 0x770   :  { %v3267_v14 = vpop.eup %3266  ;;  %v2071_v4 = vpack.c.bf16 %v2061_v42, %v2060_v62 }
 0x771   :  { %v3269_v13 = vpop.eup %3268  ;;  %v2063_v29 = vmul.f32 %v3267_v14, %v4195_v45 }
 0x772   :  { %v2062_v37 = vmul.f32 %v3269_v13, %v4197_v22  ;;  %3027 = vmatmul.mubr.msk.bf16.vlgmr.msra.gmra.mrb[72].mxu1 %vm455_vm2, %v2071_v4 }
 0x773   :  { %3038 = vmatprep.mubr.msk.bf16.mxu1 %vm3275_vm1, %v3274_v8  ;;  %v2530_v8 = vld [vmem:[%s4392_s6] sm:$0xff] }
 0x774   :  { %v2072_v30 = vpack.c.bf16 %v2063_v29, %v2062_v37  ;;  %v2542_v41 = vpack.c.bf16 %v2531_v39, %v2530_v8 }
 0x775   :  { %v3271_v7 = vpop.eup %3270 }
 0x776   :  { %3033 = vmatmul.mubr.msk.bf16.vlgmr.msra.gmra.mrb[60].mxu0 %vm455_vm2, %v2072_v30  ;;  %v2064_v36 = vmul.f32 %v3271_v7, %v4203_v15  ;;  %3042 = vmatprep.subr.bf16.mxu0 %v2542_v41 }
 0x777   :  { %3043 = vmatpush3.bf16.msra.mxu0 %v2542_v41 }
 0x7a0   :  { %v2033_v51 = vpop.xlane.xlu1 %2032 }
 0x7a1   :  { %3272 = vrcp.f32 %v2033_v51 }
 0x7a4   :  { %v2404_v55 = vpop.permute.xlu1 %2403 }
 0x7a5   :  { %3037 = vmatpush3.bf16.msra.mxu1 %v2404_v55 }
 0x7ab   :  { %v3273_v32 = vpop.eup %3272 }
 0x7ac   :  { %v2065_v45 = vmul.f32 %v3273_v32, %v4210_v38  ;;  %v2532_v38 = vld [vmem:[%s4392_s6 + $0x10] sm:$0xff] }
 0x7ad   :  { %v2543_v50 = vpack.c.bf16 %v2533_v61, %v2532_v38 }
 0x7ae   :  { %v2073_v22 = vpack.c.bf16 %v2065_v45, %v2064_v36 }
 0x7af   :  { %3044 = vmatprep.subr.bf16.mxu0 %v2543_v50 }
 0x7b0   :  { %3039 = vmatmul.mubr.msk.bf16.vlgmr.msra.gmra.mrb[76].mxu1 %vm455_vm2, %v2073_v22  ;;  %3045 = vmatpush3.bf16.msra.mxu0 %v2543_v50 }
 0x81a   :  { %v2114_v16 = vpop.f32.mrb[48].mxu0 }
 0x81b   :  { %v2998_v3 = vpop.f32.mrb[49].mxu0 }
 0x81c   :  { %v2117_v40 = vpop.f32.mrb[50].mxu0 }
 0x81d   :  { %v3074_v15 = vpack.i.bf16 %v2117_v40, %v2114_v16  ;;  %v2999_v59 = vpop.f32.mrb[51].mxu0 }
 0x81f   :  { %3075 = vrot.lane.b32.xlu0 %v3074_v15, %s3281_s17 }
 0x834   :  { %v2161_v43 = vpop.f32.mrb[64].mxu1 }
 0x835   :  { %v3004_v34 = vpop.f32.mrb[65].mxu1 }
 0x836   :  { %v2164_v35 = vpop.f32.mrb[66].mxu1 }
 0x837   :  { %v3079_v0 = vpack.i.bf16 %v2164_v35, %v2161_v43  ;;  %v3005_v52 = vpop.f32.mrb[67].mxu1 }
 0x839   :  { %v2208_v48 = vpop.f32.mrb[52].mxu0  ;;  %3080 = vrot.lane.b32.xlu1 %v3079_v0, %s3281_s17 }
 0x83a   :  { %v3010_v28 = vpop.f32.mrb[53].mxu0 }
 0x83b   :  { %v2211_v33 = vpop.f32.mrb[54].mxu0 }
 0x83c   :  { %v3084_v9 = vpack.i.bf16 %v2211_v33, %v2208_v48  ;;  %v3011_v18 = vpop.f32.mrb[55].mxu0 }
 0x83d   :  { %v2255_v1 = vpop.f32.mrb[68].mxu1 }
 0x83e   :  { %3085 = vrot.lane.b32.xlu0 %v3084_v9, %s3281_s17  ;;  %v3016_v31 = vpop.f32.mrb[69].mxu1 }
 0x83f   :  { %v2258_v12 = vpop.f32.mrb[70].mxu1 }
 0x840   :  { %v3089_v54 = vpack.i.bf16 %v2258_v12, %v2255_v1  ;;  %v3017_v11 = vpop.f32.mrb[71].mxu1 }
 0x841   :  { %v2302_v47 = vpop.f32.mrb[56].mxu0 }
 0x842   :  { %3090 = vrot.lane.b32.xlu1 %v3089_v54, %s3281_s17  ;;  %v3022_v58 = vpop.f32.mrb[57].mxu0 }
 0x843   :  { %v2305_v27 = vpop.f32.mrb[58].mxu0 }
 0x844   :  { %v3094_v46 = vpack.i.bf16 %v2305_v27, %v2302_v47  ;;  %v3023_v63 = vpop.f32.mrb[59].mxu0 }
 0x845   :  { %v2349_v17 = vpop.f32.mrb[72].mxu1 }
 0x846   :  { %3095 = vrot.lane.b32.xlu0 %v3094_v46, %s3281_s17  ;;  %v3028_v42 = vpop.f32.mrb[73].mxu1 }
 0x847   :  { %v2352_v25 = vpop.f32.mrb[74].mxu1 }
 0x848   :  { %v3099_v62 = vpack.i.bf16 %v2352_v25, %v2349_v17  ;;  %v3029_v14 = vpop.f32.mrb[75].mxu1 }
 0x849   :  { %v2396_v4 = vpop.f32.mrb[60].mxu0 }
 0x84a   :  { %3100 = vrot.lane.b32.xlu1 %v3099_v62, %s3281_s17  ;;  %v3034_v13 = vpop.f32.mrb[61].mxu0 }
 0x84b   :  { %v2399_v29 = vpop.f32.mrb[62].mxu0 }
 0x84c   :  { %v3104_v37 = vpack.i.bf16 %v2399_v29, %v2396_v4  ;;  %v3035_v30 = vpop.f32.mrb[63].mxu0 }
 0x84e   :  { %3105 = vrot.lane.b32.xlu0 %v3104_v37, %s3281_s17 }
 0x883   :  { %v2443_v51 = vpop.f32.mrb[76].mxu1 }
 0x884   :  { %v3040_v55 = vpop.f32.mrb[77].mxu1 }
 0x885   :  { %v2446_v7 = vpop.f32.mrb[78].mxu1 }
 0x886   :  { %v3109_v32 = vpack.i.bf16 %v2446_v7, %v2443_v51  ;;  %v3041_v36 = vpop.f32.mrb[79].mxu1 }
 0x888   :  { %3110 = vrot.lane.b32.xlu1 %v3109_v32, %s3281_s17 }
 0x891   :  { %v3076_v45 = vpop.permute.xlu0 %3075 }
 0x892   :  { %v3078_v22 = vunpack.i.h.bf16 %v3076_v45  ;;  %v3077_v8 = vunpack.i.l.bf16 %v3076_v45 }
 0x894   :  { %v2515_v39 = vsel %vm455_vm2, %v3998_v5, %v3078_v22  ;;  %v2514_v41 = vsel %vm455_vm2, %v3996_v2, %v3077_v8 }
 0x895   :  { %v2534_v16 = vpack.c.bf16 %v2515_v39, %v2514_v41 }
 0x897   :  { %3046 = vmatprep.mubr.msk.bf16.mxu0 %vm48_vm0, %v2534_v16 }
 0x8ab   :  { %v3081_v3 = vpop.permute.xlu1 %3080 }
 0x8ac   :  { %v3083_v40 = vunpack.i.h.bf16 %v3081_v3  ;;  %v3082_v15 = vunpack.i.l.bf16 %v3081_v3 }
 0x8ae   :  { %v2517_v59 = vsel %vm455_vm2, %v4002_v23, %v3083_v40  ;;  %v2516_v38 = vsel %vm455_vm2, %v4000_v21, %v3082_v15 }
 0x8af   :  { %v2535_v61 = vpack.c.bf16 %v2517_v59, %v2516_v38 }
 0x8b0   :  { %v3086_v50 = vpop.permute.xlu0 %3085 }
 0x8b1   :  { %v3088_v43 = vunpack.i.h.bf16 %v3086_v50  ;;  %v3087_v34 = vunpack.i.l.bf16 %v3086_v50  ;;  %3047 = vmatmul.mubr.msk.bf16.vlgmr.msra.gmra.mrb[64].mxu0 %vm48_vm0, %v2535_v61 }
 0x8b3   :  { %v2519_v2 = vsel %vm455_vm2, %v4006_v60, %v3088_v43  ;;  %v2518_v5 = vsel %vm455_vm2, %v4004_v6, %v3087_v34 }
 0x8b4   :  { %v2536_v35 = vpack.c.bf16 %v2519_v2, %v2518_v5  ;;  %v3091_v0 = vpop.permute.xlu1 %3090 }
 0x8b5   :  { %v3093_v52 = vunpack.i.h.bf16 %v3091_v0  ;;  %v3092_v48 = vunpack.i.l.bf16 %v3091_v0 }
 0x8b6   :  { %3050 = vmatprep.mubr.msk.bf16.mxu0 %vm48_vm0, %v2536_v35 }
 0x8b7   :  { %v2521_v21 = vsel %vm455_vm2, %v4010_v49, %v3093_v52  ;;  %v2520_v23 = vsel %vm455_vm2, %v4008_v24, %v3092_v48 }
 0x8b8   :  { %v2537_v28 = vpack.c.bf16 %v2521_v21, %v2520_v23  ;;  %v3096_v33 = vpop.permute.xlu0 %3095 }
 0x8b9   :  { %v3098_v9 = vunpack.i.h.bf16 %v3096_v33  ;;  %v3097_v18 = vunpack.i.l.bf16 %v3096_v33 }
 0x8ba   :  { %3051 = vmatmul.mubr.msk.bf16.gmra.mrb[68].mxu0 %vm48_vm0, %v2537_v28 }
 0x8bb   :  { %v2523_v6 = vsel %vm455_vm2, %v4014_v19, %v3098_v9  ;;  %v2522_v60 = vsel %vm455_vm2, %v4012_v26, %v3097_v18 }
 0x8bc   :  { %v2538_v1 = vpack.c.bf16 %v2523_v6, %v2522_v60  ;;  %v3101_v31 = vpop.permute.xlu1 %3100 }
 0x8bd   :  { %v3103_v12 = vunpack.i.h.bf16 %v3101_v31  ;;  %v3102_v54 = vunpack.i.l.bf16 %v3101_v31 }
 0x8be   :  { %3054 = vmatprep.mubr.msk.bf16.mxu0 %vm48_vm0, %v2538_v1 }
 0x8bf   :  { %v2525_v24 = vsel %vm455_vm2, %v4038_v56, %v3103_v12  ;;  %v2524_v49 = vsel %vm455_vm2, %v4030_v20, %v3102_v54 }
 0x8c0   :  { %v2539_v11 = vpack.c.bf16 %v2525_v24, %v2524_v49  ;;  %v3106_v47 = vpop.permute.xlu0 %3105 }
 0x8c1   :  { %v3108_v58 = vunpack.i.h.bf16 %v3106_v47  ;;  %v3107_v27 = vunpack.i.l.bf16 %v3106_v47 }
 0x8c2   :  { %3055 = vmatmul.mubr.msk.bf16.gmra.mrb[72].mxu0 %vm48_vm0, %v2539_v11 }
 0x8c3   :  { %v2527_v26 = vsel %vm455_vm2, %v4018_v44, %v3108_v58  ;;  %v2526_v19 = vsel %vm455_vm2, %v4016_v10, %v3107_v27  ;;  %v2737_v44 = vld [vmem:[%s4393_s7] ss:$0 sm:$0xff] }
 0x8c4   :  { %v2540_v46 = vpack.c.bf16 %v2527_v26, %v2526_v19 }
 0x8c6   :  { %3058 = vmatprep.mubr.msk.bf16.mxu0 %vm48_vm0, %v2540_v46 }
 0x8fa   :  { %v3111_v63 = vpop.permute.xlu1 %3110 }
 0x8fb   :  { %v3113_v56 = vunpack.i.h.bf16 %v3111_v63  ;;  %v3112_v17 = vunpack.i.l.bf16 %v3111_v63 }
 0x8fd   :  { %v2529_v20 = vsel %vm455_vm2, %v4049_v57, %v3113_v56  ;;  %v2528_v42 = vsel %vm455_vm2, %v4044_v53, %v3112_v17 }
 0x8fe   :  { %v2541_v25 = vpack.c.bf16 %v2529_v20, %v2528_v42 }
 0x900   :  { %3059 = vmatmul.mubr.msk.bf16.gmra.mrb[76].mxu0 %vm48_vm0, %v2541_v25 }
 0x984   :  { %v3048_v10 = vpop.f32.mrb[64].mxu0 }
 0x985   :  { %v2618_v62 = vadd.f32 %v3048_v10, %v2737_v44  ;;  %v2609_v14 = vpop.f32.mrb[65].mxu0 }
 0x986   :  { %v2610_v4 = vadd.f32 %v2737_v44, %v2609_v14  ;;  %v3049_v13 = vpop.f32.mrb[66].mxu0 }
 0x987   :  { %2674 = vst.msk [vmem:[%s4394_s8 + $0x10] sm:$0xff] %vm48_vm0, %v2618_v62  ;;  %v2621_v57 = vadd.f32 %v3049_v13, %v2737_v44  ;;  %v2612_v29 = vpop.f32.mrb[67].mxu0 }
 0x988   :  { %2672 = vst.msk [vmem:[%s4394_s8] sm:$0xff] %vm48_vm0, %v2610_v4  ;;  %v2613_v53 = vadd.f32 %v2737_v44, %v2612_v29 }
 0x989   :  { %2675 = vst.msk [vmem:[%s4394_s8 + $0x18] sm:$0xff] %vm48_vm0, %v2621_v57 }
 0x98a   :  { %2673 = vst.msk [vmem:[%s4394_s8 + $0x8] sm:$0xff] %vm48_vm0, %v2613_v53 }
 0x98d   :  { %v3052_v37 = vpop.f32.mrb[68].mxu0 }
 0x98e   :  { %v2634_v30 = vadd.f32 %v3052_v37, %v2737_v44  ;;  %v2625_v51 = vpop.f32.mrb[69].mxu0 }
 0x98f   :  { %v2626_v55 = vadd.f32 %v2737_v44, %v2625_v51  ;;  %v3053_v7 = vpop.f32.mrb[70].mxu0 }
 0x990   :  { %2678 = vst.msk [vmem:[%s4394_s8 + $0x30] sm:$0xff] %vm48_vm0, %v2634_v30  ;;  %v2637_v32 = vadd.f32 %v3053_v7, %v2737_v44  ;;  %v2628_v36 = vpop.f32.mrb[71].mxu0 }
 0x991   :  { %2676 = vst.msk [vmem:[%s4394_s8 + $0x20] sm:$0xff] %vm48_vm0, %v2626_v55  ;;  %v2629_v45 = vadd.f32 %v2737_v44, %v2628_v36 }
 0x992   :  { %2679 = vst.msk [vmem:[%s4394_s8 + $0x38] sm:$0xff] %vm48_vm0, %v2637_v32 }
 0x993   :  { %2677 = vst.msk [vmem:[%s4394_s8 + $0x28] sm:$0xff] %vm48_vm0, %v2629_v45 }
 0x995   :  { %v3056_v22 = vpop.f32.mrb[72].mxu0 }
 0x996   :  { %v2650_v8 = vadd.f32 %v3056_v22, %v2737_v44  ;;  %v2641_v39 = vpop.f32.mrb[73].mxu0 }
 0x997   :  { %v2642_v41 = vadd.f32 %v2737_v44, %v2641_v39  ;;  %v3057_v16 = vpop.f32.mrb[74].mxu0 }
 0x998   :  { %2682 = vst.msk [vmem:[%s4394_s8 + $0x50] sm:$0xff] %vm48_vm0, %v2650_v8  ;;  %v2653_v3 = vadd.f32 %v3057_v16, %v2737_v44  ;;  %v2644_v40 = vpop.f32.mrb[75].mxu0 }
 0x999   :  { %2680 = vst.msk [vmem:[%s4394_s8 + $0x40] sm:$0xff] %vm48_vm0, %v2642_v41  ;;  %v2645_v15 = vadd.f32 %v2737_v44, %v2644_v40 }
 0x99a   :  { %2683 = vst.msk [vmem:[%s4394_s8 + $0x58] sm:$0xff] %vm48_vm0, %v2653_v3 }
 0x99b   :  { %2681 = vst.msk [vmem:[%s4394_s8 + $0x48] sm:$0xff] %vm48_vm0, %v2645_v15 }
 0x9d3   :  { %v3060_v59 = vpop.f32.mrb[76].mxu0 }
 0x9d4   :  { %v2666_v38 = vadd.f32 %v3060_v59, %v2737_v44  ;;  %v2657_v61 = vpop.f32.mrb[77].mxu0 }
 0x9d5   :  { %v2658_v50 = vadd.f32 %v2737_v44, %v2657_v61  ;;  %v3061_v43 = vpop.f32.mrb[78].mxu0 }
 0x9d6   :  { %2686 = vst.msk [vmem:[%s4394_s8 + $0x70] sm:$0xff] %vm48_vm0, %v2666_v38  ;;  %v2669_v34 = vadd.f32 %v3061_v43, %v2737_v44  ;;  %v2660_v2 = vpop.f32.mrb[79].mxu0 }
 0x9d7   :  { %2684 = vst.msk [vmem:[%s4394_s8 + $0x60] sm:$0xff] %vm48_vm0, %v2658_v50  ;;  %v2661_v5 = vadd.f32 %v2737_v44, %v2660_v2 }
 0x9d8   :  { %2687 = vst.msk [vmem:[%s4394_s8 + $0x78] sm:$0xff] %vm48_vm0, %v2669_v34 }
 0x9d9   :  { %2685 = vst.msk [vmem:[%s4394_s8 + $0x68] sm:$0xff] %vm48_vm0, %v2661_v5 }

// kernel: swin_for_iqa_forward.13
= control target key start
LH: loop header
LB: loop body
LE: loop exit
PB: predicated region body
PF: predicated region fallthrough
CT: control target
= control target key end

     0   :  { %vm80_vm0 = vcmask 261120   ;;  %s1621_s0 = inlined_call_operand.vmem [shape: f32[128,32], index: 0, kind: input, shape index: {}]   ;;  %s1622_s1 = inlined_call_operand.vmem [shape: f32[128,32], index: 1, kind: input, shape index: {}]   ;;  %s1623_s4 = inlined_call_operand.vmem [shape: f32[32,128], index: 4, kind: input, shape index: {}]   ;;  %s1624_s2 = inlined_call_operand.vmem [shape: f32[1,32], index: 2, kind: input, shape index: {}]   ;;  %s1625_s3 = inlined_call_operand.vmem [shape: f32[1,32], index: 3, kind: input, shape index: {}]   ;;  %s1626_s6 = inlined_call_operand.vmem [shape: f32[128,32], index: 6, kind: input, shape index: {}]   ;;  %s1627_s5 = inlined_call_operand.vmem [shape: f32[1,128], index: 5, kind: input, shape index: {}]   ;;  %s1628_s7 = inlined_call_operand.vmem [shape: f32[1,32], index: 7, kind: input, shape index: {}]   ;;  %s1629_s8 = inlined_call_operand.vmem [shape: f32[128,32], index: 8, kind: output, shape index: {}]  }
   0x1   :  { %v30_v0 = vld [vmem:[%s1621_s0] sm:$0xff]  ;;  %v32_v2 = vld [vmem:[%s1621_s0 + $0x10] sm:$0xff]  ;;  %v31_v5 = vld [vmem:[%s1621_s0 + $0x8] sm:$0xff] }
   0x2   :  { %v46_v1 = vld [vmem:[%s1622_s1] sm:$0xff]  ;;  %v48_v4 = vld [vmem:[%s1622_s1 + $0x10] sm:$0xff]  ;;  %v47_v6 = vld [vmem:[%s1622_s1 + $0x8] sm:$0xff] }
   0x3   :  { %v1032_v3 = vadd.f32 %v46_v1, %v30_v0  ;;  %v1043_v7 = vadd.f32 %v48_v4, %v32_v2  ;;  %v1045_v8 = vadd.f32 %v47_v6, %v31_v5  ;;  %v33_v9 = vld [vmem:[%s1621_s0 + $0x18] sm:$0xff]  ;;  %v34_v11 = vld [vmem:[%s1621_s0 + $0x20] sm:$0xff]  ;;  %v35_v15 = vld [vmem:[%s1621_s0 + $0x28] sm:$0xff] }
   0x4   :  { %v49_v10 = vld [vmem:[%s1622_s1 + $0x18] sm:$0xff]  ;;  %v50_v14 = vld [vmem:[%s1622_s1 + $0x20] sm:$0xff]  ;;  %v51_v16 = vld [vmem:[%s1622_s1 + $0x28] sm:$0xff] }
   0x5   :  { %v81_v12 = vsel %vm80_vm0, %v1032_v3, 0.0  ;;  %v1058_v13 = vadd.f32 %v49_v10, %v33_v9  ;;  %v87_v17 = vsel %vm80_vm0, %v1043_v7, 0.0  ;;  %v84_v18 = vsel %vm80_vm0, %v1045_v8, 0.0  ;;  %v36_v22 = vld [vmem:[%s1621_s0 + $0x30] sm:$0xff]  ;;  %v37_v24 = vld [vmem:[%s1621_s0 + $0x38] sm:$0xff]  ;;  %v38_v30 = vld [vmem:[%s1621_s0 + $0x40] sm:$0xff] }
   0x6   :  { %82 = vadd.xlane.f32.xlu0 %v81_v12  ;;  %88 = vadd.xlane.f32.xlu1 %v87_v17  ;;  %v1073_v19 = vadd.f32 %v50_v14, %v34_v11  ;;  %v1077_v21 = vadd.f32 %v51_v16, %v35_v15  ;;  %v52_v23 = vld [vmem:[%s1622_s1 + $0x30] sm:$0xff]  ;;  %v53_v25 = vld [vmem:[%s1622_s1 + $0x38] sm:$0xff]  ;;  %v54_v31 = vld [vmem:[%s1622_s1 + $0x40] sm:$0xff] }
   0x7   :  { %v90_v20 = vsel %vm80_vm0, %v1058_v13, 0.0  ;;  %v1093_v27 = vadd.f32 %v52_v23, %v36_v22  ;;  %v1097_v29 = vadd.f32 %v53_v25, %v37_v24  ;;  %v39_v32 = vld [vmem:[%s1621_s0 + $0x48] sm:$0xff]  ;;  %v1113_v35 = vadd.f32 %v54_v31, %v38_v30  ;;  %v40_v38 = vld [vmem:[%s1621_s0 + $0x50] sm:$0xff]  ;;  %v41_v40 = vld [vmem:[%s1621_s0 + $0x58] sm:$0xff] }
   0x8   :  { %v93_v26 = vsel %vm80_vm0, %v1073_v19, 0.0  ;;  %v96_v28 = vsel %vm80_vm0, %v1077_v21, 0.0  ;;  %v55_v33 = vld [vmem:[%s1622_s1 + $0x48] sm:$0xff]  ;;  %v56_v39 = vld [vmem:[%s1622_s1 + $0x50] sm:$0xff]  ;;  %v57_v41 = vld [vmem:[%s1622_s1 + $0x58] sm:$0xff] }
   0x9   :  { %v99_v34 = vsel %vm80_vm0, %v1093_v27, 0.0  ;;  %v102_v36 = vsel %vm80_vm0, %v1097_v29, 0.0  ;;  %v1117_v37 = vadd.f32 %v55_v33, %v39_v32  ;;  %v105_v42 = vsel %vm80_vm0, %v1113_v35, 0.0  ;;  %v42_v46 = vld [vmem:[%s1621_s0 + $0x60] sm:$0xff]  ;;  %v43_v48 = vld [vmem:[%s1621_s0 + $0x68] sm:$0xff]  ;;  %v44_v54 = vld [vmem:[%s1621_s0 + $0x70] sm:$0xff] }
   0xa   :  { %85 = vadd.xlane.f32.xlu0 %v84_v18  ;;  %91 = vadd.xlane.f32.xlu1 %v90_v20  ;;  %v1133_v43 = vadd.f32 %v56_v39, %v40_v38  ;;  %v1137_v45 = vadd.f32 %v57_v41, %v41_v40  ;;  %v58_v47 = vld [vmem:[%s1622_s1 + $0x60] sm:$0xff]  ;;  %v59_v49 = vld [vmem:[%s1622_s1 + $0x68] sm:$0xff]  ;;  %v60_v55 = vld [vmem:[%s1622_s1 + $0x70] sm:$0xff] }
   0xb   :  { %v108_v44 = vsel %vm80_vm0, %v1117_v37, 0.0  ;;  %v1153_v51 = vadd.f32 %v58_v47, %v42_v46  ;;  %v1157_v53 = vadd.f32 %v59_v49, %v43_v48  ;;  %v45_v56 = vld [vmem:[%s1621_s0 + $0x78] sm:$0xff]  ;;  %v1173_v59 = vadd.f32 %v60_v55, %v44_v54 }
   0xc   :  { %v111_v50 = vsel %vm80_vm0, %v1133_v43, 0.0  ;;  %v114_v52 = vsel %vm80_vm0, %v1137_v45, 0.0  ;;  %v61_v57 = vld [vmem:[%s1622_s1 + $0x78] sm:$0xff] }
   0xd   :  { %v117_v58 = vsel %vm80_vm0, %v1153_v51, 0.0  ;;  %v120_v60 = vsel %vm80_vm0, %v1157_v53, 0.0  ;;  %v1177_v61 = vadd.f32 %v61_v57, %v45_v56  ;;  %v123_v62 = vsel %vm80_vm0, %v1173_v59, 0.0 }
   0xe   :  { %94 = vadd.xlane.f32.xlu0 %v93_v26  ;;  %97 = vadd.xlane.f32.xlu1 %v96_v28 }
   0xf   :  { %v126_v63 = vsel %vm80_vm0, %v1177_v61, 0.0 }
  0x12   :  { %100 = vadd.xlane.f32.xlu0 %v99_v34  ;;  %103 = vadd.xlane.f32.xlu1 %v102_v36 }
  0x16   :  { %106 = vadd.xlane.f32.xlu0 %v105_v42  ;;  %109 = vadd.xlane.f32.xlu1 %v108_v44 }
  0x1a   :  { %112 = vadd.xlane.f32.xlu0 %v111_v50  ;;  %115 = vadd.xlane.f32.xlu1 %v114_v52 }
  0x1e   :  { %118 = vadd.xlane.f32.xlu0 %v117_v58  ;;  %121 = vadd.xlane.f32.xlu1 %v120_v60 }
  0x22   :  { %124 = vadd.xlane.f32.xlu0 %v123_v62  ;;  %127 = vadd.xlane.f32.xlu1 %v126_v63 }
  0x93   :  { %v83_v0 = vpop.xlane.xlu0 %82  ;;  %v89_v2 = vpop.xlane.xlu1 %88 }
  0x94   :  { %v130_v1 = vmul.f32 0.03125, %v83_v0  ;;  %v132_v4 = vmul.f32 0.03125, %v89_v2 }
  0x96   :  { %v1184_v5 = vsub.f32 %v1032_v3, %v130_v1  ;;  %v1187_v6 = vsub.f32 %v1043_v7, %v132_v4 }
  0x97   :  { %v86_v9 = vpop.xlane.xlu0 %85  ;;  %v92_v11 = vpop.xlane.xlu1 %91 }
  0x98   :  { %v131_v10 = vmul.f32 0.03125, %v86_v9  ;;  %v162_v12 = vmul.f32 %v1184_v5, %v1184_v5  ;;  %v133_v14 = vmul.f32 0.03125, %v92_v11  ;;  %v164_v15 = vmul.f32 %v1187_v6, %v1187_v6 }
  0x9a   :  { %v1194_v16 = vsub.f32 %v1045_v8, %v131_v10  ;;  %v178_v17 = vsel %vm80_vm0, %v162_v12, 0.0  ;;  %v1198_v18 = vsub.f32 %v1058_v13, %v133_v14  ;;  %v184_v24 = vsel %vm80_vm0, %v164_v15, 0.0 }
  0x9b   :  { %179 = vadd.xlane.f32.xlu0 %v178_v17  ;;  %v95_v20 = vpop.xlane.xlu0 %94  ;;  %v98_v23 = vpop.xlane.xlu1 %97 }
  0x9c   :  { %v134_v22 = vmul.f32 0.03125, %v95_v20  ;;  %v163_v25 = vmul.f32 %v1194_v16, %v1194_v16  ;;  %v135_v26 = vmul.f32 0.03125, %v98_v23  ;;  %v165_v28 = vmul.f32 %v1198_v18, %v1198_v18 }
  0x9e   :  { %v1206_v30 = vsub.f32 %v1073_v19, %v134_v22  ;;  %v181_v31 = vsel %vm80_vm0, %v163_v25, 0.0  ;;  %v1210_v32 = vsub.f32 %v1077_v21, %v135_v26  ;;  %v187_v38 = vsel %vm80_vm0, %v165_v28, 0.0 }
  0x9f   :  { %185 = vadd.xlane.f32.xlu0 %v184_v24  ;;  %182 = vadd.xlane.f32.xlu1 %v181_v31  ;;  %v101_v33 = vpop.xlane.xlu0 %100  ;;  %v104_v36 = vpop.xlane.xlu1 %103 }
  0xa0   :  { %v136_v34 = vmul.f32 0.03125, %v101_v33  ;;  %v166_v39 = vmul.f32 %v1206_v30, %v1206_v30  ;;  %v137_v40 = vmul.f32 0.03125, %v104_v36  ;;  %v167_v41 = vmul.f32 %v1210_v32, %v1210_v32 }
  0xa2   :  { %v1218_v42 = vsub.f32 %v1093_v27, %v136_v34  ;;  %v190_v44 = vsel %vm80_vm0, %v166_v39, 0.0  ;;  %v1222_v46 = vsub.f32 %v1097_v29, %v137_v40  ;;  %v193_v50 = vsel %vm80_vm0, %v167_v41, 0.0 }
  0xa3   :  { %188 = vadd.xlane.f32.xlu1 %v187_v38  ;;  %191 = vadd.xlane.f32.xlu0 %v190_v44  ;;  %v107_v47 = vpop.xlane.xlu0 %106  ;;  %v110_v49 = vpop.xlane.xlu1 %109 }
  0xa4   :  { %v138_v48 = vmul.f32 0.03125, %v107_v47  ;;  %v168_v52 = vmul.f32 %v1218_v42, %v1218_v42  ;;  %v139_v54 = vmul.f32 0.03125, %v110_v49  ;;  %v169_v55 = vmul.f32 %v1222_v46, %v1222_v46 }
  0xa6   :  { %v1230_v56 = vsub.f32 %v1113_v35, %v138_v48  ;;  %v196_v57 = vsel %vm80_vm0, %v168_v52, 0.0  ;;  %v1234_v58 = vsub.f32 %v1117_v37, %v139_v54  ;;  %v199_v0 = vsel %vm80_vm0, %v169_v55, 0.0  ;;  %v334_v54 = vld [vmem:[%s1623_s4] sm:$0xff]  ;;  %v335_v55 = vld [vmem:[%s1623_s4 + $0x8] sm:$0xff] }
  0xa7   :  { %194 = vadd.xlane.f32.xlu1 %v193_v50  ;;  %197 = vadd.xlane.f32.xlu0 %v196_v57  ;;  %v113_v60 = vpop.xlane.xlu0 %112  ;;  %v116_v63 = vpop.xlane.xlu1 %115  ;;  %v346_v57 = vpack.c.bf16 %v335_v55, %v334_v54  ;;  %v1295_v55 = vld [vmem:[%s1624_s2] ss:$0 sm:$0xff] }
  0xa8   :  { %v140_v62 = vmul.f32 0.03125, %v113_v60  ;;  %v170_v1 = vmul.f32 %v1230_v56, %v1230_v56  ;;  %v141_v2 = vmul.f32 0.03125, %v116_v63  ;;  %v171_v4 = vmul.f32 %v1234_v58, %v1234_v58  ;;  %v336_v60 = vld [vmem:[%s1623_s4 + $0x10] sm:$0xff] }
  0xa9   :  { %846 = vmatprep.subr.bf16.mxu0 %v346_v57 }
  0xaa   :  { %v1242_v9 = vsub.f32 %v1133_v43, %v140_v62  ;;  %v202_v10 = vsel %vm80_vm0, %v170_v1, 0.0  ;;  %v1246_v11 = vsub.f32 %v1137_v45, %v141_v2  ;;  %v205_v17 = vsel %vm80_vm0, %v171_v4, 0.0  ;;  %847 = vmatpush3.bf16.msra.mxu0 %v346_v57  ;;  %v337_v62 = vld [vmem:[%s1623_s4 + $0x18] sm:$0xff] }
  0xab   :  { %200 = vadd.xlane.f32.xlu1 %v199_v0  ;;  %203 = vadd.xlane.f32.xlu0 %v202_v10  ;;  %v119_v12 = vpop.xlane.xlu0 %118  ;;  %v122_v15 = vpop.xlane.xlu1 %121  ;;  %v347_v63 = vpack.c.bf16 %v337_v62, %v336_v60 }
  0xac   :  { %v142_v14 = vmul.f32 0.03125, %v119_v12  ;;  %v172_v20 = vmul.f32 %v1242_v9, %v1242_v9  ;;  %v143_v22 = vmul.f32 0.03125, %v122_v15  ;;  %v173_v23 = vmul.f32 %v1246_v11, %v1246_v11 }
  0xad   :  { %848 = vmatprep.subr.bf16.mxu0 %v347_v63 }
  0xae   :  { %v1254_v24 = vsub.f32 %v1153_v51, %v142_v14  ;;  %v208_v25 = vsel %vm80_vm0, %v172_v20, 0.0  ;;  %v1258_v26 = vsub.f32 %v1157_v53, %v143_v22  ;;  %v211_v34 = vsel %vm80_vm0, %v173_v23, 0.0  ;;  %849 = vmatpush3.bf16.msra.mxu0 %v347_v63 }
  0xaf   :  { %206 = vadd.xlane.f32.xlu1 %v205_v17  ;;  %209 = vadd.xlane.f32.xlu0 %v208_v25  ;;  %v125_v28 = vpop.xlane.xlu0 %124  ;;  %v128_v33 = vpop.xlane.xlu1 %127 }
  0xb0   :  { %v144_v31 = vmul.f32 0.03125, %v125_v28  ;;  %v174_v36 = vmul.f32 %v1254_v24, %v1254_v24  ;;  %v145_v38 = vmul.f32 0.03125, %v128_v33  ;;  %v175_v39 = vmul.f32 %v1258_v26, %v1258_v26 }
  0xb2   :  { %v1266_v40 = vsub.f32 %v1173_v59, %v144_v31  ;;  %v214_v41 = vsel %vm80_vm0, %v174_v36, 0.0  ;;  %v1270_v44 = vsub.f32 %v1177_v61, %v145_v38  ;;  %v217_v47 = vsel %vm80_vm0, %v175_v39, 0.0 }
  0xb3   :  { %212 = vadd.xlane.f32.xlu1 %v211_v34  ;;  %215 = vadd.xlane.f32.xlu0 %v214_v41 }
  0xb4   :  { %v176_v48 = vmul.f32 %v1266_v40, %v1266_v40  ;;  %v177_v49 = vmul.f32 %v1270_v44, %v1270_v44 }
  0xb6   :  { %v220_v50 = vsel %vm80_vm0, %v176_v48, 0.0  ;;  %v223_v52 = vsel %vm80_vm0, %v177_v49, 0.0 }
  0xb7   :  { %218 = vadd.xlane.f32.xlu1 %v217_v47  ;;  %221 = vadd.xlane.f32.xlu0 %v220_v50 }
  0xbb   :  { %224 = vadd.xlane.f32.xlu1 %v223_v52 }
 0x128   :  { %v180_v0 = vpop.xlane.xlu0 %179 }
 0x129   :  { %v226_v1 = vmul.f32 0.03125, %v180_v0 }
 0x12b   :  { %v242_v2 = vadd.f32 1e-05, %v226_v1 }
 0x12c   :  { %v183_v4 = vpop.xlane.xlu1 %182  ;;  %v186_v10 = vpop.xlane.xlu0 %185 }
 0x12d   :  { %914 = vrsqrt.f32 %v242_v2  ;;  %v227_v12 = vmul.f32 0.03125, %v183_v4  ;;  %v228_v14 = vmul.f32 0.03125, %v186_v10 }
 0x12f   :  { %v243_v15 = vadd.f32 1e-05, %v227_v12  ;;  %v244_v17 = vadd.f32 1e-05, %v228_v14  ;;  %v1303_v14 = vld [vmem:[%s1625_s3] ss:$0 sm:$0xff] }
 0x130   :  { %v189_v20 = vpop.xlane.xlu1 %188  ;;  %v192_v22 = vpop.xlane.xlu0 %191 }
 0x131   :  { %916 = vrsqrt.f32 %v243_v15  ;;  %v229_v23 = vmul.f32 0.03125, %v189_v20  ;;  %v230_v25 = vmul.f32 0.03125, %v192_v22 }
 0x132   :  { %918 = vrsqrt.f32 %v244_v17 }
 0x133   :  { %v245_v28 = vadd.f32 1e-05, %v229_v23  ;;  %v246_v31 = vadd.f32 1e-05, %v230_v25 }
 0x134   :  { %v195_v33 = vpop.xlane.xlu1 %194  ;;  %v198_v34 = vpop.xlane.xlu0 %197 }
 0x135   :  { %920 = vrsqrt.f32 %v245_v28  ;;  %v231_v36 = vmul.f32 0.03125, %v195_v33  ;;  %v232_v38 = vmul.f32 0.03125, %v198_v34 }
 0x136   :  { %922 = vrsqrt.f32 %v246_v31 }
 0x137   :  { %v915_v39 = vpop.eup %914  ;;  %v247_v41 = vadd.f32 1e-05, %v231_v36  ;;  %v248_v47 = vadd.f32 1e-05, %v232_v38 }
 0x138   :  { %v201_v48 = vpop.xlane.xlu1 %200  ;;  %v204_v49 = vpop.xlane.xlu0 %203  ;;  %v274_v50 = vmul.f32 %v915_v39, %v1184_v5 }
 0x139   :  { %924 = vrsqrt.f32 %v247_v41  ;;  %v233_v52 = vmul.f32 0.03125, %v201_v48  ;;  %v234_v54 = vmul.f32 0.03125, %v204_v49 }
 0x13a   :  { %926 = vrsqrt.f32 %v248_v47  ;;  %v296_v4 = vmul.f32 %v1295_v55, %v274_v50 }
 0x13b   :  { %v917_v57 = vpop.eup %916  ;;  %v249_v60 = vadd.f32 1e-05, %v233_v52  ;;  %v250_v62 = vadd.f32 1e-05, %v234_v54 }
 0x13c   :  { %v919_v63 = vpop.eup %918  ;;  %v207_v0 = vpop.xlane.xlu1 %206  ;;  %v275_v2 = vmul.f32 %v917_v57, %v1194_v16 }
 0x13d   :  { %v210_v1 = vpop.xlane.xlu0 %209  ;;  %v276_v5 = vmul.f32 %v919_v63, %v1187_v6  ;;  %928 = vrsqrt.f32 %v249_v60  ;;  %v235_v10 = vmul.f32 0.03125, %v207_v0  ;;  %v318_v6 = vadd.f32 %v1303_v14, %v296_v4 }
 0x13e   :  { %v236_v12 = vmul.f32 0.03125, %v210_v1  ;;  %930 = vrsqrt.f32 %v250_v62  ;;  %v297_v15 = vmul.f32 %v1295_v55, %v275_v2 }
 0x13f   :  { %v921_v17 = vpop.eup %920  ;;  %v251_v20 = vadd.f32 1e-05, %v235_v10  ;;  %v298_v33 = vmul.f32 %v1295_v55, %v276_v5 }
 0x140   :  { %v252_v22 = vadd.f32 1e-05, %v236_v12  ;;  %v923_v23 = vpop.eup %922  ;;  %v277_v16 = vmul.f32 %v921_v17, %v1198_v18  ;;  %v213_v25 = vpop.xlane.xlu1 %212  ;;  %v319_v31 = vadd.f32 %v1303_v14, %v297_v15 }
 0x141   :  { %v216_v28 = vpop.xlane.xlu0 %215  ;;  %v278_v34 = vmul.f32 %v923_v23, %v1206_v30  ;;  %932 = vrsqrt.f32 %v251_v20  ;;  %v237_v36 = vmul.f32 0.03125, %v213_v25  ;;  %v320_v57 = vadd.f32 %v1303_v14, %v298_v33 }
 0x142   :  { %v238_v38 = vmul.f32 0.03125, %v216_v28  ;;  %934 = vrsqrt.f32 %v252_v22  ;;  %v338_v39 = vpack.c.bf16 %v319_v31, %v318_v6  ;;  %v299_v41 = vmul.f32 %v1295_v55, %v277_v16 }
 0x143   :  { %v925_v47 = vpop.eup %924  ;;  %v253_v48 = vadd.f32 1e-05, %v237_v36  ;;  %v300_v60 = vmul.f32 %v1295_v55, %v278_v34 }
 0x144   :  { %v254_v18 = vadd.f32 1e-05, %v238_v38  ;;  %v927_v49 = vpop.eup %926  ;;  %v279_v50 = vmul.f32 %v925_v47, %v1210_v32  ;;  %v219_v52 = vpop.xlane.xlu1 %218  ;;  %850 = vmatprep.mubr.msk.bf16.mxu0 %vm80_vm0, %v338_v39  ;;  %v321_v30 = vadd.f32 %v1303_v14, %v299_v41 }
 0x145   :  { %v222_v54 = vpop.xlane.xlu0 %221  ;;  %v280_v62 = vmul.f32 %v927_v49, %v1218_v42  ;;  %936 = vrsqrt.f32 %v253_v48  ;;  %v239_v63 = vmul.f32 0.03125, %v219_v52  ;;  %v322_v17 = vadd.f32 %v1303_v14, %v300_v60 }
 0x146   :  { %v240_v0 = vmul.f32 0.03125, %v222_v54  ;;  %938 = vrsqrt.f32 %v254_v18  ;;  %v339_v1 = vpack.c.bf16 %v321_v30, %v320_v57  ;;  %v301_v2 = vmul.f32 %v1295_v55, %v279_v50 }
 0x147   :  { %v929_v32 = vpop.eup %928  ;;  %v255_v4 = vadd.f32 1e-05, %v239_v63  ;;  %v302_v20 = vmul.f32 %v1295_v55, %v280_v62 }
 0x148   :  { %v256_v5 = vadd.f32 1e-05, %v240_v0  ;;  %v931_v10 = vpop.eup %930  ;;  %v281_v12 = vmul.f32 %v929_v32, %v1222_v46  ;;  %v225_v15 = vpop.xlane.xlu1 %224  ;;  %851 = vmatmul.mubr.msk.bf16.vlgmr.msra.gmra.mrb[0].mxu0 %vm80_vm0, %v339_v1  ;;  %v323_v42 = vadd.f32 %v1303_v14, %v301_v2 }
 0x149   :  { %v282_v22 = vmul.f32 %v931_v10, %v1230_v56  ;;  %940 = vrsqrt.f32 %v255_v4  ;;  %v241_v23 = vmul.f32 0.03125, %v225_v15  ;;  %v324_v33 = vadd.f32 %v1303_v14, %v302_v20 }
 0x14a   :  { %942 = vrsqrt.f32 %v256_v5  ;;  %v340_v16 = vpack.c.bf16 %v323_v42, %v322_v17  ;;  %v303_v25 = vmul.f32 %v1295_v55, %v281_v12  ;;  %v621_v17 = vld [vmem:[%s1626_s6 + $0x8] sm:$0xff] }
 0x14b   :  { %v933_v28 = vpop.eup %932  ;;  %v257_v6 = vadd.f32 1e-05, %v241_v23  ;;  %v304_v36 = vmul.f32 %v1295_v55, %v282_v22  ;;  %v624_v22 = vld [vmem:[%s1626_s6 + $0x20] sm:$0xff]  ;;  %v625_v23 = vld [vmem:[%s1626_s6 + $0x28] sm:$0xff] }
 0x14c   :  { %v935_v46 = vpop.eup %934  ;;  %v283_v31 = vmul.f32 %v933_v28, %v1234_v58  ;;  %854 = vmatprep.mubr.msk.bf16.mxu0 %vm80_vm0, %v340_v16  ;;  %v325_v34 = vadd.f32 %v1303_v14, %v303_v25  ;;  %v646_v16 = vpack.c.bf16 %v625_v23, %v624_v22  ;;  %v626_v25 = vld [vmem:[%s1626_s6 + $0x30] sm:$0xff]  ;;  %v627_v28 = vld [vmem:[%s1626_s6 + $0x38] sm:$0xff] }
 0x14d   :  { %v284_v56 = vmul.f32 %v935_v46, %v1242_v9  ;;  %944 = vrsqrt.f32 %v257_v6  ;;  %v326_v58 = vadd.f32 %v1303_v14, %v304_v36  ;;  %v647_v6 = vpack.c.bf16 %v627_v28, %v626_v25  ;;  %v628_v46 = vld [vmem:[%s1626_s6 + $0x40] sm:$0xff]  ;;  %v631_v36 = vld [vmem:[%s1626_s6 + $0x58] sm:$0xff] }
 0x14e   :  { %v341_v38 = vpack.c.bf16 %v325_v34, %v324_v33  ;;  %v305_v39 = vmul.f32 %v1295_v55, %v283_v31  ;;  %v629_v31 = vld [vmem:[%s1626_s6 + $0x48] sm:$0xff]  ;;  %v630_v34 = vld [vmem:[%s1626_s6 + $0x50] sm:$0xff] }
 0x14f   :  { %v937_v41 = vpop.eup %936  ;;  %v306_v49 = vmul.f32 %v1295_v55, %v284_v56  ;;  %v648_v33 = vpack.c.bf16 %v629_v31, %v628_v46  ;;  %v649_v56 = vpack.c.bf16 %v631_v36, %v630_v34 }
 0x150   :  { %v939_v47 = vpop.eup %938  ;;  %v285_v48 = vmul.f32 %v937_v41, %v1246_v11  ;;  %855 = vmatmul.mubr.msk.bf16.gmra.mrb[4].mxu0 %vm80_vm0, %v341_v38  ;;  %v327_v18 = vadd.f32 %v1303_v14, %v305_v39  ;;  %v632_v38 = vld [vmem:[%s1626_s6 + $0x60] sm:$0xff]  ;;  %v633_v39 = vld [vmem:[%s1626_s6 + $0x68] sm:$0xff] }
 0x151   :  { %v286_v50 = vmul.f32 %v939_v47, %v1254_v24  ;;  %v328_v11 = vadd.f32 %v1303_v14, %v306_v49  ;;  %v650_v41 = vpack.c.bf16 %v633_v39, %v632_v38  ;;  %v634_v47 = vld [vmem:[%s1626_s6 + $0x70] sm:$0xff] }
 0x152   :  { %v342_v52 = vpack.c.bf16 %v327_v18, %v326_v58  ;;  %v307_v9 = vmul.f32 %v1295_v55, %v285_v48  ;;  %v635_v48 = vld [vmem:[%s1626_s6 + $0x78] sm:$0xff]  ;;  %v1408_v18 = vld [vmem:[%s1627_s5] ss:$0 sm:$0xff] }
 0x153   :  { %v941_v54 = vpop.eup %940  ;;  %v308_v62 = vmul.f32 %v1295_v55, %v286_v50  ;;  %v651_v58 = vpack.c.bf16 %v635_v48, %v634_v47 }
 0x154   :  { %v943_v57 = vpop.eup %942  ;;  %v287_v30 = vmul.f32 %v941_v54, %v1258_v26  ;;  %858 = vmatprep.mubr.msk.bf16.mxu0 %vm80_vm0, %v342_v52  ;;  %v329_v60 = vadd.f32 %v1303_v14, %v307_v9 }
 0x155   :  { %v288_v63 = vmul.f32 %v943_v57, %v1266_v40  ;;  %v330_v26 = vadd.f32 %v1303_v14, %v308_v62 }
 0x156   :  { %v343_v0 = vpack.c.bf16 %v329_v60, %v328_v11  ;;  %v309_v24 = vmul.f32 %v1295_v55, %v287_v30 }
 0x157   :  { %v945_v1 = vpop.eup %944  ;;  %v310_v4 = vmul.f32 %v1295_v55, %v288_v63 }
 0x158   :  { %v289_v2 = vmul.f32 %v945_v1, %v1270_v44  ;;  %859 = vmatmul.mubr.msk.bf16.gmra.mrb[8].mxu0 %vm80_vm0, %v343_v0  ;;  %v331_v32 = vadd.f32 %v1303_v14, %v309_v24  ;;  %v620_v44 = vld [vmem:[%s1626_s6] sm:$0xff] }
 0x159   :  { %v332_v40 = vadd.f32 %v1303_v14, %v310_v4  ;;  %v644_v42 = vpack.c.bf16 %v621_v17, %v620_v44 }
 0x15a   :  { %v344_v5 = vpack.c.bf16 %v331_v32, %v330_v26  ;;  %v311_v10 = vmul.f32 %v1295_v55, %v289_v2  ;;  %v622_v55 = vld [vmem:[%s1626_s6 + $0x10] sm:$0xff] }
 0x15b   :  { %866 = vmatprep.subr.bf16.mxu0 %v644_v42  ;;  %898 = vmatprep.subr.bf16.mxu1 %v644_v42 }
 0x15c   :  { %862 = vmatprep.mubr.msk.bf16.mxu0 %vm80_vm0, %v344_v5  ;;  %v333_v12 = vadd.f32 %v1303_v14, %v311_v10  ;;  %867 = vmatpush3.bf16.msra.mxu0 %v644_v42  ;;  %v623_v14 = vld [vmem:[%s1626_s6 + $0x18] sm:$0xff] }
 0x15d   :  { %906 = vmatpush3.bf16.msra.mxu1 %v644_v42  ;;  %v645_v20 = vpack.c.bf16 %v623_v14, %v622_v55 }
 0x15e   :  { %v345_v15 = vpack.c.bf16 %v333_v12, %v332_v40 }
 0x15f   :  { %868 = vmatprep.subr.bf16.mxu0 %v645_v20  ;;  %899 = vmatprep.subr.bf16.mxu1 %v645_v20 }
 0x160   :  { %863 = vmatmul.mubr.msk.bf16.gmra.mrb[12].mxu0 %vm80_vm0, %v345_v15 }
 0x161   :  { %869 = vmatpush3.bf16.msra.mxu0 %v645_v20  ;;  %907 = vmatpush3.bf16.msra.mxu1 %v645_v20 }
 0x162   :  { %870 = vmatprep.subr.bf16.mxu0 %v646_v16  ;;  %900 = vmatprep.subr.bf16.mxu1 %v646_v16 }
 0x165   :  { %871 = vmatpush3.bf16.msra.mxu0 %v646_v16  ;;  %908 = vmatpush3.bf16.msra.mxu1 %v646_v16 }
 0x166   :  { %872 = vmatprep.subr.bf16.mxu0 %v647_v6  ;;  %901 = vmatprep.subr.bf16.mxu1 %v647_v6 }
 0x169   :  { %873 = vmatpush3.bf16.msra.mxu0 %v647_v6  ;;  %909 = vmatpush3.bf16.msra.mxu1 %v647_v6 }
 0x16a   :  { %874 = vmatprep.subr.bf16.mxu0 %v648_v33  ;;  %902 = vmatprep.subr.bf16.mxu1 %v648_v33 }
 0x16d   :  { %875 = vmatpush3.bf16.msra.mxu0 %v648_v33  ;;  %910 = vmatpush3.bf16.msra.mxu1 %v648_v33 }
 0x16e   :  { %876 = vmatprep.subr.bf16.mxu0 %v649_v56  ;;  %903 = vmatprep.subr.bf16.mxu1 %v649_v56 }
 0x171   :  { %877 = vmatpush3.bf16.msra.mxu0 %v649_v56  ;;  %911 = vmatpush3.bf16.msra.mxu1 %v649_v56 }
 0x172   :  { %878 = vmatprep.subr.bf16.mxu0 %v650_v41  ;;  %904 = vmatprep.subr.bf16.mxu1 %v650_v41 }
 0x175   :  { %879 = vmatpush3.bf16.msra.mxu0 %v650_v41  ;;  %912 = vmatpush3.bf16.msra.mxu1 %v650_v41 }
 0x176   :  { %880 = vmatprep.subr.bf16.mxu0 %v651_v58  ;;  %905 = vmatprep.subr.bf16.mxu1 %v651_v58 }
 0x179   :  { %881 = vmatpush3.bf16.msra.mxu0 %v651_v58  ;;  %913 = vmatpush3.bf16.msra.mxu1 %v651_v58 }
 0x21b   :  { %v852_v49 = vpop.f32.mrb[0].mxu0 }
 0x21c   :  { %v1411_v50 = vadd.f32 %v852_v49, %v1408_v18  ;;  %v413_v52 = vpop.f32.mrb[1].mxu0 }
 0x21d   :  { %v1414_v9 = vadd.f32 %v1408_v18, %v413_v52  ;;  %v853_v54 = vpop.f32.mrb[2].mxu0 }
 0x21e   :  { %v478_v57 = vmul.f32 %v1411_v50, %v1411_v50  ;;  %v1419_v30 = vadd.f32 %v853_v54, %v1408_v18  ;;  %v416_v11 = vpop.f32.mrb[3].mxu0 }
 0x21f   :  { %v476_v60 = vmul.f32 %v1414_v9, %v1414_v9  ;;  %v1424_v62 = vadd.f32 %v1408_v18, %v416_v11 }
 0x220   :  { %v494_v63 = vmul.f32 %v478_v57, %v1411_v50  ;;  %v479_v0 = vmul.f32 %v1419_v30, %v1419_v30 }
 0x221   :  { %v492_v24 = vmul.f32 %v476_v60, %v1414_v9  ;;  %v477_v1 = vmul.f32 %v1424_v62, %v1424_v62 }
 0x222   :  { %v510_v2 = vmul.f32 0.044715, %v494_v63  ;;  %v495_v26 = vmul.f32 %v479_v0, %v1419_v30 }
 0x223   :  { %v508_v32 = vmul.f32 0.044715, %v492_v24  ;;  %v493_v4 = vmul.f32 %v477_v1, %v1424_v62  ;;  %v856_v5 = vpop.f32.mrb[4].mxu0 }
 0x224   :  { %v526_v10 = vadd.f32 %v510_v2, %v1411_v50  ;;  %v511_v40 = vmul.f32 0.044715, %v495_v26  ;;  %v1436_v12 = vadd.f32 %v856_v5, %v1408_v18  ;;  %v429_v15 = vpop.f32.mrb[5].mxu0 }
 0x225   :  { %v524_v44 = vadd.f32 %v508_v32, %v1414_v9  ;;  %v509_v17 = vmul.f32 0.044715, %v493_v4  ;;  %v1440_v42 = vadd.f32 %v1408_v18, %v429_v15  ;;  %v857_v55 = vpop.f32.mrb[6].mxu0 }
 0x226   :  { %v542_v14 = vmul.f32 0.7978846, %v526_v10  ;;  %v527_v20 = vadd.f32 %v511_v40, %v1419_v30  ;;  %v482_v22 = vmul.f32 %v1436_v12, %v1436_v12  ;;  %v1446_v23 = vadd.f32 %v857_v55, %v1408_v18  ;;  %v432_v16 = vpop.f32.mrb[7].mxu0 }
 0x227   :  { %v540_v25 = vmul.f32 0.7978846, %v524_v44  ;;  %v525_v28 = vadd.f32 %v509_v17, %v1424_v62  ;;  %v480_v6 = vmul.f32 %v1440_v42, %v1440_v42  ;;  %v1452_v46 = vadd.f32 %v1408_v18, %v432_v16 }
 0x228   :  { %946 = vtanh.f32 %v542_v14  ;;  %v543_v31 = vmul.f32 0.7978846, %v527_v20  ;;  %v498_v33 = vmul.f32 %v482_v22, %v1436_v12  ;;  %v483_v34 = vmul.f32 %v1446_v23, %v1446_v23 }
 0x229   :  { %948 = vtanh.f32 %v540_v25  ;;  %v541_v36 = vmul.f32 0.7978846, %v525_v28  ;;  %v496_v56 = vmul.f32 %v480_v6, %v1440_v42  ;;  %v481_v38 = vmul.f32 %v1452_v46, %v1452_v46 }
 0x22a   :  { %950 = vtanh.f32 %v543_v31  ;;  %v514_v39 = vmul.f32 0.044715, %v498_v33  ;;  %v499_v41 = vmul.f32 %v483_v34, %v1446_v23 }
 0x22b   :  { %v512_v47 = vmul.f32 0.044715, %v496_v56  ;;  %v497_v48 = vmul.f32 %v481_v38, %v1452_v46  ;;  %v860_v58 = vpop.f32.mrb[8].mxu0  ;;  %952 = vtanh.f32 %v541_v36 }
 0x22c   :  { %v530_v49 = vadd.f32 %v514_v39, %v1436_v12  ;;  %v515_v52 = vmul.f32 0.044715, %v499_v41  ;;  %v1464_v54 = vadd.f32 %v860_v58, %v1408_v18  ;;  %v445_v57 = vpop.f32.mrb[9].mxu0 }
 0x22d   :  { %v513_v11 = vmul.f32 0.044715, %v497_v48  ;;  %v1467_v60 = vadd.f32 %v1408_v18, %v445_v57  ;;  %v861_v63 = vpop.f32.mrb[10].mxu0  ;;  %v528_v0 = vadd.f32 %v512_v47, %v1440_v42 }
 0x22e   :  { %v546_v24 = vmul.f32 0.7978846, %v530_v49  ;;  %v531_v1 = vadd.f32 %v515_v52, %v1446_v23  ;;  %v486_v2 = vmul.f32 %v1464_v54, %v1464_v54  ;;  %v1474_v26 = vadd.f32 %v861_v63, %v1408_v18  ;;  %v448_v32 = vpop.f32.mrb[11].mxu0 }
 0x22f   :  { %v484_v4 = vmul.f32 %v1467_v60, %v1467_v60  ;;  %v1479_v5 = vadd.f32 %v1408_v18, %v448_v32  ;;  %v529_v10 = vadd.f32 %v513_v11, %v1452_v46  ;;  %v544_v40 = vmul.f32 0.7978846, %v528_v0 }
 0x230   :  { %954 = vtanh.f32 %v546_v24  ;;  %v547_v15 = vmul.f32 0.7978846, %v531_v1  ;;  %v502_v44 = vmul.f32 %v486_v2, %v1464_v54  ;;  %v487_v17 = vmul.f32 %v1474_v26, %v1474_v26 }
 0x231   :  { %v500_v55 = vmul.f32 %v484_v4, %v1467_v60  ;;  %v485_v14 = vmul.f32 %v1479_v5, %v1479_v5  ;;  %v545_v20 = vmul.f32 0.7978846, %v529_v10  ;;  %956 = vtanh.f32 %v544_v40 }
 0x232   :  { %v947_v22 = vpop.eup %946  ;;  %958 = vtanh.f32 %v547_v15  ;;  %v518_v16 = vmul.f32 0.044715, %v502_v44  ;;  %v503_v25 = vmul.f32 %v487_v17, %v1474_v26 }
 0x233   :  { %v949_v28 = vpop.eup %948  ;;  %v574_v6 = vadd.f32 1.0, %v947_v22  ;;  %v516_v31 = vmul.f32 0.044715, %v500_v55  ;;  %v501_v33 = vmul.f32 %v485_v14, %v1479_v5  ;;  %v864_v34 = vpop.f32.mrb[12].mxu0  ;;  %960 = vtanh.f32 %v545_v20 }
 0x234   :  { %v951_v36 = vpop.eup %950  ;;  %v534_v56 = vadd.f32 %v518_v16, %v1464_v54  ;;  %v519_v38 = vmul.f32 0.044715, %v503_v25  ;;  %v1492_v39 = vadd.f32 %v864_v34, %v1408_v18  ;;  %v461_v41 = vpop.f32.mrb[13].mxu0  ;;  %v572_v47 = vadd.f32 1.0, %v949_v28 }
 0x235   :  { %v590_v48 = vmul.f32 0.5, %v574_v6  ;;  %v575_v58 = vadd.f32 1.0, %v951_v36  ;;  %v532_v49 = vadd.f32 %v516_v31, %v1467_v60  ;;  %v517_v52 = vmul.f32 0.044715, %v501_v33  ;;  %v865_v57 = vpop.f32.mrb[14].mxu0  ;;  %v953_v2 = vpop.eup %952 }
 0x236   :  { %v550_v11 = vmul.f32 0.7978846, %v534_v56  ;;  %v535_v63 = vadd.f32 %v519_v38, %v1474_v26  ;;  %v490_v0 = vmul.f32 %v1492_v39, %v1492_v39  ;;  %v1499_v24 = vadd.f32 %v1408_v18, %v461_v41  ;;  %v464_v1 = vpop.f32.mrb[15].mxu0 }
 0x237   :  { %v606_v32 = vmul.f32 %v590_v48, %v1411_v50  ;;  %v591_v4 = vmul.f32 0.5, %v575_v58  ;;  %v548_v10 = vmul.f32 0.7978846, %v532_v49  ;;  %v533_v40 = vadd.f32 %v517_v52, %v1479_v5 }
 0x238   :  { %962 = vtanh.f32 %v550_v11  ;;  %v551_v15 = vmul.f32 0.7978846, %v535_v63  ;;  %v506_v44 = vmul.f32 %v490_v0, %v1492_v39  ;;  %v488_v17 = vmul.f32 %v1499_v24, %v1499_v24 }
 0x239   :  { %v607_v55 = vmul.f32 %v591_v4, %v1419_v30  ;;  %964 = vtanh.f32 %v548_v10  ;;  %v549_v14 = vmul.f32 0.7978846, %v533_v40  ;;  %v1508_v20 = vadd.f32 %v865_v57, %v1408_v18 }
 0x23a   :  { %v955_v22 = vpop.eup %954  ;;  %966 = vtanh.f32 %v551_v15  ;;  %v522_v50 = vmul.f32 0.044715, %v506_v44  ;;  %v504_v16 = vmul.f32 %v488_v17, %v1499_v24  ;;  %v1512_v25 = vadd.f32 %v1408_v18, %v464_v1 }
 0x23b   :  { %v957_v28 = vpop.eup %956  ;;  %v637_v6 = vpack.c.bf16 %v607_v55, %v606_v32  ;;  %968 = vtanh.f32 %v549_v14  ;;  %v491_v31 = vmul.f32 %v1508_v20, %v1508_v20  ;;  %v573_v30 = vadd.f32 1.0, %v953_v2 }
 0x23c   :  { %v959_v33 = vpop.eup %958  ;;  %v538_v34 = vadd.f32 %v522_v50, %v1492_v39  ;;  %v520_v36 = vmul.f32 0.044715, %v504_v16  ;;  %v489_v56 = vmul.f32 %v1512_v25, %v1512_v25  ;;  %v588_v38 = vmul.f32 0.5, %v572_v47 }
 0x23d   :  { %v961_v41 = vpop.eup %960  ;;  %v507_v48 = vmul.f32 %v491_v31, %v1508_v20  ;;  %v589_v18 = vmul.f32 0.5, %v573_v30  ;;  %v576_v58 = vadd.f32 1.0, %v957_v28  ;;  %v578_v49 = vadd.f32 1.0, %v955_v22 }
 0x23e   :  { %v554_v52 = vmul.f32 0.7978846, %v538_v34  ;;  %v536_v57 = vadd.f32 %v520_v36, %v1499_v24  ;;  %v505_v11 = vmul.f32 %v489_v56, %v1512_v25  ;;  %v604_v63 = vmul.f32 %v588_v38, %v1414_v9 }
 0x23f   :  { %v523_v0 = vmul.f32 0.044715, %v507_v48  ;;  %v605_v1 = vmul.f32 %v589_v18, %v1424_v62  ;;  %v577_v2 = vadd.f32 1.0, %v961_v41  ;;  %v592_v32 = vmul.f32 0.5, %v576_v58 }
 0x240   :  { %970 = vtanh.f32 %v554_v52  ;;  %v552_v47 = vmul.f32 0.7978846, %v536_v57  ;;  %v521_v4 = vmul.f32 0.044715, %v505_v11  ;;  %v579_v10 = vadd.f32 1.0, %v959_v33 }
 0x241   :  { %v539_v40 = vadd.f32 %v523_v0, %v1508_v20  ;;  %v636_v15 = vpack.c.bf16 %v605_v1, %v604_v63  ;;  %v593_v44 = vmul.f32 0.5, %v577_v2  ;;  %v594_v14 = vmul.f32 0.5, %v578_v49 }
 0x242   :  { %v963_v17 = vpop.eup %962  ;;  %972 = vtanh.f32 %v552_v47  ;;  %v537_v55 = vadd.f32 %v521_v4, %v1512_v25  ;;  %v595_v22 = vmul.f32 0.5, %v579_v10  ;;  %v608_v62 = vmul.f32 %v592_v32, %v1440_v42 }
 0x243   :  { %v965_v9 = vpop.eup %964  ;;  %v555_v50 = vmul.f32 0.7978846, %v539_v40  ;;  %882 = vmatprep.mubr.bf16.mxu0 %v636_v15  ;;  %v609_v16 = vmul.f32 %v593_v44, %v1452_v46  ;;  %v582_v28 = vadd.f32 1.0, %v963_v17  ;;  %v610_v33 = vmul.f32 %v594_v14, %v1436_v12 }
 0x244   :  { %v967_v31 = vpop.eup %966  ;;  %v553_v30 = vmul.f32 0.7978846, %v537_v55  ;;  %883 = vmatmul.mubr.bf16.vlgmr.msra.gmra.mrb[16].mxu0 %v637_v6  ;;  %v611_v34 = vmul.f32 %v595_v22, %v1446_v23  ;;  %v580_v36 = vadd.f32 1.0, %v965_v9  ;;  %v819_v9 = vld [vmem:[%s1628_s7] ss:$0 sm:$0xff] }
 0x245   :  { %v969_v56 = vpop.eup %968  ;;  %974 = vtanh.f32 %v555_v50  ;;  %v638_v38 = vpack.c.bf16 %v609_v16, %v608_v62  ;;  %v583_v41 = vadd.f32 1.0, %v967_v31  ;;  %v598_v48 = vmul.f32 0.5, %v582_v28 }
 0x246   :  { %976 = vtanh.f32 %v553_v30  ;;  %v639_v18 = vpack.c.bf16 %v611_v34, %v610_v33  ;;  %v581_v58 = vadd.f32 1.0, %v969_v56  ;;  %v596_v42 = vmul.f32 0.5, %v580_v36 }
 0x247   :  { %886 = vmatprep.mubr.bf16.mxu1 %v638_v38  ;;  %v599_v46 = vmul.f32 0.5, %v583_v41  ;;  %v614_v6 = vmul.f32 %v598_v48, %v1464_v54 }
 0x248   :  { %887 = vmatmul.mubr.bf16.vlgmr.msra.gmra.mrb[0].mxu1 %v639_v18  ;;  %v597_v49 = vmul.f32 0.5, %v581_v58  ;;  %v612_v23 = vmul.f32 %v596_v42, %v1467_v60 }
 0x249   :  { %v615_v12 = vmul.f32 %v599_v46, %v1474_v26 }
 0x24a   :  { %v971_v52 = vpop.eup %970  ;;  %v613_v57 = vmul.f32 %v597_v49, %v1479_v5 }
 0x24b   :  { %v641_v11 = vpack.c.bf16 %v615_v12, %v614_v6  ;;  %v586_v1 = vadd.f32 1.0, %v971_v52 }
 0x24c   :  { %v973_v63 = vpop.eup %972  ;;  %v640_v0 = vpack.c.bf16 %v613_v57, %v612_v23 }
 0x24d   :  { %v584_v2 = vadd.f32 1.0, %v973_v63  ;;  %v602_v10 = vmul.f32 0.5, %v586_v1 }
 0x24e   :  { %890 = vmatprep.mubr.bf16.mxu1 %v640_v0 }
 0x24f   :  { %v975_v32 = vpop.eup %974  ;;  %v600_v54 = vmul.f32 0.5, %v584_v2  ;;  %v618_v44 = vmul.f32 %v602_v10, %v1492_v39 }
 0x250   :  { %v977_v47 = vpop.eup %976  ;;  %891 = vmatmul.mubr.bf16.gmra.mrb[4].mxu1 %v641_v11  ;;  %v587_v4 = vadd.f32 1.0, %v975_v32 }
 0x251   :  { %v585_v40 = vadd.f32 1.0, %v977_v47  ;;  %v616_v5 = vmul.f32 %v600_v54, %v1499_v24 }
 0x252   :  { %v603_v15 = vmul.f32 0.5, %v587_v4 }
 0x253   :  { %v601_v26 = vmul.f32 0.5, %v585_v40 }
 0x254   :  { %v619_v60 = vmul.f32 %v603_v15, %v1508_v20 }
 0x255   :  { %v617_v17 = vmul.f32 %v601_v26, %v1512_v25 }
 0x256   :  { %v643_v55 = vpack.c.bf16 %v619_v60, %v618_v44 }
 0x257   :  { %v642_v14 = vpack.c.bf16 %v617_v17, %v616_v5 }
 0x259   :  { %894 = vmatprep.mubr.bf16.mxu1 %v642_v14 }
 0x25a   :  { %895 = vmatmul.mubr.bf16.gmra.mrb[8].mxu1 %v643_v55 }
 0x317   :  { %v884_v22 = vpop.f32.mrb[16].mxu0 }
 0x318   :  { %v751_v50 = vadd.f32 %v884_v22, %v1043_v7  ;;  %v686_v62 = vpop.f32.mrb[17].mxu0 }
 0x319   :  { %v749_v39 = vadd.f32 %v686_v62, %v1032_v3  ;;  %v885_v16 = vpop.f32.mrb[18].mxu0 }
 0x31a   :  { %v774_v20 = vadd.f32 %v819_v9, %v751_v50  ;;  %v752_v24 = vadd.f32 %v885_v16, %v1058_v13  ;;  %v689_v28 = vpop.f32.mrb[19].mxu0 }
 0x31b   :  { %v772_v25 = vadd.f32 %v819_v9, %v749_v39  ;;  %v750_v31 = vadd.f32 %v689_v28, %v1045_v8  ;;  %v888_v30 = vpop.f32.mrb[0].mxu1 }
 0x31c   :  { %790 = vst.msk [vmem:[%s1629_s8 + $0x10] sm:$0xff] %vm80_vm0, %v774_v20  ;;  %v775_v33 = vadd.f32 %v819_v9, %v752_v24  ;;  %v755_v7 = vadd.f32 %v888_v30, %v1093_v27  ;;  %v702_v34 = vpop.f32.mrb[1].mxu1 }
 0x31d   :  { %788 = vst.msk [vmem:[%s1629_s8] sm:$0xff] %vm80_vm0, %v772_v25  ;;  %v773_v3 = vadd.f32 %v819_v9, %v750_v31  ;;  %v753_v13 = vadd.f32 %v702_v34, %v1073_v19  ;;  %v889_v36 = vpop.f32.mrb[2].mxu1 }
 0x31e   :  { %791 = vst.msk [vmem:[%s1629_s8 + $0x18] sm:$0xff] %vm80_vm0, %v775_v33  ;;  %v778_v8 = vadd.f32 %v819_v9, %v755_v7  ;;  %v756_v56 = vadd.f32 %v889_v36, %v1097_v29  ;;  %v705_v38 = vpop.f32.mrb[3].mxu1 }
 0x31f   :  { %789 = vst.msk [vmem:[%s1629_s8 + $0x8] sm:$0xff] %vm80_vm0, %v773_v3  ;;  %v776_v27 = vadd.f32 %v819_v9, %v753_v13  ;;  %v754_v41 = vadd.f32 %v705_v38, %v1077_v21 }
 0x320   :  { %794 = vst.msk [vmem:[%s1629_s8 + $0x30] sm:$0xff] %vm80_vm0, %v778_v8  ;;  %v779_v19 = vadd.f32 %v819_v9, %v756_v56 }
 0x321   :  { %792 = vst.msk [vmem:[%s1629_s8 + $0x20] sm:$0xff] %vm80_vm0, %v776_v27  ;;  %v777_v29 = vadd.f32 %v819_v9, %v754_v41 }
 0x322   :  { %795 = vst.msk [vmem:[%s1629_s8 + $0x38] sm:$0xff] %vm80_vm0, %v779_v19 }
 0x323   :  { %793 = vst.msk [vmem:[%s1629_s8 + $0x28] sm:$0xff] %vm80_vm0, %v777_v29  ;;  %v892_v21 = vpop.f32.mrb[4].mxu1 }
 0x324   :  { %v759_v48 = vadd.f32 %v892_v21, %v1133_v43  ;;  %v718_v18 = vpop.f32.mrb[5].mxu1 }
 0x325   :  { %v757_v58 = vadd.f32 %v718_v18, %v1113_v35  ;;  %v893_v42 = vpop.f32.mrb[6].mxu1 }
 0x326   :  { %v782_v46 = vadd.f32 %v819_v9, %v759_v48  ;;  %v760_v49 = vadd.f32 %v893_v42, %v1137_v45  ;;  %v721_v6 = vpop.f32.mrb[7].mxu1 }
 0x327   :  { %v780_v12 = vadd.f32 %v819_v9, %v757_v58  ;;  %v758_v52 = vadd.f32 %v721_v6, %v1117_v37 }
 0x328   :  { %798 = vst.msk [vmem:[%s1629_s8 + $0x50] sm:$0xff] %vm80_vm0, %v782_v46  ;;  %v783_v23 = vadd.f32 %v819_v9, %v760_v49 }
 0x329   :  { %796 = vst.msk [vmem:[%s1629_s8 + $0x40] sm:$0xff] %vm80_vm0, %v780_v12  ;;  %v781_v35 = vadd.f32 %v819_v9, %v758_v52 }
 0x32a   :  { %799 = vst.msk [vmem:[%s1629_s8 + $0x58] sm:$0xff] %vm80_vm0, %v783_v23 }
 0x32b   :  { %797 = vst.msk [vmem:[%s1629_s8 + $0x48] sm:$0xff] %vm80_vm0, %v781_v35 }
 0x32d   :  { %v896_v37 = vpop.f32.mrb[8].mxu1 }
 0x32e   :  { %v763_v43 = vadd.f32 %v896_v37, %v1173_v59  ;;  %v734_v45 = vpop.f32.mrb[9].mxu1 }
 0x32f   :  { %v761_v57 = vadd.f32 %v734_v45, %v1153_v51  ;;  %v897_v11 = vpop.f32.mrb[10].mxu1 }
 0x330   :  { %v786_v63 = vadd.f32 %v819_v9, %v763_v43  ;;  %v764_v0 = vadd.f32 %v897_v11, %v1177_v61  ;;  %v737_v1 = vpop.f32.mrb[11].mxu1 }
 0x331   :  { %v784_v2 = vadd.f32 %v819_v9, %v761_v57  ;;  %v762_v32 = vadd.f32 %v737_v1, %v1157_v53 }
 0x332   :  { %802 = vst.msk [vmem:[%s1629_s8 + $0x70] sm:$0xff] %vm80_vm0, %v786_v63  ;;  %v787_v47 = vadd.f32 %v819_v9, %v764_v0 }
 0x333   :  { %800 = vst.msk [vmem:[%s1629_s8 + $0x60] sm:$0xff] %vm80_vm0, %v784_v2  ;;  %v785_v51 = vadd.f32 %v819_v9, %v762_v32 }
 0x334   :  { %803 = vst.msk [vmem:[%s1629_s8 + $0x78] sm:$0xff] %vm80_vm0, %v787_v47 }
 0x335   :  { %801 = vst.msk [vmem:[%s1629_s8 + $0x68] sm:$0xff] %vm80_vm0, %v785_v51 }

// kernel: swin_for_iqa_forward.14
= control target key start
LH: loop header
LB: loop body
LE: loop exit
PB: predicated region body
PF: predicated region fallthrough
CT: control target
= control target key end

     0   :  { %vm48_vm0 = vcmask 261120   ;;  %vm3293_vm1 = vmmov 0   ;;  %s3294_s25 = smov 96   ;;  %vm455_vm2 = vcmask 130048   ;;  %s3296_s19 = smov 80   ;;  %s4408_s0 = inlined_call_operand.vmem [shape: f32[8,16,32], index: 0, kind: input, shape index: {}]   ;;  %s4409_s3 = inlined_call_operand.vmem [shape: f32[32,96], index: 3, kind: input, shape index: {}]   ;;  %s4410_s1 = inlined_call_operand.vmem [shape: f32[1,32], index: 1, kind: input, shape index: {}]   ;;  %s4411_s2 = inlined_call_operand.vmem [shape: f32[1,32], index: 2, kind: input, shape index: {}]   ;;  %s4412_s4 = inlined_call_operand.vmem [shape: f32[1,96], index: 4, kind: input, shape index: {}]   ;;  %s4413_s5 = inlined_call_operand.vmem [shape: f32[2,4,16,16], index: 5, kind: input, shape index: {}]   ;;  %s4414_s6 = inlined_call_operand.vmem [shape: f32[32,32], index: 6, kind: input, shape index: {}]   ;;  %s4415_s7 = inlined_call_operand.vmem [shape: f32[1,32], index: 7, kind: input, shape index: {}]   ;;  %s4416_s8 = inlined_call_operand.vmem [shape: f32[8,16,32], index: 8, kind: output, shape index: {}]  }
   0x1   :  { %v30_v0 = vld [vmem:[%s4408_s0] sm:$0xff]  ;;  %v32_v1 = vld [vmem:[%s4408_s0 + $0x10] sm:$0xff]  ;;  %v31_v2 = vld [vmem:[%s4408_s0 + $0x8] sm:$0xff]  ;;  %s3297_s20 = smov 112  }
   0x2   :  { %v49_v3 = vsel %vm48_vm0, %v30_v0, 0.0  ;;  %v55_v4 = vsel %vm48_vm0, %v32_v1, 0.0  ;;  %v33_v5 = vld [vmem:[%s4408_s0 + $0x18] sm:$0xff]  ;;  %v52_v6 = vsel %vm48_vm0, %v31_v2, 0.0  ;;  %v34_v8 = vld [vmem:[%s4408_s0 + $0x20] sm:$0xff]  ;;  %v35_v9 = vld [vmem:[%s4408_s0 + $0x28] sm:$0xff] }
   0x3   :  { %50 = vadd.xlane.f32.xlu0 %v49_v3  ;;  %56 = vadd.xlane.f32.xlu1 %v55_v4  ;;  %v58_v7 = vsel %vm48_vm0, %v33_v5, 0.0  ;;  %v61_v10 = vsel %vm48_vm0, %v34_v8, 0.0  ;;  %v64_v11 = vsel %vm48_vm0, %v35_v9, 0.0  ;;  %v3372_v12 = vld [vmem:[%s4408_s0 + $0x30] sm:$0xff]  ;;  %v3377_v13 = vld [vmem:[%s4408_s0 + $0x38] sm:$0xff]  ;;  %v3386_v16 = vld [vmem:[%s4408_s0 + $0x40] sm:$0xff] }
   0x4   :  { %v67_v14 = vsel %vm48_vm0, %v3372_v12, 0.0  ;;  %v70_v15 = vsel %vm48_vm0, %v3377_v13, 0.0  ;;  %v3391_v17 = vld [vmem:[%s4408_s0 + $0x48] sm:$0xff]  ;;  %v73_v18 = vsel %vm48_vm0, %v3386_v16, 0.0  ;;  %v3400_v20 = vld [vmem:[%s4408_s0 + $0x50] sm:$0xff]  ;;  %v3405_v21 = vld [vmem:[%s4408_s0 + $0x58] sm:$0xff] }
   0x5   :  { %v76_v19 = vsel %vm48_vm0, %v3391_v17, 0.0  ;;  %v79_v22 = vsel %vm48_vm0, %v3400_v20, 0.0  ;;  %v82_v23 = vsel %vm48_vm0, %v3405_v21, 0.0  ;;  %v3414_v24 = vld [vmem:[%s4408_s0 + $0x60] sm:$0xff]  ;;  %v3419_v25 = vld [vmem:[%s4408_s0 + $0x68] sm:$0xff]  ;;  %v3428_v28 = vld [vmem:[%s4408_s0 + $0x70] sm:$0xff] }
   0x6   :  { %v85_v26 = vsel %vm48_vm0, %v3414_v24, 0.0  ;;  %v88_v27 = vsel %vm48_vm0, %v3419_v25, 0.0  ;;  %v3433_v29 = vld [vmem:[%s4408_s0 + $0x78] sm:$0xff]  ;;  %v91_v30 = vsel %vm48_vm0, %v3428_v28, 0.0  ;;  %s3299_s0 = smov 16  }
   0x7   :  { %53 = vadd.xlane.f32.xlu0 %v52_v6  ;;  %59 = vadd.xlane.f32.xlu1 %v58_v7  ;;  %v94_v31 = vsel %vm48_vm0, %v3433_v29, 0.0 }
   0xb   :  { %62 = vadd.xlane.f32.xlu0 %v61_v10  ;;  %65 = vadd.xlane.f32.xlu1 %v64_v11 }
   0xf   :  { %68 = vadd.xlane.f32.xlu0 %v67_v14  ;;  %71 = vadd.xlane.f32.xlu1 %v70_v15 }
  0x13   :  { %74 = vadd.xlane.f32.xlu0 %v73_v18  ;;  %77 = vadd.xlane.f32.xlu1 %v76_v19 }
  0x17   :  { %80 = vadd.xlane.f32.xlu0 %v79_v22  ;;  %83 = vadd.xlane.f32.xlu1 %v82_v23 }
  0x1b   :  { %86 = vadd.xlane.f32.xlu0 %v85_v26  ;;  %89 = vadd.xlane.f32.xlu1 %v88_v27 }
  0x1f   :  { %92 = vadd.xlane.f32.xlu0 %v91_v30  ;;  %95 = vadd.xlane.f32.xlu1 %v94_v31 }
  0x90   :  { %v51_v32 = vpop.xlane.xlu0 %50  ;;  %v57_v33 = vpop.xlane.xlu1 %56 }
  0x91   :  { %v98_v34 = vmul.f32 0.03125, %v51_v32  ;;  %v100_v35 = vmul.f32 0.03125, %v57_v33 }
  0x93   :  { %v3439_v36 = vsub.f32 %v30_v0, %v98_v34  ;;  %v3441_v37 = vsub.f32 %v32_v1, %v100_v35 }
  0x94   :  { %v54_v38 = vpop.xlane.xlu0 %53  ;;  %v60_v39 = vpop.xlane.xlu1 %59 }
  0x95   :  { %v99_v40 = vmul.f32 0.03125, %v54_v38  ;;  %v101_v41 = vmul.f32 0.03125, %v60_v39  ;;  %v130_v42 = vmul.f32 %v3439_v36, %v3439_v36  ;;  %v132_v43 = vmul.f32 %v3441_v37, %v3441_v37 }
  0x97   :  { %v3447_v44 = vsub.f32 %v31_v2, %v99_v40  ;;  %v3449_v45 = vsub.f32 %v33_v5, %v101_v41  ;;  %v146_v46 = vsel %vm48_vm0, %v130_v42, 0.0  ;;  %v152_v49 = vsel %vm48_vm0, %v132_v43, 0.0 }
  0x98   :  { %147 = vadd.xlane.f32.xlu0 %v146_v46  ;;  %v63_v47 = vpop.xlane.xlu0 %62  ;;  %v66_v48 = vpop.xlane.xlu1 %65 }
  0x99   :  { %v102_v50 = vmul.f32 0.03125, %v63_v47  ;;  %v103_v51 = vmul.f32 0.03125, %v66_v48  ;;  %v131_v52 = vmul.f32 %v3447_v44, %v3447_v44  ;;  %v133_v53 = vmul.f32 %v3449_v45, %v3449_v45 }
  0x9b   :  { %v3457_v54 = vsub.f32 %v34_v8, %v102_v50  ;;  %v3459_v55 = vsub.f32 %v35_v9, %v103_v51  ;;  %v149_v56 = vsel %vm48_vm0, %v131_v52, 0.0  ;;  %v155_v59 = vsel %vm48_vm0, %v133_v53, 0.0  ;;  %v303_v53 = vld [vmem:[%s4409_s3 + $0x8] sm:$0xff] }
  0x9c   :  { %153 = vadd.xlane.f32.xlu0 %v152_v49  ;;  %150 = vadd.xlane.f32.xlu1 %v149_v56  ;;  %v69_v57 = vpop.xlane.xlu0 %68  ;;  %v72_v58 = vpop.xlane.xlu1 %71 }
  0x9d   :  { %v104_v60 = vmul.f32 0.03125, %v69_v57  ;;  %v105_v61 = vmul.f32 0.03125, %v72_v58  ;;  %v134_v62 = vmul.f32 %v3457_v54, %v3457_v54  ;;  %v135_v63 = vmul.f32 %v3459_v55, %v3459_v55  ;;  %v304_v57 = vld [vmem:[%s4409_s3 + $0x10] sm:$0xff]  ;;  %v305_v58 = vld [vmem:[%s4409_s3 + $0x18] sm:$0xff] }
  0x9f   :  { %v3468_v0 = vsub.f32 %v3372_v12, %v104_v60  ;;  %v3471_v1 = vsub.f32 %v3377_v13, %v105_v61  ;;  %v158_v2 = vsel %vm48_vm0, %v134_v62, 0.0  ;;  %v161_v5 = vsel %vm48_vm0, %v135_v63, 0.0 }
  0xa0   :  { %156 = vadd.xlane.f32.xlu1 %v155_v59  ;;  %159 = vadd.xlane.f32.xlu0 %v158_v2  ;;  %v75_v3 = vpop.xlane.xlu0 %74  ;;  %v78_v4 = vpop.xlane.xlu1 %77  ;;  %v315_v59 = vpack.c.bf16 %v305_v58, %v304_v57 }
  0xa1   :  { %v106_v6 = vmul.f32 0.03125, %v75_v3  ;;  %v107_v7 = vmul.f32 0.03125, %v78_v4  ;;  %v136_v8 = vmul.f32 %v3468_v0, %v3468_v0  ;;  %v137_v9 = vmul.f32 %v3471_v1, %v3471_v1 }
  0xa3   :  { %v3480_v10 = vsub.f32 %v3386_v16, %v106_v6  ;;  %v3483_v11 = vsub.f32 %v3391_v17, %v107_v7  ;;  %v164_v12 = vsel %vm48_vm0, %v136_v8, 0.0  ;;  %v167_v15 = vsel %vm48_vm0, %v137_v9, 0.0 }
  0xa4   :  { %162 = vadd.xlane.f32.xlu1 %v161_v5  ;;  %165 = vadd.xlane.f32.xlu0 %v164_v12  ;;  %v81_v13 = vpop.xlane.xlu0 %80  ;;  %v84_v14 = vpop.xlane.xlu1 %83 }
  0xa5   :  { %v108_v18 = vmul.f32 0.03125, %v81_v13  ;;  %v109_v19 = vmul.f32 0.03125, %v84_v14  ;;  %v138_v22 = vmul.f32 %v3480_v10, %v3480_v10  ;;  %v139_v16 = vmul.f32 %v3483_v11, %v3483_v11 }
  0xa7   :  { %v3492_v23 = vsub.f32 %v3400_v20, %v108_v18  ;;  %v3495_v17 = vsub.f32 %v3405_v21, %v109_v19  ;;  %v170_v26 = vsel %vm48_vm0, %v138_v22, 0.0  ;;  %v173_v31 = vsel %vm48_vm0, %v139_v16, 0.0 }
  0xa8   :  { %168 = vadd.xlane.f32.xlu1 %v167_v15  ;;  %171 = vadd.xlane.f32.xlu0 %v170_v26  ;;  %v87_v27 = vpop.xlane.xlu0 %86  ;;  %v90_v30 = vpop.xlane.xlu1 %89 }
  0xa9   :  { %v110_v32 = vmul.f32 0.03125, %v87_v27  ;;  %v111_v33 = vmul.f32 0.03125, %v90_v30  ;;  %v140_v34 = vmul.f32 %v3492_v23, %v3492_v23  ;;  %v141_v20 = vmul.f32 %v3495_v17, %v3495_v17 }
  0xab   :  { %v3504_v35 = vsub.f32 %v3414_v24, %v110_v32  ;;  %v3507_v21 = vsub.f32 %v3419_v25, %v111_v33  ;;  %v176_v38 = vsel %vm48_vm0, %v140_v34, 0.0  ;;  %v179_v41 = vsel %vm48_vm0, %v141_v20, 0.0  ;;  %v3545_v20 = vld [vmem:[%s4410_s1] ss:$0 sm:$0xff] }
  0xac   :  { %174 = vadd.xlane.f32.xlu1 %v173_v31  ;;  %177 = vadd.xlane.f32.xlu0 %v176_v38  ;;  %v93_v39 = vpop.xlane.xlu0 %92  ;;  %v96_v40 = vpop.xlane.xlu1 %95 }
  0xad   :  { %v112_v42 = vmul.f32 0.03125, %v93_v39  ;;  %v113_v43 = vmul.f32 0.03125, %v96_v40  ;;  %v142_v46 = vmul.f32 %v3504_v35, %v3504_v35  ;;  %v143_v24 = vmul.f32 %v3507_v21, %v3507_v21 }
  0xaf   :  { %v3516_v47 = vsub.f32 %v3428_v28, %v112_v42  ;;  %v3519_v25 = vsub.f32 %v3433_v29, %v113_v43  ;;  %v182_v48 = vsel %vm48_vm0, %v142_v46, 0.0  ;;  %v185_v49 = vsel %vm48_vm0, %v143_v24, 0.0  ;;  %v302_v29 = vld [vmem:[%s4409_s3] sm:$0xff] }
  0xb0   :  { %180 = vadd.xlane.f32.xlu1 %v179_v41  ;;  %183 = vadd.xlane.f32.xlu0 %v182_v48  ;;  %v314_v56 = vpack.c.bf16 %v303_v53, %v302_v29 }
  0xb1   :  { %v144_v50 = vmul.f32 %v3516_v47, %v3516_v47  ;;  %v145_v51 = vmul.f32 %v3519_v25, %v3519_v25 }
  0xb2   :  { %2848 = vmatprep.subr.bf16.mxu0 %v314_v56  ;;  %3080 = vmatprep.subr.bf16.mxu1 %v314_v56 }
  0xb3   :  { %v188_v52 = vsel %vm48_vm0, %v144_v50, 0.0  ;;  %v191_v28 = vsel %vm48_vm0, %v145_v51, 0.0  ;;  %2849 = vmatpush3.bf16.msra.mxu0 %v314_v56  ;;  %3082 = vmatpush3.bf16.msra.mxu1 %v314_v56 }
  0xb4   :  { %186 = vadd.xlane.f32.xlu1 %v185_v49  ;;  %189 = vadd.xlane.f32.xlu0 %v188_v52  ;;  %v3552_v49 = vld [vmem:[%s4411_s2] ss:$0 sm:$0xff] }
  0xb5   :  { %2850 = vmatprep.subr.bf16.mxu0 %v315_v59  ;;  %3081 = vmatprep.subr.bf16.mxu1 %v315_v59 }
  0xb7   :  { %2851 = vmatpush3.bf16.msra.mxu0 %v315_v59  ;;  %3083 = vmatpush3.bf16.msra.mxu1 %v315_v59 }
  0xb8   :  { %192 = vadd.xlane.f32.xlu1 %v191_v28 }
 0x125   :  { %v148_v60 = vpop.xlane.xlu0 %147 }
 0x126   :  { %v194_v61 = vmul.f32 0.03125, %v148_v60 }
 0x128   :  { %v210_v62 = vadd.f32 1e-05, %v194_v61 }
 0x129   :  { %v151_v63 = vpop.xlane.xlu1 %150  ;;  %v154_v2 = vpop.xlane.xlu0 %153 }
 0x12a   :  { %3132 = vrsqrt.f32 %v210_v62  ;;  %v195_v3 = vmul.f32 0.03125, %v151_v63  ;;  %v196_v4 = vmul.f32 0.03125, %v154_v2 }
 0x12c   :  { %v211_v5 = vadd.f32 1e-05, %v195_v3  ;;  %v212_v6 = vadd.f32 1e-05, %v196_v4 }
 0x12d   :  { %v157_v7 = vpop.xlane.xlu1 %156  ;;  %v160_v8 = vpop.xlane.xlu0 %159 }
 0x12e   :  { %3134 = vrsqrt.f32 %v211_v5  ;;  %v197_v9 = vmul.f32 0.03125, %v157_v7  ;;  %v198_v12 = vmul.f32 0.03125, %v160_v8 }
 0x12f   :  { %3136 = vrsqrt.f32 %v212_v6 }
 0x130   :  { %v213_v13 = vadd.f32 1e-05, %v197_v9  ;;  %v214_v14 = vadd.f32 1e-05, %v198_v12 }
 0x131   :  { %v163_v15 = vpop.xlane.xlu1 %162  ;;  %v166_v18 = vpop.xlane.xlu0 %165 }
 0x132   :  { %3138 = vrsqrt.f32 %v213_v13  ;;  %v199_v19 = vmul.f32 0.03125, %v163_v15  ;;  %v200_v22 = vmul.f32 0.03125, %v166_v18 }
 0x133   :  { %3140 = vrsqrt.f32 %v214_v14 }
 0x134   :  { %v3133_v16 = vpop.eup %3132  ;;  %v215_v26 = vadd.f32 1e-05, %v199_v19  ;;  %v216_v27 = vadd.f32 1e-05, %v200_v22 }
 0x135   :  { %v169_v30 = vpop.xlane.xlu1 %168  ;;  %v172_v31 = vpop.xlane.xlu0 %171  ;;  %v242_v32 = vmul.f32 %v3133_v16, %v3439_v36 }
 0x136   :  { %3142 = vrsqrt.f32 %v215_v26  ;;  %v201_v33 = vmul.f32 0.03125, %v169_v30  ;;  %v202_v34 = vmul.f32 0.03125, %v172_v31 }
 0x137   :  { %3144 = vrsqrt.f32 %v216_v27  ;;  %v264_v24 = vmul.f32 %v3545_v20, %v242_v32 }
 0x138   :  { %v3135_v38 = vpop.eup %3134  ;;  %v217_v39 = vadd.f32 1e-05, %v201_v33  ;;  %v218_v40 = vadd.f32 1e-05, %v202_v34 }
 0x139   :  { %v3137_v41 = vpop.eup %3136  ;;  %v175_v42 = vpop.xlane.xlu1 %174  ;;  %v243_v46 = vmul.f32 %v3135_v38, %v3447_v44  ;;  %v286_v57 = vadd.f32 %v3552_v49, %v264_v24 }
 0x13a   :  { %v178_v43 = vpop.xlane.xlu0 %177  ;;  %3146 = vrsqrt.f32 %v217_v39  ;;  %v203_v36 = vmul.f32 0.03125, %v175_v42  ;;  %v244_v50 = vmul.f32 %v3137_v41, %v3441_v37 }
 0x13b   :  { %v204_v48 = vmul.f32 0.03125, %v178_v43  ;;  %3148 = vrsqrt.f32 %v218_v40  ;;  %v265_v51 = vmul.f32 %v3545_v20, %v243_v46 }
 0x13c   :  { %v3139_v52 = vpop.eup %3138  ;;  %v219_v28 = vadd.f32 1e-05, %v203_v36  ;;  %v266_v60 = vmul.f32 %v3545_v20, %v244_v50 }
 0x13d   :  { %v220_v29 = vadd.f32 1e-05, %v204_v48  ;;  %v3141_v53 = vpop.eup %3140  ;;  %v181_v44 = vpop.xlane.xlu1 %180  ;;  %v287_v58 = vadd.f32 %v3552_v49, %v265_v51  ;;  %v245_v59 = vmul.f32 %v3139_v52, %v3449_v45 }
 0x13e   :  { %v184_v56 = vpop.xlane.xlu0 %183  ;;  %3150 = vrsqrt.f32 %v219_v28  ;;  %v205_v61 = vmul.f32 0.03125, %v181_v44  ;;  %v246_v2 = vmul.f32 %v3141_v53, %v3457_v54  ;;  %v288_v45 = vadd.f32 %v3552_v49, %v266_v60 }
 0x13f   :  { %v206_v37 = vmul.f32 0.03125, %v184_v56  ;;  %3152 = vrsqrt.f32 %v220_v29  ;;  %v306_v62 = vpack.c.bf16 %v287_v58, %v286_v57  ;;  %v267_v63 = vmul.f32 %v3545_v20, %v245_v59 }
 0x140   :  { %v3143_v3 = vpop.eup %3142  ;;  %v221_v4 = vadd.f32 1e-05, %v205_v61  ;;  %v268_v13 = vmul.f32 %v3545_v20, %v246_v2 }
 0x141   :  { %v222_v5 = vadd.f32 1e-05, %v206_v37  ;;  %v3145_v6 = vpop.eup %3144  ;;  %v187_v7 = vpop.xlane.xlu1 %186  ;;  %2852 = vmatprep.mubr.msk.bf16.mxu0 %vm48_vm0, %v306_v62  ;;  %v289_v9 = vadd.f32 %v3552_v49, %v267_v63  ;;  %v247_v12 = vmul.f32 %v3143_v3, %v3459_v55 }
 0x142   :  { %v190_v8 = vpop.xlane.xlu0 %189  ;;  %3154 = vrsqrt.f32 %v221_v4  ;;  %v207_v14 = vmul.f32 0.03125, %v187_v7  ;;  %v248_v54 = vmul.f32 %v3145_v6, %v3468_v0  ;;  %v290_v55 = vadd.f32 %v3552_v49, %v268_v13 }
 0x143   :  { %v208_v15 = vmul.f32 0.03125, %v190_v8  ;;  %3156 = vrsqrt.f32 %v222_v5  ;;  %v307_v18 = vpack.c.bf16 %v289_v9, %v288_v45  ;;  %v269_v19 = vmul.f32 %v3545_v20, %v247_v12  ;;  %v2706_v45 = vld [vmem:[%s4412_s4] ss:$0 sm:$0xff]  ;;  %s3295_s4 = smov 64  }
 0x144   :  { %v3147_v22 = vpop.eup %3146  ;;  %v223_v16 = vadd.f32 1e-05, %v207_v14  ;;  %v270_v33 = vmul.f32 %v3545_v20, %v248_v54  ;;  %v3292_v8 = vmov 0.0  }
 0x145   :  { %v224_v26 = vadd.f32 1e-05, %v208_v15  ;;  %v3149_v27 = vpop.eup %3148  ;;  %v193_v30 = vpop.xlane.xlu1 %192  ;;  %2853 = vmatmul.mubr.msk.bf16.vlgmr.msra.gmra.mrb[0].mxu0 %vm48_vm0, %v307_v18  ;;  %v291_v31 = vadd.f32 %v3552_v49, %v269_v19  ;;  %v249_v32 = vmul.f32 %v3147_v22, %v3471_v1  ;;  %2868 = vmatprep.subr.bf16.mxu1 %v3292_v8 }
 0x146   :  { %3158 = vrsqrt.f32 %v223_v16  ;;  %v209_v0 = vmul.f32 0.03125, %v193_v30  ;;  %v250_v34 = vmul.f32 %v3149_v27, %v3480_v10  ;;  %v292_v43 = vadd.f32 %v3552_v49, %v270_v33  ;;  %2892 = vmatprep.subr.bf16.mxu0 %v3292_v8 }
 0x147   :  { %3160 = vrsqrt.f32 %v224_v26  ;;  %v308_v38 = vpack.c.bf16 %v291_v31, %v290_v55  ;;  %v271_v39 = vmul.f32 %v3545_v20, %v249_v32 }
 0x148   :  { %v3151_v40 = vpop.eup %3150  ;;  %v225_v41 = vadd.f32 1e-05, %v209_v0  ;;  %v272_v24 = vmul.f32 %v3545_v20, %v250_v34 }
 0x149   :  { %v3153_v42 = vpop.eup %3152  ;;  %2856 = vmatprep.mubr.msk.bf16.mxu0 %vm48_vm0, %v308_v38  ;;  %v293_v46 = vadd.f32 %v3552_v49, %v271_v39  ;;  %v251_v1 = vmul.f32 %v3151_v40, %v3483_v11 }
 0x14a   :  { %3162 = vrsqrt.f32 %v225_v41  ;;  %v252_v10 = vmul.f32 %v3153_v42, %v3492_v23  ;;  %v294_v52 = vadd.f32 %v3552_v49, %v272_v24 }
 0x14b   :  { %v309_v36 = vpack.c.bf16 %v293_v46, %v292_v43  ;;  %v273_v48 = vmul.f32 %v3545_v20, %v251_v1 }
 0x14c   :  { %v3155_v50 = vpop.eup %3154  ;;  %v274_v11 = vmul.f32 %v3545_v20, %v252_v10 }
 0x14d   :  { %v3157_v51 = vpop.eup %3156  ;;  %2857 = vmatmul.mubr.msk.bf16.gmra.mrb[4].mxu0 %vm48_vm0, %v309_v36  ;;  %v295_v28 = vadd.f32 %v3552_v49, %v273_v48  ;;  %v253_v29 = vmul.f32 %v3155_v50, %v3495_v17 }
 0x14e   :  { %v254_v53 = vmul.f32 %v3157_v51, %v3504_v35  ;;  %v296_v58 = vadd.f32 %v3552_v49, %v274_v11  ;;  %2894 = vmatprep.mubr.msk.bf16.mxu0 %vm3293_vm1, %v3292_v8 }
 0x14f   :  { %v310_v44 = vpack.c.bf16 %v295_v28, %v294_v52  ;;  %v275_v23 = vmul.f32 %v3545_v20, %v253_v29 }
 0x150   :  { %v3159_v56 = vpop.eup %3158  ;;  %v276_v61 = vmul.f32 %v3545_v20, %v254_v53 }
 0x151   :  { %v3161_v57 = vpop.eup %3160  ;;  %2860 = vmatprep.mubr.msk.bf16.mxu1 %vm48_vm0, %v310_v44  ;;  %v297_v59 = vadd.f32 %v3552_v49, %v275_v23  ;;  %v255_v60 = vmul.f32 %v3159_v56, %v3507_v21 }
 0x152   :  { %v256_v17 = vmul.f32 %v3161_v57, %v3516_v47  ;;  %v298_v63 = vadd.f32 %v3552_v49, %v276_v61 }
 0x153   :  { %v311_v37 = vpack.c.bf16 %v297_v59, %v296_v58  ;;  %v277_v35 = vmul.f32 %v3545_v20, %v255_v60 }
 0x154   :  { %v3163_v62 = vpop.eup %3162  ;;  %v278_v4 = vmul.f32 %v3545_v20, %v256_v17 }
 0x155   :  { %2861 = vmatmul.mubr.msk.bf16.vlgmr.msra.gmra.mrb[0].mxu1 %vm48_vm0, %v311_v37  ;;  %v299_v2 = vadd.f32 %v3552_v49, %v277_v35  ;;  %v257_v3 = vmul.f32 %v3163_v62, %v3519_v25 }
 0x156   :  { %v300_v47 = vadd.f32 %v3552_v49, %v278_v4 }
 0x157   :  { %v312_v5 = vpack.c.bf16 %v299_v2, %v298_v63  ;;  %v279_v21 = vmul.f32 %v3545_v20, %v257_v3 }
 0x159   :  { %2864 = vmatprep.mubr.msk.bf16.mxu1 %vm48_vm0, %v312_v5  ;;  %v301_v6 = vadd.f32 %v3552_v49, %v279_v21 }
 0x15b   :  { %v313_v7 = vpack.c.bf16 %v301_v6, %v300_v47  ;;  %v869_v47 = vld [vmem:[%s4413_s5] sm:$0xff] }
 0x15d   :  { %2865 = vmatmul.mubr.msk.bf16.gmra.mrb[4].mxu1 %vm48_vm0, %v313_v7 }
 0x15e   :  { %2870 = vmatprep.mubr.msk.bf16.mxu1 %vm3293_vm1, %v3292_v8 }
 0x218   :  { %v2854_v25 = vpop.f32.mrb[0].mxu0 }
 0x219   :  { %v381_v20 = vpop.f32.mrb[1].mxu0  ;;  %v390_v12 = vadd.f32 %v2854_v25, %v2706_v45 }
 0x21a   :  { %v2855_v9 = vpop.f32.mrb[2].mxu0  ;;  %v382_v15 = vadd.f32 %v2706_v45, %v381_v20 }
 0x21b   :  { %v393_v13 = vadd.f32 %v2855_v9, %v2706_v45  ;;  %v384_v14 = vpop.f32.mrb[3].mxu0 }
 0x21c   :  { %v385_v49 = vadd.f32 %v2706_v45, %v384_v14 }
 0x21d   :  { %v3616_v54 = vpack.c.bf16 %v393_v13, %v390_v12 }
 0x21e   :  { %v3618_v18 = vpack.c.bf16 %v385_v49, %v382_v15 }
 0x21f   :  { %504 = vrot.lane.b32.xlu1 %v3616_v54, %s3294_s25 }
 0x220   :  { %453 = vrot.lane.b32.xlu0 %v3618_v18, %s3294_s25  ;;  %v2858_v19 = vpop.f32.mrb[4].mxu0 }
 0x221   :  { %v397_v22 = vpop.f32.mrb[5].mxu0  ;;  %v406_v26 = vadd.f32 %v2858_v19, %v2706_v45 }
 0x222   :  { %v2859_v16 = vpop.f32.mrb[6].mxu0  ;;  %v398_v55 = vadd.f32 %v2706_v45, %v397_v22 }
 0x223   :  { %v409_v27 = vadd.f32 %v2859_v16, %v2706_v45  ;;  %v400_v30 = vpop.f32.mrb[7].mxu0 }
 0x224   :  { %v401_v31 = vadd.f32 %v2706_v45, %v400_v30 }
 0x225   :  { %v3624_v32 = vpack.c.bf16 %v409_v27, %v406_v26 }
 0x226   :  { %v3626_v33 = vpack.c.bf16 %v401_v31, %v398_v55 }
 0x228   :  { %554 = vrot.lane.b32.xlu1 %v3626_v33, %s3294_s25  ;;  %v2862_v0 = vpop.f32.mrb[0].mxu1 }
 0x229   :  { %v413_v34 = vpop.f32.mrb[1].mxu1  ;;  %v422_v39 = vadd.f32 %v2862_v0, %v2706_v45 }
 0x22a   :  { %v2863_v38 = vpop.f32.mrb[2].mxu1  ;;  %v414_v42 = vadd.f32 %v2706_v45, %v413_v34 }
 0x22b   :  { %v425_v40 = vadd.f32 %v2863_v38, %v2706_v45  ;;  %v416_v41 = vpop.f32.mrb[3].mxu1 }
 0x22c   :  { %v417_v43 = vadd.f32 %v2706_v45, %v416_v41  ;;  %604 = vrot.lane.b32.xlu1 %v3624_v32, %s3294_s25 }
 0x22d   :  { %v3632_v46 = vpack.c.bf16 %v425_v40, %v422_v39  ;;  %v3723_v39 = vld [vmem:[%s4413_s5 + $0x10] sm:$0xff] }
 0x22e   :  { %v3634_v1 = vpack.c.bf16 %v417_v43, %v414_v42 }
 0x230   :  { %704 = vrot.lane.b32.xlu1 %v3632_v46, %s3294_s25  ;;  %654 = vrot.lane.b32.xlu0 %v3634_v1, %s3294_s25  ;;  %v2866_v24 = vpop.f32.mrb[4].mxu1 }
 0x231   :  { %v429_v10 = vpop.f32.mrb[5].mxu1  ;;  %v438_v48 = vadd.f32 %v2866_v24, %v2706_v45 }
 0x232   :  { %v2867_v36 = vpop.f32.mrb[6].mxu1  ;;  %v430_v52 = vadd.f32 %v2706_v45, %v429_v10 }
 0x233   :  { %v441_v50 = vadd.f32 %v2867_v36, %v2706_v45  ;;  %v432_v51 = vpop.f32.mrb[7].mxu1 }
 0x234   :  { %v433_v28 = vadd.f32 %v2706_v45, %v432_v51  ;;  %v870_v45 = vld [vmem:[%s4413_s5 + $0x8] sm:$0xff] }
 0x235   :  { %v3640_v29 = vpack.c.bf16 %v441_v50, %v438_v48 }
 0x236   :  { %v3642_v11 = vpack.c.bf16 %v433_v28, %v430_v52 }
 0x237   :  { %804 = vrot.lane.b32.xlu1 %v3640_v29, %s3294_s25 }
 0x238   :  { %754 = vrot.lane.b32.xlu0 %v3642_v11, %s3294_s25 }
 0x23b   :  { %1124 = vrot.lane.b32.xlu1 %v3616_v54, %s3295_s4 }
 0x23c   :  { %1077 = vrot.lane.b32.xlu0 %v3618_v18, %s3295_s4 }
 0x23f   :  { %1218 = vrot.lane.b32.xlu1 %v3624_v32, %s3295_s4 }
 0x243   :  { %1171 = vrot.lane.b32.xlu1 %v3626_v33, %s3295_s4 }
 0x291   :  { %v505_v23 = vpop.permute.xlu1 %504 }
 0x292   :  { %v454_v53 = vpop.permute.xlu0 %453  ;;  %v510_v56 = vsel %vm455_vm2, %v505_v23, 0 }
 0x293   :  { %v460_v44 = vsel %vm455_vm2, %v454_v53, 0 }
 0x294   :  { %2869 = vmatpush3.bf16.xpose.msra.mxu1 %v460_v44 }
 0x295   :  { %2874 = vmatprep.subr.bf16.mxu1 %v3292_v8 }
 0x29a   :  { %v555_v57 = vpop.permute.xlu1 %554 }
 0x29b   :  { %2871 = vmatmul.mubr.msk.bf16.vlgmr.msra.gmra.mrb[8].mxu1 %vm455_vm2, %v3618_v18  ;;  %v560_v59 = vsel %vm455_vm2, %v555_v57, 0 }
 0x29c   :  { %2875 = vmatpush3.bf16.xpose.msra.mxu1 %v510_v56  ;;  %2876 = vmatprep.mubr.msk.bf16.mxu1 %vm3293_vm1, %v3292_v8 }
 0x29d   :  { %2880 = vmatprep.subr.bf16.mxu1 %v3292_v8 }
 0x29e   :  { %v605_v61 = vpop.permute.xlu1 %604 }
 0x29f   :  { %v610_v37 = vsel %vm455_vm2, %v605_v61, 0 }
 0x2a2   :  { %v655_v58 = vpop.permute.xlu0 %654  ;;  %v705_v62 = vpop.permute.xlu1 %704 }
 0x2a3   :  { %v660_v60 = vsel %vm455_vm2, %v655_v58, 0  ;;  %2877 = vmatmul.mubr.msk.bf16.vlgmr.msra.gmra.mrb[12].mxu1 %vm455_vm2, %v3616_v54  ;;  %v710_v63 = vsel %vm455_vm2, %v705_v62, 0  ;;  %v873_v58 = vld [vmem:[%s4413_s5 + $0x20] sm:$0xff]  ;;  %v874_v62 = vld [vmem:[%s4413_s5 + $0x28] sm:$0xff] }
 0x2a4   :  { %2881 = vmatpush3.bf16.xpose.msra.mxu1 %v560_v59  ;;  %2893 = vmatpush3.bf16.xpose.msra.mxu0 %v660_v60  ;;  %v872_v59 = vld [vmem:[%s4413_s5 + $0x18] sm:$0xff] }
 0x2a5   :  { %2882 = vmatprep.mubr.msk.bf16.mxu1 %vm3293_vm1, %v3292_v8  ;;  %2886 = vmatprep.subr.bf16.mxu1 %v3292_v8 }
 0x2a6   :  { %2904 = vmatprep.subr.bf16.mxu0 %v3292_v8 }
 0x2a9   :  { %v805_v3 = vpop.permute.xlu1 %804 }
 0x2aa   :  { %v755_v17 = vpop.permute.xlu0 %754  ;;  %v810_v4 = vsel %vm455_vm2, %v805_v3, 0 }
 0x2ab   :  { %v760_v35 = vsel %vm455_vm2, %v755_v17, 0  ;;  %2883 = vmatmul.mubr.msk.bf16.vlgmr.msra.gmra.mrb[16].mxu1 %vm455_vm2, %v3626_v33  ;;  %2895 = vmatmul.mubr.msk.bf16.vlgmr.msra.gmra.mrb[8].mxu0 %vm455_vm2, %v3634_v1 }
 0x2ac   :  { %2887 = vmatpush3.bf16.xpose.msra.mxu1 %v610_v37  ;;  %2905 = vmatpush3.bf16.xpose.msra.mxu0 %v760_v35 }
 0x2ad   :  { %2888 = vmatprep.mubr.msk.bf16.mxu1 %vm3293_vm1, %v3292_v8  ;;  %2906 = vmatprep.mubr.msk.bf16.mxu0 %vm3293_vm1, %v3292_v8  ;;  %v1125_v5 = vpop.permute.xlu1 %1124 }
 0x2ae   :  { %2898 = vmatprep.subr.bf16.mxu1 %v3292_v8  ;;  %2916 = vmatprep.subr.bf16.mxu0 %v3292_v8  ;;  %v1078_v2 = vpop.permute.xlu0 %1077 }
 0x2b3   :  { %2889 = vmatmul.mubr.msk.bf16.vlgmr.msra.gmra.mrb[20].mxu1 %vm455_vm2, %v3624_v32  ;;  %2907 = vmatmul.mubr.msk.bf16.vlgmr.msra.gmra.mrb[12].mxu0 %vm455_vm2, %v3642_v11 }
 0x2b4   :  { %2899 = vmatpush3.bf16.xpose.msra.mxu1 %v710_v63  ;;  %2917 = vmatpush3.bf16.msra.mxu0 %v1078_v2 }
 0x2b5   :  { %2900 = vmatprep.mubr.msk.bf16.mxu1 %vm3293_vm1, %v3292_v8  ;;  %2910 = vmatprep.subr.bf16.mxu1 %v3292_v8 }
 0x2b6   :  { %2918 = vmatprep.mubr.msk.bf16.mxu0 %vm3293_vm1, %v3292_v8  ;;  %2928 = vmatprep.subr.bf16.mxu0 %v3292_v8 }
 0x2bb   :  { %2901 = vmatmul.mubr.msk.bf16.vlgmr.msra.gmra.mrb[24].mxu1 %vm455_vm2, %v3632_v46 }
 0x2bc   :  { %2911 = vmatpush3.bf16.xpose.msra.mxu1 %v810_v4  ;;  %2912 = vmatprep.mubr.msk.bf16.mxu1 %vm3293_vm1, %v3292_v8 }
 0x2bd   :  { %2922 = vmatprep.subr.bf16.mxu1 %v3292_v8 }
 0x2c3   :  { %2913 = vmatmul.mubr.msk.bf16.vlgmr.msra.gmra.mrb[28].mxu1 %vm455_vm2, %v3640_v29 }
 0x2c4   :  { %2923 = vmatpush3.bf16.msra.mxu1 %v1125_v5  ;;  %2924 = vmatprep.mubr.msk.bf16.mxu1 %vm3293_vm1, %v3292_v8 }
 0x2c5   :  { %2934 = vmatprep.subr.bf16.mxu1 %v3292_v8 }
 0x36e   :  { %v496_v21 = vpop.f32.mrb[8].mxu1 }
 0x36f   :  { %v853_v6 = vmul.f32 0.25, %v496_v21  ;;  %v2872_v7 = vpop.f32.mrb[9].mxu1 }
 0x370   :  { %v499_v25 = vpop.f32.mrb[10].mxu1  ;;  %v876_v7 = vld [vmem:[%s4413_s5 + $0x38] sm:$0xff] }
 0x371   :  { %v854_v20 = vmul.f32 0.25, %v499_v25  ;;  %v2873_v9 = vpop.f32.mrb[11].mxu1  ;;  %v3712_v12 = vadd.f32 %v869_v47, %v853_v6 }
 0x373   :  { %v893_v13 = vsel %vm455_vm2, %v3712_v12, -inf  ;;  %v3716_v14 = vadd.f32 %v870_v45, %v854_v20 }
 0x374   :  { %894 = vmax.xlane.f32.xlu0 %v893_v13 }
 0x375   :  { %v896_v15 = vsel %vm455_vm2, %v3716_v14, -inf }
 0x376   :  { %897 = vmax.xlane.f32.xlu1 %v896_v15  ;;  %v546_v49 = vpop.f32.mrb[12].mxu1  ;;  %v875_v15 = vld [vmem:[%s4413_s5 + $0x30] sm:$0xff] }
 0x377   :  { %v2878_v19 = vpop.f32.mrb[13].mxu1  ;;  %v855_v30 = vmul.f32 0.25, %v546_v49 }
 0x378   :  { %v549_v22 = vpop.f32.mrb[14].mxu1 }
 0x379   :  { %v2879_v16 = vpop.f32.mrb[15].mxu1  ;;  %v3732_v36 = vadd.f32 %v3723_v39, %v855_v30  ;;  %v856_v52 = vmul.f32 0.25, %v549_v22 }
 0x37b   :  { %v899_v23 = vsel %vm455_vm2, %v3732_v36, -inf  ;;  %v3753_v4 = vadd.f32 %v872_v59, %v856_v52 }
 0x37d   :  { %v902_v20 = vsel %vm455_vm2, %v3753_v4, -inf }
 0x37e   :  { %v596_v26 = vpop.f32.mrb[16].mxu1  ;;  %v696_v27 = vpop.f32.mrb[8].mxu0 }
 0x37f   :  { %v861_v55 = vmul.f32 0.25, %v696_v27  ;;  %v2884_v31 = vpop.f32.mrb[17].mxu1  ;;  %v2896_v0 = vpop.f32.mrb[9].mxu0  ;;  %v857_v63 = vmul.f32 0.25, %v596_v26 }
 0x380   :  { %v599_v34 = vpop.f32.mrb[18].mxu1  ;;  %v699_v38 = vpop.f32.mrb[10].mxu0 }
 0x381   :  { %v862_v40 = vmul.f32 0.25, %v699_v38  ;;  %v2885_v41 = vpop.f32.mrb[19].mxu1  ;;  %v2897_v42 = vpop.f32.mrb[11].mxu0  ;;  %v3725_v43 = vadd.f32 %v869_v47, %v861_v55  ;;  %v858_v60 = vmul.f32 0.25, %v599_v34  ;;  %v3764_v9 = vadd.f32 %v873_v58, %v857_v63 }
 0x383   :  { %v917_v24 = vsel %vm455_vm2, %v3725_v43, -inf  ;;  %v3729_v10 = vadd.f32 %v870_v45, %v862_v40  ;;  %v3757_v47 = vadd.f32 %v874_v62, %v858_v60  ;;  %v905_v27 = vsel %vm455_vm2, %v3764_v9, -inf }
 0x384   :  { %918 = vmax.xlane.f32.xlu0 %v917_v24 }
 0x385   :  { %v920_v48 = vsel %vm455_vm2, %v3729_v10, -inf  ;;  %v908_v22 = vsel %vm455_vm2, %v3757_v47, -inf }
 0x386   :  { %v646_v50 = vpop.f32.mrb[20].mxu1  ;;  %921 = vmax.xlane.f32.xlu1 %v920_v48  ;;  %v796_v51 = vpop.f32.mrb[12].mxu0 }
 0x387   :  { %v865_v28 = vmul.f32 0.25, %v796_v51  ;;  %v2890_v53 = vpop.f32.mrb[21].mxu1  ;;  %v2908_v44 = vpop.f32.mrb[13].mxu0  ;;  %v859_v25 = vmul.f32 0.25, %v646_v50 }
 0x388   :  { %v649_v56 = vpop.f32.mrb[22].mxu1  ;;  %900 = vmax.xlane.f32.xlu0 %v899_v23  ;;  %v799_v57 = vpop.f32.mrb[14].mxu0 }
 0x389   :  { %v866_v61 = vmul.f32 0.25, %v799_v57  ;;  %v2891_v17 = vpop.f32.mrb[23].mxu1  ;;  %v2909_v37 = vpop.f32.mrb[15].mxu0  ;;  %v3744_v35 = vadd.f32 %v873_v58, %v865_v28  ;;  %v860_v5 = vmul.f32 0.25, %v649_v56  ;;  %v3775_v30 = vadd.f32 %v875_v15, %v859_v25 }
 0x38a   :  { %v3802_v44 = vpop.permute.xlu1 %1218 }
 0x38b   :  { %v929_v2 = vsel %vm455_vm2, %v3744_v35, -inf  ;;  %v3751_v3 = vadd.f32 %v874_v62, %v866_v61  ;;  %v3771_v16 = vadd.f32 %v876_v7, %v860_v5  ;;  %v911_v40 = vsel %vm455_vm2, %v3775_v30, -inf }
 0x38c   :  { %930 = vmax.xlane.f32.xlu0 %v929_v2 }
 0x38d   :  { %v932_v21 = vsel %vm455_vm2, %v3751_v3, -inf  ;;  %v914_v55 = vsel %vm455_vm2, %v3771_v16, -inf }
 0x38e   :  { %v746_v6 = vpop.f32.mrb[24].mxu1  ;;  %933 = vmax.xlane.f32.xlu1 %v932_v21  ;;  %v3804_v23 = vpop.permute.xlu1 %1171 }
 0x38f   :  { %v2902_v45 = vpop.f32.mrb[25].mxu1  ;;  %v863_v26 = vmul.f32 0.25, %v746_v6 }
 0x390   :  { %v749_v13 = vpop.f32.mrb[26].mxu1  ;;  %903 = vmax.xlane.f32.xlu0 %v902_v20 }
 0x391   :  { %v864_v49 = vmul.f32 0.25, %v749_v13  ;;  %v2903_v19 = vpop.f32.mrb[27].mxu1  ;;  %v3784_v41 = vadd.f32 %v3723_v39, %v863_v26 }
 0x392   :  { %909 = vmax.xlane.f32.xlu1 %v908_v22 }
 0x393   :  { %v3779_v31 = vadd.f32 %v872_v59, %v864_v49  ;;  %v923_v50 = vsel %vm455_vm2, %v3784_v41, -inf }
 0x394   :  { %906 = vmax.xlane.f32.xlu0 %v905_v27 }
 0x395   :  { %v926_v48 = vsel %vm455_vm2, %v3779_v31, -inf }
 0x396   :  { %v846_v0 = vpop.f32.mrb[28].mxu1  ;;  %915 = vmax.xlane.f32.xlu1 %v914_v55 }
 0x397   :  { %v867_v34 = vmul.f32 0.25, %v846_v0  ;;  %v2914_v38 = vpop.f32.mrb[29].mxu1 }
 0x398   :  { %v849_v42 = vpop.f32.mrb[30].mxu1  ;;  %912 = vmax.xlane.f32.xlu0 %v911_v40 }
 0x399   :  { %v2915_v24 = vpop.f32.mrb[31].mxu1  ;;  %v3790_v51 = vadd.f32 %v875_v15, %v867_v34  ;;  %v868_v39 = vmul.f32 0.25, %v849_v42 }
 0x39a   :  { %927 = vmax.xlane.f32.xlu1 %v926_v48 }
 0x39b   :  { %v935_v52 = vsel %vm455_vm2, %v3790_v51, -inf  ;;  %v3798_v28 = vadd.f32 %v876_v7, %v868_v39 }
 0x39c   :  { %924 = vmax.xlane.f32.xlu0 %v923_v50 }
 0x39d   :  { %v938_v53 = vsel %vm455_vm2, %v3798_v28, -inf }
 0x3a0   :  { %936 = vmax.xlane.f32.xlu0 %v935_v52 }
 0x3ab   :  { %1312 = vrot.lane.b32.xlu1 %v3632_v46, %s3295_s4 }
 0x3b6   :  { %1265 = vrot.lane.b32.xlu0 %v3634_v1, %s3295_s4 }
 0x3cf   :  { %939 = vmax.xlane.f32.xlu1 %v938_v53 }
 0x401   :  { %v895_v56 = vpop.xlane.xlu0 %894 }
 0x402   :  { %v941_v57 = vsub.f32 %v3712_v12, %v895_v56 }
 0x403   :  { %v898_v58 = vpop.xlane.xlu1 %897 }
 0x404   :  { %v957_v59 = vmul.f32 1.442695, %v941_v57  ;;  %v942_v60 = vsub.f32 %v3716_v14, %v898_v58 }
 0x406   :  { %3164 = vpow2.f32 %v957_v59  ;;  %v959_v61 = vmul.f32 1.442695, %v942_v60 }
 0x408   :  { %3166 = vpow2.f32 %v959_v61 }
 0x410   :  { %v3808_v17 = vpop.eup %3164 }
 0x411   :  { %v919_v37 = vpop.xlane.xlu0 %918  ;;  %v989_v62 = vsel %vm455_vm2, %v3808_v17, 0.0 }
 0x412   :  { %v3812_v63 = vpop.eup %3166  ;;  %v949_v2 = vsub.f32 %v3725_v43, %v919_v37  ;;  %990 = vadd.xlane.f32.xlu0 %v989_v62 }
 0x413   :  { %v922_v5 = vpop.xlane.xlu1 %921  ;;  %v992_v12 = vsel %vm455_vm2, %v3812_v63, 0.0 }
 0x414   :  { %v973_v21 = vmul.f32 1.442695, %v949_v2  ;;  %v950_v14 = vsub.f32 %v3729_v10, %v922_v5  ;;  %993 = vadd.xlane.f32.xlu1 %v992_v12 }
 0x415   :  { %v901_v6 = vpop.xlane.xlu0 %900 }
 0x416   :  { %3168 = vpow2.f32 %v973_v21  ;;  %v975_v7 = vmul.f32 1.442695, %v950_v14  ;;  %v943_v25 = vsub.f32 %v3732_v36, %v901_v6 }
 0x418   :  { %3170 = vpow2.f32 %v975_v7  ;;  %v961_v45 = vmul.f32 1.442695, %v943_v25 }
 0x419   :  { %v931_v20 = vpop.xlane.xlu0 %930 }
 0x41a   :  { %3172 = vpow2.f32 %v961_v45  ;;  %v953_v43 = vsub.f32 %v3744_v35, %v931_v20 }
 0x41b   :  { %v934_v13 = vpop.xlane.xlu1 %933 }
 0x41c   :  { %v981_v15 = vmul.f32 1.442695, %v953_v43  ;;  %v954_v49 = vsub.f32 %v3751_v3, %v934_v13 }
 0x41d   :  { %v904_v19 = vpop.xlane.xlu0 %903 }
 0x41e   :  { %3174 = vpow2.f32 %v981_v15  ;;  %v944_v10 = vsub.f32 %v3753_v4, %v904_v19  ;;  %v983_v27 = vmul.f32 1.442695, %v954_v49 }
 0x41f   :  { %v910_v22 = vpop.xlane.xlu1 %909 }
 0x420   :  { %v3822_v26 = vpop.eup %3168  ;;  %v963_v55 = vmul.f32 1.442695, %v944_v10  ;;  %v946_v36 = vsub.f32 %v3757_v47, %v910_v22 }
 0x421   :  { %v907_v0 = vpop.xlane.xlu0 %906  ;;  %v1013_v34 = vsel %vm455_vm2, %v3822_v26, 0.0 }
 0x422   :  { %v3827_v35 = vpop.eup %3170  ;;  %3176 = vpow2.f32 %v963_v55  ;;  %v945_v3 = vsub.f32 %v3764_v9, %v907_v0  ;;  %1014 = vadd.xlane.f32.xlu0 %v1013_v34  ;;  %v967_v42 = vmul.f32 1.442695, %v946_v36 }
 0x423   :  { %v916_v38 = vpop.xlane.xlu1 %915  ;;  %v1016_v4 = vsel %vm455_vm2, %v3827_v35, 0.0  ;;  %3178 = vpow2.f32 %v983_v27 }
 0x424   :  { %v3832_v40 = vpop.eup %3172  ;;  %v965_v24 = vmul.f32 1.442695, %v945_v3  ;;  %v948_v47 = vsub.f32 %v3771_v16, %v916_v38  ;;  %1017 = vadd.xlane.f32.xlu1 %v1016_v4 }
 0x425   :  { %v913_v48 = vpop.xlane.xlu0 %912  ;;  %v995_v50 = vsel %vm455_vm2, %v3832_v40, 0.0 }
 0x426   :  { %3180 = vpow2.f32 %v965_v24  ;;  %v947_v9 = vsub.f32 %v3775_v30, %v913_v48  ;;  %996 = vadd.xlane.f32.xlu0 %v995_v50  ;;  %v971_v39 = vmul.f32 1.442695, %v948_v47 }
 0x427   :  { %3182 = vpow2.f32 %v967_v42  ;;  %v928_v25 = vpop.xlane.xlu1 %927 }
 0x428   :  { %v3838_v52 = vpop.eup %3174  ;;  %v969_v53 = vmul.f32 1.442695, %v947_v9  ;;  %v952_v20 = vsub.f32 %v3779_v31, %v928_v25 }
 0x429   :  { %v925_v56 = vpop.xlane.xlu0 %924  ;;  %v1025_v57 = vsel %vm455_vm2, %v3838_v52, 0.0 }
 0x42a   :  { %3184 = vpow2.f32 %v969_v53  ;;  %v951_v16 = vsub.f32 %v3784_v41, %v925_v56  ;;  %1026 = vadd.xlane.f32.xlu0 %v1025_v57  ;;  %v979_v13 = vmul.f32 1.442695, %v952_v20 }
 0x42b   :  { %3186 = vpow2.f32 %v971_v39  ;;  %v3889_v31 = vpop.permute.xlu1 %1312 }
 0x42c   :  { %v3843_v58 = vpop.eup %3176  ;;  %v977_v59 = vmul.f32 1.442695, %v951_v16 }
 0x42d   :  { %v998_v30 = vsel %vm455_vm2, %v3843_v58, 0.0  ;;  %v3847_v60 = vpop.eup %3178  ;;  %v937_v45 = vpop.xlane.xlu0 %936 }
 0x42e   :  { %3188 = vpow2.f32 %v977_v59  ;;  %999 = vadd.xlane.f32.xlu1 %v998_v30  ;;  %v1028_v37 = vsel %vm455_vm2, %v3847_v60, 0.0  ;;  %v955_v43 = vsub.f32 %v3790_v51, %v937_v45 }
 0x42f   :  { %3190 = vpow2.f32 %v979_v13 }
 0x430   :  { %v3849_v61 = vpop.eup %3180  ;;  %v985_v15 = vmul.f32 1.442695, %v955_v43 }
 0x431   :  { %v1001_v41 = vsel %vm455_vm2, %v3849_v61, 0.0  ;;  %v3855_v62 = vpop.eup %3182  ;;  %v3902_v36 = vpop.permute.xlu0 %1265 }
 0x432   :  { %1029 = vadd.xlane.f32.xlu1 %v1028_v37  ;;  %1002 = vadd.xlane.f32.xlu0 %v1001_v41  ;;  %v1004_v5 = vsel %vm455_vm2, %v3855_v62, 0.0  ;;  %3192 = vpow2.f32 %v985_v15 }
 0x434   :  { %v3857_v2 = vpop.eup %3184 }
 0x435   :  { %v1007_v12 = vsel %vm455_vm2, %v3857_v2, 0.0  ;;  %v3863_v21 = vpop.eup %3186 }
 0x436   :  { %1005 = vadd.xlane.f32.xlu1 %v1004_v5  ;;  %1008 = vadd.xlane.f32.xlu0 %v1007_v12  ;;  %v1010_v6 = vsel %vm455_vm2, %v3863_v21, 0.0 }
 0x438   :  { %v3865_v14 = vpop.eup %3188 }
 0x439   :  { %v1019_v7 = vsel %vm455_vm2, %v3865_v14, 0.0  ;;  %v3877_v49 = vpop.eup %3190 }
 0x43a   :  { %1011 = vadd.xlane.f32.xlu1 %v1010_v6  ;;  %1020 = vadd.xlane.f32.xlu0 %v1019_v7  ;;  %v1022_v10 = vsel %vm455_vm2, %v3877_v49, 0.0 }
 0x43c   :  { %v3879_v19 = vpop.eup %3192 }
 0x43d   :  { %v1031_v22 = vsel %vm455_vm2, %v3879_v19, 0.0 }
 0x44b   :  { %1406 = vrot.lane.b32.xlu1 %v3640_v29, %s3295_s4 }
 0x450   :  { %1359 = vrot.lane.b32.xlu0 %v3642_v11, %s3295_s4 }
 0x45c   :  { %v940_v51 = vpop.xlane.xlu1 %939 }
 0x45d   :  { %v956_v27 = vsub.f32 %v3798_v28, %v940_v51 }
 0x45f   :  { %v987_v55 = vmul.f32 1.442695, %v956_v27 }
 0x461   :  { %3194 = vpow2.f32 %v987_v55 }
 0x46b   :  { %v3906_v34 = vpop.eup %3194 }
 0x46c   :  { %v1034_v3 = vsel %vm455_vm2, %v3906_v34, 0.0 }
 0x46f   :  { %1023 = vadd.xlane.f32.xlu1 %v1022_v10  ;;  %1032 = vadd.xlane.f32.xlu0 %v1031_v22 }
 0x480   :  { %1506 = vrot.lane.b32.xlu1 %v3616_v54, %s3296_s19 }
 0x485   :  { %1455 = vrot.lane.b32.xlu0 %v3618_v18, %s3296_s19 }
 0x489   :  { %1453 = vrot.lane.b32.xlu0 %v3618_v18, %s3297_s20 }
 0x48d   :  { %1504 = vrot.lane.b32.xlu0 %v3616_v54, %s3297_s20 }
 0x491   :  { %1555 = vrot.lane.b32.xlu0 %v3626_v33, %s3297_s20 }
 0x495   :  { %1606 = vrot.lane.b32.xlu0 %v3624_v32, %s3297_s20 }
 0x499   :  { %1657 = vrot.lane.b32.xlu0 %v3634_v1, %s3297_s20 }
 0x49d   :  { %1708 = vrot.lane.b32.xlu0 %v3632_v46, %s3297_s20 }
 0x49f   :  { %v991_v0 = vpop.xlane.xlu0 %990 }
 0x4a0   :  { %3196 = vrcp.f32 %v991_v0 }
 0x4a1   :  { %v994_v28 = vpop.xlane.xlu1 %993  ;;  %1759 = vrot.lane.b32.xlu0 %v3642_v11, %s3297_s20 }
 0x4a2   :  { %3198 = vrcp.f32 %v994_v28 }
 0x4a4   :  { %1035 = vadd.xlane.f32.xlu1 %v1034_v3 }
 0x4aa   :  { %v3197_v38 = vpop.eup %3196 }
 0x4ab   :  { %v1053_v42 = vmul.f32 %v3197_v38, %v3808_v17 }
 0x4ac   :  { %v3199_v4 = vpop.eup %3198 }
 0x4ad   :  { %v1054_v24 = vmul.f32 %v3199_v4, %v3812_v63 }
 0x4af   :  { %v1015_v47 = vpop.xlane.xlu0 %1014  ;;  %v1069_v48 = vpack.c.bf16 %v1054_v24, %v1053_v42 }
 0x4b1   :  { %2919 = vmatmul.mubr.msk.bf16.vlgmr.msra.gmra.mrb[16].mxu0 %vm455_vm2, %v1069_v48  ;;  %v1018_v9 = vpop.xlane.xlu1 %1017 }
 0x4b2   :  { %2929 = vmatpush3.bf16.msra.mxu0 %v3804_v23  ;;  %2930 = vmatprep.mubr.msk.bf16.mxu0 %vm3293_vm1, %v3292_v8 }
 0x4b3   :  { %2940 = vmatprep.subr.bf16.mxu0 %v3292_v8  ;;  %v997_v50 = vpop.xlane.xlu0 %996 }
 0x4b4   :  { %3200 = vrcp.f32 %v997_v50 }
 0x4b5   :  { %1557 = vrot.lane.b32.xlu1 %v3626_v33, %s3296_s19 }
 0x4b7   :  { %v1027_v17 = vpop.xlane.xlu0 %1026 }
 0x4b9   :  { %1608 = vrot.lane.b32.xlu1 %v3624_v32, %s3296_s19 }
 0x4bb   :  { %v1000_v63 = vpop.xlane.xlu1 %999 }
 0x4bc   :  { %3202 = vrcp.f32 %v1000_v63 }
 0x4bd   :  { %1659 = vrot.lane.b32.xlu1 %v3634_v1, %s3296_s19 }
 0x4be   :  { %v3201_v57 = vpop.eup %3200 }
 0x4bf   :  { %v1030_v23 = vpop.xlane.xlu1 %1029  ;;  %v1003_v39 = vpop.xlane.xlu0 %1002  ;;  %v1055_v59 = vmul.f32 %v3201_v57, %v3832_v40 }
 0x4c0   :  { %3204 = vrcp.f32 %v1003_v39 }
 0x4c1   :  { %1710 = vrot.lane.b32.xlu1 %v3632_v46, %s3296_s19 }
 0x4c3   :  { %v1006_v53 = vpop.xlane.xlu1 %1005  ;;  %v1009_v56 = vpop.xlane.xlu0 %1008 }
 0x4c4   :  { %3206 = vrcp.f32 %v1006_v53 }
 0x4c5   :  { %1761 = vrot.lane.b32.xlu1 %v3642_v11, %s3296_s19  ;;  %3208 = vrcp.f32 %v1009_v56 }
 0x4c6   :  { %v3203_v16 = vpop.eup %3202  ;;  %3210 = vrcp.f32 %v1018_v9 }
 0x4c7   :  { %v1056_v30 = vmul.f32 %v3203_v16, %v3843_v58  ;;  %v1012_v37 = vpop.xlane.xlu1 %1011 }
 0x4c8   :  { %3212 = vrcp.f32 %v1012_v37 }
 0x4c9   :  { %1812 = vrot.lane.b32.xlu1 %v3640_v29, %s3296_s19  ;;  %v1070_v41 = vpack.c.bf16 %v1056_v30, %v1055_v59  ;;  %3214 = vrcp.f32 %v1015_v47 }
 0x4ca   :  { %v3205_v5 = vpop.eup %3204  ;;  %3216 = vrcp.f32 %v1030_v23 }
 0x4cb   :  { %2925 = vmatmul.mubr.msk.bf16.vlgmr.msra.gmra.mrb[32].mxu1 %vm455_vm2, %v1070_v41  ;;  %v1057_v58 = vmul.f32 %v3205_v5, %v3849_v61  ;;  %3218 = vrcp.f32 %v1027_v17  ;;  %v1407_v51 = vpop.permute.xlu1 %1406 }
 0x4cc   :  { %2935 = vmatpush3.bf16.msra.mxu1 %v3802_v44  ;;  %2936 = vmatprep.mubr.msk.bf16.mxu1 %vm3293_vm1, %v3292_v8 }
 0x4cd   :  { %1810 = vrot.lane.b32.xlu1 %v3640_v29, %s3297_s20  ;;  %2946 = vmatprep.subr.bf16.mxu1 %v3292_v8 }
 0x4ce   :  { %v3207_v40 = vpop.eup %3206 }
 0x4cf   :  { %v1058_v12 = vmul.f32 %v3207_v40, %v3855_v62  ;;  %v3209_v6 = vpop.eup %3208  ;;  %v1021_v62 = vpop.xlane.xlu0 %1020 }
 0x4d0   :  { %v3211_v7 = vpop.eup %3210  ;;  %v1059_v44 = vmul.f32 %v3209_v6, %v3857_v2  ;;  %3220 = vrcp.f32 %v1021_v62 }
 0x4d1   :  { %v1071_v25 = vpack.c.bf16 %v1058_v12, %v1057_v58  ;;  %v1062_v61 = vmul.f32 %v3211_v7, %v3827_v35 }
 0x4d2   :  { %v3213_v45 = vpop.eup %3212 }
 0x4d3   :  { %v1060_v20 = vmul.f32 %v3213_v45, %v3863_v21  ;;  %2931 = vmatmul.mubr.msk.bf16.vlgmr.msra.gmra.mrb[20].mxu0 %vm455_vm2, %v1071_v25  ;;  %v3215_v43 = vpop.eup %3214  ;;  %v1360_v10 = vpop.permute.xlu0 %1359 }
 0x4d4   :  { %2941 = vmatpush3.bf16.msra.mxu0 %v3902_v36  ;;  %2942 = vmatprep.mubr.msk.bf16.mxu0 %vm3293_vm1, %v3292_v8  ;;  %v1061_v15 = vmul.f32 %v3215_v43, %v3822_v26  ;;  %v3217_v21 = vpop.eup %3216 }
 0x4d5   :  { %v1072_v13 = vpack.c.bf16 %v1060_v20, %v1059_v44  ;;  %2952 = vmatprep.subr.bf16.mxu0 %v3292_v8  ;;  %v3219_v35 = vpop.eup %3218  ;;  %v1066_v26 = vmul.f32 %v3217_v21, %v3847_v60 }
 0x4d6   :  { %v1073_v2 = vpack.c.bf16 %v1062_v61, %v1061_v15  ;;  %v1065_v22 = vmul.f32 %v3219_v35, %v3838_v52 }
 0x4d7   :  { %2937 = vmatmul.mubr.msk.bf16.vlgmr.msra.gmra.mrb[36].mxu1 %vm455_vm2, %v1072_v13 }
 0x4d8   :  { %2947 = vmatpush3.bf16.msra.mxu1 %v3889_v31  ;;  %2948 = vmatprep.mubr.msk.bf16.mxu1 %vm3293_vm1, %v3292_v8  ;;  %v1075_v31 = vpack.c.bf16 %v1066_v26, %v1065_v22 }
 0x4d9   :  { %2958 = vmatprep.subr.bf16.mxu1 %v3292_v8 }
 0x4da   :  { %v3221_v60 = vpop.eup %3220 }
 0x4db   :  { %2943 = vmatmul.mubr.msk.bf16.vlgmr.msra.gmra.mrb[24].mxu0 %vm455_vm2, %v1073_v2  ;;  %v1063_v52 = vmul.f32 %v3221_v60, %v3865_v14 }
 0x4dc   :  { %2953 = vmatpush3.bf16.msra.mxu0 %v1360_v10  ;;  %2954 = vmatprep.mubr.msk.bf16.mxu0 %vm3293_vm1, %v3292_v8 }
 0x4dd   :  { %2964 = vmatprep.subr.bf16.mxu0 %v3292_v8 }
 0x4e3   :  { %2955 = vmatmul.mubr.msk.bf16.vlgmr.msra.gmra.mrb[28].mxu0 %vm455_vm2, %v1075_v31 }
 0x4e4   :  { %2966 = vmatprep.mubr.msk.bf16.mxu0 %vm3293_vm1, %v3292_v8 }
 0x4fc   :  { %v1024_v27 = vpop.xlane.xlu1 %1023  ;;  %v1033_v55 = vpop.xlane.xlu0 %1032 }
 0x4fd   :  { %3222 = vrcp.f32 %v1024_v27 }
 0x4fe   :  { %3224 = vrcp.f32 %v1033_v55 }
 0x500   :  { %v1456_v36 = vpop.permute.xlu0 %1455  ;;  %v1507_v42 = vpop.permute.xlu1 %1506 }
 0x501   :  { %v1461_v0 = vsel %vm455_vm2, %v1456_v36, 0  ;;  %v1512_v16 = vsel %vm455_vm2, %v1507_v42, 0 }
 0x502   :  { %2965 = vmatpush3.bf16.xpose.msra.mxu0 %v1461_v0 }
 0x503   :  { %2976 = vmatprep.subr.bf16.mxu0 %v3292_v8 }
 0x504   :  { %v1454_v38 = vpop.permute.xlu0 %1453 }
 0x507   :  { %v3223_v28 = vpop.eup %3222 }
 0x508   :  { %v1064_v3 = vmul.f32 %v3223_v28, %v3877_v49  ;;  %v1505_v24 = vpop.permute.xlu0 %1504  ;;  %v3225_v9 = vpop.eup %3224 }
 0x509   :  { %2967 = vmatmul.mubr.msk.bf16.vlgmr.msra.gmra.mrb[32].mxu0 %vm455_vm2, %v1454_v38  ;;  %v1067_v23 = vmul.f32 %v3225_v9, %v3879_v19 }
 0x50a   :  { %v1074_v4 = vpack.c.bf16 %v1064_v3, %v1063_v52  ;;  %2978 = vmatprep.mubr.msk.bf16.mxu0 %vm3293_vm1, %v3292_v8  ;;  %v2739_v3 = vld [vmem:[%s4413_s5 + $0x40] sm:$0xff] }
 0x50c   :  { %2949 = vmatmul.mubr.msk.bf16.vlgmr.msra.gmra.mrb[40].mxu1 %vm455_vm2, %v1074_v4  ;;  %v1556_v49 = vpop.permute.xlu0 %1555 }
 0x50d   :  { %2959 = vmatpush3.bf16.msra.mxu1 %v1407_v51  ;;  %2960 = vmatprep.mubr.msk.bf16.mxu1 %vm3293_vm1, %v3292_v8 }
 0x50e   :  { %2970 = vmatprep.subr.bf16.mxu1 %v3292_v8 }
 0x510   :  { %v1607_v17 = vpop.permute.xlu0 %1606 }
 0x514   :  { %v1658_v59 = vpop.permute.xlu0 %1657 }
 0x518   :  { %v1709_v37 = vpop.permute.xlu0 %1708 }
 0x51c   :  { %v1760_v5 = vpop.permute.xlu0 %1759 }
 0x531   :  { %v1036_v14 = vpop.xlane.xlu1 %1035 }
 0x532   :  { %3226 = vrcp.f32 %v1036_v14 }
 0x535   :  { %v1558_v47 = vpop.permute.xlu1 %1557 }
 0x536   :  { %v1563_v48 = vsel %vm455_vm2, %v1558_v47, 0 }
 0x537   :  { %2977 = vmatpush3.bf16.xpose.msra.mxu0 %v1563_v48 }
 0x538   :  { %2988 = vmatprep.subr.bf16.mxu0 %v3292_v8 }
 0x539   :  { %v1609_v50 = vpop.permute.xlu1 %1608 }
 0x53a   :  { %v1614_v41 = vsel %vm455_vm2, %v1609_v50, 0 }
 0x53c   :  { %v3227_v63 = vpop.eup %3226 }
 0x53d   :  { %v1068_v39 = vmul.f32 %v3227_v63, %v3906_v34  ;;  %v1660_v53 = vpop.permute.xlu1 %1659 }
 0x53e   :  { %v1665_v56 = vsel %vm455_vm2, %v1660_v53, 0  ;;  %2979 = vmatmul.mubr.msk.bf16.vlgmr.msra.gmra.mrb[36].mxu0 %vm455_vm2, %v1556_v49 }
 0x53f   :  { %2989 = vmatpush3.bf16.xpose.msra.mxu0 %v1665_v56  ;;  %v1076_v57 = vpack.c.bf16 %v1068_v39, %v1067_v23  ;;  %2990 = vmatprep.mubr.msk.bf16.mxu0 %vm3293_vm1, %v3292_v8 }
 0x540   :  { %3000 = vmatprep.subr.bf16.mxu0 %v3292_v8 }
 0x541   :  { %v1711_v30 = vpop.permute.xlu1 %1710  ;;  %2961 = vmatmul.mubr.msk.bf16.vlgmr.msra.gmra.mrb[44].mxu1 %vm455_vm2, %v1076_v57 }
 0x542   :  { %2971 = vmatpush3.bf16.xpose.msra.mxu1 %v1512_v16  ;;  %2972 = vmatprep.mubr.msk.bf16.mxu1 %vm3293_vm1, %v3292_v8  ;;  %v1716_v40 = vsel %vm455_vm2, %v1711_v30, 0  ;;  %v4061_v16 = vld [vmem:[%s4413_s5 + $0x68] sm:$0xff] }
 0x543   :  { %2982 = vmatprep.subr.bf16.mxu1 %v3292_v8 }
 0x545   :  { %v1762_v19 = vpop.permute.xlu1 %1761 }
 0x546   :  { %v1767_v34 = vsel %vm455_vm2, %v1762_v19, 0  ;;  %2991 = vmatmul.mubr.msk.bf16.vlgmr.msra.gmra.mrb[40].mxu0 %vm455_vm2, %v1658_v59 }
 0x547   :  { %3001 = vmatpush3.bf16.xpose.msra.mxu0 %v1767_v34  ;;  %3002 = vmatprep.mubr.msk.bf16.mxu0 %vm3293_vm1, %v3292_v8 }
 0x548   :  { %3012 = vmatprep.subr.bf16.mxu0 %v3292_v8 }
 0x549   :  { %2973 = vmatmul.mubr.msk.bf16.vlgmr.msra.gmra.mrb[48].mxu1 %vm455_vm2, %v1505_v24  ;;  %v1813_v58 = vpop.permute.xlu1 %1812  ;;  %v2740_v24 = vld [vmem:[%s4413_s5 + $0x48] sm:$0xff] }
 0x54a   :  { %2983 = vmatpush3.bf16.xpose.msra.mxu1 %v1614_v41  ;;  %2984 = vmatprep.mubr.msk.bf16.mxu1 %vm3293_vm1, %v3292_v8  ;;  %v1818_v12 = vsel %vm455_vm2, %v1813_v58, 0 }
 0x54b   :  { %2994 = vmatprep.subr.bf16.mxu1 %v3292_v8 }
 0x54d   :  { %v1811_v6 = vpop.permute.xlu1 %1810 }
 0x54e   :  { %3003 = vmatmul.mubr.msk.bf16.vlgmr.msra.gmra.mrb[44].mxu0 %vm455_vm2, %v1760_v5 }
 0x54f   :  { %3014 = vmatprep.mubr.msk.bf16.mxu0 %vm3293_vm1, %v3292_v8 }
 0x551   :  { %2985 = vmatmul.mubr.msk.bf16.vlgmr.msra.gmra.mrb[52].mxu1 %vm455_vm2, %v1607_v17 }
 0x552   :  { %2995 = vmatpush3.bf16.xpose.msra.mxu1 %v1716_v40  ;;  %2996 = vmatprep.mubr.msk.bf16.mxu1 %vm3293_vm1, %v3292_v8 }
 0x553   :  { %3006 = vmatprep.subr.bf16.mxu1 %v3292_v8 }
 0x559   :  { %2997 = vmatmul.mubr.msk.bf16.vlgmr.msra.gmra.mrb[56].mxu1 %vm455_vm2, %v1709_v37 }
 0x55a   :  { %3007 = vmatpush3.bf16.xpose.msra.mxu1 %v1818_v12  ;;  %3008 = vmatprep.mubr.msk.bf16.mxu1 %vm3293_vm1, %v3292_v8 }
 0x55b   :  { %3018 = vmatprep.subr.bf16.mxu1 %v3292_v8 }
 0x561   :  { %3009 = vmatmul.mubr.msk.bf16.vlgmr.msra.gmra.mrb[60].mxu1 %vm455_vm2, %v1811_v6 }
 0x562   :  { %3020 = vmatprep.mubr.msk.bf16.mxu1 %vm3293_vm1, %v3292_v8 }
 0x584   :  { %v4016_v7 = vpop.f32.mrb[16].mxu0 }
 0x585   :  { %v2920_v25 = vpop.f32.mrb[17].mxu0 }
 0x586   :  { %v4018_v45 = vpop.f32.mrb[18].mxu0 }
 0x587   :  { %v2921_v44 = vpop.f32.mrb[19].mxu0 }
 0x59e   :  { %v4020_v20 = vpop.f32.mrb[32].mxu1 }
 0x59f   :  { %v2926_v43 = vpop.f32.mrb[33].mxu1 }
 0x5a0   :  { %v4022_v61 = vpop.f32.mrb[34].mxu1 }
 0x5a1   :  { %v2927_v62 = vpop.f32.mrb[35].mxu1 }
 0x5a6   :  { %v4024_v13 = vpop.f32.mrb[20].mxu0 }
 0x5a7   :  { %v2932_v15 = vpop.f32.mrb[21].mxu0 }
 0x5a8   :  { %v4026_v2 = vpop.f32.mrb[22].mxu0 }
 0x5a9   :  { %v2933_v21 = vpop.f32.mrb[23].mxu0 }
 0x5aa   :  { %v4028_v10 = vpop.f32.mrb[36].mxu1  ;;  %v2741_v21 = vld [vmem:[%s4413_s5 + $0x50] sm:$0xff] }
 0x5ab   :  { %v2938_v35 = vpop.f32.mrb[37].mxu1 }
 0x5ac   :  { %v4030_v26 = vpop.f32.mrb[38].mxu1 }
 0x5ad   :  { %v2939_v22 = vpop.f32.mrb[39].mxu1 }
 0x5ae   :  { %v4032_v31 = vpop.f32.mrb[24].mxu0 }
 0x5af   :  { %v2944_v51 = vpop.f32.mrb[25].mxu0 }
 0x5b0   :  { %v4034_v27 = vpop.f32.mrb[26].mxu0 }
 0x5b1   :  { %v2945_v55 = vpop.f32.mrb[27].mxu0 }
 0x5b6   :  { %v4036_v36 = vpop.f32.mrb[28].mxu0 }
 0x5b7   :  { %v2956_v0 = vpop.f32.mrb[29].mxu0 }
 0x5b8   :  { %v4038_v60 = vpop.f32.mrb[30].mxu0  ;;  %v2742_v0 = vld [vmem:[%s4413_s5 + $0x58] sm:$0xff] }
 0x5b9   :  { %v2957_v28 = vpop.f32.mrb[31].mxu0 }
 0x5dc   :  { %v1497_v52 = vpop.f32.mrb[32].mxu0 }
 0x5dd   :  { %v1861_v38 = vmul.f32 0.25, %v1497_v52  ;;  %v2968_v4 = vpop.f32.mrb[33].mxu0 }
 0x5de   :  { %v1500_v42 = vpop.f32.mrb[34].mxu0 }
 0x5df   :  { %v1862_v14 = vmul.f32 0.25, %v1500_v42  ;;  %v4046_v49 = vpop.f32.mrb[40].mxu1  ;;  %v2969_v47 = vpop.f32.mrb[35].mxu0  ;;  %v4048_v48 = vadd.f32 %v2739_v3, %v1861_v38 }
 0x5e0   :  { %v2950_v50 = vpop.f32.mrb[41].mxu1 }
 0x5e1   :  { %v4050_v9 = vadd.f32 %v2740_v24, %v1862_v14  ;;  %v4052_v17 = vpop.f32.mrb[42].mxu1  ;;  %v1902_v63 = vsel %vm455_vm2, %v4048_v48, -inf }
 0x5e2   :  { %v2951_v23 = vpop.f32.mrb[43].mxu1  ;;  %1903 = vmax.xlane.f32.xlu0 %v1902_v63 }
 0x5e3   :  { %v1905_v39 = vsel %vm455_vm2, %v4050_v9, -inf }
 0x5e4   :  { %1906 = vmax.xlane.f32.xlu1 %v1905_v39 }
 0x611   :  { %v1599_v53 = vpop.f32.mrb[36].mxu0 }
 0x612   :  { %v2980_v56 = vpop.f32.mrb[37].mxu0  ;;  %v1865_v38 = vmul.f32 0.25, %v1599_v53 }
 0x613   :  { %v1602_v57 = vpop.f32.mrb[38].mxu0 }
 0x614   :  { %v1866_v59 = vmul.f32 0.25, %v1602_v57  ;;  %v4063_v30 = vpop.f32.mrb[44].mxu1  ;;  %v2981_v19 = vpop.f32.mrb[39].mxu0 }
 0x615   :  { %v2962_v34 = vpop.f32.mrb[45].mxu1 }
 0x616   :  { %v4066_v37 = vadd.f32 %v4061_v16, %v1866_v59  ;;  %v4068_v41 = vpop.f32.mrb[46].mxu1  ;;  %v2745_v59 = vld [vmem:[%s4413_s5 + $0x70] sm:$0xff]  ;;  %v2746_v34 = vld [vmem:[%s4413_s5 + $0x78] sm:$0xff] }
 0x617   :  { %v2963_v5 = vpop.f32.mrb[47].mxu1 }
 0x618   :  { %v1917_v40 = vsel %vm455_vm2, %v4066_v37, -inf }
 0x619   :  { %1918 = vmax.xlane.f32.xlu1 %v1917_v40  ;;  %v1701_v58 = vpop.f32.mrb[40].mxu0 }
 0x61a   :  { %v1869_v12 = vmul.f32 0.25, %v1701_v58  ;;  %v2992_v6 = vpop.f32.mrb[41].mxu0 }
 0x61b   :  { %v1704_v25 = vpop.f32.mrb[42].mxu0 }
 0x61c   :  { %v4072_v44 = vadd.f32 %v2739_v3, %v1869_v12  ;;  %v1870_v43 = vmul.f32 0.25, %v1704_v25  ;;  %v1548_v62 = vpop.f32.mrb[48].mxu1  ;;  %v2993_v15 = vpop.f32.mrb[43].mxu0 }
 0x61d   :  { %v1863_v35 = vmul.f32 0.25, %v1548_v62  ;;  %v2974_v22 = vpop.f32.mrb[49].mxu1 }
 0x61e   :  { %v4077_v51 = vadd.f32 %v2740_v24, %v1870_v43  ;;  %v1551_v55 = vpop.f32.mrb[50].mxu1  ;;  %v2743_v24 = vld [vmem:[%s4413_s5 + $0x60] sm:$0xff]  ;;  %s3298_s5 = smov 48  }
 0x61f   :  { %v1864_v28 = vmul.f32 0.25, %v1551_v55  ;;  %v2975_v52 = vpop.f32.mrb[51].mxu1  ;;  %v4082_v3 = vadd.f32 %v2741_v21, %v1863_v35  ;;  %v4091_v39 = vadd.f32 %v2743_v24, %v1865_v38 }
 0x620   :  { %v1929_v38 = vsel %vm455_vm2, %v4077_v51, -inf }
 0x621   :  { %v4084_v4 = vadd.f32 %v2742_v0, %v1864_v28  ;;  %v1803_v42 = vpop.f32.mrb[44].mxu0  ;;  %v1908_v14 = vsel %vm455_vm2, %v4082_v3, -inf  ;;  %v1914_v6 = vsel %vm455_vm2, %v4091_v39, -inf }
 0x622   :  { %1909 = vmax.xlane.f32.xlu0 %v1908_v14  ;;  %v3004_v47 = vpop.f32.mrb[45].mxu0  ;;  %v1873_v14 = vmul.f32 0.25, %v1803_v42 }
 0x623   :  { %v1806_v50 = vpop.f32.mrb[46].mxu0  ;;  %v1911_v53 = vsel %vm455_vm2, %v4084_v4, -inf }
 0x624   :  { %v1650_v63 = vpop.f32.mrb[52].mxu1  ;;  %v3005_v23 = vpop.f32.mrb[47].mxu0  ;;  %v1874_v55 = vmul.f32 0.25, %v1806_v50 }
 0x625   :  { %v1867_v56 = vmul.f32 0.25, %v1650_v63  ;;  %v2986_v57 = vpop.f32.mrb[53].mxu1  ;;  %v1926_v23 = vsel %vm455_vm2, %v4072_v44, -inf }
 0x626   :  { %1912 = vmax.xlane.f32.xlu0 %v1911_v53  ;;  %v1653_v19 = vpop.f32.mrb[54].mxu1  ;;  %v4124_v53 = vadd.f32 %v2743_v24, %v1873_v14 }
 0x627   :  { %v1868_v5 = vmul.f32 0.25, %v1653_v19  ;;  %v2987_v40 = vpop.f32.mrb[55].mxu1  ;;  %v4101_v58 = vadd.f32 %v2745_v59, %v1867_v56  ;;  %v4120_v56 = vadd.f32 %v4061_v16, %v1874_v55 }
 0x628   :  { %v1938_v24 = vsel %vm455_vm2, %v4124_v53, -inf }
 0x629   :  { %v4103_v12 = vadd.f32 %v2746_v34, %v1868_v5  ;;  %v1920_v35 = vsel %vm455_vm2, %v4101_v58, -inf  ;;  %v1941_v16 = vsel %vm455_vm2, %v4120_v56, -inf }
 0x62a   :  { %1915 = vmax.xlane.f32.xlu0 %v1914_v6 }
 0x62b   :  { %v1923_v25 = vsel %vm455_vm2, %v4103_v12, -inf }
 0x62c   :  { %1924 = vmax.xlane.f32.xlu1 %v1923_v25  ;;  %v1752_v43 = vpop.f32.mrb[56].mxu1 }
 0x62d   :  { %v1871_v62 = vmul.f32 0.25, %v1752_v43  ;;  %v2998_v15 = vpop.f32.mrb[57].mxu1 }
 0x62e   :  { %1921 = vmax.xlane.f32.xlu0 %v1920_v35  ;;  %v1755_v22 = vpop.f32.mrb[58].mxu1 }
 0x62f   :  { %v1872_v28 = vmul.f32 0.25, %v1755_v22  ;;  %v2999_v52 = vpop.f32.mrb[59].mxu1  ;;  %v4113_v47 = vadd.f32 %v2741_v21, %v1871_v62 }
 0x630   :  { %1930 = vmax.xlane.f32.xlu1 %v1929_v38 }
 0x631   :  { %v4115_v63 = vadd.f32 %v2742_v0, %v1872_v28  ;;  %v1932_v21 = vsel %vm455_vm2, %v4113_v47, -inf }
 0x632   :  { %1927 = vmax.xlane.f32.xlu0 %v1926_v23 }
 0x633   :  { %v1935_v50 = vsel %vm455_vm2, %v4115_v63, -inf }
 0x634   :  { %1936 = vmax.xlane.f32.xlu1 %v1935_v50  ;;  %v1854_v57 = vpop.f32.mrb[60].mxu1 }
 0x635   :  { %v1875_v19 = vmul.f32 0.25, %v1854_v57  ;;  %v3010_v42 = vpop.f32.mrb[61].mxu1 }
 0x636   :  { %1933 = vmax.xlane.f32.xlu0 %v1932_v21  ;;  %v1857_v0 = vpop.f32.mrb[62].mxu1 }
 0x637   :  { %v1876_v5 = vmul.f32 0.25, %v1857_v0  ;;  %v3011_v40 = vpop.f32.mrb[63].mxu1  ;;  %v4130_v6 = vadd.f32 %v2745_v59, %v1875_v19 }
 0x638   :  { %1942 = vmax.xlane.f32.xlu1 %v1941_v16 }
 0x639   :  { %v4132_v25 = vadd.f32 %v2746_v34, %v1876_v5  ;;  %v1944_v43 = vsel %vm455_vm2, %v4130_v6, -inf }
 0x63a   :  { %1939 = vmax.xlane.f32.xlu0 %v1938_v24 }
 0x63e   :  { %1945 = vmax.xlane.f32.xlu0 %v1944_v43 }
 0x649   :  { %2133 = vrot.lane.b32.xlu1 %v3616_v54, %s3298_s5  ;;  %v1947_v54 = vsel %vm455_vm2, %v4132_v25, -inf }
 0x64d   :  { %2180 = vrot.lane.b32.xlu1 %v3626_v33, %s3298_s5 }
 0x651   :  { %2227 = vrot.lane.b32.xlu1 %v3624_v32, %s3298_s5 }
 0x654   :  { %2086 = vrot.lane.b32.xlu0 %v3618_v18, %s3298_s5 }
 0x658   :  { %2274 = vrot.lane.b32.xlu0 %v3634_v1, %s3298_s5 }
 0x66f   :  { %v1904_v59 = vpop.xlane.xlu0 %1903 }
 0x670   :  { %v1950_v34 = vsub.f32 %v4048_v48, %v1904_v59 }
 0x671   :  { %v1907_v18 = vpop.xlane.xlu1 %1906 }
 0x672   :  { %v1966_v62 = vmul.f32 1.442695, %v1950_v34  ;;  %v1951_v33 = vsub.f32 %v4050_v9, %v1907_v18 }
 0x674   :  { %3228 = vpow2.f32 %v1966_v62  ;;  %v1968_v1 = vmul.f32 1.442695, %v1951_v33 }
 0x675   :  { %1948 = vmax.xlane.f32.xlu1 %v1947_v54 }
 0x676   :  { %3230 = vpow2.f32 %v1968_v1 }
 0x67e   :  { %v4151_v15 = vpop.eup %3228 }
 0x67f   :  { %v1998_v32 = vsel %vm455_vm2, %v4151_v15, 0.0 }
 0x680   :  { %1999 = vadd.xlane.f32.xlu0 %v1998_v32  ;;  %v4158_v48 = vpop.eup %3230 }
 0x681   :  { %v2001_v35 = vsel %vm455_vm2, %v4158_v48, 0.0 }
 0x686   :  { %2321 = vrot.lane.b32.xlu1 %v3632_v46, %s3298_s5 }
 0x6a6   :  { %v1919_v22 = vpop.xlane.xlu1 %1918 }
 0x6a7   :  { %v1955_v52 = vsub.f32 %v4066_v37, %v1919_v22 }
 0x6a9   :  { %v1976_v9 = vmul.f32 1.442695, %v1955_v52 }
 0x6aa   :  { %2002 = vadd.xlane.f32.xlu1 %v2001_v35 }
 0x6af   :  { %v1910_v55 = vpop.xlane.xlu0 %1909 }
 0x6b0   :  { %v1952_v28 = vsub.f32 %v4082_v3, %v1910_v55 }
 0x6b2   :  { %v1970_v38 = vmul.f32 1.442695, %v1952_v28 }
 0x6b3   :  { %v1913_v14 = vpop.xlane.xlu0 %1912 }
 0x6b4   :  { %3232 = vpow2.f32 %v1970_v38  ;;  %v1953_v46 = vsub.f32 %v4084_v4, %v1913_v14 }
 0x6b6   :  { %v1972_v23 = vmul.f32 1.442695, %v1953_v46 }
 0x6b7   :  { %v1916_v50 = vpop.xlane.xlu0 %1915 }
 0x6b8   :  { %3234 = vpow2.f32 %v1972_v23  ;;  %v1954_v57 = vsub.f32 %v4091_v39, %v1916_v50 }
 0x6b9   :  { %v1925_v19 = vpop.xlane.xlu1 %1924  ;;  %3236 = vpow2.f32 %v1976_v9 }
 0x6ba   :  { %v1974_v42 = vmul.f32 1.442695, %v1954_v57  ;;  %v1957_v21 = vsub.f32 %v4103_v12, %v1925_v19 }
 0x6bb   :  { %v1922_v0 = vpop.xlane.xlu0 %1921 }
 0x6bc   :  { %3238 = vpow2.f32 %v1974_v42  ;;  %v1980_v3 = vmul.f32 1.442695, %v1957_v21  ;;  %v1956_v37 = vsub.f32 %v4101_v58, %v1922_v0 }
 0x6bd   :  { %v1931_v5 = vpop.xlane.xlu1 %1930 }
 0x6be   :  { %v4168_v40 = vpop.eup %3232  ;;  %3240 = vpow2.f32 %v1980_v3  ;;  %v1978_v4 = vmul.f32 1.442695, %v1956_v37  ;;  %v1959_v16 = vsub.f32 %v4077_v51, %v1931_v5 }
 0x6bf   :  { %v1928_v24 = vpop.xlane.xlu0 %1927  ;;  %v2004_v39 = vsel %vm455_vm2, %v4168_v40, 0.0 }
 0x6c0   :  { %3242 = vpow2.f32 %v1978_v4  ;;  %v1984_v43 = vmul.f32 1.442695, %v1959_v16  ;;  %v1958_v12 = vsub.f32 %v4072_v44, %v1928_v24  ;;  %2005 = vadd.xlane.f32.xlu0 %v2004_v39 }
 0x6c1   :  { %v1937_v59 = vpop.xlane.xlu1 %1936 }
 0x6c2   :  { %v4174_v34 = vpop.eup %3234  ;;  %3244 = vpow2.f32 %v1984_v43  ;;  %v1982_v58 = vmul.f32 1.442695, %v1958_v12  ;;  %v1961_v62 = vsub.f32 %v4115_v63, %v1937_v59 }
 0x6c3   :  { %v1934_v54 = vpop.xlane.xlu0 %1933  ;;  %v2007_v51 = vsel %vm455_vm2, %v4174_v34, 0.0  ;;  %v4179_v32 = vpop.eup %3236 }
 0x6c4   :  { %3246 = vpow2.f32 %v1982_v58  ;;  %v1988_v18 = vmul.f32 1.442695, %v1961_v62  ;;  %v1960_v33 = vsub.f32 %v4113_v47, %v1934_v54  ;;  %2008 = vadd.xlane.f32.xlu1 %v2007_v51  ;;  %v2013_v63 = vsel %vm455_vm2, %v4179_v32, 0.0 }
 0x6c5   :  { %v1943_v44 = vpop.xlane.xlu1 %1942 }
 0x6c6   :  { %v4182_v1 = vpop.eup %3238  ;;  %3248 = vpow2.f32 %v1988_v18  ;;  %v1986_v35 = vmul.f32 1.442695, %v1960_v33  ;;  %v1963_v22 = vsub.f32 %v4120_v56, %v1943_v44 }
 0x6c7   :  { %v1940_v55 = vpop.xlane.xlu0 %1939  ;;  %v2010_v28 = vsel %vm455_vm2, %v4182_v1, 0.0 }
 0x6c8   :  { %v4189_v52 = vpop.eup %3240  ;;  %3250 = vpow2.f32 %v1986_v35  ;;  %v1992_v38 = vmul.f32 1.442695, %v1963_v22  ;;  %v1962_v47 = vsub.f32 %v4124_v53, %v1940_v55  ;;  %2014 = vadd.xlane.f32.xlu1 %v2013_v63  ;;  %2011 = vadd.xlane.f32.xlu0 %v2010_v28 }
 0x6c9   :  { %v2134_v14 = vpop.permute.xlu1 %2133  ;;  %v2019_v23 = vsel %vm455_vm2, %v4189_v52, 0.0 }
 0x6ca   :  { %v4192_v46 = vpop.eup %3242  ;;  %3252 = vpow2.f32 %v1992_v38  ;;  %v1990_v56 = vmul.f32 1.442695, %v1962_v47  ;;  %3019 = vmatpush3.bf16.msra.mxu1 %v2134_v14 }
 0x6cb   :  { %v1946_v9 = vpop.xlane.xlu0 %1945  ;;  %v2016_v50 = vsel %vm455_vm2, %v4192_v46, 0.0  ;;  %3030 = vmatprep.subr.bf16.mxu1 %v3292_v8 }
 0x6cc   :  { %v4199_v57 = vpop.eup %3244  ;;  %3254 = vpow2.f32 %v1990_v56  ;;  %v1964_v53 = vsub.f32 %v4130_v6, %v1946_v9  ;;  %2020 = vadd.xlane.f32.xlu1 %v2019_v23  ;;  %2017 = vadd.xlane.f32.xlu0 %v2016_v50 }
 0x6cd   :  { %v2025_v0 = vsel %vm455_vm2, %v4199_v57, 0.0  ;;  %v2181_v58 = vpop.permute.xlu1 %2180 }
 0x6ce   :  { %v4202_v19 = vpop.eup %3246  ;;  %v1994_v42 = vmul.f32 1.442695, %v1964_v53 }
 0x6cf   :  { %v2087_v21 = vpop.permute.xlu0 %2086  ;;  %v2022_v3 = vsel %vm455_vm2, %v4202_v19, 0.0 }
 0x6d0   :  { %v4208_v37 = vpop.eup %3248  ;;  %3256 = vpow2.f32 %v1994_v42  ;;  %2026 = vadd.xlane.f32.xlu1 %v2025_v0  ;;  %2023 = vadd.xlane.f32.xlu0 %v2022_v3 }
 0x6d1   :  { %3013 = vmatpush3.bf16.msra.mxu0 %v2087_v21  ;;  %v2031_v6 = vsel %vm455_vm2, %v4208_v37, 0.0  ;;  %v2228_v62 = vpop.permute.xlu1 %2227 }
 0x6d2   :  { %v4210_v5 = vpop.eup %3250  ;;  %3024 = vmatprep.subr.bf16.mxu0 %v3292_v8 }
 0x6d3   :  { %v2028_v4 = vsel %vm455_vm2, %v4210_v5, 0.0  ;;  %v2275_v35 = vpop.permute.xlu0 %2274 }
 0x6d4   :  { %v4217_v16 = vpop.eup %3252  ;;  %2032 = vadd.xlane.f32.xlu1 %v2031_v6  ;;  %2029 = vadd.xlane.f32.xlu0 %v2028_v4 }
 0x6d5   :  { %v2037_v39 = vsel %vm455_vm2, %v4217_v16, 0.0 }
 0x6d6   :  { %v4219_v24 = vpop.eup %3254 }
 0x6d7   :  { %v2034_v43 = vsel %vm455_vm2, %v4219_v24, 0.0 }
 0x6d8   :  { %2038 = vadd.xlane.f32.xlu1 %v2037_v39  ;;  %2035 = vadd.xlane.f32.xlu0 %v2034_v43 }
 0x6da   :  { %v4225_v12 = vpop.eup %3256 }
 0x6db   :  { %v2040_v59 = vsel %vm455_vm2, %v4225_v12, 0.0 }
 0x6dc   :  { %2041 = vadd.xlane.f32.xlu0 %v2040_v59 }
 0x6f2   :  { %2368 = vrot.lane.b32.xlu0 %v3642_v11, %s3298_s5 }
 0x702   :  { %v1949_v54 = vpop.xlane.xlu1 %1948 }
 0x703   :  { %v1965_v51 = vsub.f32 %v4132_v25, %v1949_v54 }
 0x705   :  { %v1996_v18 = vmul.f32 1.442695, %v1965_v51 }
 0x706   :  { %v4238_v22 = vpop.permute.xlu1 %2321 }
 0x707   :  { %3258 = vpow2.f32 %v1996_v18 }
 0x70d   :  { %v2000_v11 = vpop.xlane.xlu0 %1999 }
 0x70e   :  { %3260 = vrcp.f32 %v2000_v11 }
 0x711   :  { %v4232_v33 = vpop.eup %3258 }
 0x712   :  { %v2043_v44 = vsel %vm455_vm2, %v4232_v33, 0.0 }
 0x713   :  { %2044 = vadd.xlane.f32.xlu1 %v2043_v44 }
 0x718   :  { %v3261_v63 = vpop.eup %3260 }
 0x719   :  { %v2062_v28 = vmul.f32 %v3261_v63, %v4151_v15 }
 0x724   :  { %2415 = vrot.lane.b32.xlu1 %v3640_v29, %s3298_s5 }
 0x737   :  { %v2003_v55 = vpop.xlane.xlu1 %2002 }
 0x738   :  { %3262 = vrcp.f32 %v2003_v55 }
 0x742   :  { %v3263_v25 = vpop.eup %3262 }
 0x743   :  { %v2063_v38 = vmul.f32 %v3263_v25, %v4158_v48 }
 0x745   :  { %v2078_v47 = vpack.c.bf16 %v2063_v38, %v2062_v28 }
 0x747   :  { %3015 = vmatmul.mubr.msk.bf16.vlgmr.msra.gmra.mrb[48].mxu0 %vm455_vm2, %v2078_v47 }
 0x748   :  { %3025 = vmatpush3.bf16.msra.mxu0 %v2181_v58  ;;  %3026 = vmatprep.mubr.msk.bf16.mxu0 %vm3293_vm1, %v3292_v8 }
 0x749   :  { %3036 = vmatprep.subr.bf16.mxu0 %v3292_v8 }
 0x74d   :  { %v2006_v29 = vpop.xlane.xlu0 %2005 }
 0x74e   :  { %3264 = vrcp.f32 %v2006_v29 }
 0x751   :  { %v2009_v14 = vpop.xlane.xlu1 %2008 }
 0x752   :  { %3266 = vrcp.f32 %v2009_v14 }
 0x755   :  { %v2015_v56 = vpop.xlane.xlu1 %2014  ;;  %v2012_v9 = vpop.xlane.xlu0 %2011 }
 0x756   :  { %3268 = vrcp.f32 %v2015_v56 }
 0x757   :  { %3270 = vrcp.f32 %v2012_v9 }
 0x758   :  { %v3265_v48 = vpop.eup %3264 }
 0x759   :  { %v2021_v15 = vpop.xlane.xlu1 %2020  ;;  %v2018_v23 = vpop.xlane.xlu0 %2017  ;;  %v2064_v53 = vmul.f32 %v3265_v48, %v4168_v40  ;;  %v2543_v48 = vld [vmem:[%s4414_s6 + $0x8] sm:$0xff] }
 0x75a   :  { %3272 = vrcp.f32 %v2021_v15 }
 0x75b   :  { %3274 = vrcp.f32 %v2018_v23 }
 0x75c   :  { %v3267_v50 = vpop.eup %3266 }
 0x75d   :  { %v2065_v42 = vmul.f32 %v3267_v50, %v4174_v34  ;;  %v2027_v21 = vpop.xlane.xlu1 %2026  ;;  %v2024_v0 = vpop.xlane.xlu0 %2023 }
 0x75e   :  { %3276 = vrcp.f32 %v2027_v21 }
 0x75f   :  { %3278 = vrcp.f32 %v2024_v0  ;;  %v2079_v3 = vpack.c.bf16 %v2065_v42, %v2064_v53 }
 0x760   :  { %v3269_v6 = vpop.eup %3268 }
 0x761   :  { %v3271_v4 = vpop.eup %3270  ;;  %v2067_v39 = vmul.f32 %v3269_v6, %v4179_v32  ;;  %v2033_v43 = vpop.xlane.xlu1 %2032  ;;  %3021 = vmatmul.mubr.msk.bf16.vlgmr.msra.gmra.mrb[64].mxu1 %vm455_vm2, %v2079_v3  ;;  %v2545_v3 = vld [vmem:[%s4414_s6 + $0x18] sm:$0xff] }
 0x762   :  { %v2030_v59 = vpop.xlane.xlu0 %2029  ;;  %v2066_v58 = vmul.f32 %v3271_v4, %v4182_v1  ;;  %3280 = vrcp.f32 %v2033_v43  ;;  %3031 = vmatpush3.bf16.msra.mxu1 %v2228_v62  ;;  %3032 = vmatprep.mubr.msk.bf16.mxu1 %vm3293_vm1, %v3292_v8 }
 0x763   :  { %3282 = vrcp.f32 %v2030_v59  ;;  %3042 = vmatprep.subr.bf16.mxu1 %v3292_v8 }
 0x764   :  { %v3273_v40 = vpop.eup %3272  ;;  %v2080_v34 = vpack.c.bf16 %v2067_v39, %v2066_v58 }
 0x765   :  { %v3275_v54 = vpop.eup %3274  ;;  %v2069_v51 = vmul.f32 %v3273_v40, %v4189_v52  ;;  %v2039_v32 = vpop.xlane.xlu1 %2038 }
 0x766   :  { %v2036_v18 = vpop.xlane.xlu0 %2035  ;;  %v2068_v44 = vmul.f32 %v3275_v54, %v4192_v46  ;;  %3284 = vrcp.f32 %v2039_v32  ;;  %3027 = vmatmul.mubr.msk.bf16.vlgmr.msra.gmra.mrb[52].mxu0 %vm455_vm2, %v2080_v34 }
 0x767   :  { %3037 = vmatpush3.bf16.msra.mxu0 %v2275_v35  ;;  %3286 = vrcp.f32 %v2036_v18  ;;  %3038 = vmatprep.mubr.msk.bf16.mxu0 %vm3293_vm1, %v3292_v8 }
 0x768   :  { %v3277_v1 = vpop.eup %3276  ;;  %v2081_v62 = vpack.c.bf16 %v2069_v51, %v2068_v44  ;;  %3048 = vmatprep.subr.bf16.mxu0 %v3292_v8 }
 0x769   :  { %v3279_v11 = vpop.eup %3278  ;;  %v2071_v55 = vmul.f32 %v3277_v1, %v4199_v57 }
 0x76a   :  { %v2042_v52 = vpop.xlane.xlu0 %2041  ;;  %v2070_v63 = vmul.f32 %v3279_v11, %v4202_v19  ;;  %3033 = vmatmul.mubr.msk.bf16.vlgmr.msra.gmra.mrb[68].mxu1 %vm455_vm2, %v2081_v62 }
 0x76b   :  { %3043 = vmatpush3.bf16.msra.mxu1 %v4238_v22  ;;  %3044 = vmatprep.mubr.msk.bf16.mxu1 %vm3293_vm1, %v3292_v8  ;;  %3288 = vrcp.f32 %v2042_v52 }
 0x76c   :  { %v3281_v46 = vpop.eup %3280  ;;  %v2082_v35 = vpack.c.bf16 %v2071_v55, %v2070_v63  ;;  %3054 = vmatprep.subr.bf16.mxu1 %v3292_v8 }
 0x76d   :  { %v3283_v25 = vpop.eup %3282  ;;  %v2073_v28 = vmul.f32 %v3281_v46, %v4208_v37 }
 0x76e   :  { %v2369_v38 = vpop.permute.xlu0 %2368  ;;  %v2072_v57 = vmul.f32 %v3283_v25, %v4210_v5  ;;  %3039 = vmatmul.mubr.msk.bf16.vlgmr.msra.gmra.mrb[56].mxu0 %vm455_vm2, %v2082_v35 }
 0x76f   :  { %3049 = vmatpush3.bf16.msra.mxu0 %v2369_v38  ;;  %3050 = vmatprep.mubr.msk.bf16.mxu0 %vm3293_vm1, %v3292_v8 }
 0x770   :  { %v3285_v19 = vpop.eup %3284  ;;  %v2083_v22 = vpack.c.bf16 %v2073_v28, %v2072_v57 }
 0x771   :  { %v3287_v47 = vpop.eup %3286  ;;  %v2075_v29 = vmul.f32 %v3285_v19, %v4217_v16 }
 0x772   :  { %v2074_v14 = vmul.f32 %v3287_v47, %v4219_v24  ;;  %3045 = vmatmul.mubr.msk.bf16.vlgmr.msra.gmra.mrb[72].mxu1 %vm455_vm2, %v2083_v22 }
 0x773   :  { %3056 = vmatprep.mubr.msk.bf16.mxu1 %vm3293_vm1, %v3292_v8  ;;  %v2542_v8 = vld [vmem:[%s4414_s6] sm:$0xff] }
 0x774   :  { %v2084_v37 = vpack.c.bf16 %v2075_v29, %v2074_v14  ;;  %v2554_v50 = vpack.c.bf16 %v2543_v48, %v2542_v8 }
 0x775   :  { %v3289_v9 = vpop.eup %3288 }
 0x776   :  { %3051 = vmatmul.mubr.msk.bf16.vlgmr.msra.gmra.mrb[60].mxu0 %vm455_vm2, %v2084_v37  ;;  %v2076_v23 = vmul.f32 %v3289_v9, %v4225_v12  ;;  %3060 = vmatprep.subr.bf16.mxu0 %v2554_v50 }
 0x777   :  { %3061 = vmatpush3.bf16.msra.mxu0 %v2554_v50 }
 0x7a0   :  { %v2045_v5 = vpop.xlane.xlu1 %2044 }
 0x7a1   :  { %3290 = vrcp.f32 %v2045_v5 }
 0x7a4   :  { %v2416_v56 = vpop.permute.xlu1 %2415 }
 0x7a5   :  { %3055 = vmatpush3.bf16.msra.mxu1 %v2416_v56 }
 0x7ab   :  { %v3291_v15 = vpop.eup %3290 }
 0x7ac   :  { %v2077_v16 = vmul.f32 %v3291_v15, %v4232_v33  ;;  %v2544_v33 = vld [vmem:[%s4414_s6 + $0x10] sm:$0xff] }
 0x7ad   :  { %v2555_v6 = vpack.c.bf16 %v2545_v3, %v2544_v33 }
 0x7ae   :  { %v2085_v24 = vpack.c.bf16 %v2077_v16, %v2076_v23 }
 0x7af   :  { %3062 = vmatprep.subr.bf16.mxu0 %v2555_v6 }
 0x7b0   :  { %3057 = vmatmul.mubr.msk.bf16.vlgmr.msra.gmra.mrb[76].mxu1 %vm455_vm2, %v2085_v24  ;;  %3063 = vmatpush3.bf16.msra.mxu0 %v2555_v6 }
 0x81a   :  { %v2126_v53 = vpop.f32.mrb[48].mxu0 }
 0x81b   :  { %v3016_v42 = vpop.f32.mrb[49].mxu0 }
 0x81c   :  { %v2129_v21 = vpop.f32.mrb[50].mxu0 }
 0x81d   :  { %v3092_v12 = vpack.i.bf16 %v2129_v21, %v2126_v53  ;;  %v3017_v0 = vpop.f32.mrb[51].mxu0 }
 0x81f   :  { %3093 = vrot.lane.b32.xlu0 %v3092_v12, %s3299_s0 }
 0x834   :  { %v2173_v4 = vpop.f32.mrb[64].mxu1 }
 0x835   :  { %v3022_v39 = vpop.f32.mrb[65].mxu1 }
 0x836   :  { %v2176_v43 = vpop.f32.mrb[66].mxu1 }
 0x837   :  { %v3097_v59 = vpack.i.bf16 %v2176_v43, %v2173_v4  ;;  %v3023_v58 = vpop.f32.mrb[67].mxu1 }
 0x839   :  { %v2220_v40 = vpop.f32.mrb[52].mxu0  ;;  %3098 = vrot.lane.b32.xlu1 %v3097_v59, %s3299_s0 }
 0x83a   :  { %v3028_v34 = vpop.f32.mrb[53].mxu0 }
 0x83b   :  { %v2223_v54 = vpop.f32.mrb[54].mxu0 }
 0x83c   :  { %v3102_v51 = vpack.i.bf16 %v2223_v54, %v2220_v40  ;;  %v3029_v32 = vpop.f32.mrb[55].mxu0 }
 0x83d   :  { %v2267_v18 = vpop.f32.mrb[68].mxu1 }
 0x83e   :  { %3103 = vrot.lane.b32.xlu0 %v3102_v51, %s3299_s0  ;;  %v3034_v44 = vpop.f32.mrb[69].mxu1 }
 0x83f   :  { %v2270_v1 = vpop.f32.mrb[70].mxu1 }
 0x840   :  { %v3107_v62 = vpack.i.bf16 %v2270_v1, %v2267_v18  ;;  %v3035_v11 = vpop.f32.mrb[71].mxu1 }
 0x841   :  { %v2314_v55 = vpop.f32.mrb[56].mxu0 }
 0x842   :  { %3108 = vrot.lane.b32.xlu1 %v3107_v62, %s3299_s0  ;;  %v3040_v52 = vpop.f32.mrb[57].mxu0 }
 0x843   :  { %v2317_v63 = vpop.f32.mrb[58].mxu0 }
 0x844   :  { %v3112_v46 = vpack.i.bf16 %v2317_v63, %v2314_v55  ;;  %v3041_v35 = vpop.f32.mrb[59].mxu0 }
 0x845   :  { %v2361_v25 = vpop.f32.mrb[72].mxu1 }
 0x846   :  { %3113 = vrot.lane.b32.xlu0 %v3112_v46, %s3299_s0  ;;  %v3046_v28 = vpop.f32.mrb[73].mxu1 }
 0x847   :  { %v2364_v38 = vpop.f32.mrb[74].mxu1 }
 0x848   :  { %v3117_v57 = vpack.i.bf16 %v2364_v38, %v2361_v25  ;;  %v3047_v19 = vpop.f32.mrb[75].mxu1 }
 0x849   :  { %v2408_v22 = vpop.f32.mrb[60].mxu0 }
 0x84a   :  { %3118 = vrot.lane.b32.xlu1 %v3117_v57, %s3299_s0  ;;  %v3052_v47 = vpop.f32.mrb[61].mxu0 }
 0x84b   :  { %v2411_v29 = vpop.f32.mrb[62].mxu0 }
 0x84c   :  { %v3122_v14 = vpack.i.bf16 %v2411_v29, %v2408_v22  ;;  %v3053_v37 = vpop.f32.mrb[63].mxu0 }
 0x84e   :  { %3123 = vrot.lane.b32.xlu0 %v3122_v14, %s3299_s0 }
 0x883   :  { %v2455_v5 = vpop.f32.mrb[76].mxu1 }
 0x884   :  { %v3058_v56 = vpop.f32.mrb[77].mxu1 }
 0x885   :  { %v2458_v9 = vpop.f32.mrb[78].mxu1 }
 0x886   :  { %v3127_v15 = vpack.i.bf16 %v2458_v9, %v2455_v5  ;;  %v3059_v23 = vpop.f32.mrb[79].mxu1 }
 0x888   :  { %3128 = vrot.lane.b32.xlu1 %v3127_v15, %s3299_s0 }
 0x891   :  { %v3094_v16 = vpop.permute.xlu0 %3093 }
 0x892   :  { %v3096_v24 = vunpack.i.h.bf16 %v3094_v16  ;;  %v3095_v8 = vunpack.i.l.bf16 %v3094_v16 }
 0x894   :  { %v2527_v48 = vsel %vm455_vm2, %v4018_v45, %v3096_v24  ;;  %v2526_v50 = vsel %vm455_vm2, %v4016_v7, %v3095_v8 }
 0x895   :  { %v2546_v53 = vpack.c.bf16 %v2527_v48, %v2526_v50 }
 0x897   :  { %3064 = vmatprep.mubr.msk.bf16.mxu0 %vm48_vm0, %v2546_v53 }
 0x8ab   :  { %v3099_v42 = vpop.permute.xlu1 %3098 }
 0x8ac   :  { %v3101_v21 = vunpack.i.h.bf16 %v3099_v42  ;;  %v3100_v12 = vunpack.i.l.bf16 %v3099_v42 }
 0x8ae   :  { %v2529_v0 = vsel %vm455_vm2, %v4022_v61, %v3101_v21  ;;  %v2528_v33 = vsel %vm455_vm2, %v4020_v20, %v3100_v12 }
 0x8af   :  { %v2547_v3 = vpack.c.bf16 %v2529_v0, %v2528_v33 }
 0x8b0   :  { %v3104_v6 = vpop.permute.xlu0 %3103 }
 0x8b1   :  { %v3106_v4 = vunpack.i.h.bf16 %v3104_v6  ;;  %v3105_v39 = vunpack.i.l.bf16 %v3104_v6  ;;  %3065 = vmatmul.mubr.msk.bf16.vlgmr.msra.gmra.mrb[64].mxu0 %vm48_vm0, %v2547_v3 }
 0x8b3   :  { %v2531_v7 = vsel %vm455_vm2, %v4026_v2, %v3106_v4  ;;  %v2530_v45 = vsel %vm455_vm2, %v4024_v13, %v3105_v39 }
 0x8b4   :  { %v2548_v43 = vpack.c.bf16 %v2531_v7, %v2530_v45  ;;  %v3109_v59 = vpop.permute.xlu1 %3108 }
 0x8b5   :  { %v3111_v58 = vunpack.i.h.bf16 %v3109_v59  ;;  %v3110_v40 = vunpack.i.l.bf16 %v3109_v59 }
 0x8b6   :  { %3068 = vmatprep.mubr.msk.bf16.mxu0 %vm48_vm0, %v2548_v43 }
 0x8b7   :  { %v2533_v20 = vsel %vm455_vm2, %v4030_v26, %v3111_v58  ;;  %v2532_v61 = vsel %vm455_vm2, %v4028_v10, %v3110_v40 }
 0x8b8   :  { %v2549_v34 = vpack.c.bf16 %v2533_v20, %v2532_v61  ;;  %v3114_v54 = vpop.permute.xlu0 %3113 }
 0x8b9   :  { %v3116_v51 = vunpack.i.h.bf16 %v3114_v54  ;;  %v3115_v32 = vunpack.i.l.bf16 %v3114_v54 }
 0x8ba   :  { %3069 = vmatmul.mubr.msk.bf16.gmra.mrb[68].mxu0 %vm48_vm0, %v2549_v34 }
 0x8bb   :  { %v2535_v13 = vsel %vm455_vm2, %v4034_v27, %v3116_v51  ;;  %v2534_v2 = vsel %vm455_vm2, %v4032_v31, %v3115_v32 }
 0x8bc   :  { %v2550_v18 = vpack.c.bf16 %v2535_v13, %v2534_v2  ;;  %v3119_v44 = vpop.permute.xlu1 %3118 }
 0x8bd   :  { %v3121_v1 = vunpack.i.h.bf16 %v3119_v44  ;;  %v3120_v62 = vunpack.i.l.bf16 %v3119_v44 }
 0x8be   :  { %3072 = vmatprep.mubr.msk.bf16.mxu0 %vm48_vm0, %v2550_v18 }
 0x8bf   :  { %v2537_v10 = vsel %vm455_vm2, %v4052_v17, %v3121_v1  ;;  %v2536_v26 = vsel %vm455_vm2, %v4046_v49, %v3120_v62 }
 0x8c0   :  { %v2551_v11 = vpack.c.bf16 %v2537_v10, %v2536_v26  ;;  %v3124_v55 = vpop.permute.xlu0 %3123 }
 0x8c1   :  { %v3126_v52 = vunpack.i.h.bf16 %v3124_v55  ;;  %v3125_v63 = vunpack.i.l.bf16 %v3124_v55 }
 0x8c2   :  { %3073 = vmatmul.mubr.msk.bf16.gmra.mrb[72].mxu0 %vm48_vm0, %v2551_v11 }
 0x8c3   :  { %v2539_v31 = vsel %vm455_vm2, %v4038_v60, %v3126_v52  ;;  %v2538_v27 = vsel %vm455_vm2, %v4036_v36, %v3125_v63  ;;  %v2755_v60 = vld [vmem:[%s4415_s7] ss:$0 sm:$0xff] }
 0x8c4   :  { %v2552_v46 = vpack.c.bf16 %v2539_v31, %v2538_v27 }
 0x8c6   :  { %3076 = vmatprep.mubr.msk.bf16.mxu0 %vm48_vm0, %v2552_v46 }
 0x8fa   :  { %v3129_v35 = vpop.permute.xlu1 %3128 }
 0x8fb   :  { %v3131_v17 = vunpack.i.h.bf16 %v3129_v35  ;;  %v3130_v25 = vunpack.i.l.bf16 %v3129_v35 }
 0x8fd   :  { %v2541_v49 = vsel %vm455_vm2, %v4068_v41, %v3131_v17  ;;  %v2540_v28 = vsel %vm455_vm2, %v4063_v30, %v3130_v25 }
 0x8fe   :  { %v2553_v38 = vpack.c.bf16 %v2541_v49, %v2540_v28 }
 0x900   :  { %3077 = vmatmul.mubr.msk.bf16.gmra.mrb[76].mxu0 %vm48_vm0, %v2553_v38 }
 0x984   :  { %v3066_v36 = vpop.f32.mrb[64].mxu0 }
 0x985   :  { %v2630_v57 = vadd.f32 %v3066_v36, %v2755_v60  ;;  %v2621_v19 = vpop.f32.mrb[65].mxu0 }
 0x986   :  { %v2622_v22 = vadd.f32 %v2755_v60, %v2621_v19  ;;  %v3067_v47 = vpop.f32.mrb[66].mxu0 }
 0x987   :  { %2686 = vst.msk [vmem:[%s4416_s8 + $0x10] sm:$0xff] %vm48_vm0, %v2630_v57  ;;  %v2633_v41 = vadd.f32 %v3067_v47, %v2755_v60  ;;  %v2624_v29 = vpop.f32.mrb[67].mxu0 }
 0x988   :  { %2684 = vst.msk [vmem:[%s4416_s8] sm:$0xff] %vm48_vm0, %v2622_v22  ;;  %v2625_v30 = vadd.f32 %v2755_v60, %v2624_v29 }
 0x989   :  { %2687 = vst.msk [vmem:[%s4416_s8 + $0x18] sm:$0xff] %vm48_vm0, %v2633_v41 }
 0x98a   :  { %2685 = vst.msk [vmem:[%s4416_s8 + $0x8] sm:$0xff] %vm48_vm0, %v2625_v30 }
 0x98d   :  { %v3070_v14 = vpop.f32.mrb[68].mxu0 }
 0x98e   :  { %v2646_v37 = vadd.f32 %v3070_v14, %v2755_v60  ;;  %v2637_v5 = vpop.f32.mrb[69].mxu0 }
 0x98f   :  { %v2638_v56 = vadd.f32 %v2755_v60, %v2637_v5  ;;  %v3071_v9 = vpop.f32.mrb[70].mxu0 }
 0x990   :  { %2690 = vst.msk [vmem:[%s4416_s8 + $0x30] sm:$0xff] %vm48_vm0, %v2646_v37  ;;  %v2649_v15 = vadd.f32 %v3071_v9, %v2755_v60  ;;  %v2640_v23 = vpop.f32.mrb[71].mxu0 }
 0x991   :  { %2688 = vst.msk [vmem:[%s4416_s8 + $0x20] sm:$0xff] %vm48_vm0, %v2638_v56  ;;  %v2641_v16 = vadd.f32 %v2755_v60, %v2640_v23 }
 0x992   :  { %2691 = vst.msk [vmem:[%s4416_s8 + $0x38] sm:$0xff] %vm48_vm0, %v2649_v15 }
 0x993   :  { %2689 = vst.msk [vmem:[%s4416_s8 + $0x28] sm:$0xff] %vm48_vm0, %v2641_v16 }
 0x995   :  { %v3074_v24 = vpop.f32.mrb[72].mxu0 }
 0x996   :  { %v2662_v8 = vadd.f32 %v3074_v24, %v2755_v60  ;;  %v2653_v48 = vpop.f32.mrb[73].mxu0 }
 0x997   :  { %v2654_v50 = vadd.f32 %v2755_v60, %v2653_v48  ;;  %v3075_v53 = vpop.f32.mrb[74].mxu0 }
 0x998   :  { %2694 = vst.msk [vmem:[%s4416_s8 + $0x50] sm:$0xff] %vm48_vm0, %v2662_v8  ;;  %v2665_v42 = vadd.f32 %v3075_v53, %v2755_v60  ;;  %v2656_v21 = vpop.f32.mrb[75].mxu0 }
 0x999   :  { %2692 = vst.msk [vmem:[%s4416_s8 + $0x40] sm:$0xff] %vm48_vm0, %v2654_v50  ;;  %v2657_v12 = vadd.f32 %v2755_v60, %v2656_v21 }
 0x99a   :  { %2695 = vst.msk [vmem:[%s4416_s8 + $0x58] sm:$0xff] %vm48_vm0, %v2665_v42 }
 0x99b   :  { %2693 = vst.msk [vmem:[%s4416_s8 + $0x48] sm:$0xff] %vm48_vm0, %v2657_v12 }
 0x9d3   :  { %v3078_v0 = vpop.f32.mrb[76].mxu0 }
 0x9d4   :  { %v2678_v33 = vadd.f32 %v3078_v0, %v2755_v60  ;;  %v2669_v3 = vpop.f32.mrb[77].mxu0 }
 0x9d5   :  { %v2670_v6 = vadd.f32 %v2755_v60, %v2669_v3  ;;  %v3079_v4 = vpop.f32.mrb[78].mxu0 }
 0x9d6   :  { %2698 = vst.msk [vmem:[%s4416_s8 + $0x70] sm:$0xff] %vm48_vm0, %v2678_v33  ;;  %v2681_v39 = vadd.f32 %v3079_v4, %v2755_v60  ;;  %v2672_v7 = vpop.f32.mrb[79].mxu0 }
 0x9d7   :  { %2696 = vst.msk [vmem:[%s4416_s8 + $0x60] sm:$0xff] %vm48_vm0, %v2670_v6  ;;  %v2673_v45 = vadd.f32 %v2755_v60, %v2672_v7 }
 0x9d8   :  { %2699 = vst.msk [vmem:[%s4416_s8 + $0x78] sm:$0xff] %vm48_vm0, %v2681_v39 }
 0x9d9   :  { %2697 = vst.msk [vmem:[%s4416_s8 + $0x68] sm:$0xff] %vm48_vm0, %v2673_v45 }

// kernel: swin_for_iqa_forward.16
= control target key start
LH: loop header
LB: loop body
LE: loop exit
PB: predicated region body
PF: predicated region fallthrough
CT: control target
= control target key end

     0   :  { %vm164_vm0 = vcmask 523264   ;;  %s336_s0 = inlined_call_operand.vmem [shape: f32[32,128], index: 0, kind: input, shape index: {}]   ;;  %s337_s3 = inlined_call_operand.vmem [shape: f32[128,64], index: 3, kind: input, shape index: {}]   ;;  %s338_s1 = inlined_call_operand.vmem [shape: f32[1,128], index: 1, kind: input, shape index: {}]   ;;  %s339_s2 = inlined_call_operand.vmem [shape: f32[1,128], index: 2, kind: input, shape index: {}]   ;;  %s340_s4 = inlined_call_operand.vmem [shape: f32[32,64], index: 4, kind: output, shape index: {}]  }
   0x1   :  { %v18_v0 = vld [vmem:[%s336_s0] sm:$0xff]  ;;  %v20_v1 = vld [vmem:[%s336_s0 + $0x10] sm:$0xff]  ;;  %v19_v2 = vld [vmem:[%s336_s0 + $0x8] sm:$0xff] }
   0x2   :  { %24 = vadd.xlane.f32.xlu0 %v18_v0  ;;  %28 = vadd.xlane.f32.xlu1 %v20_v1  ;;  %v21_v3 = vld [vmem:[%s336_s0 + $0x18] sm:$0xff]  ;;  %v89_v4 = vld [vmem:[%s337_s3] sm:$0xff]  ;;  %v90_v5 = vld [vmem:[%s337_s3 + $0x8] sm:$0xff] }
   0x3   :  { %v107_v6 = vpack.c.bf16 %v90_v5, %v89_v4  ;;  %v91_v23 = vld [vmem:[%s337_s3 + $0x10] sm:$0xff]  ;;  %v92_v24 = vld [vmem:[%s337_s3 + $0x18] sm:$0xff]  ;;  %v93_v26 = vld [vmem:[%s337_s3 + $0x20] sm:$0xff] }
   0x4   :  { %v108_v25 = vpack.c.bf16 %v92_v24, %v91_v23  ;;  %v94_v27 = vld [vmem:[%s337_s3 + $0x28] sm:$0xff]  ;;  %v95_v29 = vld [vmem:[%s337_s3 + $0x30] sm:$0xff]  ;;  %v96_v30 = vld [vmem:[%s337_s3 + $0x38] sm:$0xff] }
   0x5   :  { %185 = vmatprep.subr.bf16.mxu0 %v107_v6  ;;  %v109_v28 = vpack.c.bf16 %v94_v27, %v93_v26  ;;  %v110_v31 = vpack.c.bf16 %v96_v30, %v95_v29  ;;  %v97_v32 = vld [vmem:[%s337_s3 + $0x40] sm:$0xff]  ;;  %v98_v33 = vld [vmem:[%s337_s3 + $0x48] sm:$0xff]  ;;  %v99_v34 = vld [vmem:[%s337_s3 + $0x50] sm:$0xff] }
   0x6   :  { %26 = vadd.xlane.f32.xlu0 %v19_v2  ;;  %30 = vadd.xlane.f32.xlu1 %v21_v3  ;;  %v111_v35 = vpack.c.bf16 %v98_v33, %v97_v32  ;;  %v100_v36 = vld [vmem:[%s337_s3 + $0x58] sm:$0xff]  ;;  %v101_v38 = vld [vmem:[%s337_s3 + $0x60] sm:$0xff]  ;;  %v102_v39 = vld [vmem:[%s337_s3 + $0x68] sm:$0xff] }
   0x7   :  { %186 = vmatpush3.bf16.msra.mxu0 %v107_v6  ;;  %v112_v37 = vpack.c.bf16 %v100_v36, %v99_v34  ;;  %v113_v40 = vpack.c.bf16 %v102_v39, %v101_v38  ;;  %v103_v41 = vld [vmem:[%s337_s3 + $0x70] sm:$0xff]  ;;  %v104_v42 = vld [vmem:[%s337_s3 + $0x78] sm:$0xff]  ;;  %v173_v58 = vld [vmem:[%s338_s1] ss:$0 sm:$0xff] }
   0x8   :  { %187 = vmatprep.subr.bf16.mxu0 %v108_v25  ;;  %v114_v43 = vpack.c.bf16 %v104_v42, %v103_v41  ;;  %v174_v63 = vld [vmem:[%s339_s2] ss:$0 sm:$0xff] }
   0xb   :  { %188 = vmatpush3.bf16.msra.mxu0 %v108_v25 }
   0xc   :  { %189 = vmatprep.subr.bf16.mxu0 %v109_v28 }
   0xf   :  { %190 = vmatpush3.bf16.msra.mxu0 %v109_v28 }
  0x10   :  { %191 = vmatprep.subr.bf16.mxu0 %v110_v31 }
  0x13   :  { %192 = vmatpush3.bf16.msra.mxu0 %v110_v31 }
  0x14   :  { %193 = vmatprep.subr.bf16.mxu0 %v111_v35 }
  0x17   :  { %194 = vmatpush3.bf16.msra.mxu0 %v111_v35 }
  0x18   :  { %195 = vmatprep.subr.bf16.mxu0 %v112_v37 }
  0x1b   :  { %196 = vmatpush3.bf16.msra.mxu0 %v112_v37 }
  0x1c   :  { %197 = vmatprep.subr.bf16.mxu0 %v113_v40 }
  0x1f   :  { %198 = vmatpush3.bf16.msra.mxu0 %v113_v40 }
  0x20   :  { %199 = vmatprep.subr.bf16.mxu0 %v114_v43 }
  0x23   :  { %200 = vmatpush3.bf16.msra.mxu0 %v114_v43 }
  0x8f   :  { %v25_v7 = vpop.xlane.xlu0 %24  ;;  %v29_v8 = vpop.xlane.xlu1 %28 }
  0x90   :  { %v33_v9 = vmul.f32 0.0078125, %v25_v7  ;;  %v35_v10 = vmul.f32 0.0078125, %v29_v8 }
  0x92   :  { %v256_v11 = vsub.f32 %v18_v0, %v33_v9  ;;  %v258_v12 = vsub.f32 %v20_v1, %v35_v10 }
  0x93   :  { %v27_v13 = vpop.xlane.xlu0 %26  ;;  %v31_v14 = vpop.xlane.xlu1 %30 }
  0x94   :  { %v34_v15 = vmul.f32 0.0078125, %v27_v13  ;;  %v41_v16 = vmul.f32 %v256_v11, %v256_v11  ;;  %v36_v17 = vmul.f32 0.0078125, %v31_v14  ;;  %v43_v20 = vmul.f32 %v258_v12, %v258_v12 }
  0x96   :  { %v262_v18 = vsub.f32 %v19_v2, %v34_v15  ;;  %45 = vadd.xlane.f32.xlu0 %v41_v16  ;;  %v264_v19 = vsub.f32 %v21_v3, %v36_v17 }
  0x98   :  { %v42_v21 = vmul.f32 %v262_v18, %v262_v18  ;;  %v44_v22 = vmul.f32 %v264_v19, %v264_v19 }
  0x9a   :  { %49 = vadd.xlane.f32.xlu0 %v43_v20  ;;  %47 = vadd.xlane.f32.xlu1 %v42_v21 }
  0x9e   :  { %51 = vadd.xlane.f32.xlu1 %v44_v22 }
 0x123   :  { %v46_v44 = vpop.xlane.xlu0 %45 }
 0x124   :  { %v53_v45 = vmul.f32 0.0078125, %v46_v44 }
 0x126   :  { %v57_v46 = vadd.f32 1e-05, %v53_v45 }
 0x127   :  { %v48_v47 = vpop.xlane.xlu1 %47  ;;  %v50_v48 = vpop.xlane.xlu0 %49 }
 0x128   :  { %205 = vrsqrt.f32 %v57_v46  ;;  %v54_v49 = vmul.f32 0.0078125, %v48_v47  ;;  %v55_v50 = vmul.f32 0.0078125, %v50_v48 }
 0x12a   :  { %v58_v51 = vadd.f32 1e-05, %v54_v49  ;;  %v59_v52 = vadd.f32 1e-05, %v55_v50 }
 0x12b   :  { %v52_v53 = vpop.xlane.xlu1 %51 }
 0x12c   :  { %207 = vrsqrt.f32 %v58_v51  ;;  %v56_v54 = vmul.f32 0.0078125, %v52_v53 }
 0x12d   :  { %209 = vrsqrt.f32 %v59_v52 }
 0x12e   :  { %v60_v55 = vadd.f32 1e-05, %v56_v54 }
 0x130   :  { %211 = vrsqrt.f32 %v60_v55 }
 0x132   :  { %v206_v56 = vpop.eup %205 }
 0x133   :  { %v65_v57 = vmul.f32 %v206_v56, %v256_v11 }
 0x135   :  { %v75_v62 = vmul.f32 %v173_v58, %v65_v57 }
 0x136   :  { %v208_v59 = vpop.eup %207 }
 0x137   :  { %v210_v60 = vpop.eup %209  ;;  %v66_v61 = vmul.f32 %v208_v59, %v262_v18  ;;  %v85_v3 = vadd.f32 %v174_v63, %v75_v62 }
 0x138   :  { %v67_v0 = vmul.f32 %v210_v60, %v258_v12 }
 0x139   :  { %v76_v1 = vmul.f32 %v173_v58, %v66_v61 }
 0x13a   :  { %v212_v2 = vpop.eup %211  ;;  %v77_v6 = vmul.f32 %v173_v58, %v67_v0 }
 0x13b   :  { %v86_v4 = vadd.f32 %v174_v63, %v76_v1  ;;  %v68_v5 = vmul.f32 %v212_v2, %v264_v19 }
 0x13c   :  { %v87_v9 = vadd.f32 %v174_v63, %v77_v6 }
 0x13d   :  { %v105_v7 = vpack.c.bf16 %v86_v4, %v85_v3  ;;  %v78_v8 = vmul.f32 %v173_v58, %v68_v5 }
 0x13f   :  { %201 = vmatprep.mubr.bf16.mxu0 %v105_v7  ;;  %v88_v10 = vadd.f32 %v174_v63, %v78_v8 }
 0x141   :  { %v106_v11 = vpack.c.bf16 %v88_v10, %v87_v9 }
 0x143   :  { %202 = vmatmul.mubr.bf16.vlgmr.msra.gmra.mrb[0].mxu0 %v106_v11 }
 0x216   :  { %v203_v13 = vpop.f32.mrb[0].mxu0 }
 0x217   :  { %167 = vst.msk [vmem:[%s340_s4 + $0x10] sm:$0xff] %vm164_vm0, %v203_v13  ;;  %v149_v12 = vpop.f32.mrb[1].mxu0 }
 0x218   :  { %165 = vst.msk [vmem:[%s340_s4] sm:$0xff] %vm164_vm0, %v149_v12  ;;  %v204_v14 = vpop.f32.mrb[2].mxu0 }
 0x219   :  { %168 = vst.msk [vmem:[%s340_s4 + $0x18] sm:$0xff] %vm164_vm0, %v204_v14  ;;  %v152_v15 = vpop.f32.mrb[3].mxu0 }
 0x21a   :  { %166 = vst.msk [vmem:[%s340_s4 + $0x8] sm:$0xff] %vm164_vm0, %v152_v15 }

// kernel: swin_for_iqa_forward.21
= control target key start
LH: loop header
LB: loop body
LE: loop exit
PB: predicated region body
PF: predicated region fallthrough
CT: control target
= control target key end

     0   :  { %vm41_vm0 = vcmask 523264   ;;  %v660_v31 = vmov 0   ;;  %vm212_vm1 = vcmask 1041409   ;;  %vm662_vm2 = vmmov 0   ;;  %s1124_s0 = inlined_call_operand.vmem [shape: f32[2,16,64], index: 0, kind: input, shape index: {}]   ;;  %s1125_s3 = inlined_call_operand.vmem [shape: f32[64,512], index: 3, kind: input, shape index: {}]   ;;  %s1126_s5 = inlined_call_operand.vmem [shape: f32[512,128], index: 5, kind: input, shape index: {}]   ;;  %s1127_s1 = inlined_call_operand.vmem [shape: f32[1,1,64], index: 1, kind: input, shape index: {}]   ;;  %s1128_s2 = inlined_call_operand.vmem [shape: f32[1,1,64], index: 2, kind: input, shape index: {}]   ;;  %s1129_s4 = inlined_call_operand.vmem [shape: f32[1,512], index: 4, kind: input, shape index: {}]   ;;  %s1130_s7 = inlined_call_operand.vmem [shape: f32[128,1], index: 7, kind: input, shape index: {}]   ;;  %s1131_s8 = inlined_call_operand.<no memory space> [shape: f32[1,1], index: 8, kind: input, shape index: {}]   ;;  %s1132_s6 = inlined_call_operand.vmem [shape: f32[1,128], index: 6, kind: input, shape index: {}]   ;;  %s1133_s9 = inlined_call_operand.vmem [shape: f32[2,1], index: 9, kind: output, shape index: {}]  }
   0x1   :  { %v35_v0 = vld [vmem:[%s1124_s0] sm:$0xff]  ;;  %v37_v1 = vld [vmem:[%s1124_s0 + $0x10] sm:$0xff]  ;;  %v36_v2 = vld [vmem:[%s1124_s0 + $0x8] sm:$0xff]  ;;  %250 = vmatprep.mubr.bf16.mxu1 %v660_v31  ;;  %vm564_vm3 = vcmask 1024  }
   0x2   :  { %v42_v3 = vsel %vm41_vm0, %v35_v0, 0.0  ;;  %v48_v4 = vsel %vm41_vm0, %v37_v1, 0.0  ;;  %v38_v5 = vld [vmem:[%s1124_s0 + $0x18] sm:$0xff]  ;;  %v45_v6 = vsel %vm41_vm0, %v36_v2, 0.0  ;;  %v137_v28 = vld [vmem:[%s1125_s3 + $0x8] sm:$0xff]  ;;  %v136_v30 = vld [vmem:[%s1125_s3] sm:$0xff] }
   0x3   :  { %43 = vadd.xlane.f32.xlu0 %v42_v3  ;;  %49 = vadd.xlane.f32.xlu1 %v48_v4  ;;  %v51_v7 = vsel %vm41_vm0, %v38_v5, 0.0  ;;  %v141_v29 = vld [vmem:[%s1125_s3 + $0x28] sm:$0xff]  ;;  %v140_v33 = vld [vmem:[%s1125_s3 + $0x20] sm:$0xff]  ;;  %v139_v52 = vld [vmem:[%s1125_s3 + $0x18] sm:$0xff] }
   0x4   :  { %v171_v32 = vpack.c.bf16 %v141_v29, %v137_v28  ;;  %v145_v34 = vld [vmem:[%s1125_s3 + $0x48] sm:$0xff]  ;;  %v170_v36 = vpack.c.bf16 %v140_v33, %v136_v30  ;;  %v144_v38 = vld [vmem:[%s1125_s3 + $0x40] sm:$0xff]  ;;  %v143_v53 = vld [vmem:[%s1125_s3 + $0x38] sm:$0xff] }
   0x5   :  { %v149_v35 = vld [vmem:[%s1125_s3 + $0x68] sm:$0xff]  ;;  %v148_v39 = vld [vmem:[%s1125_s3 + $0x60] sm:$0xff]  ;;  %v173_v55 = vpack.c.bf16 %v143_v53, %v139_v52  ;;  %v322_v61 = vld [vmem:[%s1126_s5 + $0x90] sm:$0xff] }
   0x6   :  { %v175_v37 = vpack.c.bf16 %v149_v35, %v145_v34  ;;  %v153_v40 = vld [vmem:[%s1125_s3 + $0x88] sm:$0xff]  ;;  %218 = vmatprep.subr.bf16.mxu1 %v171_v32  ;;  %v174_v42 = vpack.c.bf16 %v148_v39, %v144_v38  ;;  %v152_v44 = vld [vmem:[%s1125_s3 + $0x80] sm:$0xff]  ;;  %v323_v62 = vld [vmem:[%s1126_s5 + $0x98] sm:$0xff] }
   0x7   :  { %46 = vadd.xlane.f32.xlu0 %v45_v6  ;;  %52 = vadd.xlane.f32.xlu1 %v51_v7  ;;  %v157_v41 = vld [vmem:[%s1125_s3 + $0xa8] sm:$0xff]  ;;  %v156_v45 = vld [vmem:[%s1125_s3 + $0xa0] sm:$0xff]  ;;  %v314_v29 = vld [vmem:[%s1126_s5 + $0x50] sm:$0xff] }
   0x8   :  { %219 = vmatpush1.bf16.msra.mxu1 %v170_v36  ;;  %v179_v43 = vpack.c.bf16 %v157_v41, %v153_v40  ;;  %v161_v46 = vld [vmem:[%s1125_s3 + $0xc8] sm:$0xff]  ;;  %v178_v48 = vpack.c.bf16 %v156_v45, %v152_v44  ;;  %v160_v50 = vld [vmem:[%s1125_s3 + $0xc0] sm:$0xff]  ;;  %v315_v30 = vld [vmem:[%s1126_s5 + $0x58] sm:$0xff] }
   0x9   :  { %220 = vmatprep.subr.bf16.mxu1 %v175_v37  ;;  %v165_v47 = vld [vmem:[%s1125_s3 + $0xe8] sm:$0xff]  ;;  %v164_v51 = vld [vmem:[%s1125_s3 + $0xe0] sm:$0xff]  ;;  %v377_v32 = vpack.c.bf16 %v315_v30, %v314_v29 }
   0xa   :  { %v183_v49 = vpack.c.bf16 %v165_v47, %v161_v46  ;;  %v182_v54 = vpack.c.bf16 %v164_v51, %v160_v50  ;;  %v320_v56 = vld [vmem:[%s1126_s5 + $0x80] sm:$0xff]  ;;  %v321_v57 = vld [vmem:[%s1126_s5 + $0x88] sm:$0xff] }
   0xb   :  { %v304_v58 = vld [vmem:[%s1126_s5] sm:$0xff]  ;;  %v380_v59 = vpack.c.bf16 %v321_v57, %v320_v56  ;;  %v305_v60 = vld [vmem:[%s1126_s5 + $0x8] sm:$0xff] }
   0xc   :  { %221 = vmatpush1.bf16.msra.mxu1 %v174_v42  ;;  %v372_v63 = vpack.c.bf16 %v305_v60, %v304_v58  ;;  %v324_v3 = vld [vmem:[%s1126_s5 + $0xa0] sm:$0xff]  ;;  %v325_v4 = vld [vmem:[%s1126_s5 + $0xa8] sm:$0xff] }
   0xd   :  { %222 = vmatprep.subr.bf16.mxu1 %v179_v43  ;;  %576 = vmatprep.subr.bf16.mxu0 %v380_v59  ;;  %v382_v6 = vpack.c.bf16 %v325_v4, %v324_v3  ;;  %v308_v7 = vld [vmem:[%s1126_s5 + $0x20] sm:$0xff] }
   0xe   :  { %577 = vmatpush3.bf16.msra.mxu0 %v372_v63  ;;  %v570_v46 = vld [vmem:[%s1127_s1] ss:$0 sm:$0xff] }
   0xf   :  { %v571_v50 = vld [vmem:[%s1128_s2] ss:$0 sm:$0xff] }
  0x10   :  { %223 = vmatpush1.bf16.msra.mxu1 %v178_v48 }
  0x11   :  { %224 = vmatprep.subr.bf16.mxu1 %v183_v49 }
  0x14   :  { %225 = vmatpush1.bf16.msra.mxu1 %v182_v54 }
  0x15   :  { %259 = vmatprep.subr.bf16.mxu1 %v173_v55 }
  0x90   :  { %v44_v8 = vpop.xlane.xlu0 %43  ;;  %v50_v9 = vpop.xlane.xlu1 %49 }
  0x91   :  { %v55_v10 = vmul.f32 0.015625, %v44_v8  ;;  %v57_v11 = vmul.f32 0.015625, %v50_v9  ;;  %v309_v8 = vld [vmem:[%s1126_s5 + $0x28] sm:$0xff]  ;;  %v326_v9 = vld [vmem:[%s1126_s5 + $0xb0] sm:$0xff] }
  0x93   :  { %v729_v12 = vsub.f32 %v35_v0, %v55_v10  ;;  %v731_v13 = vsub.f32 %v37_v1, %v57_v11  ;;  %v381_v0 = vpack.c.bf16 %v323_v62, %v322_v61  ;;  %v306_v1 = vld [vmem:[%s1126_s5 + $0x10] sm:$0xff]  ;;  %v327_v10 = vld [vmem:[%s1126_s5 + $0xb8] sm:$0xff]  ;;  %v374_v11 = vpack.c.bf16 %v309_v8, %v308_v7 }
  0x94   :  { %v47_v14 = vpop.xlane.xlu0 %46  ;;  %v53_v15 = vpop.xlane.xlu1 %52 }
  0x95   :  { %v56_v16 = vmul.f32 0.015625, %v47_v14  ;;  %v58_v17 = vmul.f32 0.015625, %v53_v15  ;;  %v63_v18 = vmul.f32 %v729_v12, %v729_v12  ;;  %v65_v19 = vmul.f32 %v731_v13, %v731_v13  ;;  %578 = vmatprep.subr.bf16.mxu0 %v381_v0  ;;  %v310_v15 = vld [vmem:[%s1126_s5 + $0x30] sm:$0xff] }
  0x96   :  { %v383_v14 = vpack.c.bf16 %v327_v10, %v326_v9 }
  0x97   :  { %v737_v20 = vsub.f32 %v36_v2, %v56_v16  ;;  %v739_v21 = vsub.f32 %v38_v5, %v58_v17  ;;  %v67_v22 = vsel %vm41_vm0, %v63_v18, 0.0  ;;  %v73_v23 = vsel %vm41_vm0, %v65_v19, 0.0  ;;  %v307_v2 = vld [vmem:[%s1126_s5 + $0x18] sm:$0xff]  ;;  %v328_v17 = vld [vmem:[%s1126_s5 + $0xc0] sm:$0xff]  ;;  %v329_v18 = vld [vmem:[%s1126_s5 + $0xc8] sm:$0xff] }
  0x98   :  { %68 = vadd.xlane.f32.xlu0 %v67_v22  ;;  %v373_v5 = vpack.c.bf16 %v307_v2, %v306_v1  ;;  %v311_v16 = vld [vmem:[%s1126_s5 + $0x38] sm:$0xff]  ;;  %v384_v22 = vpack.c.bf16 %v329_v18, %v328_v17 }
  0x99   :  { %v64_v24 = vmul.f32 %v737_v20, %v737_v20  ;;  %v66_v25 = vmul.f32 %v739_v21, %v739_v21  ;;  %v375_v19 = vpack.c.bf16 %v311_v16, %v310_v15 }
  0x9a   :  { %579 = vmatpush3.bf16.msra.mxu0 %v373_v5 }
  0x9b   :  { %v70_v26 = vsel %vm41_vm0, %v64_v24, 0.0  ;;  %v76_v27 = vsel %vm41_vm0, %v66_v25, 0.0  ;;  %580 = vmatprep.subr.bf16.mxu0 %v382_v6  ;;  %v313_v24 = vld [vmem:[%s1126_s5 + $0x48] sm:$0xff]  ;;  %v330_v25 = vld [vmem:[%s1126_s5 + $0xd0] sm:$0xff] }
  0x9c   :  { %74 = vadd.xlane.f32.xlu0 %v73_v23  ;;  %71 = vadd.xlane.f32.xlu1 %v70_v26  ;;  %v312_v23 = vld [vmem:[%s1126_s5 + $0x40] sm:$0xff]  ;;  %v331_v26 = vld [vmem:[%s1126_s5 + $0xd8] sm:$0xff] }
  0x9d   :  { %v385_v28 = vpack.c.bf16 %v331_v26, %v330_v25  ;;  %v147_v25 = vld [vmem:[%s1125_s3 + $0x58] sm:$0xff] }
  0x9e   :  { %581 = vmatpush3.bf16.msra.mxu0 %v374_v11  ;;  %v151_v26 = vld [vmem:[%s1125_s3 + $0x78] sm:$0xff] }
  0x9f   :  { %582 = vmatprep.subr.bf16.mxu0 %v383_v14  ;;  %v177_v30 = vpack.c.bf16 %v151_v26, %v147_v25  ;;  %v363_v25 = vld [vmem:[%s1126_s5 + $0x1d8] sm:$0xff]  ;;  %v346_v26 = vld [vmem:[%s1126_s5 + $0x150] sm:$0xff] }
  0xa0   :  { %77 = vadd.xlane.f32.xlu1 %v76_v27  ;;  %v376_v27 = vpack.c.bf16 %v313_v24, %v312_v23 }
  0xa2   :  { %583 = vmatpush3.bf16.msra.mxu0 %v375_v19  ;;  %v138_v19 = vld [vmem:[%s1125_s3 + $0x10] sm:$0xff] }
  0xa3   :  { %584 = vmatprep.subr.bf16.mxu0 %v384_v22  ;;  %v142_v22 = vld [vmem:[%s1125_s3 + $0x30] sm:$0xff] }
  0xa6   :  { %585 = vmatpush3.bf16.msra.mxu0 %v376_v27 }
  0xa7   :  { %586 = vmatprep.subr.bf16.mxu0 %v385_v28  ;;  %v172_v28 = vpack.c.bf16 %v142_v22, %v138_v19  ;;  %v344_v19 = vld [vmem:[%s1126_s5 + $0x140] sm:$0xff]  ;;  %v345_v22 = vld [vmem:[%s1126_s5 + $0x148] sm:$0xff] }
  0xaa   :  { %587 = vmatpush3.bf16.msra.mxu0 %v377_v32  ;;  %v146_v32 = vld [vmem:[%s1125_s3 + $0x50] sm:$0xff] }
 0x125   :  { %v69_v33 = vpop.xlane.xlu0 %68 }
 0x126   :  { %v79_v34 = vmul.f32 0.015625, %v69_v33  ;;  %v150_v33 = vld [vmem:[%s1125_s3 + $0x70] sm:$0xff] }
 0x128   :  { %v83_v35 = vadd.f32 1e-05, %v79_v34  ;;  %v155_v34 = vld [vmem:[%s1125_s3 + $0x98] sm:$0xff] }
 0x129   :  { %v72_v36 = vpop.xlane.xlu1 %71  ;;  %v75_v37 = vpop.xlane.xlu0 %74 }
 0x12a   :  { %652 = vrsqrt.f32 %v83_v35  ;;  %v80_v38 = vmul.f32 0.015625, %v72_v36  ;;  %v81_v39 = vmul.f32 0.015625, %v75_v37  ;;  %v159_v35 = vld [vmem:[%s1125_s3 + $0xb8] sm:$0xff]  ;;  %v176_v36 = vpack.c.bf16 %v150_v33, %v146_v32  ;;  %v365_v32 = vld [vmem:[%s1126_s5 + $0x1e8] sm:$0xff] }
 0x12b   :  { %v181_v37 = vpack.c.bf16 %v159_v35, %v155_v34  ;;  %v348_v34 = vld [vmem:[%s1126_s5 + $0x160] sm:$0xff]  ;;  %v349_v35 = vld [vmem:[%s1126_s5 + $0x168] sm:$0xff] }
 0x12c   :  { %v84_v40 = vadd.f32 1e-05, %v80_v38  ;;  %v85_v41 = vadd.f32 1e-05, %v81_v39  ;;  %v154_v38 = vld [vmem:[%s1125_s3 + $0x90] sm:$0xff] }
 0x12d   :  { %v78_v42 = vpop.xlane.xlu1 %77  ;;  %v158_v39 = vld [vmem:[%s1125_s3 + $0xb0] sm:$0xff] }
 0x12e   :  { %654 = vrsqrt.f32 %v84_v40  ;;  %v82_v43 = vmul.f32 0.015625, %v78_v42  ;;  %v163_v40 = vld [vmem:[%s1125_s3 + $0xd8] sm:$0xff] }
 0x12f   :  { %656 = vrsqrt.f32 %v85_v41  ;;  %v167_v41 = vld [vmem:[%s1125_s3 + $0xf8] sm:$0xff] }
 0x130   :  { %v86_v44 = vadd.f32 1e-05, %v82_v43  ;;  %v185_v42 = vpack.c.bf16 %v167_v41, %v163_v40  ;;  %v162_v43 = vld [vmem:[%s1125_s3 + $0xd0] sm:$0xff]  ;;  %v351_v41 = vld [vmem:[%s1126_s5 + $0x178] sm:$0xff] }
 0x131   :  { %v350_v40 = vld [vmem:[%s1126_s5 + $0x170] sm:$0xff] }
 0x132   :  { %658 = vrsqrt.f32 %v86_v44  ;;  %v166_v44 = vld [vmem:[%s1125_s3 + $0xf0] sm:$0xff] }
 0x134   :  { %v653_v45 = vpop.eup %652 }
 0x135   :  { %v91_v47 = vmul.f32 %v653_v45, %v729_v12  ;;  %v352_v45 = vld [vmem:[%s1126_s5 + $0x180] sm:$0xff] }
 0x137   :  { %v101_v48 = vmul.f32 %v570_v46, %v91_v47  ;;  %v184_v47 = vpack.c.bf16 %v166_v44, %v162_v43  ;;  %v188_v43 = vlaneseq }
 0x138   :  { %v655_v49 = vpop.eup %654 }
 0x139   :  { %v657_v51 = vpop.eup %656  ;;  %v92_v52 = vmul.f32 %v655_v49, %v737_v20  ;;  %v111_v54 = vadd.f32 %v571_v50, %v101_v48  ;;  %v336_v49 = vld [vmem:[%s1126_s5 + $0x100] sm:$0xff]  ;;  %v189_v44 = vshrl.u32 %v188_v43, 7 }
 0x13a   :  { %v93_v53 = vmul.f32 %v657_v51, %v731_v13  ;;  %v354_v51 = vld [vmem:[%s1126_s5 + $0x190] sm:$0xff] }
 0x13b   :  { %v102_v55 = vmul.f32 %v570_v46, %v92_v52  ;;  %v115_v12 = vsel %vm41_vm0, %v111_v54, 0.0  ;;  %v355_v52 = vld [vmem:[%s1126_s5 + $0x198] sm:$0xff] }
 0x13c   :  { %v659_v56 = vpop.eup %658  ;;  %v103_v57 = vmul.f32 %v570_v46, %v93_v53  ;;  %v397_v54 = vpack.c.bf16 %v355_v52, %v354_v51 }
 0x13d   :  { %v112_v58 = vadd.f32 %v571_v50, %v102_v55  ;;  %v94_v59 = vmul.f32 %v659_v56, %v739_v21  ;;  %v338_v55 = vld [vmem:[%s1126_s5 + $0x110] sm:$0xff]  ;;  %v339_v56 = vld [vmem:[%s1126_s5 + $0x118] sm:$0xff] }
 0x13e   :  { %v113_v61 = vadd.f32 %v571_v50, %v103_v57  ;;  %v389_v57 = vpack.c.bf16 %v339_v56, %v338_v55 }
 0x13f   :  { %v116_v60 = vsel %vm41_vm0, %v112_v58, 0.0  ;;  %v104_v62 = vmul.f32 %v570_v46, %v94_v59  ;;  %v353_v46 = vld [vmem:[%s1126_s5 + $0x188] sm:$0xff]  ;;  %v356_v58 = vld [vmem:[%s1126_s5 + $0x1a0] sm:$0xff] }
 0x140   :  { %v117_v63 = vadd.f32 %v116_v60, %v115_v12  ;;  %v124_v20 = vsel %vm41_vm0, %v113_v61, 0.0  ;;  %v396_v48 = vpack.c.bf16 %v353_v46, %v352_v45  ;;  %v357_v59 = vld [vmem:[%s1126_s5 + $0x1a8] sm:$0xff]  ;;  %v332_v60 = vld [vmem:[%s1126_s5 + $0xe0] sm:$0xff]  ;;  %v190_v45 = vsub.s32 0, %v189_v44 }
 0x141   :  { %v114_v0 = vadd.f32 %v571_v50, %v104_v62  ;;  %v337_v50 = vld [vmem:[%s1126_s5 + $0x108] sm:$0xff]  ;;  %v398_v12 = vpack.c.bf16 %v357_v59, %v356_v58  ;;  %v340_v62 = vld [vmem:[%s1126_s5 + $0x120] sm:$0xff] }
 0x142   :  { %v118_v1 = vrot.slane %v117_v63, 4  ;;  %v388_v53 = vpack.c.bf16 %v337_v50, %v336_v49  ;;  %v333_v61 = vld [vmem:[%s1126_s5 + $0xe8] sm:$0xff]  ;;  %v186_v46 = vld [vmem:[%s1129_s4] sm:$0xf] }
 0x143   :  { %v125_v13 = vsel %vm41_vm0, %v114_v0, 0.0  ;;  %v341_v0 = vld [vmem:[%s1126_s5 + $0x128] sm:$0xff] }
 0x144   :  { %v126_v2 = vadd.f32 %v125_v13, %v124_v20  ;;  %v119_v3 = vadd.f32 %v118_v1, %v117_v63  ;;  %v386_v63 = vpack.c.bf16 %v333_v61, %v332_v60  ;;  %v316_v1 = vld [vmem:[%s1126_s5 + $0x60] sm:$0xff]  ;;  %v317_v20 = vld [vmem:[%s1126_s5 + $0x68] sm:$0xff]  ;;  %v390_v13 = vpack.c.bf16 %v341_v0, %v340_v62  ;;  %v494_v62 = vld [vmem:[%s1130_s7 + $0x10] sm:$0xff] }
 0x145   :  { %v493_v58 = vld [vmem:[%s1130_s7 + $0x8] sm:$0xff]  ;;  %v198_v0 = vsub.s32 2, %v189_v44 }
 0x146   :  { %v120_v4 = vrot.slane %v119_v3, 2  ;;  %v127_v5 = vrot.slane %v126_v2, 4  ;;  %588 = vmatprep.subr.bf16.mxu0 %v386_v63  ;;  %v495_v63 = vld [vmem:[%s1130_s7 + $0x18] sm:$0xff] }
 0x148   :  { %v121_v6 = vadd.f32 %v120_v4, %v119_v3  ;;  %v128_v7 = vadd.f32 %v127_v5, %v126_v2  ;;  %v378_v2 = vpack.c.bf16 %v317_v20, %v316_v1  ;;  %v358_v3 = vld [vmem:[%s1126_s5 + $0x1b0] sm:$0xff]  ;;  %v359_v4 = vld [vmem:[%s1126_s5 + $0x1b8] sm:$0xff]  ;;  %v202_v1 = vsub.s32 3, %v189_v44 }
 0x149   :  { %v399_v5 = vpack.c.bf16 %v359_v4, %v358_v3  ;;  %v510_v20 = vpack.c.bf16 %v495_v63, %v494_v62 }
 0x14a   :  { %v122_v21 = vrot.slane %v121_v6, 1  ;;  %v129_v8 = vrot.slane %v128_v7, 2  ;;  %589 = vmatpush3.bf16.msra.mxu0 %v378_v2  ;;  %v203_v2 = vrot.slane %v186_v46, %v202_v1 }
 0x14c   :  { %v123_v9 = vadd.f32 %v122_v21, %v121_v6  ;;  %v130_v10 = vadd.f32 %v129_v8, %v128_v7  ;;  %v334_v6 = vld [vmem:[%s1126_s5 + $0xf0] sm:$0xff]  ;;  %v335_v7 = vld [vmem:[%s1126_s5 + $0xf8] sm:$0xff] }
 0x14d   :  { %v342_v21 = vld [vmem:[%s1126_s5 + $0x130] sm:$0xff]  ;;  %v387_v8 = vpack.c.bf16 %v335_v7, %v334_v6 }
 0x14e   :  { %v131_v11 = vrot.slane %v130_v10, 1  ;;  %v134_v14 = vmul.f32 0.0625, %v123_v9  ;;  %v343_v9 = vld [vmem:[%s1126_s5 + $0x138] sm:$0xff] }
 0x14f   :  { %590 = vmatprep.subr.bf16.mxu0 %v387_v8 }
 0x150   :  { %v132_v15 = vadd.f32 %v131_v11, %v130_v10  ;;  %v168_v17 = vpack.c.bf16 %v134_v14, %v134_v14  ;;  %v318_v10 = vld [vmem:[%s1126_s5 + $0x70] sm:$0xff]  ;;  %v319_v11 = vld [vmem:[%s1126_s5 + $0x78] sm:$0xff]  ;;  %v391_v14 = vpack.c.bf16 %v343_v9, %v342_v21 }
 0x152   :  { %v135_v16 = vmul.f32 0.0625, %v132_v15  ;;  %v210_v23 = vunpack.c.l.b16 %v168_v17  ;;  %v379_v15 = vpack.c.bf16 %v319_v11, %v318_v10  ;;  %v361_v17 = vld [vmem:[%s1126_s5 + $0x1c8] sm:$0xff] }
 0x154   :  { %v169_v18 = vpack.c.bf16 %v135_v16, %v135_v16  ;;  %v360_v16 = vld [vmem:[%s1126_s5 + $0x1c0] sm:$0xff]  ;;  %591 = vmatpush3.bf16.msra.mxu0 %v379_v15  ;;  %v497_v15 = vld [vmem:[%s1130_s7 + $0x28] sm:$0xff] }
 0x156   :  { %v211_v24 = vunpack.c.l.b16 %v169_v18  ;;  %v400_v18 = vpack.c.bf16 %v361_v17, %v360_v16  ;;  %v498_v17 = vld [vmem:[%s1130_s7 + $0x30] sm:$0xff] }
 0x158   :  { %v213_v27 = vsel %vm212_vm1, %v211_v24, %v210_v23  ;;  %v392_v23 = vpack.c.bf16 %v345_v22, %v344_v19  ;;  %v362_v24 = vld [vmem:[%s1126_s5 + $0x1d0] sm:$0xff]  ;;  %v500_v19 = vld [vmem:[%s1130_s7 + $0x40] sm:$0xff] }
 0x159   :  { %v214_v29 = vpack.c.b16 %v213_v27, %v213_v27  ;;  %v401_v27 = vpack.c.bf16 %v363_v25, %v362_v24  ;;  %v502_v25 = vld [vmem:[%s1130_s7 + $0x50] sm:$0xff] }
 0x15b   :  { %572 = vmatmul.mubr.msk.bf16.vlgmr.msra.gmra.mrb[0].mxu1 %vm41_vm0, %v214_v29 }
 0x15c   :  { %260 = vmatpush1.bf16.msra.mxu1 %v172_v28  ;;  %291 = vmatprep.mubr.bf16.mxu1 %v660_v31  ;;  %v180_v31 = vpack.c.bf16 %v158_v39, %v154_v38  ;;  %v347_v28 = vld [vmem:[%s1126_s5 + $0x158] sm:$0xff] }
 0x15d   :  { %261 = vmatprep.subr.bf16.mxu1 %v177_v30  ;;  %v364_v30 = vld [vmem:[%s1126_s5 + $0x1e0] sm:$0xff]  ;;  %v367_v38 = vld [vmem:[%s1126_s5 + $0x1f8] sm:$0xff] }
 0x15e   :  { %v402_v33 = vpack.c.bf16 %v365_v32, %v364_v30  ;;  %v506_v32 = vld [vmem:[%s1130_s7 + $0x70] sm:$0xff] }
 0x160   :  { %262 = vmatpush1.bf16.msra.mxu1 %v176_v36  ;;  %v394_v36 = vpack.c.bf16 %v349_v35, %v348_v34  ;;  %v14_v35 = vstv %s1131_s8 }
 0x161   :  { %263 = vmatprep.subr.bf16.mxu1 %v181_v37  ;;  %v366_v37 = vld [vmem:[%s1126_s5 + $0x1f0] sm:$0xff]  ;;  %15 = vst [vmem:[#allocation2] sm:$0x1] %v14_v35 }
 0x162   :  { %v403_v39 = vpack.c.bf16 %v367_v38, %v366_v37 }
 0x164   :  { %264 = vmatpush1.bf16.msra.mxu1 %v180_v31  ;;  %v395_v31 = vpack.c.bf16 %v351_v41, %v350_v40  ;;  %v574_v41 = vld [vmem:[%s1132_s6] ss:$0 sm:$0xff] }
 0x165   :  { %265 = vmatprep.subr.bf16.mxu1 %v185_v42  ;;  %v661_v42 = vmov 0.0  }
 0x166   :  { %629 = vmatprep.subr.bf16.mxu0 %v661_v42 }
 0x168   :  { %266 = vmatpush1.bf16.msra.mxu1 %v184_v47  ;;  %v194_v47 = vsub.s32 1, %v189_v44 }
 0x169   :  { %598 = vmatprep.subr.bf16.mxu1 %v396_v48  ;;  %v191_v48 = vrot.slane %v186_v46, %v190_v45 }
 0x16a   :  { %v195_v49 = vrot.slane %v186_v46, %v194_v47 }
 0x16b   :  { %573 = vmatmul.mubr.msk.bf16.vlgmr.msra.gmra.mrb[4].mxu1 %vm41_vm0, %v214_v29  ;;  %v393_v29 = vpack.c.bf16 %v347_v28, %v346_v26  ;;  %v503_v26 = vld [vmem:[%s1130_s7 + $0x58] sm:$0xff]  ;;  %v504_v28 = vld [vmem:[%s1130_s7 + $0x60] sm:$0xff] }
 0x16c   :  { %599 = vmatpush3.bf16.msra.mxu1 %v388_v53 }
 0x16d   :  { %600 = vmatprep.subr.bf16.mxu1 %v397_v54 }
 0x170   :  { %601 = vmatpush3.bf16.msra.mxu1 %v389_v57  ;;  %v492_v57 = vld [vmem:[%s1130_s7] sm:$0xff] }
 0x171   :  { %602 = vmatprep.subr.bf16.mxu1 %v398_v12  ;;  %v509_v60 = vpack.c.bf16 %v493_v58, %v492_v57 }
 0x174   :  { %603 = vmatpush3.bf16.msra.mxu1 %v390_v13  ;;  %v199_v13 = vrot.slane %v186_v46, %v198_v0 }
 0x175   :  { %604 = vmatprep.subr.bf16.mxu1 %v399_v5 }
 0x178   :  { %605 = vmatpush3.bf16.msra.mxu1 %v391_v14  ;;  %v496_v14 = vld [vmem:[%s1130_s7 + $0x20] sm:$0xff] }
 0x179   :  { %606 = vmatprep.subr.bf16.mxu1 %v400_v18  ;;  %v511_v16 = vpack.c.bf16 %v497_v15, %v496_v14  ;;  %v499_v18 = vld [vmem:[%s1130_s7 + $0x38] sm:$0xff] }
 0x17a   :  { %v512_v22 = vpack.c.bf16 %v499_v18, %v498_v17 }
 0x17c   :  { %607 = vmatpush3.bf16.msra.mxu1 %v392_v23  ;;  %v501_v23 = vld [vmem:[%s1130_s7 + $0x48] sm:$0xff] }
 0x17d   :  { %608 = vmatprep.subr.bf16.mxu1 %v401_v27  ;;  %v513_v24 = vpack.c.bf16 %v501_v23, %v500_v19  ;;  %v514_v27 = vpack.c.bf16 %v503_v26, %v502_v25 }
 0x180   :  { %609 = vmatpush3.bf16.msra.mxu1 %v393_v29  ;;  %v505_v29 = vld [vmem:[%s1130_s7 + $0x68] sm:$0xff] }
 0x181   :  { %610 = vmatprep.subr.bf16.mxu1 %v402_v33  ;;  %v515_v30 = vpack.c.bf16 %v505_v29, %v504_v28  ;;  %v507_v33 = vld [vmem:[%s1130_s7 + $0x78] sm:$0xff] }
 0x182   :  { %v516_v34 = vpack.c.bf16 %v507_v33, %v506_v32 }
 0x184   :  { %611 = vmatpush3.bf16.msra.mxu1 %v394_v36 }
 0x185   :  { %612 = vmatprep.subr.bf16.mxu1 %v403_v39 }
 0x188   :  { %613 = vmatpush3.bf16.msra.mxu1 %v395_v31 }
 0x22e   :  { %v252_v50 = vpop.f32.mrb[0].mxu1 }
 0x22f   :  { %v253_v51 = vadd.f32 %v252_v50, %v191_v48  ;;  %v254_v52 = vpop.f32.mrb[1].mxu1  ;;  %v575_v50 = vld [vmem:[#allocation2] ss:$0 sm:$0xff] }
 0x230   :  { %v255_v53 = vadd.f32 %v254_v52, %v195_v49  ;;  %v256_v54 = vpop.f32.mrb[2].mxu1 }
 0x231   :  { %v300_v55 = vmax.f32 %v253_v51, 0.0  ;;  %v257_v56 = vpop.f32.mrb[3].mxu1 }
 0x232   :  { %v301_v59 = vmax.f32 %v255_v53, 0.0 }
 0x233   :  { %v368_v61 = vpack.c.bf16 %v300_v55, %v300_v55 }
 0x234   :  { %v369_v12 = vpack.c.bf16 %v301_v59, %v301_v59 }
 0x236   :  { %443 = vmatprep.mubr.bf16.mxu0 %v369_v12 }
 0x237   :  { %444 = vmatmul.mubr.bf16.vlgmr.msra.gmra.mrb[0].mxu0 %v368_v61 }
 0x238   :  { %630 = vmatpush3.bf16.msra.mxu0 %v509_v60  ;;  %645 = vmatprep.mubr.msk.bf16.mxu0 %vm662_vm2, %v661_v42 }
 0x239   :  { %631 = vmatprep.subr.bf16.mxu0 %v661_v42 }
 0x23c   :  { %632 = vmatpush3.bf16.msra.mxu0 %v510_v20 }
 0x23d   :  { %633 = vmatprep.subr.bf16.mxu0 %v661_v42 }
 0x23e   :  { %v293_v3 = vpop.f32.mrb[4].mxu1 }
 0x23f   :  { %v294_v4 = vadd.f32 %v293_v3, %v199_v13  ;;  %v295_v5 = vpop.f32.mrb[5].mxu1 }
 0x240   :  { %v296_v6 = vadd.f32 %v295_v5, %v203_v2  ;;  %v297_v7 = vpop.f32.mrb[6].mxu1  ;;  %634 = vmatpush3.bf16.msra.mxu0 %v511_v16 }
 0x241   :  { %v302_v21 = vmax.f32 %v294_v4, 0.0  ;;  %v298_v8 = vpop.f32.mrb[7].mxu1  ;;  %635 = vmatprep.subr.bf16.mxu0 %v661_v42 }
 0x242   :  { %v303_v9 = vmax.f32 %v296_v6, 0.0 }
 0x243   :  { %v370_v11 = vpack.c.bf16 %v302_v21, %v302_v21 }
 0x244   :  { %v371_v10 = vpack.c.bf16 %v303_v9, %v303_v9  ;;  %636 = vmatpush3.bf16.msra.mxu0 %v512_v22 }
 0x245   :  { %637 = vmatprep.subr.bf16.mxu0 %v661_v42 }
 0x246   :  { %483 = vmatprep.mubr.bf16.mxu1 %v371_v10 }
 0x247   :  { %484 = vmatmul.mubr.bf16.vlgmr.msra.gmra.mrb[8].mxu1 %v370_v11 }
 0x248   :  { %638 = vmatpush3.bf16.msra.mxu0 %v513_v24 }
 0x249   :  { %639 = vmatprep.subr.bf16.mxu0 %v661_v42 }
 0x24c   :  { %640 = vmatpush3.bf16.msra.mxu0 %v514_v27 }
 0x24d   :  { %641 = vmatprep.subr.bf16.mxu0 %v661_v42 }
 0x250   :  { %642 = vmatpush3.bf16.msra.mxu0 %v515_v30 }
 0x251   :  { %643 = vmatprep.subr.bf16.mxu0 %v661_v42 }
 0x254   :  { %644 = vmatpush3.bf16.msra.mxu0 %v516_v34 }
 0x30a   :  { %v592_v36 = vpop.f32.mrb[0].mxu0 }
 0x30b   :  { %v593_v37 = vpop.f32.mrb[1].mxu0 }
 0x30c   :  { %v594_v38 = vadd.f32 %v593_v37, %v592_v36  ;;  %v595_v39 = vpop.f32.mrb[2].mxu0 }
 0x30d   :  { %v596_v40 = vpop.f32.mrb[3].mxu0 }
 0x30e   :  { %v446_v44 = vadd.f32 %v594_v38, %v574_v41 }
 0x31a   :  { %v614_v31 = vpop.f32.mrb[8].mxu1 }
 0x31b   :  { %v615_v43 = vpop.f32.mrb[9].mxu1 }
 0x31c   :  { %v616_v45 = vadd.f32 %v615_v43, %v614_v31  ;;  %v617_v46 = vpop.f32.mrb[10].mxu1 }
 0x31d   :  { %v618_v42 = vpop.f32.mrb[11].mxu1 }
 0x31e   :  { %v486_v47 = vadd.f32 %v616_v45, %v446_v44 }
 0x320   :  { %v491_v48 = vmax.f32 %v486_v47, 0.0 }
 0x322   :  { %v508_v49 = vpack.c.bf16 %v491_v48, %v491_v48 }
 0x324   :  { %646 = vmatmul.mubr.bf16.vlgmr.msra.gmra.mrb[4].mxu0 %v508_v49 }
 0x3f7   :  { %v558_v51 = vpop.f32.mrb[4].mxu0 }
 0x3f8   :  { %v559_v52 = vadd.f32 %v575_v50, %v558_v51  ;;  %v647_v53 = vpop.f32.mrb[5].mxu0 }
 0x3f9   :  { %v561_v54 = vpop.f32.mrb[6].mxu0 }
 0x3fa   :  { %565 = vst.msk [vmem:[%s1133_s9] sm:$0x3] %vm564_vm3, %v559_v52  ;;  %v648_v55 = vpop.f32.mrb[7].mxu0 }

// kernel: swin_for_iqa_forward.18
= control target key start
LH: loop header
LB: loop body
LE: loop exit
PB: predicated region body
PF: predicated region fallthrough
CT: control target
= control target key end

     0   :  { %vm44_vm0 = vcmask 523264   ;;  %v469_v60 = vmov 0   ;;  %s817_s0 = inlined_call_operand.vmem [shape: f32[32,64], index: 0, kind: input, shape index: {}]   ;;  %s818_s1 = inlined_call_operand.vmem [shape: f32[32,64], index: 1, kind: input, shape index: {}]   ;;  %s819_s4 = inlined_call_operand.vmem [shape: f32[64,256], index: 4, kind: input, shape index: {}]   ;;  %s820_s2 = inlined_call_operand.vmem [shape: f32[1,64], index: 2, kind: input, shape index: {}]   ;;  %s821_s3 = inlined_call_operand.vmem [shape: f32[1,64], index: 3, kind: input, shape index: {}]   ;;  %s822_s6 = inlined_call_operand.vmem [shape: f32[256,64], index: 6, kind: input, shape index: {}]   ;;  %s823_s5 = inlined_call_operand.vmem [shape: f32[1,256], index: 5, kind: input, shape index: {}]   ;;  %s824_s7 = inlined_call_operand.vmem [shape: f32[1,64], index: 7, kind: input, shape index: {}]   ;;  %s825_s8 = inlined_call_operand.vmem [shape: f32[32,64], index: 8, kind: output, shape index: {}]  }
   0x1   :  { %v30_v0 = vld [vmem:[%s817_s0] sm:$0xff]  ;;  %v32_v2 = vld [vmem:[%s817_s0 + $0x10] sm:$0xff]  ;;  %v31_v5 = vld [vmem:[%s817_s0 + $0x8] sm:$0xff]  ;;  %194 = vmatprep.mubr.bf16.mxu0 %v469_v60 }
   0x2   :  { %v34_v1 = vld [vmem:[%s818_s1] sm:$0xff]  ;;  %v36_v4 = vld [vmem:[%s818_s1 + $0x10] sm:$0xff]  ;;  %v35_v6 = vld [vmem:[%s818_s1 + $0x8] sm:$0xff] }
   0x3   :  { %v524_v3 = vadd.f32 %v34_v1, %v30_v0  ;;  %v535_v7 = vadd.f32 %v36_v4, %v32_v2  ;;  %v537_v8 = vadd.f32 %v35_v6, %v31_v5  ;;  %v33_v9 = vld [vmem:[%s817_s0 + $0x18] sm:$0xff]  ;;  %v119_v36 = vld [vmem:[%s819_s4 + $0x8] sm:$0xff]  ;;  %v118_v39 = vld [vmem:[%s819_s4] sm:$0xff] }
   0x4   :  { %v37_v10 = vld [vmem:[%s818_s1 + $0x18] sm:$0xff]  ;;  %v120_v40 = vld [vmem:[%s819_s4 + $0x10] sm:$0xff]  ;;  %v123_v42 = vld [vmem:[%s819_s4 + $0x28] sm:$0xff] }
   0x5   :  { %v45_v11 = vsel %vm44_vm0, %v524_v3, 0.0  ;;  %v547_v12 = vadd.f32 %v37_v10, %v33_v9  ;;  %v51_v13 = vsel %vm44_vm0, %v535_v7, 0.0  ;;  %v48_v14 = vsel %vm44_vm0, %v537_v8, 0.0  ;;  %v121_v37 = vld [vmem:[%s819_s4 + $0x18] sm:$0xff]  ;;  %v122_v45 = vld [vmem:[%s819_s4 + $0x20] sm:$0xff]  ;;  %v124_v46 = vld [vmem:[%s819_s4 + $0x30] sm:$0xff] }
   0x6   :  { %46 = vadd.xlane.f32.xlu0 %v45_v11  ;;  %52 = vadd.xlane.f32.xlu1 %v51_v13  ;;  %v137_v38 = vpack.c.bf16 %v121_v37, %v119_v36  ;;  %v136_v41 = vpack.c.bf16 %v120_v40, %v118_v39  ;;  %v125_v43 = vld [vmem:[%s819_s4 + $0x38] sm:$0xff]  ;;  %v138_v47 = vpack.c.bf16 %v124_v46, %v122_v45  ;;  %v127_v48 = vld [vmem:[%s819_s4 + $0x48] sm:$0xff]  ;;  %v126_v51 = vld [vmem:[%s819_s4 + $0x40] sm:$0xff] }
   0x7   :  { %v54_v15 = vsel %vm44_vm0, %v547_v12, 0.0  ;;  %v139_v44 = vpack.c.bf16 %v125_v43, %v123_v42  ;;  %v129_v49 = vld [vmem:[%s819_s4 + $0x58] sm:$0xff]  ;;  %v128_v52 = vld [vmem:[%s819_s4 + $0x50] sm:$0xff]  ;;  %v131_v54 = vld [vmem:[%s819_s4 + $0x68] sm:$0xff] }
   0x8   :  { %162 = vmatprep.subr.bf16.mxu0 %v137_v38  ;;  %v141_v50 = vpack.c.bf16 %v129_v49, %v127_v48  ;;  %v140_v53 = vpack.c.bf16 %v128_v52, %v126_v51  ;;  %v133_v55 = vld [vmem:[%s819_s4 + $0x78] sm:$0xff]  ;;  %v130_v57 = vld [vmem:[%s819_s4 + $0x60] sm:$0xff]  ;;  %v132_v58 = vld [vmem:[%s819_s4 + $0x70] sm:$0xff] }
   0x9   :  { %163 = vmatpush1.bf16.msra.mxu0 %v136_v41  ;;  %v143_v56 = vpack.c.bf16 %v133_v55, %v131_v54  ;;  %v142_v59 = vpack.c.bf16 %v132_v58, %v130_v57  ;;  %v287_v36 = vld [vmem:[%s822_s6] sm:$0xff]  ;;  %v288_v37 = vld [vmem:[%s822_s6 + $0x8] sm:$0xff]  ;;  %v305_v39 = vld [vmem:[%s822_s6 + $0x90] sm:$0xff] }
   0xa   :  { %49 = vadd.xlane.f32.xlu0 %v48_v14  ;;  %55 = vadd.xlane.f32.xlu1 %v54_v15  ;;  %v411_v15 = vld [vmem:[%s820_s2] ss:$0 sm:$0xff]  ;;  %v323_v38 = vpack.c.bf16 %v288_v37, %v287_v36  ;;  %v306_v40 = vld [vmem:[%s822_s6 + $0x98] sm:$0xff]  ;;  %v289_v42 = vld [vmem:[%s822_s6 + $0x10] sm:$0xff] }
   0xb   :  { %164 = vmatprep.subr.bf16.mxu0 %v139_v44  ;;  %v332_v41 = vpack.c.bf16 %v306_v40, %v305_v39  ;;  %v290_v43 = vld [vmem:[%s822_s6 + $0x18] sm:$0xff]  ;;  %v307_v45 = vld [vmem:[%s822_s6 + $0xa0] sm:$0xff]  ;;  %v308_v46 = vld [vmem:[%s822_s6 + $0xa8] sm:$0xff] }
   0xc   :  { %v324_v44 = vpack.c.bf16 %v290_v43, %v289_v42  ;;  %v291_v48 = vld [vmem:[%s822_s6 + $0x20] sm:$0xff]  ;;  %v292_v49 = vld [vmem:[%s822_s6 + $0x28] sm:$0xff]  ;;  %v309_v51 = vld [vmem:[%s822_s6 + $0xb0] sm:$0xff] }
   0xd   :  { %165 = vmatpush1.bf16.msra.mxu0 %v138_v47  ;;  %v333_v47 = vpack.c.bf16 %v308_v46, %v307_v45  ;;  %v310_v52 = vld [vmem:[%s822_s6 + $0xb8] sm:$0xff]  ;;  %v293_v54 = vld [vmem:[%s822_s6 + $0x30] sm:$0xff]  ;;  %v311_v57 = vld [vmem:[%s822_s6 + $0xc0] sm:$0xff] }
   0xe   :  { %166 = vmatprep.subr.bf16.mxu0 %v141_v50  ;;  %v325_v50 = vpack.c.bf16 %v292_v49, %v291_v48  ;;  %v294_v55 = vld [vmem:[%s822_s6 + $0x38] sm:$0xff]  ;;  %v312_v58 = vld [vmem:[%s822_s6 + $0xc8] sm:$0xff] }
  0x11   :  { %167 = vmatpush1.bf16.msra.mxu0 %v140_v53  ;;  %v334_v53 = vpack.c.bf16 %v310_v52, %v309_v51 }
  0x12   :  { %168 = vmatprep.subr.bf16.mxu0 %v143_v56  ;;  %v326_v56 = vpack.c.bf16 %v294_v55, %v293_v54 }
  0x15   :  { %169 = vmatpush1.bf16.msra.mxu0 %v142_v59  ;;  %v335_v59 = vpack.c.bf16 %v312_v58, %v311_v57 }
  0x93   :  { %v47_v16 = vpop.xlane.xlu0 %46  ;;  %v53_v18 = vpop.xlane.xlu1 %52 }
  0x94   :  { %v58_v17 = vmul.f32 0.015625, %v47_v16  ;;  %v60_v19 = vmul.f32 0.015625, %v53_v18 }
  0x96   :  { %v556_v20 = vsub.f32 %v524_v3, %v58_v17  ;;  %v559_v21 = vsub.f32 %v535_v7, %v60_v19 }
  0x97   :  { %v50_v22 = vpop.xlane.xlu0 %49  ;;  %v56_v24 = vpop.xlane.xlu1 %55 }
  0x98   :  { %v59_v23 = vmul.f32 0.015625, %v50_v22  ;;  %v66_v25 = vmul.f32 %v556_v20, %v556_v20  ;;  %v61_v26 = vmul.f32 0.015625, %v56_v24  ;;  %v68_v27 = vmul.f32 %v559_v21, %v559_v21  ;;  %v412_v22 = vld [vmem:[%s821_s3] ss:$0 sm:$0xff] }
  0x9a   :  { %v566_v28 = vsub.f32 %v537_v8, %v59_v23  ;;  %v70_v29 = vsel %vm44_vm0, %v66_v25, 0.0  ;;  %v570_v30 = vsub.f32 %v547_v12, %v61_v26  ;;  %v76_v31 = vsel %vm44_vm0, %v68_v27, 0.0 }
  0x9b   :  { %71 = vadd.xlane.f32.xlu0 %v70_v29 }
  0x9c   :  { %v67_v32 = vmul.f32 %v566_v28, %v566_v28  ;;  %v69_v33 = vmul.f32 %v570_v30, %v570_v30 }
  0x9e   :  { %v73_v34 = vsel %vm44_vm0, %v67_v32, 0.0  ;;  %v79_v35 = vsel %vm44_vm0, %v69_v33, 0.0 }
  0x9f   :  { %77 = vadd.xlane.f32.xlu0 %v76_v31  ;;  %74 = vadd.xlane.f32.xlu1 %v73_v34 }
  0xa3   :  { %80 = vadd.xlane.f32.xlu1 %v79_v35  ;;  %v303_v35 = vld [vmem:[%s822_s6 + $0x80] sm:$0xff] }
 0x128   :  { %v72_v61 = vpop.xlane.xlu0 %71 }
 0x129   :  { %v82_v62 = vmul.f32 0.015625, %v72_v61  ;;  %v296_v61 = vld [vmem:[%s822_s6 + $0x48] sm:$0xff] }
 0x12b   :  { %v86_v63 = vadd.f32 1e-05, %v82_v62 }
 0x12c   :  { %v75_v0 = vpop.xlane.xlu1 %74  ;;  %v78_v1 = vpop.xlane.xlu0 %77 }
 0x12d   :  { %445 = vrsqrt.f32 %v86_v63  ;;  %v83_v2 = vmul.f32 0.015625, %v75_v0  ;;  %v84_v4 = vmul.f32 0.015625, %v78_v1  ;;  %v313_v63 = vld [vmem:[%s822_s6 + $0xd0] sm:$0xff]  ;;  %v314_v0 = vld [vmem:[%s822_s6 + $0xd8] sm:$0xff] }
 0x12e   :  { %v336_v1 = vpack.c.bf16 %v314_v0, %v313_v63 }
 0x12f   :  { %v87_v5 = vadd.f32 1e-05, %v83_v2  ;;  %v88_v6 = vadd.f32 1e-05, %v84_v4  ;;  %v297_v2 = vld [vmem:[%s822_s6 + $0x50] sm:$0xff]  ;;  %v298_v4 = vld [vmem:[%s822_s6 + $0x58] sm:$0xff] }
 0x130   :  { %v81_v9 = vpop.xlane.xlu1 %80 }
 0x131   :  { %447 = vrsqrt.f32 %v87_v5  ;;  %v85_v10 = vmul.f32 0.015625, %v81_v9  ;;  %v328_v5 = vpack.c.bf16 %v298_v4, %v297_v2  ;;  %v316_v9 = vld [vmem:[%s822_s6 + $0xe8] sm:$0xff] }
 0x132   :  { %449 = vrsqrt.f32 %v88_v6  ;;  %v315_v6 = vld [vmem:[%s822_s6 + $0xe0] sm:$0xff] }
 0x133   :  { %v89_v11 = vadd.f32 1e-05, %v85_v10  ;;  %v299_v10 = vld [vmem:[%s822_s6 + $0x60] sm:$0xff] }
 0x135   :  { %451 = vrsqrt.f32 %v89_v11  ;;  %v337_v11 = vpack.c.bf16 %v316_v9, %v315_v6 }
 0x137   :  { %v446_v13 = vpop.eup %445 }
 0x138   :  { %v94_v14 = vmul.f32 %v446_v13, %v556_v20  ;;  %v300_v13 = vld [vmem:[%s822_s6 + $0x68] sm:$0xff] }
 0x13a   :  { %v104_v18 = vmul.f32 %v411_v15, %v94_v14  ;;  %v317_v14 = vld [vmem:[%s822_s6 + $0xf0] sm:$0xff] }
 0x13b   :  { %v448_v16 = vpop.eup %447 }
 0x13c   :  { %v95_v17 = vmul.f32 %v448_v16, %v566_v28  ;;  %v450_v19 = vpop.eup %449  ;;  %v114_v20 = vadd.f32 %v412_v22, %v104_v18  ;;  %v329_v16 = vpack.c.bf16 %v300_v13, %v299_v10  ;;  %v301_v18 = vld [vmem:[%s822_s6 + $0x70] sm:$0xff] }
 0x13d   :  { %v96_v25 = vmul.f32 %v450_v19, %v559_v21  ;;  %v304_v21 = vld [vmem:[%s822_s6 + $0x88] sm:$0xff]  ;;  %v302_v19 = vld [vmem:[%s822_s6 + $0x78] sm:$0xff] }
 0x13e   :  { %v105_v23 = vmul.f32 %v411_v15, %v95_v17 }
 0x13f   :  { %v452_v24 = vpop.eup %451  ;;  %v106_v32 = vmul.f32 %v411_v15, %v96_v25 }
 0x140   :  { %v97_v26 = vmul.f32 %v452_v24, %v570_v30  ;;  %v115_v27 = vadd.f32 %v412_v22, %v105_v23  ;;  %v331_v30 = vpack.c.bf16 %v304_v21, %v303_v35  ;;  %v146_v23 = vlaneseq }
 0x141   :  { %v116_v33 = vadd.f32 %v412_v22, %v106_v32 }
 0x142   :  { %v134_v29 = vpack.c.bf16 %v115_v27, %v114_v20  ;;  %v107_v31 = vmul.f32 %v411_v15, %v97_v26  ;;  %416 = vmatprep.subr.bf16.mxu1 %v331_v30  ;;  %v318_v15 = vld [vmem:[%s822_s6 + $0xf8] sm:$0xff]  ;;  %v147_v24 = vshrl.u32 %v146_v23, 7  ;;  %v144_v26 = vld [vmem:[%s823_s5] sm:$0x3] }
 0x143   :  { %417 = vmatpush3.bf16.msra.mxu1 %v323_v38  ;;  %v338_v17 = vpack.c.bf16 %v318_v15, %v317_v14 }
 0x144   :  { %413 = vmatmul.mubr.msk.bf16.vlgmr.msra.gmra.mrb[0].mxu0 %vm44_vm0, %v134_v29  ;;  %v117_v28 = vadd.f32 %v412_v22, %v107_v31  ;;  %418 = vmatprep.subr.bf16.mxu1 %v332_v41  ;;  %v330_v22 = vpack.c.bf16 %v302_v19, %v301_v18  ;;  %v148_v25 = vsub.s32 0, %v147_v24  ;;  %v152_v20 = vsub.s32 1, %v147_v24 }
 0x145   :  { %204 = vmatprep.mubr.bf16.mxu0 %v469_v60  ;;  %v295_v60 = vld [vmem:[%s822_s6 + $0x40] sm:$0xff] }
 0x146   :  { %v135_v34 = vpack.c.bf16 %v117_v28, %v116_v33  ;;  %v327_v62 = vpack.c.bf16 %v296_v61, %v295_v60  ;;  %v149_v27 = vrot.slane %v144_v26, %v148_v25  ;;  %v153_v29 = vrot.slane %v144_v26, %v152_v20 }
 0x147   :  { %419 = vmatpush3.bf16.msra.mxu1 %v324_v44 }
 0x148   :  { %420 = vmatprep.subr.bf16.mxu1 %v333_v47 }
 0x14b   :  { %421 = vmatpush3.bf16.msra.mxu1 %v325_v50 }
 0x14c   :  { %414 = vmatmul.mubr.msk.bf16.gmra.mrb[4].mxu0 %vm44_vm0, %v135_v34  ;;  %422 = vmatprep.subr.bf16.mxu1 %v334_v53 }
 0x14f   :  { %423 = vmatpush3.bf16.msra.mxu1 %v326_v56 }
 0x150   :  { %424 = vmatprep.subr.bf16.mxu1 %v335_v59 }
 0x153   :  { %425 = vmatpush3.bf16.msra.mxu1 %v327_v62 }
 0x154   :  { %426 = vmatprep.subr.bf16.mxu1 %v336_v1 }
 0x157   :  { %427 = vmatpush3.bf16.msra.mxu1 %v328_v5 }
 0x158   :  { %428 = vmatprep.subr.bf16.mxu1 %v337_v11 }
 0x15b   :  { %429 = vmatpush3.bf16.msra.mxu1 %v329_v16 }
 0x15c   :  { %430 = vmatprep.subr.bf16.mxu1 %v338_v17 }
 0x15f   :  { %431 = vmatpush3.bf16.msra.mxu1 %v330_v22 }
 0x217   :  { %v196_v31 = vpop.f32.mrb[0].mxu0 }
 0x218   :  { %v738_v32 = vadd.f32 %v196_v31, %v149_v27  ;;  %v198_v28 = vpop.f32.mrb[1].mxu0 }
 0x219   :  { %v740_v33 = vadd.f32 %v198_v28, %v153_v29  ;;  %v200_v34 = vpop.f32.mrb[2].mxu0 }
 0x21a   :  { %v215_v35 = vmul.f32 %v738_v32, %v738_v32  ;;  %v744_v21 = vadd.f32 %v200_v34, %v149_v27  ;;  %v202_v30 = vpop.f32.mrb[3].mxu0 }
 0x21b   :  { %v216_v36 = vmul.f32 %v740_v33, %v740_v33  ;;  %v748_v37 = vadd.f32 %v202_v30, %v153_v29 }
 0x21c   :  { %v223_v38 = vmul.f32 %v215_v35, %v738_v32  ;;  %v217_v39 = vmul.f32 %v744_v21, %v744_v21 }
 0x21d   :  { %v224_v40 = vmul.f32 %v216_v36, %v740_v33  ;;  %v218_v41 = vmul.f32 %v748_v37, %v748_v37 }
 0x21e   :  { %v231_v42 = vmul.f32 0.044715, %v223_v38  ;;  %v225_v43 = vmul.f32 %v217_v39, %v744_v21 }
 0x21f   :  { %v232_v44 = vmul.f32 0.044715, %v224_v40  ;;  %v226_v45 = vmul.f32 %v218_v41, %v748_v37  ;;  %v206_v46 = vpop.f32.mrb[4].mxu0 }
 0x220   :  { %v239_v47 = vadd.f32 %v231_v42, %v738_v32  ;;  %v233_v48 = vmul.f32 0.044715, %v225_v43  ;;  %v759_v49 = vadd.f32 %v206_v46, %v149_v27  ;;  %v208_v50 = vpop.f32.mrb[5].mxu0 }
 0x221   :  { %v234_v51 = vmul.f32 0.044715, %v226_v45  ;;  %v761_v52 = vadd.f32 %v208_v50, %v153_v29  ;;  %v210_v53 = vpop.f32.mrb[6].mxu0  ;;  %v240_v54 = vadd.f32 %v232_v44, %v740_v33 }
 0x222   :  { %v247_v55 = vmul.f32 0.7978846, %v239_v47  ;;  %v241_v56 = vadd.f32 %v233_v48, %v744_v21  ;;  %v219_v57 = vmul.f32 %v759_v49, %v759_v49  ;;  %v767_v58 = vadd.f32 %v210_v53, %v149_v27  ;;  %v212_v59 = vpop.f32.mrb[7].mxu0 }
 0x223   :  { %v220_v60 = vmul.f32 %v761_v52, %v761_v52  ;;  %v771_v61 = vadd.f32 %v212_v59, %v153_v29  ;;  %v242_v62 = vadd.f32 %v234_v51, %v748_v37  ;;  %v248_v63 = vmul.f32 0.7978846, %v240_v54 }
 0x224   :  { %453 = vtanh.f32 %v247_v55  ;;  %v249_v0 = vmul.f32 0.7978846, %v241_v56  ;;  %v227_v1 = vmul.f32 %v219_v57, %v759_v49  ;;  %v221_v2 = vmul.f32 %v767_v58, %v767_v58 }
 0x225   :  { %v228_v4 = vmul.f32 %v220_v60, %v761_v52  ;;  %v222_v5 = vmul.f32 %v771_v61, %v771_v61  ;;  %v250_v6 = vmul.f32 0.7978846, %v242_v62  ;;  %455 = vtanh.f32 %v248_v63 }
 0x226   :  { %457 = vtanh.f32 %v249_v0  ;;  %v235_v9 = vmul.f32 0.044715, %v227_v1  ;;  %v229_v10 = vmul.f32 %v221_v2, %v767_v58 }
 0x227   :  { %v236_v11 = vmul.f32 0.044715, %v228_v4  ;;  %v230_v13 = vmul.f32 %v222_v5, %v771_v61  ;;  %459 = vtanh.f32 %v250_v6  ;;  %v415_v5 = vld [vmem:[%s824_s7] ss:$0 sm:$0xff] }
 0x228   :  { %v243_v14 = vadd.f32 %v235_v9, %v759_v49  ;;  %v237_v15 = vmul.f32 0.044715, %v229_v10 }
 0x229   :  { %v244_v16 = vadd.f32 %v236_v11, %v761_v52  ;;  %v238_v17 = vmul.f32 0.044715, %v230_v13 }
 0x22a   :  { %v251_v18 = vmul.f32 0.7978846, %v243_v14  ;;  %v245_v19 = vadd.f32 %v237_v15, %v767_v58 }
 0x22b   :  { %v252_v22 = vmul.f32 0.7978846, %v244_v16  ;;  %v246_v23 = vadd.f32 %v238_v17, %v771_v61 }
 0x22c   :  { %461 = vtanh.f32 %v251_v18  ;;  %v253_v24 = vmul.f32 0.7978846, %v245_v19 }
 0x22d   :  { %463 = vtanh.f32 %v252_v22  ;;  %v254_v25 = vmul.f32 0.7978846, %v246_v23 }
 0x22e   :  { %v454_v26 = vpop.eup %453  ;;  %465 = vtanh.f32 %v253_v24 }
 0x22f   :  { %v456_v20 = vpop.eup %455  ;;  %467 = vtanh.f32 %v254_v25  ;;  %v263_v27 = vadd.f32 1.0, %v454_v26 }
 0x230   :  { %v458_v29 = vpop.eup %457  ;;  %v264_v31 = vadd.f32 1.0, %v456_v20 }
 0x231   :  { %v460_v28 = vpop.eup %459  ;;  %v265_v34 = vadd.f32 1.0, %v458_v29  ;;  %v271_v35 = vmul.f32 0.5, %v263_v27 }
 0x232   :  { %v266_v30 = vadd.f32 1.0, %v460_v28  ;;  %v272_v36 = vmul.f32 0.5, %v264_v31 }
 0x233   :  { %v273_v38 = vmul.f32 0.5, %v265_v34  ;;  %v279_v40 = vmul.f32 %v271_v35, %v738_v32 }
 0x234   :  { %v274_v39 = vmul.f32 0.5, %v266_v30  ;;  %v280_v43 = vmul.f32 %v272_v36, %v740_v33 }
 0x235   :  { %v281_v41 = vmul.f32 %v273_v38, %v744_v21 }
 0x236   :  { %v462_v42 = vpop.eup %461  ;;  %v282_v44 = vmul.f32 %v274_v39, %v748_v37 }
 0x237   :  { %v464_v45 = vpop.eup %463  ;;  %v319_v46 = vpack.c.bf16 %v281_v41, %v279_v40  ;;  %v267_v47 = vadd.f32 1.0, %v462_v42 }
 0x238   :  { %v466_v48 = vpop.eup %465  ;;  %v320_v50 = vpack.c.bf16 %v282_v44, %v280_v43  ;;  %v268_v51 = vadd.f32 1.0, %v464_v45 }
 0x239   :  { %v468_v53 = vpop.eup %467  ;;  %v269_v54 = vadd.f32 1.0, %v466_v48  ;;  %v275_v55 = vmul.f32 0.5, %v267_v47 }
 0x23a   :  { %371 = vmatprep.mubr.bf16.mxu1 %v320_v50  ;;  %v270_v56 = vadd.f32 1.0, %v468_v53  ;;  %v276_v57 = vmul.f32 0.5, %v268_v51 }
 0x23b   :  { %372 = vmatmul.mubr.bf16.vlgmr.msra.gmra.mrb[0].mxu1 %v319_v46  ;;  %v277_v32 = vmul.f32 0.5, %v269_v54  ;;  %v283_v59 = vmul.f32 %v275_v55, %v759_v49 }
 0x23c   :  { %v278_v21 = vmul.f32 0.5, %v270_v56  ;;  %v284_v37 = vmul.f32 %v276_v57, %v761_v52 }
 0x23d   :  { %v285_v33 = vmul.f32 %v277_v32, %v767_v58 }
 0x23e   :  { %v286_v60 = vmul.f32 %v278_v21, %v771_v61 }
 0x23f   :  { %v321_v62 = vpack.c.bf16 %v285_v33, %v283_v59 }
 0x240   :  { %v322_v63 = vpack.c.bf16 %v286_v60, %v284_v37 }
 0x242   :  { %379 = vmatprep.mubr.bf16.mxu1 %v322_v63 }
 0x243   :  { %380 = vmatmul.mubr.bf16.gmra.mrb[4].mxu1 %v321_v62 }
 0x30e   :  { %v432_v0 = vpop.f32.mrb[0].mxu1 }
 0x30f   :  { %v433_v1 = vpop.f32.mrb[1].mxu1 }
 0x310   :  { %v434_v2 = vadd.f32 %v433_v1, %v432_v0  ;;  %v435_v4 = vpop.f32.mrb[2].mxu1 }
 0x311   :  { %v436_v6 = vpop.f32.mrb[3].mxu1 }
 0x312   :  { %v388_v49 = vadd.f32 %v434_v2, %v524_v3  ;;  %v437_v58 = vadd.f32 %v436_v6, %v435_v4 }
 0x314   :  { %v399_v9 = vadd.f32 %v415_v5, %v388_v49  ;;  %v389_v52 = vadd.f32 %v437_v58, %v537_v8 }
 0x316   :  { %403 = vst.msk [vmem:[%s825_s8] sm:$0xff] %vm44_vm0, %v399_v9  ;;  %v400_v61 = vadd.f32 %v415_v5, %v389_v52  ;;  %v438_v10 = vpop.f32.mrb[4].mxu1 }
 0x317   :  { %v439_v11 = vpop.f32.mrb[5].mxu1 }
 0x318   :  { %404 = vst.msk [vmem:[%s825_s8 + $0x8] sm:$0xff] %vm44_vm0, %v400_v61  ;;  %v440_v13 = vadd.f32 %v439_v11, %v438_v10  ;;  %v441_v14 = vpop.f32.mrb[6].mxu1 }
 0x319   :  { %v442_v3 = vpop.f32.mrb[7].mxu1 }
 0x31a   :  { %v390_v15 = vadd.f32 %v440_v13, %v535_v7  ;;  %v443_v16 = vadd.f32 %v442_v3, %v441_v14 }
 0x31c   :  { %v401_v8 = vadd.f32 %v415_v5, %v390_v15  ;;  %v391_v17 = vadd.f32 %v443_v16, %v547_v12 }
 0x31e   :  { %405 = vst.msk [vmem:[%s825_s8 + $0x10] sm:$0xff] %vm44_vm0, %v401_v8  ;;  %v402_v18 = vadd.f32 %v415_v5, %v391_v17 }
 0x320   :  { %406 = vst.msk [vmem:[%s825_s8 + $0x18] sm:$0xff] %vm44_vm0, %v402_v18 }

// kernel: swin_for_iqa_forward.17
= control target key start
LH: loop header
LB: loop body
LE: loop exit
PB: predicated region body
PF: predicated region fallthrough
CT: control target
= control target key end

     0   :  { %vm36_vm0 = vcmask 523264   ;;  %v1650_v52 = vmov 0   ;;  %vm1652_vm1 = vmmov 0   ;;  %vm212_vm2 = vcmask 130048   ;;  %s1654_s28 = smov 48   ;;  %s1655_s29 = smov 112   ;;  %s2084_s0 = inlined_call_operand.vmem [shape: f32[2,16,64], index: 0, kind: input, shape index: {}]   ;;  %s2085_s3 = inlined_call_operand.vmem [shape: f32[64,192], index: 3, kind: input, shape index: {}]   ;;  %s2086_s1 = inlined_call_operand.vmem [shape: f32[1,64], index: 1, kind: input, shape index: {}]   ;;  %s2087_s2 = inlined_call_operand.vmem [shape: f32[1,64], index: 2, kind: input, shape index: {}]   ;;  %s2088_s4 = inlined_call_operand.vmem [shape: f32[1,192], index: 4, kind: input, shape index: {}]   ;;  %s2089_s5 = inlined_call_operand.vmem [shape: f32[4,1,16,16], index: 5, kind: input, shape index: {}]   ;;  %s2090_s6 = inlined_call_operand.vmem [shape: f32[64,64], index: 6, kind: input, shape index: {}]   ;;  %s2091_s7 = inlined_call_operand.vmem [shape: f32[1,64], index: 7, kind: input, shape index: {}]   ;;  %s2092_s8 = inlined_call_operand.vmem [shape: f32[2,16,64], index: 8, kind: output, shape index: {}]  }
   0x1   :  { %v30_v0 = vld [vmem:[%s2084_s0] sm:$0xff]  ;;  %v32_v1 = vld [vmem:[%s2084_s0 + $0x10] sm:$0xff]  ;;  %v31_v2 = vld [vmem:[%s2084_s0 + $0x8] sm:$0xff]  ;;  %186 = vmatprep.mubr.bf16.mxu0 %v1650_v52  ;;  %s1656_s12 = smov 32   ;;  %s1658_s17 = smov 16   ;;  %vm1269_vm3 = vcmask 261120  }
   0x2   :  { %v37_v3 = vsel %vm36_vm0, %v30_v0, 0.0  ;;  %v43_v4 = vsel %vm36_vm0, %v32_v1, 0.0  ;;  %v33_v5 = vld [vmem:[%s2084_s0 + $0x18] sm:$0xff]  ;;  %v40_v6 = vsel %vm36_vm0, %v31_v2, 0.0  ;;  %v111_v28 = vld [vmem:[%s2085_s3 + $0x8] sm:$0xff]  ;;  %v110_v31 = vld [vmem:[%s2085_s3] sm:$0xff] }
   0x3   :  { %38 = vadd.xlane.f32.xlu0 %v37_v3  ;;  %44 = vadd.xlane.f32.xlu1 %v43_v4  ;;  %v46_v7 = vsel %vm36_vm0, %v33_v5, 0.0  ;;  %v113_v29 = vld [vmem:[%s2085_s3 + $0x18] sm:$0xff]  ;;  %v112_v32 = vld [vmem:[%s2085_s3 + $0x10] sm:$0xff]  ;;  %v115_v34 = vld [vmem:[%s2085_s3 + $0x28] sm:$0xff]  ;;  %s1657_s0 = smov 96   ;;  %s1659_s18 = smov 80  }
   0x4   :  { %v129_v30 = vpack.c.bf16 %v113_v29, %v111_v28  ;;  %v128_v33 = vpack.c.bf16 %v112_v32, %v110_v31  ;;  %v117_v35 = vld [vmem:[%s2085_s3 + $0x38] sm:$0xff]  ;;  %v114_v37 = vld [vmem:[%s2085_s3 + $0x20] sm:$0xff]  ;;  %v116_v38 = vld [vmem:[%s2085_s3 + $0x30] sm:$0xff]  ;;  %vm1274_vm4 = vcmask 392192  }
   0x5   :  { %v131_v36 = vpack.c.bf16 %v117_v35, %v115_v34  ;;  %v130_v39 = vpack.c.bf16 %v116_v38, %v114_v37  ;;  %v119_v40 = vld [vmem:[%s2085_s3 + $0x48] sm:$0xff]  ;;  %v121_v41 = vld [vmem:[%s2085_s3 + $0x58] sm:$0xff]  ;;  %v118_v43 = vld [vmem:[%s2085_s3 + $0x40] sm:$0xff] }
   0x6   :  { %154 = vmatprep.subr.bf16.mxu0 %v129_v30  ;;  %v133_v42 = vpack.c.bf16 %v121_v41, %v119_v40  ;;  %v120_v44 = vld [vmem:[%s2085_s3 + $0x50] sm:$0xff]  ;;  %v123_v46 = vld [vmem:[%s2085_s3 + $0x68] sm:$0xff]  ;;  %v125_v47 = vld [vmem:[%s2085_s3 + $0x78] sm:$0xff] }
   0x7   :  { %41 = vadd.xlane.f32.xlu0 %v40_v6  ;;  %47 = vadd.xlane.f32.xlu1 %v46_v7  ;;  %v132_v45 = vpack.c.bf16 %v120_v44, %v118_v43  ;;  %v135_v48 = vpack.c.bf16 %v125_v47, %v123_v46  ;;  %v122_v49 = vld [vmem:[%s2085_s3 + $0x60] sm:$0xff]  ;;  %v124_v50 = vld [vmem:[%s2085_s3 + $0x70] sm:$0xff] }
   0x8   :  { %155 = vmatpush1.bf16.msra.mxu0 %v128_v33  ;;  %v134_v51 = vpack.c.bf16 %v124_v50, %v122_v49  ;;  %v1363_v3 = vld [vmem:[%s2086_s1] ss:$0 sm:$0xff] }
   0x9   :  { %156 = vmatprep.subr.bf16.mxu0 %v131_v36 }
   0xc   :  { %157 = vmatpush1.bf16.msra.mxu0 %v130_v39 }
   0xd   :  { %158 = vmatprep.subr.bf16.mxu0 %v133_v42 }
  0x10   :  { %159 = vmatpush1.bf16.msra.mxu0 %v132_v45 }
  0x11   :  { %160 = vmatprep.subr.bf16.mxu0 %v135_v48 }
  0x14   :  { %161 = vmatpush1.bf16.msra.mxu0 %v134_v51 }
  0x90   :  { %v39_v8 = vpop.xlane.xlu0 %38  ;;  %v45_v9 = vpop.xlane.xlu1 %44 }
  0x91   :  { %v50_v10 = vmul.f32 0.015625, %v39_v8  ;;  %v52_v11 = vmul.f32 0.015625, %v45_v9  ;;  %v1364_v8 = vld [vmem:[%s2087_s2] ss:$0 sm:$0xff] }
  0x93   :  { %v1721_v12 = vsub.f32 %v30_v0, %v50_v10  ;;  %v1723_v13 = vsub.f32 %v32_v1, %v52_v11 }
  0x94   :  { %v42_v14 = vpop.xlane.xlu0 %41  ;;  %v48_v15 = vpop.xlane.xlu1 %47 }
  0x95   :  { %v51_v16 = vmul.f32 0.015625, %v42_v14  ;;  %v53_v17 = vmul.f32 0.015625, %v48_v15  ;;  %v58_v18 = vmul.f32 %v1721_v12, %v1721_v12  ;;  %v60_v19 = vmul.f32 %v1723_v13, %v1723_v13 }
  0x97   :  { %v1729_v20 = vsub.f32 %v31_v2, %v51_v16  ;;  %v1731_v21 = vsub.f32 %v33_v5, %v53_v17  ;;  %v62_v22 = vsel %vm36_vm0, %v58_v18, 0.0  ;;  %v68_v23 = vsel %vm36_vm0, %v60_v19, 0.0 }
  0x98   :  { %63 = vadd.xlane.f32.xlu0 %v62_v22 }
  0x99   :  { %v59_v24 = vmul.f32 %v1729_v20, %v1729_v20  ;;  %v61_v25 = vmul.f32 %v1731_v21, %v1731_v21 }
  0x9b   :  { %v65_v26 = vsel %vm36_vm0, %v59_v24, 0.0  ;;  %v71_v27 = vsel %vm36_vm0, %v61_v25, 0.0  ;;  %v136_v25 = vld [vmem:[%s2088_s4] sm:$0x3]  ;;  %s1653_s4 = smov 64  }
  0x9c   :  { %69 = vadd.xlane.f32.xlu0 %v68_v23  ;;  %66 = vadd.xlane.f32.xlu1 %v65_v26  ;;  %v1651_v23 = vmov 0.0  }
  0x9d   :  { %1448 = vmatprep.subr.bf16.mxu0 %v1651_v23  ;;  %1430 = vmatprep.subr.bf16.mxu1 %v1651_v23 }
  0x9e   :  { %1432 = vmatprep.mubr.msk.bf16.mxu1 %vm1652_vm1, %v1651_v23 }
  0xa0   :  { %72 = vadd.xlane.f32.xlu1 %v71_v27 }
 0x125   :  { %v64_v53 = vpop.xlane.xlu0 %63 }
 0x126   :  { %v74_v54 = vmul.f32 0.015625, %v64_v53 }
 0x128   :  { %v78_v55 = vadd.f32 1e-05, %v74_v54  ;;  %v314_v54 = vld [vmem:[%s2089_s5] sm:$0xff] }
 0x129   :  { %v67_v56 = vpop.xlane.xlu1 %66  ;;  %v70_v57 = vpop.xlane.xlu0 %69 }
 0x12a   :  { %1578 = vrsqrt.f32 %v78_v55  ;;  %v75_v58 = vmul.f32 0.015625, %v67_v56  ;;  %v76_v59 = vmul.f32 0.015625, %v70_v57 }
 0x12c   :  { %v79_v60 = vadd.f32 1e-05, %v75_v58  ;;  %v80_v61 = vadd.f32 1e-05, %v76_v59  ;;  %v315_v58 = vld [vmem:[%s2089_s5 + $0x8] sm:$0xff] }
 0x12d   :  { %v73_v62 = vpop.xlane.xlu1 %72 }
 0x12e   :  { %1580 = vrsqrt.f32 %v79_v60  ;;  %v77_v63 = vmul.f32 0.015625, %v73_v62 }
 0x12f   :  { %1582 = vrsqrt.f32 %v80_v61 }
 0x130   :  { %v81_v0 = vadd.f32 1e-05, %v77_v63 }
 0x132   :  { %1584 = vrsqrt.f32 %v81_v0 }
 0x134   :  { %v1579_v1 = vpop.eup %1578 }
 0x135   :  { %v86_v2 = vmul.f32 %v1579_v1, %v1721_v12 }
 0x137   :  { %v96_v6 = vmul.f32 %v1363_v3, %v86_v2 }
 0x138   :  { %v1581_v4 = vpop.eup %1580 }
 0x139   :  { %v87_v5 = vmul.f32 %v1581_v4, %v1729_v20  ;;  %v1583_v7 = vpop.eup %1582  ;;  %v106_v12 = vadd.f32 %v1364_v8, %v96_v6 }
 0x13a   :  { %v88_v11 = vmul.f32 %v1583_v7, %v1723_v13  ;;  %v138_v13 = vlaneseq }
 0x13b   :  { %v97_v9 = vmul.f32 %v1363_v3, %v87_v5 }
 0x13c   :  { %v1585_v10 = vpop.eup %1584  ;;  %v98_v18 = vmul.f32 %v1363_v3, %v88_v11 }
 0x13d   :  { %v89_v14 = vmul.f32 %v1585_v10, %v1731_v21  ;;  %v107_v15 = vadd.f32 %v1364_v8, %v97_v9  ;;  %v139_v21 = vshrl.u32 %v138_v13, 7 }
 0x13e   :  { %v108_v20 = vadd.f32 %v1364_v8, %v98_v18 }
 0x13f   :  { %v126_v16 = vpack.c.bf16 %v107_v15, %v106_v12  ;;  %v99_v17 = vmul.f32 %v1363_v3, %v89_v14  ;;  %v144_v24 = vsub.s32 1, %v139_v21  ;;  %v140_v26 = vsub.s32 0, %v139_v21 }
 0x141   :  { %1365 = vmatmul.mubr.msk.bf16.vlgmr.msra.gmra.mrb[0].mxu0 %vm36_vm0, %v126_v16  ;;  %v109_v19 = vadd.f32 %v1364_v8, %v99_v17  ;;  %v145_v27 = vrot.slane %v136_v25, %v144_v24  ;;  %v141_v28 = vrot.slane %v136_v25, %v140_v26 }
 0x142   :  { %196 = vmatprep.mubr.bf16.mxu0 %v1650_v52 }
 0x143   :  { %v127_v22 = vpack.c.bf16 %v109_v19, %v108_v20 }
 0x149   :  { %1366 = vmatmul.mubr.msk.bf16.gmra.mrb[4].mxu0 %vm36_vm0, %v127_v22 }
 0x14a   :  { %1450 = vmatprep.mubr.msk.bf16.mxu0 %vm1652_vm1, %v1651_v23 }
 0x214   :  { %v188_v29 = vpop.f32.mrb[0].mxu0 }
 0x215   :  { %v190_v30 = vpop.f32.mrb[1].mxu0  ;;  %v189_v33 = vadd.f32 %v188_v29, %v141_v28 }
 0x216   :  { %v191_v31 = vadd.f32 %v190_v30, %v145_v27  ;;  %v192_v32 = vpop.f32.mrb[2].mxu0 }
 0x217   :  { %v193_v34 = vadd.f32 %v192_v32, %v141_v28  ;;  %v194_v35 = vpop.f32.mrb[3].mxu0 }
 0x218   :  { %v195_v36 = vadd.f32 %v194_v35, %v145_v27 }
 0x219   :  { %v1810_v37 = vpack.c.bf16 %v193_v34, %v189_v33 }
 0x21a   :  { %v1812_v38 = vpack.c.bf16 %v195_v36, %v191_v31 }
 0x21b   :  { %210 = vrot.lane.b32.xlu0 %v1810_v37, %s1653_s4 }
 0x21c   :  { %v198_v39 = vpop.f32.mrb[4].mxu0 }
 0x21d   :  { %v200_v40 = vpop.f32.mrb[5].mxu0  ;;  %v199_v42 = vadd.f32 %v198_v39, %v141_v28 }
 0x21e   :  { %v202_v41 = vpop.f32.mrb[6].mxu0  ;;  %v201_v45 = vadd.f32 %v200_v40, %v145_v27 }
 0x21f   :  { %v203_v43 = vadd.f32 %v202_v41, %v141_v28  ;;  %v204_v44 = vpop.f32.mrb[7].mxu0 }
 0x220   :  { %v205_v46 = vadd.f32 %v204_v44, %v145_v27 }
 0x221   :  { %v1815_v47 = vpack.c.bf16 %v203_v43, %v199_v42 }
 0x222   :  { %v1817_v48 = vpack.c.bf16 %v205_v46, %v201_v45 }
 0x223   :  { %261 = vrot.lane.b32.xlu1 %v1815_v47, %s1653_s4 }
 0x224   :  { %1449 = vmatpush3.bf16.msra.mxu0 %v1817_v48 }
 0x225   :  { %1460 = vmatprep.subr.bf16.mxu0 %v1651_v23 }
 0x28d   :  { %v211_v49 = vpop.permute.xlu0 %210 }
 0x28e   :  { %v217_v50 = vsel %vm212_vm2, %v211_v49, 0 }
 0x28f   :  { %1431 = vmatpush3.bf16.xpose.msra.mxu1 %v217_v50 }
 0x290   :  { %1436 = vmatprep.subr.bf16.mxu1 %v1651_v23 }
 0x295   :  { %v262_v51 = vpop.permute.xlu1 %261 }
 0x296   :  { %v267_v52 = vsel %vm212_vm2, %v262_v51, 0  ;;  %1433 = vmatmul.mubr.msk.bf16.vlgmr.msra.gmra.mrb[0].mxu1 %vm212_vm2, %v1810_v37 }
 0x297   :  { %1437 = vmatpush3.bf16.xpose.msra.mxu1 %v267_v52  ;;  %1438 = vmatprep.mubr.msk.bf16.mxu1 %vm1652_vm1, %v1651_v23 }
 0x298   :  { %1442 = vmatprep.subr.bf16.mxu1 %v1651_v23 }
 0x29e   :  { %1439 = vmatmul.mubr.msk.bf16.vlgmr.msra.gmra.mrb[4].mxu1 %vm212_vm2, %v1815_v47 }
 0x29f   :  { %1443 = vmatpush3.bf16.msra.mxu1 %v1812_v38  ;;  %1444 = vmatprep.mubr.msk.bf16.mxu1 %vm1652_vm1, %v1651_v23 }
 0x2a0   :  { %1454 = vmatprep.subr.bf16.mxu1 %v1651_v23 }
 0x369   :  { %v253_v53 = vpop.f32.mrb[0].mxu1 }
 0x36a   :  { %v310_v55 = vmul.f32 0.25, %v253_v53  ;;  %v1434_v56 = vpop.f32.mrb[1].mxu1 }
 0x36b   :  { %v256_v57 = vpop.f32.mrb[2].mxu1 }
 0x36c   :  { %v311_v59 = vmul.f32 0.25, %v256_v57  ;;  %v1435_v60 = vpop.f32.mrb[3].mxu1  ;;  %v316_v61 = vadd.f32 %v314_v54, %v310_v55 }
 0x36e   :  { %v320_v62 = vsel %vm212_vm2, %v316_v61, -inf  ;;  %v317_v63 = vadd.f32 %v315_v58, %v311_v59 }
 0x36f   :  { %321 = vmax.xlane.f32.xlu1 %v320_v62 }
 0x370   :  { %v323_v0 = vsel %vm212_vm2, %v317_v63, -inf }
 0x371   :  { %324 = vmax.xlane.f32.xlu0 %v323_v0  ;;  %v303_v1 = vpop.f32.mrb[4].mxu1 }
 0x372   :  { %v312_v2 = vmul.f32 0.25, %v303_v1  ;;  %v1440_v3 = vpop.f32.mrb[5].mxu1  ;;  %v1374_v1 = vld [vmem:[%s2089_s5 + $0x18] sm:$0xff] }
 0x373   :  { %v306_v4 = vpop.f32.mrb[6].mxu1 }
 0x374   :  { %v313_v5 = vmul.f32 0.25, %v306_v4  ;;  %v1441_v6 = vpop.f32.mrb[7].mxu1  ;;  %v318_v7 = vadd.f32 %v314_v54, %v312_v2 }
 0x376   :  { %v326_v8 = vsel %vm212_vm2, %v318_v7, -inf  ;;  %v319_v9 = vadd.f32 %v315_v58, %v313_v5 }
 0x377   :  { %327 = vmax.xlane.f32.xlu0 %v326_v8 }
 0x378   :  { %v329_v10 = vsel %vm212_vm2, %v319_v9, -inf }
 0x379   :  { %330 = vmax.xlane.f32.xlu1 %v329_v10 }
 0x3fc   :  { %v322_v11 = vpop.xlane.xlu1 %321 }
 0x3fd   :  { %v332_v14 = vsub.f32 %v316_v61, %v322_v11  ;;  %v1373_v61 = vld [vmem:[%s2089_s5 + $0x10] sm:$0xff] }
 0x3fe   :  { %v325_v12 = vpop.xlane.xlu0 %324 }
 0x3ff   :  { %v336_v15 = vmul.f32 1.442695, %v332_v14  ;;  %v333_v16 = vsub.f32 %v317_v63, %v325_v12 }
 0x401   :  { %1586 = vpow2.f32 %v336_v15  ;;  %v338_v17 = vmul.f32 1.442695, %v333_v16 }
 0x403   :  { %1588 = vpow2.f32 %v338_v17 }
 0x404   :  { %v328_v18 = vpop.xlane.xlu0 %327 }
 0x405   :  { %v334_v19 = vsub.f32 %v318_v7, %v328_v18 }
 0x406   :  { %v331_v27 = vpop.xlane.xlu1 %330 }
 0x407   :  { %v340_v20 = vmul.f32 1.442695, %v334_v19  ;;  %v335_v28 = vsub.f32 %v319_v9, %v331_v27 }
 0x409   :  { %1590 = vpow2.f32 %v340_v20  ;;  %v342_v29 = vmul.f32 1.442695, %v335_v28 }
 0x40b   :  { %v1587_v22 = vpop.eup %1586  ;;  %1592 = vpow2.f32 %v342_v29 }
 0x40c   :  { %v344_v13 = vsel %vm212_vm2, %v1587_v22, 0.0 }
 0x40d   :  { %v1589_v21 = vpop.eup %1588  ;;  %345 = vadd.xlane.f32.xlu0 %v344_v13 }
 0x40e   :  { %v347_v24 = vsel %vm212_vm2, %v1589_v21, 0.0 }
 0x40f   :  { %348 = vadd.xlane.f32.xlu1 %v347_v24 }
 0x413   :  { %v1591_v25 = vpop.eup %1590 }
 0x414   :  { %v350_v26 = vsel %vm212_vm2, %v1591_v25, 0.0 }
 0x415   :  { %351 = vadd.xlane.f32.xlu0 %v350_v26  ;;  %v1593_v30 = vpop.eup %1592 }
 0x416   :  { %v353_v31 = vsel %vm212_vm2, %v1593_v30, 0.0 }
 0x420   :  { %509 = vrot.lane.b32.xlu1 %v1815_v47, %s1654_s28 }
 0x42b   :  { %458 = vrot.lane.b32.xlu0 %v1810_v37, %s1654_s28 }
 0x444   :  { %354 = vadd.xlane.f32.xlu1 %v353_v31 }
 0x455   :  { %456 = vrot.lane.b32.xlu1 %v1810_v37, %s1655_s29 }
 0x459   :  { %507 = vrot.lane.b32.xlu1 %v1815_v47, %s1655_s29 }
 0x49a   :  { %v346_v32 = vpop.xlane.xlu0 %345 }
 0x49b   :  { %1594 = vrcp.f32 %v346_v32 }
 0x49c   :  { %v349_v33 = vpop.xlane.xlu1 %348 }
 0x49d   :  { %1596 = vrcp.f32 %v349_v33 }
 0x4a0   :  { %v510_v44 = vpop.permute.xlu1 %509 }
 0x4a1   :  { %v515_v54 = vsel %vm212_vm2, %v510_v44, 0 }
 0x4a2   :  { %v352_v34 = vpop.xlane.xlu0 %351 }
 0x4a3   :  { %1598 = vrcp.f32 %v352_v34 }
 0x4a5   :  { %v1595_v35 = vpop.eup %1594 }
 0x4a6   :  { %v360_v39 = vmul.f32 %v1595_v35, %v1587_v22  ;;  %v459_v41 = vpop.permute.xlu0 %458 }
 0x4a7   :  { %v1597_v36 = vpop.eup %1596  ;;  %v464_v43 = vsel %vm212_vm2, %v459_v41, 0 }
 0x4a8   :  { %v361_v40 = vmul.f32 %v1597_v36, %v1589_v21 }
 0x4aa   :  { %v364_v42 = vpack.c.bf16 %v361_v40, %v360_v39 }
 0x4ac   :  { %1445 = vmatmul.mubr.msk.bf16.vlgmr.msra.gmra.mrb[8].mxu1 %vm212_vm2, %v364_v42 }
 0x4ad   :  { %1455 = vmatpush3.bf16.xpose.msra.mxu1 %v464_v43  ;;  %1456 = vmatprep.mubr.msk.bf16.mxu1 %vm1652_vm1, %v1651_v23  ;;  %v1599_v49 = vpop.eup %1598 }
 0x4ae   :  { %1466 = vmatprep.subr.bf16.mxu1 %v1651_v23  ;;  %v362_v51 = vmul.f32 %v1599_v49, %v1591_v25 }
 0x4d1   :  { %v355_v45 = vpop.xlane.xlu1 %354 }
 0x4d2   :  { %1600 = vrcp.f32 %v355_v45 }
 0x4d5   :  { %v457_v46 = vpop.permute.xlu1 %456 }
 0x4d6   :  { %1457 = vmatmul.mubr.msk.bf16.vlgmr.msra.gmra.mrb[12].mxu1 %vm212_vm2, %v457_v46 }
 0x4d7   :  { %1468 = vmatprep.mubr.msk.bf16.mxu1 %vm1652_vm1, %v1651_v23 }
 0x4d9   :  { %v508_v55 = vpop.permute.xlu1 %507 }
 0x4dc   :  { %v1601_v50 = vpop.eup %1600 }
 0x4dd   :  { %v363_v52 = vmul.f32 %v1601_v50, %v1593_v30 }
 0x4df   :  { %v365_v53 = vpack.c.bf16 %v363_v52, %v362_v51 }
 0x4e1   :  { %1451 = vmatmul.mubr.msk.bf16.vlgmr.msra.gmra.mrb[8].mxu0 %vm212_vm2, %v365_v53 }
 0x4e2   :  { %1461 = vmatpush3.bf16.xpose.msra.mxu0 %v515_v54  ;;  %1462 = vmatprep.mubr.msk.bf16.mxu0 %vm1652_vm1, %v1651_v23 }
 0x4e3   :  { %1472 = vmatprep.subr.bf16.mxu0 %v1651_v23 }
 0x4e9   :  { %1463 = vmatmul.mubr.msk.bf16.vlgmr.msra.gmra.mrb[12].mxu0 %vm212_vm2, %v508_v55 }
 0x4ea   :  { %1474 = vmatprep.mubr.msk.bf16.mxu0 %vm1652_vm1, %v1651_v23 }
 0x57f   :  { %v1874_v56 = vpop.f32.mrb[8].mxu1 }
 0x580   :  { %v1446_v57 = vpop.f32.mrb[9].mxu1 }
 0x581   :  { %v1876_v58 = vpop.f32.mrb[10].mxu1 }
 0x582   :  { %v1447_v59 = vpop.f32.mrb[11].mxu1 }
 0x5a9   :  { %v500_v60 = vpop.f32.mrb[12].mxu1 }
 0x5aa   :  { %v558_v62 = vmul.f32 0.25, %v500_v60  ;;  %v1458_v63 = vpop.f32.mrb[13].mxu1 }
 0x5ab   :  { %v503_v0 = vpop.f32.mrb[14].mxu1 }
 0x5ac   :  { %v559_v2 = vmul.f32 0.25, %v503_v0  ;;  %v1459_v3 = vpop.f32.mrb[15].mxu1  ;;  %v565_v4 = vadd.f32 %v1373_v61, %v558_v62 }
 0x5ae   :  { %v569_v5 = vsel %vm212_vm2, %v565_v4, -inf  ;;  %v566_v6 = vadd.f32 %v1374_v1, %v559_v2 }
 0x5af   :  { %570 = vmax.xlane.f32.xlu0 %v569_v5 }
 0x5b0   :  { %v572_v7 = vsel %vm212_vm2, %v566_v6, -inf }
 0x5b1   :  { %573 = vmax.xlane.f32.xlu1 %v572_v7 }
 0x5b4   :  { %v1886_v8 = vpop.f32.mrb[8].mxu0 }
 0x5b5   :  { %v1452_v9 = vpop.f32.mrb[9].mxu0 }
 0x5b6   :  { %v1888_v10 = vpop.f32.mrb[10].mxu0 }
 0x5b7   :  { %v1453_v11 = vpop.f32.mrb[11].mxu0 }
 0x5bc   :  { %v551_v14 = vpop.f32.mrb[12].mxu0 }
 0x5bd   :  { %v560_v12 = vmul.f32 0.25, %v551_v14  ;;  %v1464_v15 = vpop.f32.mrb[13].mxu0 }
 0x5be   :  { %v554_v16 = vpop.f32.mrb[14].mxu0 }
 0x5bf   :  { %v561_v17 = vmul.f32 0.25, %v554_v16  ;;  %v1465_v18 = vpop.f32.mrb[15].mxu0  ;;  %v567_v19 = vadd.f32 %v1373_v61, %v560_v12  ;;  %v1379_v16 = vld [vmem:[%s2089_s5 + $0x20] sm:$0xff] }
 0x5c1   :  { %v575_v20 = vsel %vm212_vm2, %v567_v19, -inf  ;;  %v568_v22 = vadd.f32 %v1374_v1, %v561_v17 }
 0x5c2   :  { %576 = vmax.xlane.f32.xlu0 %v575_v20  ;;  %v1380_v20 = vld [vmem:[%s2089_s5 + $0x28] sm:$0xff] }
 0x5c3   :  { %v578_v13 = vsel %vm212_vm2, %v568_v22, -inf }
 0x5c6   :  { %579 = vmax.xlane.f32.xlu0 %v578_v13 }
 0x63c   :  { %v571_v21 = vpop.xlane.xlu0 %570 }
 0x63d   :  { %v581_v24 = vsub.f32 %v565_v4, %v571_v21 }
 0x63e   :  { %v574_v25 = vpop.xlane.xlu1 %573 }
 0x63f   :  { %v585_v26 = vmul.f32 1.442695, %v581_v24  ;;  %v582_v27 = vsub.f32 %v566_v6, %v574_v25 }
 0x641   :  { %1602 = vpow2.f32 %v585_v26  ;;  %v587_v28 = vmul.f32 1.442695, %v582_v27 }
 0x643   :  { %1604 = vpow2.f32 %v587_v28 }
 0x64b   :  { %v1603_v29 = vpop.eup %1602 }
 0x64c   :  { %v593_v30 = vsel %vm212_vm2, %v1603_v29, 0.0 }
 0x64d   :  { %v1605_v31 = vpop.eup %1604  ;;  %594 = vadd.xlane.f32.xlu0 %v593_v30 }
 0x64e   :  { %v596_v32 = vsel %vm212_vm2, %v1605_v31, 0.0 }
 0x64f   :  { %v577_v33 = vpop.xlane.xlu0 %576  ;;  %597 = vadd.xlane.f32.xlu1 %v596_v32 }
 0x650   :  { %v583_v34 = vsub.f32 %v567_v19, %v577_v33 }
 0x652   :  { %v589_v35 = vmul.f32 1.442695, %v583_v34 }
 0x653   :  { %v580_v40 = vpop.xlane.xlu0 %579 }
 0x654   :  { %1606 = vpow2.f32 %v589_v35  ;;  %v584_v41 = vsub.f32 %v568_v22, %v580_v40 }
 0x656   :  { %v591_v42 = vmul.f32 1.442695, %v584_v41 }
 0x658   :  { %1608 = vpow2.f32 %v591_v42 }
 0x65e   :  { %v1607_v36 = vpop.eup %1606 }
 0x65f   :  { %v599_v39 = vsel %vm212_vm2, %v1607_v36, 0.0 }
 0x660   :  { %600 = vadd.xlane.f32.xlu0 %v599_v39  ;;  %664 = vrot.lane.b32.xlu1 %v1817_v48, %s1655_s29 }
 0x662   :  { %v1609_v43 = vpop.eup %1608 }
 0x663   :  { %v602_v44 = vsel %vm212_vm2, %v1609_v43, 0.0 }
 0x664   :  { %713 = vrot.lane.b32.xlu1 %v1810_v37, %s1656_s12 }
 0x676   :  { %616 = vrot.lane.b32.xlu0 %v1812_v38, %s1655_s29 }
 0x67a   :  { %711 = vrot.lane.b32.xlu0 %v1810_v37, %s1657_s0 }
 0x688   :  { %603 = vadd.xlane.f32.xlu1 %v602_v44 }
 0x699   :  { %764 = vrot.lane.b32.xlu1 %v1815_v47, %s1656_s12 }
 0x69d   :  { %762 = vrot.lane.b32.xlu1 %v1815_v47, %s1657_s0 }
 0x6da   :  { %v595_v49 = vpop.xlane.xlu0 %594 }
 0x6dc   :  { %v598_v45 = vpop.xlane.xlu1 %597 }
 0x6dd   :  { %1610 = vrcp.f32 %v598_v45 }
 0x6de   :  { %1612 = vrcp.f32 %v595_v49 }
 0x6e0   :  { %v665_v46 = vpop.permute.xlu1 %664 }
 0x6e1   :  { %1473 = vmatpush3.bf16.msra.mxu0 %v665_v46 }
 0x6e2   :  { %1484 = vmatprep.subr.bf16.mxu0 %v1651_v23 }
 0x6e4   :  { %v714_v59 = vpop.permute.xlu1 %713 }
 0x6e5   :  { %v719_v60 = vsel %vm212_vm2, %v714_v59, 0 }
 0x6e7   :  { %v1611_v50 = vpop.eup %1610 }
 0x6e8   :  { %v1613_v52 = vpop.eup %1612  ;;  %v610_v53 = vmul.f32 %v1611_v50, %v1605_v31 }
 0x6e9   :  { %v609_v54 = vmul.f32 %v1613_v52, %v1603_v29 }
 0x6eb   :  { %v613_v57 = vpack.c.bf16 %v610_v53, %v609_v54 }
 0x6ed   :  { %v601_v51 = vpop.xlane.xlu0 %600 }
 0x6ee   :  { %1614 = vrcp.f32 %v601_v51 }
 0x6f1   :  { %v617_v55 = vpop.permute.xlu0 %616 }
 0x6f2   :  { %1467 = vmatpush3.bf16.msra.mxu1 %v617_v55 }
 0x6f3   :  { %1478 = vmatprep.subr.bf16.mxu1 %v1651_v23 }
 0x6f5   :  { %1469 = vmatmul.mubr.msk.bf16.vlgmr.msra.gmra.mrb[16].mxu1 %vm212_vm2, %v613_v57  ;;  %v712_v61 = vpop.permute.xlu0 %711 }
 0x6f6   :  { %1480 = vmatprep.mubr.msk.bf16.mxu1 %vm1652_vm1, %v1651_v23 }
 0x6f8   :  { %v1615_v63 = vpop.eup %1614 }
 0x6f9   :  { %v611_v1 = vmul.f32 %v1615_v63, %v1607_v36 }
 0x6fb   :  { %1479 = vmatpush3.bf16.xpose.msra.mxu1 %v719_v60 }
 0x6fc   :  { %1490 = vmatprep.subr.bf16.mxu1 %v1651_v23 }
 0x702   :  { %1481 = vmatmul.mubr.msk.bf16.vlgmr.msra.gmra.mrb[20].mxu1 %vm212_vm2, %v712_v61 }
 0x703   :  { %1492 = vmatprep.mubr.msk.bf16.mxu1 %vm1652_vm1, %v1651_v23 }
 0x715   :  { %v604_v62 = vpop.xlane.xlu1 %603 }
 0x716   :  { %1616 = vrcp.f32 %v604_v62 }
 0x719   :  { %v765_v3 = vpop.permute.xlu1 %764 }
 0x71a   :  { %v770_v5 = vsel %vm212_vm2, %v765_v3, 0 }
 0x71d   :  { %v763_v6 = vpop.permute.xlu1 %762 }
 0x720   :  { %v1617_v0 = vpop.eup %1616 }
 0x721   :  { %v612_v2 = vmul.f32 %v1617_v0, %v1609_v43 }
 0x723   :  { %v614_v4 = vpack.c.bf16 %v612_v2, %v611_v1 }
 0x725   :  { %1475 = vmatmul.mubr.msk.bf16.vlgmr.msra.gmra.mrb[16].mxu0 %vm212_vm2, %v614_v4 }
 0x726   :  { %1485 = vmatpush3.bf16.xpose.msra.mxu0 %v770_v5  ;;  %1486 = vmatprep.mubr.msk.bf16.mxu0 %vm1652_vm1, %v1651_v23 }
 0x727   :  { %1496 = vmatprep.subr.bf16.mxu0 %v1651_v23 }
 0x72d   :  { %1487 = vmatmul.mubr.msk.bf16.vlgmr.msra.gmra.mrb[20].mxu0 %vm212_vm2, %v763_v6 }
 0x72e   :  { %1498 = vmatprep.mubr.msk.bf16.mxu0 %vm1652_vm1, %v1651_v23 }
 0x7c8   :  { %v1926_v7 = vpop.f32.mrb[16].mxu1 }
 0x7c9   :  { %v1470_v9 = vpop.f32.mrb[17].mxu1 }
 0x7ca   :  { %v1928_v11 = vpop.f32.mrb[18].mxu1 }
 0x7cb   :  { %v1548_v14 = vpack.i.bf16 %v1928_v11, %v1926_v7  ;;  %v1471_v12 = vpop.f32.mrb[19].mxu1 }
 0x7d5   :  { %v755_v15 = vpop.f32.mrb[20].mxu1 }
 0x7d6   :  { %v813_v17 = vmul.f32 0.25, %v755_v15  ;;  %v1482_v18 = vpop.f32.mrb[21].mxu1 }
 0x7d7   :  { %v758_v19 = vpop.f32.mrb[22].mxu1 }
 0x7d8   :  { %v814_v22 = vmul.f32 0.25, %v758_v19  ;;  %v1483_v13 = vpop.f32.mrb[23].mxu1  ;;  %v820_v21 = vadd.f32 %v1379_v16, %v813_v17 }
 0x7da   :  { %v824_v24 = vsel %vm212_vm2, %v820_v21, -inf  ;;  %v821_v25 = vadd.f32 %v1380_v20, %v814_v22 }
 0x7db   :  { %825 = vmax.xlane.f32.xlu0 %v824_v24 }
 0x7dc   :  { %v827_v26 = vsel %vm212_vm2, %v821_v25, -inf }
 0x7dd   :  { %828 = vmax.xlane.f32.xlu1 %v827_v26 }
 0x7f8   :  { %v1940_v27 = vpop.f32.mrb[16].mxu0 }
 0x7f9   :  { %v1476_v28 = vpop.f32.mrb[17].mxu0 }
 0x7fa   :  { %v1942_v29 = vpop.f32.mrb[18].mxu0 }
 0x7fb   :  { %v1553_v30 = vpack.i.bf16 %v1942_v29, %v1940_v27  ;;  %v1477_v31 = vpop.f32.mrb[19].mxu0 }
 0x800   :  { %v806_v32 = vpop.f32.mrb[20].mxu0 }
 0x801   :  { %v815_v33 = vmul.f32 0.25, %v806_v32  ;;  %v1488_v34 = vpop.f32.mrb[21].mxu0 }
 0x802   :  { %v809_v35 = vpop.f32.mrb[22].mxu0 }
 0x803   :  { %v816_v36 = vmul.f32 0.25, %v809_v35  ;;  %v1489_v39 = vpop.f32.mrb[23].mxu0  ;;  %v822_v40 = vadd.f32 %v1379_v16, %v815_v33 }
 0x805   :  { %v830_v41 = vsel %vm212_vm2, %v822_v40, -inf  ;;  %v823_v42 = vadd.f32 %v1380_v20, %v816_v36 }
 0x806   :  { %831 = vmax.xlane.f32.xlu0 %v830_v41  ;;  %v1385_v41 = vld [vmem:[%s2089_s5 + $0x30] sm:$0xff] }
 0x807   :  { %v833_v43 = vsel %vm212_vm2, %v823_v42, -inf }
 0x80a   :  { %834 = vmax.xlane.f32.xlu0 %v833_v43 }
 0x868   :  { %v826_v44 = vpop.xlane.xlu0 %825 }
 0x869   :  { %v836_v45 = vsub.f32 %v820_v21, %v826_v44 }
 0x86a   :  { %v829_v46 = vpop.xlane.xlu1 %828 }
 0x86b   :  { %v840_v49 = vmul.f32 1.442695, %v836_v45  ;;  %v837_v50 = vsub.f32 %v821_v25, %v829_v46 }
 0x86d   :  { %1618 = vpow2.f32 %v840_v49  ;;  %v842_v51 = vmul.f32 1.442695, %v837_v50 }
 0x86f   :  { %1620 = vpow2.f32 %v842_v51 }
 0x877   :  { %v1619_v52 = vpop.eup %1618 }
 0x878   :  { %v848_v53 = vsel %vm212_vm2, %v1619_v52, 0.0 }
 0x879   :  { %v1621_v54 = vpop.eup %1620  ;;  %849 = vadd.xlane.f32.xlu0 %v848_v53 }
 0x87a   :  { %v851_v55 = vsel %vm212_vm2, %v1621_v54, 0.0 }
 0x87b   :  { %852 = vadd.xlane.f32.xlu1 %v851_v55 }
 0x88c   :  { %917 = vrot.lane.b32.xlu1 %v1817_v48, %s1657_s0 }
 0x890   :  { %966 = vrot.lane.b32.xlu1 %v1810_v37, %s1658_s17 }
 0x893   :  { %v832_v57 = vpop.xlane.xlu0 %831 }
 0x894   :  { %v838_v59 = vsub.f32 %v822_v40, %v832_v57 }
 0x896   :  { %v844_v60 = vmul.f32 1.442695, %v838_v59 }
 0x897   :  { %v835_v61 = vpop.xlane.xlu0 %834 }
 0x898   :  { %1622 = vpow2.f32 %v844_v60  ;;  %v839_v62 = vsub.f32 %v823_v42, %v835_v61 }
 0x89a   :  { %v846_v0 = vmul.f32 1.442695, %v839_v62 }
 0x89c   :  { %1624 = vpow2.f32 %v846_v0 }
 0x8a2   :  { %v1623_v63 = vpop.eup %1622 }
 0x8a3   :  { %v854_v1 = vsel %vm212_vm2, %v1623_v63, 0.0 }
 0x8a4   :  { %855 = vadd.xlane.f32.xlu0 %v854_v1 }
 0x8a6   :  { %v1625_v2 = vpop.eup %1624 }
 0x8a7   :  { %v857_v3 = vsel %vm212_vm2, %v1625_v2, 0.0 }
 0x8b4   :  { %858 = vadd.xlane.f32.xlu1 %v857_v3 }
 0x8ba   :  { %870 = vrot.lane.b32.xlu0 %v1812_v38, %s1657_s0 }
 0x8be   :  { %964 = vrot.lane.b32.xlu0 %v1810_v37, %s1659_s18 }
 0x8c5   :  { %1017 = vrot.lane.b32.xlu1 %v1815_v47, %s1658_s17 }
 0x8c9   :  { %1015 = vrot.lane.b32.xlu1 %v1815_v47, %s1659_s18 }
 0x906   :  { %v850_v6 = vpop.xlane.xlu0 %849 }
 0x908   :  { %v853_v4 = vpop.xlane.xlu1 %852 }
 0x909   :  { %1626 = vrcp.f32 %v853_v4 }
 0x90a   :  { %1628 = vrcp.f32 %v850_v6 }
 0x90c   :  { %v918_v5 = vpop.permute.xlu1 %917 }
 0x90d   :  { %1497 = vmatpush3.bf16.msra.mxu0 %v918_v5 }
 0x90e   :  { %1508 = vmatprep.subr.bf16.mxu0 %v1651_v23 }
 0x910   :  { %v967_v47 = vpop.permute.xlu1 %966 }
 0x911   :  { %v972_v19 = vsel %vm212_vm2, %v967_v47, 0 }
 0x913   :  { %v1627_v9 = vpop.eup %1626 }
 0x914   :  { %v1629_v15 = vpop.eup %1628  ;;  %v865_v16 = vmul.f32 %v1627_v9, %v1621_v54 }
 0x915   :  { %v864_v17 = vmul.f32 %v1629_v15, %v1619_v52 }
 0x917   :  { %v868_v18 = vpack.c.bf16 %v865_v16, %v864_v17 }
 0x931   :  { %v856_v12 = vpop.xlane.xlu0 %855 }
 0x932   :  { %1630 = vrcp.f32 %v856_v12 }
 0x935   :  { %v871_v37 = vpop.permute.xlu0 %870 }
 0x936   :  { %1491 = vmatpush3.bf16.msra.mxu1 %v871_v37 }
 0x937   :  { %1502 = vmatprep.subr.bf16.mxu1 %v1651_v23 }
 0x939   :  { %1493 = vmatmul.mubr.msk.bf16.vlgmr.msra.gmra.mrb[24].mxu1 %vm212_vm2, %v868_v18  ;;  %v965_v22 = vpop.permute.xlu0 %964 }
 0x93a   :  { %1504 = vmatprep.mubr.msk.bf16.mxu1 %vm1652_vm1, %v1651_v23 }
 0x93c   :  { %v1631_v13 = vpop.eup %1630 }
 0x93d   :  { %v866_v24 = vmul.f32 %v1631_v13, %v1623_v63 }
 0x93f   :  { %1503 = vmatpush3.bf16.xpose.msra.mxu1 %v972_v19 }
 0x940   :  { %1514 = vmatprep.subr.bf16.mxu1 %v1651_v23 }
 0x941   :  { %v859_v20 = vpop.xlane.xlu1 %858 }
 0x942   :  { %1632 = vrcp.f32 %v859_v20 }
 0x945   :  { %v1018_v26 = vpop.permute.xlu1 %1017 }
 0x946   :  { %1505 = vmatmul.mubr.msk.bf16.vlgmr.msra.gmra.mrb[28].mxu1 %vm212_vm2, %v965_v22  ;;  %v1023_v31 = vsel %vm212_vm2, %v1018_v26, 0 }
 0x947   :  { %1516 = vmatprep.mubr.msk.bf16.mxu1 %vm1652_vm1, %v1651_v23 }
 0x949   :  { %v1016_v32 = vpop.permute.xlu1 %1015 }
 0x94c   :  { %v1633_v21 = vpop.eup %1632 }
 0x94d   :  { %v867_v25 = vmul.f32 %v1633_v21, %v1625_v2 }
 0x94f   :  { %v869_v28 = vpack.c.bf16 %v867_v25, %v866_v24 }
 0x951   :  { %1499 = vmatmul.mubr.msk.bf16.vlgmr.msra.gmra.mrb[24].mxu0 %vm212_vm2, %v869_v28 }
 0x952   :  { %1509 = vmatpush3.bf16.xpose.msra.mxu0 %v1023_v31  ;;  %1510 = vmatprep.mubr.msk.bf16.mxu0 %vm1652_vm1, %v1651_v23 }
 0x953   :  { %1520 = vmatprep.subr.bf16.mxu0 %v1651_v23 }
 0x959   :  { %1511 = vmatmul.mubr.msk.bf16.vlgmr.msra.gmra.mrb[28].mxu0 %vm212_vm2, %v1016_v32 }
 0x95a   :  { %1522 = vmatprep.mubr.msk.bf16.mxu0 %vm1652_vm1, %v1651_v23  ;;  %v1386_v23 = vld [vmem:[%s2089_s5 + $0x38] sm:$0xff] }
 0xa0c   :  { %v1982_v33 = vpop.f32.mrb[24].mxu1 }
 0xa0d   :  { %v1494_v34 = vpop.f32.mrb[25].mxu1 }
 0xa0e   :  { %v1984_v35 = vpop.f32.mrb[26].mxu1 }
 0xa0f   :  { %v1558_v36 = vpack.i.bf16 %v1984_v35, %v1982_v33  ;;  %v1495_v39 = vpop.f32.mrb[27].mxu1 }
 0xa19   :  { %v1008_v40 = vpop.f32.mrb[28].mxu1 }
 0xa1a   :  { %v1066_v42 = vmul.f32 0.25, %v1008_v40  ;;  %v1506_v43 = vpop.f32.mrb[29].mxu1 }
 0xa1b   :  { %v1011_v44 = vpop.f32.mrb[30].mxu1  ;;  %v1279_v43 = vld [vmem:[%s2090_s6] sm:$0xff] }
 0xa1c   :  { %v1067_v45 = vmul.f32 0.25, %v1011_v44  ;;  %v1507_v46 = vpop.f32.mrb[31].mxu1  ;;  %v1073_v49 = vadd.f32 %v1385_v41, %v1066_v42  ;;  %v1280_v44 = vld [vmem:[%s2090_s6 + $0x8] sm:$0xff] }
 0xa1d   :  { %v1282_v46 = vld [vmem:[%s2090_s6 + $0x18] sm:$0xff] }
 0xa1e   :  { %v1077_v50 = vsel %vm212_vm2, %v1073_v49, -inf  ;;  %v1074_v51 = vadd.f32 %v1386_v23, %v1067_v45  ;;  %v1281_v45 = vld [vmem:[%s2090_s6 + $0x10] sm:$0xff] }
 0xa1f   :  { %1078 = vmax.xlane.f32.xlu0 %v1077_v50  ;;  %v1283_v50 = vld [vmem:[%s2090_s6 + $0x20] sm:$0xff] }
 0xa20   :  { %v1080_v52 = vsel %vm212_vm2, %v1074_v51, -inf }
 0xa21   :  { %1081 = vmax.xlane.f32.xlu1 %v1080_v52 }
 0xa24   :  { %v957_v53 = vpop.f32.mrb[24].mxu0 }
 0xa25   :  { %v1500_v54 = vpop.f32.mrb[25].mxu0 }
 0xa26   :  { %v960_v55 = vpop.f32.mrb[26].mxu0 }
 0xa27   :  { %v1563_v57 = vpack.i.bf16 %v960_v55, %v957_v53  ;;  %v1501_v59 = vpop.f32.mrb[27].mxu0 }
 0xa2c   :  { %v1059_v60 = vpop.f32.mrb[28].mxu0 }
 0xa2d   :  { %v1068_v61 = vmul.f32 0.25, %v1059_v60  ;;  %v1512_v62 = vpop.f32.mrb[29].mxu0  ;;  %v1285_v60 = vld [vmem:[%s2090_s6 + $0x30] sm:$0xff] }
 0xa2e   :  { %v1062_v63 = vpop.f32.mrb[30].mxu0 }
 0xa2f   :  { %v1069_v0 = vmul.f32 0.25, %v1062_v63  ;;  %v1513_v1 = vpop.f32.mrb[31].mxu0  ;;  %v1075_v2 = vadd.f32 %v1385_v41, %v1068_v61  ;;  %v1286_v61 = vld [vmem:[%s2090_s6 + $0x38] sm:$0xff] }
 0xa30   :  { %v1292_v62 = vpack.c.bf16 %v1286_v61, %v1285_v60 }
 0xa31   :  { %v1083_v3 = vsel %vm212_vm2, %v1075_v2, -inf  ;;  %v1076_v4 = vadd.f32 %v1386_v23, %v1069_v0  ;;  %v1289_v23 = vpack.c.bf16 %v1280_v44, %v1279_v43 }
 0xa32   :  { %1084 = vmax.xlane.f32.xlu0 %v1083_v3 }
 0xa33   :  { %v1086_v5 = vsel %vm212_vm2, %v1076_v4, -inf }
 0xa36   :  { %1087 = vmax.xlane.f32.xlu0 %v1086_v5 }
 0xaac   :  { %v1079_v6 = vpop.xlane.xlu0 %1078 }
 0xaad   :  { %v1089_v9 = vsub.f32 %v1073_v49, %v1079_v6  ;;  %v1290_v49 = vpack.c.bf16 %v1282_v46, %v1281_v45 }
 0xaae   :  { %v1082_v12 = vpop.xlane.xlu1 %1081 }
 0xaaf   :  { %v1093_v15 = vmul.f32 1.442695, %v1089_v9  ;;  %v1090_v16 = vsub.f32 %v1074_v51, %v1082_v12  ;;  %v1284_v51 = vld [vmem:[%s2090_s6 + $0x28] sm:$0xff] }
 0xab0   :  { %v1291_v52 = vpack.c.bf16 %v1284_v51, %v1283_v50 }
 0xab1   :  { %1634 = vpow2.f32 %v1093_v15  ;;  %v1095_v17 = vmul.f32 1.442695, %v1090_v16 }
 0xab3   :  { %1636 = vpow2.f32 %v1095_v17 }
 0xabb   :  { %v1635_v37 = vpop.eup %1634 }
 0xabc   :  { %v1101_v18 = vsel %vm212_vm2, %v1635_v37, 0.0 }
 0xabd   :  { %v1637_v47 = vpop.eup %1636  ;;  %1102 = vadd.xlane.f32.xlu0 %v1101_v18 }
 0xabe   :  { %v1104_v19 = vsel %vm212_vm2, %v1637_v47, 0.0 }
 0xabf   :  { %v1085_v20 = vpop.xlane.xlu0 %1084  ;;  %1105 = vadd.xlane.f32.xlu1 %v1104_v19 }
 0xac0   :  { %v1091_v22 = vsub.f32 %v1075_v2, %v1085_v20 }
 0xac2   :  { %v1097_v13 = vmul.f32 1.442695, %v1091_v22 }
 0xac3   :  { %v1088_v21 = vpop.xlane.xlu0 %1087 }
 0xac4   :  { %1638 = vpow2.f32 %v1097_v13  ;;  %v1092_v24 = vsub.f32 %v1076_v4, %v1088_v21 }
 0xac6   :  { %v1099_v25 = vmul.f32 1.442695, %v1092_v24 }
 0xac8   :  { %1640 = vpow2.f32 %v1099_v25 }
 0xace   :  { %v1639_v26 = vpop.eup %1638 }
 0xacf   :  { %v1107_v28 = vsel %vm212_vm2, %v1639_v26, 0.0 }
 0xad0   :  { %1108 = vadd.xlane.f32.xlu0 %v1107_v28 }
 0xad2   :  { %v1641_v31 = vpop.eup %1640 }
 0xad3   :  { %v1110_v32 = vsel %vm212_vm2, %v1641_v31, 0.0 }
 0xad4   :  { %1111 = vadd.xlane.f32.xlu1 %v1110_v32 }
 0xae5   :  { %1170 = vrot.lane.b32.xlu1 %v1817_v48, %s1659_s18 }
 0xae6   :  { %1123 = vrot.lane.b32.xlu0 %v1812_v38, %s1659_s18 }
 0xae9   :  { %1549 = vrot.lane.b32.xlu1 %v1548_v14, %s1658_s17 }
 0xaea   :  { %1559 = vrot.lane.b32.xlu0 %v1558_v36, %s1656_s12 }
 0xaed   :  { %1554 = vrot.lane.b32.xlu1 %v1553_v30, %s1658_s17 }
 0xaf1   :  { %1564 = vrot.lane.b32.xlu1 %v1563_v57, %s1656_s12 }
 0xb4a   :  { %v1103_v34 = vpop.xlane.xlu0 %1102 }
 0xb4c   :  { %v1106_v48 = vpop.xlane.xlu1 %1105 }
 0xb4d   :  { %1642 = vrcp.f32 %v1106_v48 }
 0xb4e   :  { %1644 = vrcp.f32 %v1103_v34 }
 0xb57   :  { %v1643_v38 = vpop.eup %1642 }
 0xb58   :  { %v1645_v7 = vpop.eup %1644  ;;  %v1118_v11 = vmul.f32 %v1643_v38, %v1637_v47 }
 0xb59   :  { %v1117_v14 = vmul.f32 %v1645_v7, %v1635_v37 }
 0xb5b   :  { %v1121_v35 = vpack.c.bf16 %v1118_v11, %v1117_v14 }
 0xb5d   :  { %v1109_v39 = vpop.xlane.xlu0 %1108 }
 0xb5e   :  { %1646 = vrcp.f32 %v1109_v39 }
 0xb61   :  { %v1124_v40 = vpop.permute.xlu0 %1123  ;;  %v1112_v33 = vpop.xlane.xlu1 %1111 }
 0xb62   :  { %1648 = vrcp.f32 %v1112_v33  ;;  %1515 = vmatpush3.bf16.msra.mxu1 %v1124_v40 }
 0xb63   :  { %1526 = vmatprep.subr.bf16.mxu1 %v1289_v23 }
 0xb65   :  { %1517 = vmatmul.mubr.msk.bf16.vlgmr.msra.gmra.mrb[32].mxu1 %vm212_vm2, %v1121_v35  ;;  %v1171_v27 = vpop.permute.xlu1 %1170  ;;  %v1560_v9 = vpop.permute.xlu0 %1559 }
 0xb66   :  { %1521 = vmatpush3.bf16.msra.mxu0 %v1171_v27  ;;  %1527 = vmatpush3.bf16.msra.mxu1 %v1289_v23  ;;  %v1562_v16 = vunpack.i.h.bf16 %v1560_v9  ;;  %v1561_v17 = vunpack.i.l.bf16 %v1560_v9 }
 0xb67   :  { %1528 = vmatprep.subr.bf16.mxu1 %v1290_v49 }
 0xb68   :  { %v1647_v29 = vpop.eup %1646 }
 0xb69   :  { %v1119_v36 = vmul.f32 %v1647_v29, %v1639_v26  ;;  %v1550_v4 = vpop.permute.xlu1 %1549 }
 0xb6a   :  { %1529 = vmatpush3.bf16.msra.mxu1 %v1290_v49  ;;  %v1552_v5 = vunpack.i.h.bf16 %v1550_v4  ;;  %v1551_v6 = vunpack.i.l.bf16 %v1550_v4 }
 0xb6b   :  { %1530 = vmatprep.subr.bf16.mxu1 %v1291_v52 }
 0xb6c   :  { %v1649_v30 = vpop.eup %1648  ;;  %v1266_v12 = vsel %vm212_vm2, %v1876_v58, %v1552_v5  ;;  %v1265_v15 = vsel %vm212_vm2, %v1874_v56, %v1551_v6 }
 0xb6d   :  { %v1120_v41 = vmul.f32 %v1649_v30, %v1641_v31  ;;  %v1555_v18 = vpop.permute.xlu1 %1554  ;;  %v1270_v20 = vsel %vm1269_vm3, %v1265_v15, %v1561_v17  ;;  %v1271_v22 = vsel %vm1269_vm3, %v1266_v12, %v1562_v16 }
 0xb6e   :  { %1531 = vmatpush3.bf16.msra.mxu1 %v1291_v52  ;;  %v1557_v24 = vunpack.i.h.bf16 %v1555_v18  ;;  %v1556_v25 = vunpack.i.l.bf16 %v1555_v18 }
 0xb6f   :  { %v1122_v42 = vpack.c.bf16 %v1120_v41, %v1119_v36  ;;  %1532 = vmatprep.subr.bf16.mxu1 %v1292_v62 }
 0xb70   :  { %v1268_v32 = vsel %vm212_vm2, %v1888_v10, %v1557_v24  ;;  %v1267_v48 = vsel %vm212_vm2, %v1886_v8, %v1556_v25  ;;  %v1389_v10 = vld [vmem:[%s2091_s7] ss:$0 sm:$0xff] }
 0xb71   :  { %1523 = vmatmul.mubr.msk.bf16.vlgmr.msra.gmra.mrb[32].mxu0 %vm212_vm2, %v1122_v42  ;;  %v1565_v56 = vpop.permute.xlu1 %1564 }
 0xb72   :  { %1533 = vmatpush3.bf16.msra.mxu1 %v1292_v62  ;;  %v1567_v26 = vunpack.i.h.bf16 %v1565_v56  ;;  %v1566_v28 = vunpack.i.l.bf16 %v1565_v56 }
 0xb74   :  { %v1272_v39 = vsel %vm1269_vm3, %v1267_v48, %v1566_v28  ;;  %v1273_v7 = vsel %vm1269_vm3, %v1268_v32, %v1567_v26 }
 0xc38   :  { %v1163_v53 = vpop.f32.mrb[32].mxu1 }
 0xc39   :  { %v1518_v54 = vpop.f32.mrb[33].mxu1 }
 0xc3a   :  { %v1166_v55 = vpop.f32.mrb[34].mxu1 }
 0xc3b   :  { %v1568_v57 = vpack.i.bf16 %v1166_v55, %v1163_v53  ;;  %v1519_v59 = vpop.f32.mrb[35].mxu1 }
 0xc3d   :  { %1569 = vrot.lane.b32.xlu0 %v1568_v57, %s1654_s28 }
 0xc44   :  { %v1210_v63 = vpop.f32.mrb[32].mxu0 }
 0xc45   :  { %v1524_v0 = vpop.f32.mrb[33].mxu0 }
 0xc46   :  { %v1213_v1 = vpop.f32.mrb[34].mxu0 }
 0xc47   :  { %v1573_v2 = vpack.i.bf16 %v1213_v1, %v1210_v63  ;;  %v1525_v3 = vpop.f32.mrb[35].mxu0 }
 0xc49   :  { %1574 = vrot.lane.b32.xlu1 %v1573_v2, %s1654_s28 }
 0xcaf   :  { %v1570_v37 = vpop.permute.xlu0 %1569 }
 0xcb0   :  { %v1572_v47 = vunpack.i.h.bf16 %v1570_v37  ;;  %v1571_v19 = vunpack.i.l.bf16 %v1570_v37 }
 0xcb2   :  { %v1276_v13 = vsel %vm1274_vm4, %v1271_v22, %v1572_v47  ;;  %v1275_v21 = vsel %vm1274_vm4, %v1270_v20, %v1571_v19 }
 0xcb3   :  { %v1287_v58 = vpack.c.bf16 %v1276_v13, %v1275_v21 }
 0xcb5   :  { %1534 = vmatprep.mubr.msk.bf16.mxu1 %vm36_vm0, %v1287_v58 }
 0xcbb   :  { %v1575_v31 = vpop.permute.xlu1 %1574 }
 0xcbc   :  { %v1577_v34 = vunpack.i.h.bf16 %v1575_v31  ;;  %v1576_v38 = vunpack.i.l.bf16 %v1575_v31 }
 0xcbe   :  { %v1277_v11 = vsel %vm1274_vm4, %v1272_v39, %v1576_v38  ;;  %v1278_v14 = vsel %vm1274_vm4, %v1273_v7, %v1577_v34 }
 0xcbf   :  { %v1288_v40 = vpack.c.bf16 %v1278_v14, %v1277_v11 }
 0xcc1   :  { %1535 = vmatmul.mubr.msk.bf16.vlgmr.msra.gmra.mrb[36].mxu1 %vm36_vm0, %v1288_v40 }
 0xd94   :  { %v1536_v33 = vpop.f32.mrb[36].mxu1 }
 0xd95   :  { %v1349_v35 = vadd.f32 %v1536_v33, %v1389_v10  ;;  %v1340_v8 = vpop.f32.mrb[37].mxu1 }
 0xd96   :  { %v1341_v27 = vadd.f32 %v1389_v10, %v1340_v8  ;;  %v1537_v29 = vpop.f32.mrb[38].mxu1 }
 0xd97   :  { %1357 = vst.msk [vmem:[%s2092_s8 + $0x10] sm:$0xff] %vm36_vm0, %v1349_v35  ;;  %v1352_v30 = vadd.f32 %v1537_v29, %v1389_v10  ;;  %v1343_v36 = vpop.f32.mrb[39].mxu1 }
 0xd98   :  { %1355 = vst.msk [vmem:[%s2092_s8] sm:$0xff] %vm36_vm0, %v1341_v27  ;;  %v1344_v41 = vadd.f32 %v1389_v10, %v1343_v36 }
 0xd99   :  { %1358 = vst.msk [vmem:[%s2092_s8 + $0x18] sm:$0xff] %vm36_vm0, %v1352_v30 }
 0xd9a   :  { %1356 = vst.msk [vmem:[%s2092_s8 + $0x8] sm:$0xff] %vm36_vm0, %v1344_v41 }

</bundles_post_ra>
